<compile_context>
chip_gen: v5e
topology: v5e:2x2
jax: 0.10.0
libtpu: 0.0.40
codegen_flags: <defaults>
</compile_context>

<pallas_src>
import functools

import numpy as np
import jax
import jax.numpy as jnp
from jax.experimental import pallas as pl
from jax.experimental.pallas import tpu as pltpu


_LANES = 128
_IN_CH = 3
_BACKBONE_CH = (8, 16, 32, 64)   # in_channels_list
_LATERAL_CH = (24, 32, 64, 64)   # out_channels_list
_FUSED_CH = (24, 24, 32)         # fused_channels_list


# ---------------------------------------------------------------------------
# constant 0/1 gather / duplication matrices (numpy, baked at trace time)
# ---------------------------------------------------------------------------
def _stride2_taps_np(h, w):
    """9 stacked tap-gather matrices for a 3x3 / stride-2 / pad-1 conv."""
    ho, wo = h // 2, w // 2
    g = np.zeros((9, ho * wo, h * w), np.float32)
    for ki in range(3):
        for kj in range(3):
            t = ki * 3 + kj
            for oh in range(ho):
                for ow in range(wo):
                    sh, sw = 2 * oh + ki - 1, 2 * ow + kj - 1
                    if 0 <= sh < h and 0 <= sw < w:
                        g[t, oh * wo + ow, sh * w + sw] = 1.0
    return g.reshape(9 * ho * wo, h * w)


def _stride1_taps_np(h, w):
    """9 stacked tap-gather matrices for a 3x3 / stride-1 / pad-1 conv."""
    m = h * w
    g = np.zeros((9, m, m), np.float32)
    for ki in range(3):
        for kj in range(3):
            t = ki * 3 + kj
            for r in range(h):
                for c in range(w):
                    sh, sw = r + ki - 1, c + kj - 1
                    if 0 <= sh < h and 0 <= sw < w:
                        g[t, r * w + c, sh * w + sw] = 1.0
    return g.reshape(9 * m, m)


def _upsample2_np(hc, wc):
    """Nearest-neighbour 2x upsample as a (4*hc*wc, hc*wc) 0/1 matrix."""
    d = np.zeros((4 * hc * wc, hc * wc), np.float32)
    for r in range(2 * hc):
        for c in range(2 * wc):
            d[r * (2 * wc) + c, (r // 2) * wc + (c // 2)] = 1.0
    return d


# ---------------------------------------------------------------------------
# the fused kernel: whole backbone + FPN for one image per grid step
# ---------------------------------------------------------------------------
def _fpn_kernel(a0_ref, wb0_ref, wb_ref, bb_ref,
                g1_ref, g2_ref, g3_ref,
                wl_ref, bl_ref,
                d0_ref, d1_ref, d2_ref, gs2_ref,
                wf_ref, fb_ref,
                out_ref,
                pad0_ref, pad1_ref, *, spatial):
    f32 = jnp.float32
    bf16 = jnp.bfloat16

    def mm(a, b):
        # bf16 MXU inputs, f32 accumulation.
        return jnp.dot(a.astype(bf16), b.astype(bf16),
                       preferred_element_type=f32)

    # ----- backbone level 0 (stem): pre-packed (M0, 27) patches -> one matmul
    f = jnp.maximum(mm(a0_ref[0], wb0_ref[...]) + bb_ref[0], 0.0)
    feats = [f]

    # ----- backbone levels 1..3: stride-2 taps via 0/1 gather matmuls
    g_refs = (g1_ref, g2_ref, g3_ref)
    for lvl in range(3):
        ho, wo = spatial[lvl + 1]
        mo = ho * wo
        gathered = mm(g_refs[lvl][...], f)                 # (9*mo, 128)
        acc = jnp.zeros((mo, _LANES), f32)
        for t in range(9):
            tap = gathered[t * mo:(t + 1) * mo, :]
            acc = acc + mm(tap, wb_ref[lvl, t])
        f = jnp.maximum(acc + bb_ref[lvl + 1], 0.0)
        feats.append(f)

    # ----- FPN lateral 1x1 convs (no ReLU)
    lats = [mm(feats[i], wl_ref[i]) + bl_ref[i] for i in range(4)]

    # ----- top-down: nearest-2x upsample + add + fused 3x3 conv + ReLU
    d_refs = (d0_ref, d1_ref, d2_ref)
    pad_refs = (pad0_ref, pad1_ref)
    p = lats[3]
    for i in (2, 1, 0):
        hi, wi = spatial[i]
        mi = hi * wi
        up = mm(d_refs[i][...], p)                         # 2x nearest upsample
        fused_in = lats[i] + up
        acc = jnp.zeros((mi, _LANES), f32)
        if i == 2:
            # coarsest fused level: taps via 0/1 gather matmul (tiny).
            gathered = mm(gs2_ref[...], fused_in)          # (9*mi, 128)
            for t in range(9):
                tap = gathered[t * mi:(t + 1) * mi, :]
                acc = acc + mm(tap, wf_ref[i, t])
        else:
            # finer levels: pad in VMEM scratch, slice the 9 taps.
            pref = pad_refs[i]
            pref[...] = jnp.zeros(pref.shape, f32)
            pref[1:hi + 1, 1:wi + 1, :] = fused_in.reshape(hi, wi, _LANES)
            for ki in range(3):
                for kj in range(3):
                    tap = pref[ki:ki + hi, kj:kj + wi, :].reshape(mi, _LANES)
                    acc = acc + mm(tap, wf_ref[i, ki * 3 + kj])
        p = jnp.maximum(acc + fb_ref[i], 0.0)

    out_ref[0] = p


# ---------------------------------------------------------------------------
# wrapper: XLA does only the stem patch-pack + final channel strip/transpose
# ---------------------------------------------------------------------------
def _forward(params, x):
    (wb0, wb, bb, wl, bl, wfu, fb) = params
    n, c, h, w = x.shape
    assert c == _IN_CH
    assert h % 32 == 0 and w % 32 == 0, "input spatial dims must be multiples of 32"

    spatial = ((h // 2, w // 2), (h // 4, w // 4),
               (h // 8, w // 8), (h // 16, w // 16))
    m0 = spatial[0][0] * spatial[0][1]
    bf16 = jnp.bfloat16

    # constant gather / duplication matrices (trace-time numpy -> constants)
    g1 = jnp.asarray(_stride2_taps_np(*spatial[0]), bf16)
    g2 = jnp.asarray(_stride2_taps_np(*spatial[1]), bf16)
    g3 = jnp.asarray(_stride2_taps_np(*spatial[2]), bf16)
    d0 = jnp.asarray(_upsample2_np(*spatial[1]), bf16)
    d1 = jnp.asarray(_upsample2_np(*spatial[2]), bf16)
    d2 = jnp.asarray(_upsample2_np(*spatial[3]), bf16)
    gs2 = jnp.asarray(_stride1_taps_np(*spatial[2]), bf16)

    # stem patches: (N, M0, 27) -- only the 3-channel input is im2col'ed.
    ho0, wo0 = spatial[0]
    x_nhwc = jnp.transpose(x, (0, 2, 3, 1))
    xpad = jnp.pad(x_nhwc, ((0, 0), (1, 1), (1, 1), (0, 0)))
    cols = [xpad[:, ki:ki + 2 * ho0 - 1:2, kj:kj + 2 * wo0 - 1:2, :]
            for ki in range(3) for kj in range(3)]
    a0 = jnp.concatenate(cols, axis=-1).reshape(n, m0, 27)

    def _full(arr):
        nd = arr.ndim
        return pl.BlockSpec(arr.shape, lambda b, nd=nd: (0,) * nd)

    operands = (a0, wb0, wb, bb, g1, g2, g3, wl, bl, d0, d1, d2, gs2, wfu, fb)
    in_specs = [pl.BlockSpec((1, m0, 27), lambda b: (b, 0, 0))]
    in_specs += [_full(arr) for arr in operands[1:]]

    out = pl.pallas_call(
        functools.partial(_fpn_kernel, spatial=spatial),
        out_shape=jax.ShapeDtypeStruct((n, m0, _LANES), jnp.float32),
        grid=(n,),
        in_specs=in_specs,
        out_specs=pl.BlockSpec((1, m0, _LANES), lambda b: (b, 0, 0)),
        scratch_shapes=[
            pltpu.VMEM((spatial[0][0] + 2, spatial[0][1] + 2, _LANES), jnp.float32),
            pltpu.VMEM((spatial[1][0] + 2, spatial[1][1] + 2, _LANES), jnp.float32),
        ],
        compiler_params=pltpu.CompilerParams(
            dimension_semantics=("parallel",),
            vmem_limit_bytes=32 * 1024 * 1024),
    )(*operands)

    out = out[:, :, :_FUSED_CH[0]].reshape(n, ho0, wo0, _FUSED_CH[0])
    return jnp.transpose(out, (0, 3, 1, 2))          # NHWC -> NCHW


# ---------------------------------------------------------------------------
# model
# ---------------------------------------------------------------------------
def _conv_params(key, kh, kw, cin, cout):
    wkey, bkey = jax.random.split(key)
    scale = 1.0 / float(np.sqrt(kh * kw * cin))
    w = jax.random.uniform(wkey, (kh, kw, cin, cout), jnp.float32, -scale, scale)
    b = jax.random.uniform(bkey, (cout,), jnp.float32, -scale, scale)
    return w, b


class BackboneWithFPN:
    def __init__(self, key, *, in_channels=_IN_CH,
                 in_channels_list=_BACKBONE_CH,
                 out_channels_list=_LATERAL_CH,
                 fused_channels_list=_FUSED_CH,
                 out_channels=24):
        self.out_channels = out_channels
        keys = jax.random.split(key, 16)
        k = iter(keys)

        # synthetic backbone: 4 x (conv3x3 stride2 + ReLU) feature levels
        self.backbone = []
        cprev = in_channels
        for c in in_channels_list:
            self.backbone.append(_conv_params(next(k), 3, 3, cprev, c))
            cprev = c
        self.laterals = [
            _conv_params(next(k), 1, 1, cin, cout)
            for cin, cout in zip(in_channels_list, out_channels_list)
        ]
        self.fused = [
            _conv_params(next(k), 3, 3, out_channels_list[i], fused_channels_list[i])
            for i in range(len(fused_channels_list))
        ]

        self._params = self._pack_params()
        self._fwd = jax.jit(_forward)

    def _pack_params(self):
        """Zero-pad every weight/bias to 128 output lanes (lane-dense stores);
        pre-cast matmul weights to bf16 (padded lanes are exactly zero)."""
        bf16 = jnp.bfloat16

        w0, _ = self.backbone[0]
        wb0 = np.zeros((27, _LANES), np.float32)
        wb0[:, :w0.shape[3]] = np.asarray(w0).reshape(27, w0.shape[3])

        wb = np.zeros((3, 9, _LANES, _LANES), np.float32)
        for lvl in range(1, 4):
            wnp = np.asarray(self.backbone[lvl][0])
            _, _, cin, cout = wnp.shape
            for ki in range(3):
                for kj in range(3):
                    wb[lvl - 1, ki * 3 + kj, :cin, :cout] = wnp[ki, kj]

        bb = np.zeros((4, 1, _LANES), np.float32)
        for lvl in range(4):
            bnp = np.asarray(self.backbone[lvl][1])
            bb[lvl, 0, :bnp.shape[0]] = bnp

        wl = np.zeros((4, _LANES, _LANES), np.float32)
        bl = np.zeros((4, 1, _LANES), np.float32)
        for i in range(4):
            wnp = np.asarray(self.laterals[i][0])
            bnp = np.asarray(self.laterals[i][1])
            cin, cout = wnp.shape[2], wnp.shape[3]
            wl[i, :cin, :cout] = wnp[0, 0]
            bl[i, 0, :cout] = bnp

        wfu = np.zeros((3, 9, _LANES, _LANES), np.float32)
        fb = np.zeros((3, 1, _LANES), np.float32)
        for i in range(3):
            wnp = np.asarray(self.fused[i][0])
            bnp = np.asarray(self.fused[i][1])
            _, _, cin, cout = wnp.shape
            for ki in range(3):
                for kj in range(3):
                    wfu[i, ki * 3 + kj, :cin, :cout] = wnp[ki, kj]
            fb[i, 0, :cout] = bnp

        return (jnp.asarray(wb0, bf16), jnp.asarray(wb, bf16),
                jnp.asarray(bb, jnp.float32),
                jnp.asarray(wl, bf16), jnp.asarray(bl, jnp.float32),
                jnp.asarray(wfu, bf16), jnp.asarray(fb, jnp.float32))

    def __call__(self, x_nchw):
        return self._fwd(self._params, x_nchw)


if __name__ == "__main__":
    key = jax.random.PRNGKey(0)
    pkey, xkey = jax.random.split(key)
    model = BackboneWithFPN(pkey)
    x = jax.random.normal(xkey, (2, 3, 32, 32), jnp.float32)   # NCHW input
    out = model(x)
    out = jax.block_until_ready(out)
    assert out.shape == (2, 24, 16, 16), out.shape
    assert out.dtype == jnp.float32
    assert bool(jnp.isfinite(out).all())
    print("KERNEL_OK")
</pallas_src>

<mosaic_0001>
module attributes {stable_mosaic.version = 11 : i64} {
  func.func @_fpn_kernel(%arg0: i32, %arg1: memref<1x256x27xf32, #tpu.memory_space<vmem>>, %arg2: memref<27x128xbf16, #tpu.memory_space<vmem>>, %arg3: memref<3x9x128x128xbf16, #tpu.memory_space<vmem>>, %arg4: memref<4x1x128xf32, #tpu.memory_space<vmem>>, %arg5: memref<576x256xbf16, #tpu.memory_space<vmem>>, %arg6: memref<144x64xbf16, #tpu.memory_space<vmem>>, %arg7: memref<36x16xbf16, #tpu.memory_space<vmem>>, %arg8: memref<4x128x128xbf16, #tpu.memory_space<vmem>>, %arg9: memref<4x1x128xf32, #tpu.memory_space<vmem>>, %arg10: memref<256x64xbf16, #tpu.memory_space<vmem>>, %arg11: memref<64x16xbf16, #tpu.memory_space<vmem>>, %arg12: memref<16x4xbf16, #tpu.memory_space<vmem>>, %arg13: memref<144x16xbf16, #tpu.memory_space<vmem>>, %arg14: memref<3x9x128x128xbf16, #tpu.memory_space<vmem>>, %arg15: memref<3x1x128xf32, #tpu.memory_space<vmem>>, %arg16: memref<1x256x128xf32, #tpu.memory_space<vmem>>, %arg17: memref<18x18x128xf32, #tpu.memory_space<vmem>>, %arg18: memref<10x10x128xf32, #tpu.memory_space<vmem>>) attributes {dimension_semantics = [#tpu.dimension_semantics<parallel>], iteration_bounds = array<i64: 2>, scalar_prefetch = 0 : i64, scratch_operands = 2 : i64, tpu.core_type = #tpu.core_type<tc>, window_params = [{transform_indices = @transform_0, window_bounds = array<i64: 1, 256, 27>}, {pipeline_mode = #tpu.pipeline_mode<synchronous>, transform_indices = @transform_1, window_bounds = array<i64: 27, 128>}, {pipeline_mode = #tpu.pipeline_mode<synchronous>, transform_indices = @transform_2, window_bounds = array<i64: 3, 9, 128, 128>}, {pipeline_mode = #tpu.pipeline_mode<synchronous>, transform_indices = @transform_3, window_bounds = array<i64: 4, 1, 128>}, {pipeline_mode = #tpu.pipeline_mode<synchronous>, transform_indices = @transform_4, window_bounds = array<i64: 576, 256>}, {pipeline_mode = #tpu.pipeline_mode<synchronous>, transform_indices = @transform_5, window_bounds = array<i64: 144, 64>}, {pipeline_mode = #tpu.pipeline_mode<synchronous>, transform_indices = @transform_6, window_bounds = array<i64: 36, 16>}, {pipeline_mode = #tpu.pipeline_mode<synchronous>, transform_indices = @transform_7, window_bounds = array<i64: 4, 128, 128>}, {pipeline_mode = #tpu.pipeline_mode<synchronous>, transform_indices = @transform_8, window_bounds = array<i64: 4, 1, 128>}, {pipeline_mode = #tpu.pipeline_mode<synchronous>, transform_indices = @transform_9, window_bounds = array<i64: 256, 64>}, {pipeline_mode = #tpu.pipeline_mode<synchronous>, transform_indices = @transform_10, window_bounds = array<i64: 64, 16>}, {pipeline_mode = #tpu.pipeline_mode<synchronous>, transform_indices = @transform_11, window_bounds = array<i64: 16, 4>}, {pipeline_mode = #tpu.pipeline_mode<synchronous>, transform_indices = @transform_12, window_bounds = array<i64: 144, 16>}, {pipeline_mode = #tpu.pipeline_mode<synchronous>, transform_indices = @transform_13, window_bounds = array<i64: 3, 9, 128, 128>}, {pipeline_mode = #tpu.pipeline_mode<synchronous>, transform_indices = @transform_14, window_bounds = array<i64: 3, 1, 128>}, {transform_indices = @transform_15, window_bounds = array<i64: 1, 256, 128>}]} {
    %c0 = arith.constant 0 : index
    %c0_0 = arith.constant 0 : index
    %c0_1 = arith.constant 0 : index
    %0 = vector.load %arg1[%c0, %c0_0, %c0_1] : memref<1x256x27xf32, #tpu.memory_space<vmem>>, vector<1x256x27xf32>
    %1 = vector.shape_cast %0 : vector<1x256x27xf32> to vector<256x27xf32>
    %c0_2 = arith.constant 0 : index
    %c0_3 = arith.constant 0 : index
    %2 = vector.load %arg2[%c0_2, %c0_3] : memref<27x128xbf16, #tpu.memory_space<vmem>>, vector<27x128xbf16>
    %3 = arith.truncf %1 : vector<256x27xf32> to vector<256x27xbf16>
    %cst = arith.constant dense<0.000000e+00> : vector<256x128xf32>
    %4 = tpu.matmul %3, %2, %cst {dimension_numbers = #tpu.dot_dimension_numbers<[1], [0], [0], [1], [0, 0, 1, 1], [], []>} : vector<256x27xbf16>, vector<27x128xbf16>, vector<256x128xf32> -> vector<256x128xf32>
    %c0_4 = arith.constant 0 : index
    %c0_5 = arith.constant 0 : index
    %c0_6 = arith.constant 0 : index
    %5 = vector.load %arg4[%c0_4, %c0_5, %c0_6] : memref<4x1x128xf32, #tpu.memory_space<vmem>>, vector<1x1x128xf32>
    %6 = vector.shape_cast %5 : vector<1x1x128xf32> to vector<1x128xf32>
    %7 = vector.broadcast %6 : vector<1x128xf32> to vector<256x128xf32>
    %8 = arith.addf %4, %7 : vector<256x128xf32>
    %cst_7 = arith.constant 0.000000e+00 : f32
    %9 = vector.broadcast %cst_7 : f32 to vector<256x128xf32>
    %10 = arith.maximumf %8, %9 : vector<256x128xf32>
    %c0_8 = arith.constant 0 : index
    %c0_9 = arith.constant 0 : index
    %11 = vector.load %arg5[%c0_8, %c0_9] : memref<576x256xbf16, #tpu.memory_space<vmem>>, vector<576x256xbf16>
    %12 = arith.truncf %10 : vector<256x128xf32> to vector<256x128xbf16>
    %cst_10 = arith.constant dense<0.000000e+00> : vector<576x128xf32>
    %13 = tpu.matmul %11, %12, %cst_10 {dimension_numbers = #tpu.dot_dimension_numbers<[1], [0], [0], [1], [0, 0, 1, 1], [], []>} : vector<576x256xbf16>, vector<256x128xbf16>, vector<576x128xf32> -> vector<576x128xf32>
    %cst_11 = arith.constant 0.000000e+00 : f32
    %14 = vector.broadcast %cst_11 : f32 to vector<64x128xf32>
    %15 = vector.extract_strided_slice %13 {offsets = [0, 0], sizes = [64, 128], strides = [1, 1]} : vector<576x128xf32> to vector<64x128xf32>
    %c0_12 = arith.constant 0 : index
    %c0_13 = arith.constant 0 : index
    %c0_14 = arith.constant 0 : index
    %c0_15 = arith.constant 0 : index
    %16 = vector.load %arg3[%c0_12, %c0_13, %c0_14, %c0_15] : memref<3x9x128x128xbf16, #tpu.memory_space<vmem>>, vector<1x1x128x128xbf16>
    %17 = vector.shape_cast %16 : vector<1x1x128x128xbf16> to vector<128x128xbf16>
    %18 = arith.truncf %15 : vector<64x128xf32> to vector<64x128xbf16>
    %cst_16 = arith.constant dense<0.000000e+00> : vector<64x128xf32>
    %19 = tpu.matmul %18, %17, %cst_16 {dimension_numbers = #tpu.dot_dimension_numbers<[1], [0], [0], [1], [0, 0, 1, 1], [], []>} : vector<64x128xbf16>, vector<128x128xbf16>, vector<64x128xf32> -> vector<64x128xf32>
    %20 = arith.addf %14, %19 : vector<64x128xf32>
    %21 = vector.extract_strided_slice %13 {offsets = [64, 0], sizes = [64, 128], strides = [1, 1]} : vector<576x128xf32> to vector<64x128xf32>
    %c0_17 = arith.constant 0 : index
    %c1 = arith.constant 1 : index
    %c0_18 = arith.constant 0 : index
    %c0_19 = arith.constant 0 : index
    %22 = vector.load %arg3[%c0_17, %c1, %c0_18, %c0_19] : memref<3x9x128x128xbf16, #tpu.memory_space<vmem>>, vector<1x1x128x128xbf16>
    %23 = vector.shape_cast %22 : vector<1x1x128x128xbf16> to vector<128x128xbf16>
    %24 = arith.truncf %21 : vector<64x128xf32> to vector<64x128xbf16>
    %cst_20 = arith.constant dense<0.000000e+00> : vector<64x128xf32>
    %25 = tpu.matmul %24, %23, %cst_20 {dimension_numbers = #tpu.dot_dimension_numbers<[1], [0], [0], [1], [0, 0, 1, 1], [], []>} : vector<64x128xbf16>, vector<128x128xbf16>, vector<64x128xf32> -> vector<64x128xf32>
    %26 = arith.addf %20, %25 : vector<64x128xf32>
    %27 = vector.extract_strided_slice %13 {offsets = [128, 0], sizes = [64, 128], strides = [1, 1]} : vector<576x128xf32> to vector<64x128xf32>
    %c0_21 = arith.constant 0 : index
    %c2 = arith.constant 2 : index
    %c0_22 = arith.constant 0 : index
    %c0_23 = arith.constant 0 : index
    %28 = vector.load %arg3[%c0_21, %c2, %c0_22, %c0_23] : memref<3x9x128x128xbf16, #tpu.memory_space<vmem>>, vector<1x1x128x128xbf16>
    %29 = vector.shape_cast %28 : vector<1x1x128x128xbf16> to vector<128x128xbf16>
    %30 = arith.truncf %27 : vector<64x128xf32> to vector<64x128xbf16>
    %cst_24 = arith.constant dense<0.000000e+00> : vector<64x128xf32>
    %31 = tpu.matmul %30, %29, %cst_24 {dimension_numbers = #tpu.dot_dimension_numbers<[1], [0], [0], [1], [0, 0, 1, 1], [], []>} : vector<64x128xbf16>, vector<128x128xbf16>, vector<64x128xf32> -> vector<64x128xf32>
    %32 = arith.addf %26, %31 : vector<64x128xf32>
    %33 = vector.extract_strided_slice %13 {offsets = [192, 0], sizes = [64, 128], strides = [1, 1]} : vector<576x128xf32> to vector<64x128xf32>
    %c0_25 = arith.constant 0 : index
    %c3 = arith.constant 3 : index
    %c0_26 = arith.constant 0 : index
    %c0_27 = arith.constant 0 : index
    %34 = vector.load %arg3[%c0_25, %c3, %c0_26, %c0_27] : memref<3x9x128x128xbf16, #tpu.memory_space<vmem>>, vector<1x1x128x128xbf16>
    %35 = vector.shape_cast %34 : vector<1x1x128x128xbf16> to vector<128x128xbf16>
    %36 = arith.truncf %33 : vector<64x128xf32> to vector<64x128xbf16>
    %cst_28 = arith.constant dense<0.000000e+00> : vector<64x128xf32>
    %37 = tpu.matmul %36, %35, %cst_28 {dimension_numbers = #tpu.dot_dimension_numbers<[1], [0], [0], [1], [0, 0, 1, 1], [], []>} : vector<64x128xbf16>, vector<128x128xbf16>, vector<64x128xf32> -> vector<64x128xf32>
    %38 = arith.addf %32, %37 : vector<64x128xf32>
    %39 = vector.extract_strided_slice %13 {offsets = [256, 0], sizes = [64, 128], strides = [1, 1]} : vector<576x128xf32> to vector<64x128xf32>
    %c0_29 = arith.constant 0 : index
    %c4 = arith.constant 4 : index
    %c0_30 = arith.constant 0 : index
    %c0_31 = arith.constant 0 : index
    %40 = vector.load %arg3[%c0_29, %c4, %c0_30, %c0_31] : memref<3x9x128x128xbf16, #tpu.memory_space<vmem>>, vector<1x1x128x128xbf16>
    %41 = vector.shape_cast %40 : vector<1x1x128x128xbf16> to vector<128x128xbf16>
    %42 = arith.truncf %39 : vector<64x128xf32> to vector<64x128xbf16>
    %cst_32 = arith.constant dense<0.000000e+00> : vector<64x128xf32>
    %43 = tpu.matmul %42, %41, %cst_32 {dimension_numbers = #tpu.dot_dimension_numbers<[1], [0], [0], [1], [0, 0, 1, 1], [], []>} : vector<64x128xbf16>, vector<128x128xbf16>, vector<64x128xf32> -> vector<64x128xf32>
    %44 = arith.addf %38, %43 : vector<64x128xf32>
    %45 = vector.extract_strided_slice %13 {offsets = [320, 0], sizes = [64, 128], strides = [1, 1]} : vector<576x128xf32> to vector<64x128xf32>
    %c0_33 = arith.constant 0 : index
    %c5 = arith.constant 5 : index
    %c0_34 = arith.constant 0 : index
    %c0_35 = arith.constant 0 : index
    %46 = vector.load %arg3[%c0_33, %c5, %c0_34, %c0_35] : memref<3x9x128x128xbf16, #tpu.memory_space<vmem>>, vector<1x1x128x128xbf16>
    %47 = vector.shape_cast %46 : vector<1x1x128x128xbf16> to vector<128x128xbf16>
    %48 = arith.truncf %45 : vector<64x128xf32> to vector<64x128xbf16>
    %cst_36 = arith.constant dense<0.000000e+00> : vector<64x128xf32>
    %49 = tpu.matmul %48, %47, %cst_36 {dimension_numbers = #tpu.dot_dimension_numbers<[1], [0], [0], [1], [0, 0, 1, 1], [], []>} : vector<64x128xbf16>, vector<128x128xbf16>, vector<64x128xf32> -> vector<64x128xf32>
    %50 = arith.addf %44, %49 : vector<64x128xf32>
    %51 = vector.extract_strided_slice %13 {offsets = [384, 0], sizes = [64, 128], strides = [1, 1]} : vector<576x128xf32> to vector<64x128xf32>
    %c0_37 = arith.constant 0 : index
    %c6 = arith.constant 6 : index
    %c0_38 = arith.constant 0 : index
    %c0_39 = arith.constant 0 : index
    %52 = vector.load %arg3[%c0_37, %c6, %c0_38, %c0_39] : memref<3x9x128x128xbf16, #tpu.memory_space<vmem>>, vector<1x1x128x128xbf16>
    %53 = vector.shape_cast %52 : vector<1x1x128x128xbf16> to vector<128x128xbf16>
    %54 = arith.truncf %51 : vector<64x128xf32> to vector<64x128xbf16>
    %cst_40 = arith.constant dense<0.000000e+00> : vector<64x128xf32>
    %55 = tpu.matmul %54, %53, %cst_40 {dimension_numbers = #tpu.dot_dimension_numbers<[1], [0], [0], [1], [0, 0, 1, 1], [], []>} : vector<64x128xbf16>, vector<128x128xbf16>, vector<64x128xf32> -> vector<64x128xf32>
    %56 = arith.addf %50, %55 : vector<64x128xf32>
    %57 = vector.extract_strided_slice %13 {offsets = [448, 0], sizes = [64, 128], strides = [1, 1]} : vector<576x128xf32> to vector<64x128xf32>
    %c0_41 = arith.constant 0 : index
    %c7 = arith.constant 7 : index
    %c0_42 = arith.constant 0 : index
    %c0_43 = arith.constant 0 : index
    %58 = vector.load %arg3[%c0_41, %c7, %c0_42, %c0_43] : memref<3x9x128x128xbf16, #tpu.memory_space<vmem>>, vector<1x1x128x128xbf16>
    %59 = vector.shape_cast %58 : vector<1x1x128x128xbf16> to vector<128x128xbf16>
    %60 = arith.truncf %57 : vector<64x128xf32> to vector<64x128xbf16>
    %cst_44 = arith.constant dense<0.000000e+00> : vector<64x128xf32>
    %61 = tpu.matmul %60, %59, %cst_44 {dimension_numbers = #tpu.dot_dimension_numbers<[1], [0], [0], [1], [0, 0, 1, 1], [], []>} : vector<64x128xbf16>, vector<128x128xbf16>, vector<64x128xf32> -> vector<64x128xf32>
    %62 = arith.addf %56, %61 : vector<64x128xf32>
    %63 = vector.extract_strided_slice %13 {offsets = [512, 0], sizes = [64, 128], strides = [1, 1]} : vector<576x128xf32> to vector<64x128xf32>
    %c0_45 = arith.constant 0 : index
    %c8 = arith.constant 8 : index
    %c0_46 = arith.constant 0 : index
    %c0_47 = arith.constant 0 : index
    %64 = vector.load %arg3[%c0_45, %c8, %c0_46, %c0_47] : memref<3x9x128x128xbf16, #tpu.memory_space<vmem>>, vector<1x1x128x128xbf16>
    %65 = vector.shape_cast %64 : vector<1x1x128x128xbf16> to vector<128x128xbf16>
    %66 = arith.truncf %63 : vector<64x128xf32> to vector<64x128xbf16>
    %cst_48 = arith.constant dense<0.000000e+00> : vector<64x128xf32>
    %67 = tpu.matmul %66, %65, %cst_48 {dimension_numbers = #tpu.dot_dimension_numbers<[1], [0], [0], [1], [0, 0, 1, 1], [], []>} : vector<64x128xbf16>, vector<128x128xbf16>, vector<64x128xf32> -> vector<64x128xf32>
    %68 = arith.addf %62, %67 : vector<64x128xf32>
    %c1_49 = arith.constant 1 : index
    %c0_50 = arith.constant 0 : index
    %c0_51 = arith.constant 0 : index
    %69 = vector.load %arg4[%c1_49, %c0_50, %c0_51] : memref<4x1x128xf32, #tpu.memory_space<vmem>>, vector<1x1x128xf32>
    %70 = vector.shape_cast %69 : vector<1x1x128xf32> to vector<1x128xf32>
    %71 = vector.broadcast %70 : vector<1x128xf32> to vector<64x128xf32>
    %72 = arith.addf %68, %71 : vector<64x128xf32>
    %cst_52 = arith.constant 0.000000e+00 : f32
    %73 = vector.broadcast %cst_52 : f32 to vector<64x128xf32>
    %74 = arith.maximumf %72, %73 : vector<64x128xf32>
    %c0_53 = arith.constant 0 : index
    %c0_54 = arith.constant 0 : index
    %75 = vector.load %arg6[%c0_53, %c0_54] : memref<144x64xbf16, #tpu.memory_space<vmem>>, vector<144x64xbf16>
    %76 = arith.truncf %74 : vector<64x128xf32> to vector<64x128xbf16>
    %cst_55 = arith.constant dense<0.000000e+00> : vector<144x128xf32>
    %77 = tpu.matmul %75, %76, %cst_55 {dimension_numbers = #tpu.dot_dimension_numbers<[1], [0], [0], [1], [0, 0, 1, 1], [], []>} : vector<144x64xbf16>, vector<64x128xbf16>, vector<144x128xf32> -> vector<144x128xf32>
    %cst_56 = arith.constant 0.000000e+00 : f32
    %78 = vector.broadcast %cst_56 : f32 to vector<16x128xf32>
    %79 = vector.extract_strided_slice %77 {offsets = [0, 0], sizes = [16, 128], strides = [1, 1]} : vector<144x128xf32> to vector<16x128xf32>
    %c1_57 = arith.constant 1 : index
    %c0_58 = arith.constant 0 : index
    %c0_59 = arith.constant 0 : index
    %c0_60 = arith.constant 0 : index
    %80 = vector.load %arg3[%c1_57, %c0_58, %c0_59, %c0_60] : memref<3x9x128x128xbf16, #tpu.memory_space<vmem>>, vector<1x1x128x128xbf16>
    %81 = vector.shape_cast %80 : vector<1x1x128x128xbf16> to vector<128x128xbf16>
    %82 = arith.truncf %79 : vector<16x128xf32> to vector<16x128xbf16>
    %cst_61 = arith.constant dense<0.000000e+00> : vector<16x128xf32>
    %83 = tpu.matmul %82, %81, %cst_61 {dimension_numbers = #tpu.dot_dimension_numbers<[1], [0], [0], [1], [0, 0, 1, 1], [], []>} : vector<16x128xbf16>, vector<128x128xbf16>, vector<16x128xf32> -> vector<16x128xf32>
    %84 = arith.addf %78, %83 : vector<16x128xf32>
    %85 = vector.extract_strided_slice %77 {offsets = [16, 0], sizes = [16, 128], strides = [1, 1]} : vector<144x128xf32> to vector<16x128xf32>
    %c1_62 = arith.constant 1 : index
    %c1_63 = arith.constant 1 : index
    %c0_64 = arith.constant 0 : index
    %c0_65 = arith.constant 0 : index
    %86 = vector.load %arg3[%c1_62, %c1_63, %c0_64, %c0_65] : memref<3x9x128x128xbf16, #tpu.memory_space<vmem>>, vector<1x1x128x128xbf16>
    %87 = vector.shape_cast %86 : vector<1x1x128x128xbf16> to vector<128x128xbf16>
    %88 = arith.truncf %85 : vector<16x128xf32> to vector<16x128xbf16>
    %cst_66 = arith.constant dense<0.000000e+00> : vector<16x128xf32>
    %89 = tpu.matmul %88, %87, %cst_66 {dimension_numbers = #tpu.dot_dimension_numbers<[1], [0], [0], [1], [0, 0, 1, 1], [], []>} : vector<16x128xbf16>, vector<128x128xbf16>, vector<16x128xf32> -> vector<16x128xf32>
    %90 = arith.addf %84, %89 : vector<16x128xf32>
    %91 = vector.extract_strided_slice %77 {offsets = [32, 0], sizes = [16, 128], strides = [1, 1]} : vector<144x128xf32> to vector<16x128xf32>
    %c1_67 = arith.constant 1 : index
    %c2_68 = arith.constant 2 : index
    %c0_69 = arith.constant 0 : index
    %c0_70 = arith.constant 0 : index
    %92 = vector.load %arg3[%c1_67, %c2_68, %c0_69, %c0_70] : memref<3x9x128x128xbf16, #tpu.memory_space<vmem>>, vector<1x1x128x128xbf16>
    %93 = vector.shape_cast %92 : vector<1x1x128x128xbf16> to vector<128x128xbf16>
    %94 = arith.truncf %91 : vector<16x128xf32> to vector<16x128xbf16>
    %cst_71 = arith.constant dense<0.000000e+00> : vector<16x128xf32>
    %95 = tpu.matmul %94, %93, %cst_71 {dimension_numbers = #tpu.dot_dimension_numbers<[1], [0], [0], [1], [0, 0, 1, 1], [], []>} : vector<16x128xbf16>, vector<128x128xbf16>, vector<16x128xf32> -> vector<16x128xf32>
    %96 = arith.addf %90, %95 : vector<16x128xf32>
    %97 = vector.extract_strided_slice %77 {offsets = [48, 0], sizes = [16, 128], strides = [1, 1]} : vector<144x128xf32> to vector<16x128xf32>
    %c1_72 = arith.constant 1 : index
    %c3_73 = arith.constant 3 : index
    %c0_74 = arith.constant 0 : index
    %c0_75 = arith.constant 0 : index
    %98 = vector.load %arg3[%c1_72, %c3_73, %c0_74, %c0_75] : memref<3x9x128x128xbf16, #tpu.memory_space<vmem>>, vector<1x1x128x128xbf16>
    %99 = vector.shape_cast %98 : vector<1x1x128x128xbf16> to vector<128x128xbf16>
    %100 = arith.truncf %97 : vector<16x128xf32> to vector<16x128xbf16>
    %cst_76 = arith.constant dense<0.000000e+00> : vector<16x128xf32>
    %101 = tpu.matmul %100, %99, %cst_76 {dimension_numbers = #tpu.dot_dimension_numbers<[1], [0], [0], [1], [0, 0, 1, 1], [], []>} : vector<16x128xbf16>, vector<128x128xbf16>, vector<16x128xf32> -> vector<16x128xf32>
    %102 = arith.addf %96, %101 : vector<16x128xf32>
    %103 = vector.extract_strided_slice %77 {offsets = [64, 0], sizes = [16, 128], strides = [1, 1]} : vector<144x128xf32> to vector<16x128xf32>
    %c1_77 = arith.constant 1 : index
    %c4_78 = arith.constant 4 : index
    %c0_79 = arith.constant 0 : index
    %c0_80 = arith.constant 0 : index
    %104 = vector.load %arg3[%c1_77, %c4_78, %c0_79, %c0_80] : memref<3x9x128x128xbf16, #tpu.memory_space<vmem>>, vector<1x1x128x128xbf16>
    %105 = vector.shape_cast %104 : vector<1x1x128x128xbf16> to vector<128x128xbf16>
    %106 = arith.truncf %103 : vector<16x128xf32> to vector<16x128xbf16>
    %cst_81 = arith.constant dense<0.000000e+00> : vector<16x128xf32>
    %107 = tpu.matmul %106, %105, %cst_81 {dimension_numbers = #tpu.dot_dimension_numbers<[1], [0], [0], [1], [0, 0, 1, 1], [], []>} : vector<16x128xbf16>, vector<128x128xbf16>, vector<16x128xf32> -> vector<16x128xf32>
    %108 = arith.addf %102, %107 : vector<16x128xf32>
    %109 = vector.extract_strided_slice %77 {offsets = [80, 0], sizes = [16, 128], strides = [1, 1]} : vector<144x128xf32> to vector<16x128xf32>
    %c1_82 = arith.constant 1 : index
    %c5_83 = arith.constant 5 : index
    %c0_84 = arith.constant 0 : index
    %c0_85 = arith.constant 0 : index
    %110 = vector.load %arg3[%c1_82, %c5_83, %c0_84, %c0_85] : memref<3x9x128x128xbf16, #tpu.memory_space<vmem>>, vector<1x1x128x128xbf16>
    %111 = vector.shape_cast %110 : vector<1x1x128x128xbf16> to vector<128x128xbf16>
    %112 = arith.truncf %109 : vector<16x128xf32> to vector<16x128xbf16>
    %cst_86 = arith.constant dense<0.000000e+00> : vector<16x128xf32>
    %113 = tpu.matmul %112, %111, %cst_86 {dimension_numbers = #tpu.dot_dimension_numbers<[1], [0], [0], [1], [0, 0, 1, 1], [], []>} : vector<16x128xbf16>, vector<128x128xbf16>, vector<16x128xf32> -> vector<16x128xf32>
    %114 = arith.addf %108, %113 : vector<16x128xf32>
    %115 = vector.extract_strided_slice %77 {offsets = [96, 0], sizes = [16, 128], strides = [1, 1]} : vector<144x128xf32> to vector<16x128xf32>
    %c1_87 = arith.constant 1 : index
    %c6_88 = arith.constant 6 : index
    %c0_89 = arith.constant 0 : index
    %c0_90 = arith.constant 0 : index
    %116 = vector.load %arg3[%c1_87, %c6_88, %c0_89, %c0_90] : memref<3x9x128x128xbf16, #tpu.memory_space<vmem>>, vector<1x1x128x128xbf16>
    %117 = vector.shape_cast %116 : vector<1x1x128x128xbf16> to vector<128x128xbf16>
    %118 = arith.truncf %115 : vector<16x128xf32> to vector<16x128xbf16>
    %cst_91 = arith.constant dense<0.000000e+00> : vector<16x128xf32>
    %119 = tpu.matmul %118, %117, %cst_91 {dimension_numbers = #tpu.dot_dimension_numbers<[1], [0], [0], [1], [0, 0, 1, 1], [], []>} : vector<16x128xbf16>, vector<128x128xbf16>, vector<16x128xf32> -> vector<16x128xf32>
    %120 = arith.addf %114, %119 : vector<16x128xf32>
    %121 = vector.extract_strided_slice %77 {offsets = [112, 0], sizes = [16, 128], strides = [1, 1]} : vector<144x128xf32> to vector<16x128xf32>
    %c1_92 = arith.constant 1 : index
    %c7_93 = arith.constant 7 : index
    %c0_94 = arith.constant 0 : index
    %c0_95 = arith.constant 0 : index
    %122 = vector.load %arg3[%c1_92, %c7_93, %c0_94, %c0_95] : memref<3x9x128x128xbf16, #tpu.memory_space<vmem>>, vector<1x1x128x128xbf16>
    %123 = vector.shape_cast %122 : vector<1x1x128x128xbf16> to vector<128x128xbf16>
    %124 = arith.truncf %121 : vector<16x128xf32> to vector<16x128xbf16>
    %cst_96 = arith.constant dense<0.000000e+00> : vector<16x128xf32>
    %125 = tpu.matmul %124, %123, %cst_96 {dimension_numbers = #tpu.dot_dimension_numbers<[1], [0], [0], [1], [0, 0, 1, 1], [], []>} : vector<16x128xbf16>, vector<128x128xbf16>, vector<16x128xf32> -> vector<16x128xf32>
    %126 = arith.addf %120, %125 : vector<16x128xf32>
    %127 = vector.extract_strided_slice %77 {offsets = [128, 0], sizes = [16, 128], strides = [1, 1]} : vector<144x128xf32> to vector<16x128xf32>
    %c1_97 = arith.constant 1 : index
    %c8_98 = arith.constant 8 : index
    %c0_99 = arith.constant 0 : index
    %c0_100 = arith.constant 0 : index
    %128 = vector.load %arg3[%c1_97, %c8_98, %c0_99, %c0_100] : memref<3x9x128x128xbf16, #tpu.memory_space<vmem>>, vector<1x1x128x128xbf16>
    %129 = vector.shape_cast %128 : vector<1x1x128x128xbf16> to vector<128x128xbf16>
    %130 = arith.truncf %127 : vector<16x128xf32> to vector<16x128xbf16>
    %cst_101 = arith.constant dense<0.000000e+00> : vector<16x128xf32>
    %131 = tpu.matmul %130, %129, %cst_101 {dimension_numbers = #tpu.dot_dimension_numbers<[1], [0], [0], [1], [0, 0, 1, 1], [], []>} : vector<16x128xbf16>, vector<128x128xbf16>, vector<16x128xf32> -> vector<16x128xf32>
    %132 = arith.addf %126, %131 : vector<16x128xf32>
    %c2_102 = arith.constant 2 : index
    %c0_103 = arith.constant 0 : index
    %c0_104 = arith.constant 0 : index
    %133 = vector.load %arg4[%c2_102, %c0_103, %c0_104] : memref<4x1x128xf32, #tpu.memory_space<vmem>>, vector<1x1x128xf32>
    %134 = vector.shape_cast %133 : vector<1x1x128xf32> to vector<1x128xf32>
    %135 = vector.broadcast %134 : vector<1x128xf32> to vector<16x128xf32>
    %136 = arith.addf %132, %135 : vector<16x128xf32>
    %cst_105 = arith.constant 0.000000e+00 : f32
    %137 = vector.broadcast %cst_105 : f32 to vector<16x128xf32>
    %138 = arith.maximumf %136, %137 : vector<16x128xf32>
    %c0_106 = arith.constant 0 : index
    %c0_107 = arith.constant 0 : index
    %139 = vector.load %arg7[%c0_106, %c0_107] : memref<36x16xbf16, #tpu.memory_space<vmem>>, vector<36x16xbf16>
    %140 = arith.truncf %138 : vector<16x128xf32> to vector<16x128xbf16>
    %cst_108 = arith.constant dense<0.000000e+00> : vector<36x128xf32>
    %141 = tpu.matmul %139, %140, %cst_108 {dimension_numbers = #tpu.dot_dimension_numbers<[1], [0], [0], [1], [0, 0, 1, 1], [], []>} : vector<36x16xbf16>, vector<16x128xbf16>, vector<36x128xf32> -> vector<36x128xf32>
    %cst_109 = arith.constant 0.000000e+00 : f32
    %142 = vector.broadcast %cst_109 : f32 to vector<4x128xf32>
    %143 = vector.extract_strided_slice %141 {offsets = [0, 0], sizes = [4, 128], strides = [1, 1]} : vector<36x128xf32> to vector<4x128xf32>
    %c2_110 = arith.constant 2 : index
    %c0_111 = arith.constant 0 : index
    %c0_112 = arith.constant 0 : index
    %c0_113 = arith.constant 0 : index
    %144 = vector.load %arg3[%c2_110, %c0_111, %c0_112, %c0_113] : memref<3x9x128x128xbf16, #tpu.memory_space<vmem>>, vector<1x1x128x128xbf16>
    %145 = vector.shape_cast %144 : vector<1x1x128x128xbf16> to vector<128x128xbf16>
    %146 = arith.truncf %143 : vector<4x128xf32> to vector<4x128xbf16>
    %cst_114 = arith.constant dense<0.000000e+00> : vector<4x128xf32>
    %147 = tpu.matmul %146, %145, %cst_114 {dimension_numbers = #tpu.dot_dimension_numbers<[1], [0], [0], [1], [0, 0, 1, 1], [], []>} : vector<4x128xbf16>, vector<128x128xbf16>, vector<4x128xf32> -> vector<4x128xf32>
    %148 = arith.addf %142, %147 : vector<4x128xf32>
    %149 = vector.extract_strided_slice %141 {offsets = [4, 0], sizes = [4, 128], strides = [1, 1]} : vector<36x128xf32> to vector<4x128xf32>
    %c2_115 = arith.constant 2 : index
    %c1_116 = arith.constant 1 : index
    %c0_117 = arith.constant 0 : index
    %c0_118 = arith.constant 0 : index
    %150 = vector.load %arg3[%c2_115, %c1_116, %c0_117, %c0_118] : memref<3x9x128x128xbf16, #tpu.memory_space<vmem>>, vector<1x1x128x128xbf16>
    %151 = vector.shape_cast %150 : vector<1x1x128x128xbf16> to vector<128x128xbf16>
    %152 = arith.truncf %149 : vector<4x128xf32> to vector<4x128xbf16>
    %cst_119 = arith.constant dense<0.000000e+00> : vector<4x128xf32>
    %153 = tpu.matmul %152, %151, %cst_119 {dimension_numbers = #tpu.dot_dimension_numbers<[1], [0], [0], [1], [0, 0, 1, 1], [], []>} : vector<4x128xbf16>, vector<128x128xbf16>, vector<4x128xf32> -> vector<4x128xf32>
    %154 = arith.addf %148, %153 : vector<4x128xf32>
    %155 = vector.extract_strided_slice %141 {offsets = [8, 0], sizes = [4, 128], strides = [1, 1]} : vector<36x128xf32> to vector<4x128xf32>
    %c2_120 = arith.constant 2 : index
    %c2_121 = arith.constant 2 : index
    %c0_122 = arith.constant 0 : index
    %c0_123 = arith.constant 0 : index
    %156 = vector.load %arg3[%c2_120, %c2_121, %c0_122, %c0_123] : memref<3x9x128x128xbf16, #tpu.memory_space<vmem>>, vector<1x1x128x128xbf16>
    %157 = vector.shape_cast %156 : vector<1x1x128x128xbf16> to vector<128x128xbf16>
    %158 = arith.truncf %155 : vector<4x128xf32> to vector<4x128xbf16>
    %cst_124 = arith.constant dense<0.000000e+00> : vector<4x128xf32>
    %159 = tpu.matmul %158, %157, %cst_124 {dimension_numbers = #tpu.dot_dimension_numbers<[1], [0], [0], [1], [0, 0, 1, 1], [], []>} : vector<4x128xbf16>, vector<128x128xbf16>, vector<4x128xf32> -> vector<4x128xf32>
    %160 = arith.addf %154, %159 : vector<4x128xf32>
    %161 = vector.extract_strided_slice %141 {offsets = [12, 0], sizes = [4, 128], strides = [1, 1]} : vector<36x128xf32> to vector<4x128xf32>
    %c2_125 = arith.constant 2 : index
    %c3_126 = arith.constant 3 : index
    %c0_127 = arith.constant 0 : index
    %c0_128 = arith.constant 0 : index
    %162 = vector.load %arg3[%c2_125, %c3_126, %c0_127, %c0_128] : memref<3x9x128x128xbf16, #tpu.memory_space<vmem>>, vector<1x1x128x128xbf16>
    %163 = vector.shape_cast %162 : vector<1x1x128x128xbf16> to vector<128x128xbf16>
    %164 = arith.truncf %161 : vector<4x128xf32> to vector<4x128xbf16>
    %cst_129 = arith.constant dense<0.000000e+00> : vector<4x128xf32>
    %165 = tpu.matmul %164, %163, %cst_129 {dimension_numbers = #tpu.dot_dimension_numbers<[1], [0], [0], [1], [0, 0, 1, 1], [], []>} : vector<4x128xbf16>, vector<128x128xbf16>, vector<4x128xf32> -> vector<4x128xf32>
    %166 = arith.addf %160, %165 : vector<4x128xf32>
    %167 = vector.extract_strided_slice %141 {offsets = [16, 0], sizes = [4, 128], strides = [1, 1]} : vector<36x128xf32> to vector<4x128xf32>
    %c2_130 = arith.constant 2 : index
    %c4_131 = arith.constant 4 : index
    %c0_132 = arith.constant 0 : index
    %c0_133 = arith.constant 0 : index
    %168 = vector.load %arg3[%c2_130, %c4_131, %c0_132, %c0_133] : memref<3x9x128x128xbf16, #tpu.memory_space<vmem>>, vector<1x1x128x128xbf16>
    %169 = vector.shape_cast %168 : vector<1x1x128x128xbf16> to vector<128x128xbf16>
    %170 = arith.truncf %167 : vector<4x128xf32> to vector<4x128xbf16>
    %cst_134 = arith.constant dense<0.000000e+00> : vector<4x128xf32>
    %171 = tpu.matmul %170, %169, %cst_134 {dimension_numbers = #tpu.dot_dimension_numbers<[1], [0], [0], [1], [0, 0, 1, 1], [], []>} : vector<4x128xbf16>, vector<128x128xbf16>, vector<4x128xf32> -> vector<4x128xf32>
    %172 = arith.addf %166, %171 : vector<4x128xf32>
    %173 = vector.extract_strided_slice %141 {offsets = [20, 0], sizes = [4, 128], strides = [1, 1]} : vector<36x128xf32> to vector<4x128xf32>
    %c2_135 = arith.constant 2 : index
    %c5_136 = arith.constant 5 : index
    %c0_137 = arith.constant 0 : index
    %c0_138 = arith.constant 0 : index
    %174 = vector.load %arg3[%c2_135, %c5_136, %c0_137, %c0_138] : memref<3x9x128x128xbf16, #tpu.memory_space<vmem>>, vector<1x1x128x128xbf16>
    %175 = vector.shape_cast %174 : vector<1x1x128x128xbf16> to vector<128x128xbf16>
    %176 = arith.truncf %173 : vector<4x128xf32> to vector<4x128xbf16>
    %cst_139 = arith.constant dense<0.000000e+00> : vector<4x128xf32>
    %177 = tpu.matmul %176, %175, %cst_139 {dimension_numbers = #tpu.dot_dimension_numbers<[1], [0], [0], [1], [0, 0, 1, 1], [], []>} : vector<4x128xbf16>, vector<128x128xbf16>, vector<4x128xf32> -> vector<4x128xf32>
    %178 = arith.addf %172, %177 : vector<4x128xf32>
    %179 = vector.extract_strided_slice %141 {offsets = [24, 0], sizes = [4, 128], strides = [1, 1]} : vector<36x128xf32> to vector<4x128xf32>
    %c2_140 = arith.constant 2 : index
    %c6_141 = arith.constant 6 : index
    %c0_142 = arith.constant 0 : index
    %c0_143 = arith.constant 0 : index
    %180 = vector.load %arg3[%c2_140, %c6_141, %c0_142, %c0_143] : memref<3x9x128x128xbf16, #tpu.memory_space<vmem>>, vector<1x1x128x128xbf16>
    %181 = vector.shape_cast %180 : vector<1x1x128x128xbf16> to vector<128x128xbf16>
    %182 = arith.truncf %179 : vector<4x128xf32> to vector<4x128xbf16>
    %cst_144 = arith.constant dense<0.000000e+00> : vector<4x128xf32>
    %183 = tpu.matmul %182, %181, %cst_144 {dimension_numbers = #tpu.dot_dimension_numbers<[1], [0], [0], [1], [0, 0, 1, 1], [], []>} : vector<4x128xbf16>, vector<128x128xbf16>, vector<4x128xf32> -> vector<4x128xf32>
    %184 = arith.addf %178, %183 : vector<4x128xf32>
    %185 = vector.extract_strided_slice %141 {offsets = [28, 0], sizes = [4, 128], strides = [1, 1]} : vector<36x128xf32> to vector<4x128xf32>
    %c2_145 = arith.constant 2 : index
    %c7_146 = arith.constant 7 : index
    %c0_147 = arith.constant 0 : index
    %c0_148 = arith.constant 0 : index
    %186 = vector.load %arg3[%c2_145, %c7_146, %c0_147, %c0_148] : memref<3x9x128x128xbf16, #tpu.memory_space<vmem>>, vector<1x1x128x128xbf16>
    %187 = vector.shape_cast %186 : vector<1x1x128x128xbf16> to vector<128x128xbf16>
    %188 = arith.truncf %185 : vector<4x128xf32> to vector<4x128xbf16>
    %cst_149 = arith.constant dense<0.000000e+00> : vector<4x128xf32>
    %189 = tpu.matmul %188, %187, %cst_149 {dimension_numbers = #tpu.dot_dimension_numbers<[1], [0], [0], [1], [0, 0, 1, 1], [], []>} : vector<4x128xbf16>, vector<128x128xbf16>, vector<4x128xf32> -> vector<4x128xf32>
    %190 = arith.addf %184, %189 : vector<4x128xf32>
    %191 = vector.extract_strided_slice %141 {offsets = [32, 0], sizes = [4, 128], strides = [1, 1]} : vector<36x128xf32> to vector<4x128xf32>
    %c2_150 = arith.constant 2 : index
    %c8_151 = arith.constant 8 : index
    %c0_152 = arith.constant 0 : index
    %c0_153 = arith.constant 0 : index
    %192 = vector.load %arg3[%c2_150, %c8_151, %c0_152, %c0_153] : memref<3x9x128x128xbf16, #tpu.memory_space<vmem>>, vector<1x1x128x128xbf16>
    %193 = vector.shape_cast %192 : vector<1x1x128x128xbf16> to vector<128x128xbf16>
    %194 = arith.truncf %191 : vector<4x128xf32> to vector<4x128xbf16>
    %cst_154 = arith.constant dense<0.000000e+00> : vector<4x128xf32>
    %195 = tpu.matmul %194, %193, %cst_154 {dimension_numbers = #tpu.dot_dimension_numbers<[1], [0], [0], [1], [0, 0, 1, 1], [], []>} : vector<4x128xbf16>, vector<128x128xbf16>, vector<4x128xf32> -> vector<4x128xf32>
    %196 = arith.addf %190, %195 : vector<4x128xf32>
    %c3_155 = arith.constant 3 : index
    %c0_156 = arith.constant 0 : index
    %c0_157 = arith.constant 0 : index
    %197 = vector.load %arg4[%c3_155, %c0_156, %c0_157] : memref<4x1x128xf32, #tpu.memory_space<vmem>>, vector<1x1x128xf32>
    %198 = vector.shape_cast %197 : vector<1x1x128xf32> to vector<1x128xf32>
    %199 = vector.broadcast %198 : vector<1x128xf32> to vector<4x128xf32>
    %200 = arith.addf %196, %199 : vector<4x128xf32>
    %cst_158 = arith.constant 0.000000e+00 : f32
    %201 = vector.broadcast %cst_158 : f32 to vector<4x128xf32>
    %202 = arith.maximumf %200, %201 : vector<4x128xf32>
    %c0_159 = arith.constant 0 : index
    %c0_160 = arith.constant 0 : index
    %c0_161 = arith.constant 0 : index
    %203 = vector.load %arg8[%c0_159, %c0_160, %c0_161] : memref<4x128x128xbf16, #tpu.memory_space<vmem>>, vector<1x128x128xbf16>
    %204 = vector.shape_cast %203 : vector<1x128x128xbf16> to vector<128x128xbf16>
    %205 = arith.truncf %10 : vector<256x128xf32> to vector<256x128xbf16>
    %cst_162 = arith.constant dense<0.000000e+00> : vector<256x128xf32>
    %206 = tpu.matmul %205, %204, %cst_162 {dimension_numbers = #tpu.dot_dimension_numbers<[1], [0], [0], [1], [0, 0, 1, 1], [], []>} : vector<256x128xbf16>, vector<128x128xbf16>, vector<256x128xf32> -> vector<256x128xf32>
    %c0_163 = arith.constant 0 : index
    %c0_164 = arith.constant 0 : index
    %c0_165 = arith.constant 0 : index
    %207 = vector.load %arg9[%c0_163, %c0_164, %c0_165] : memref<4x1x128xf32, #tpu.memory_space<vmem>>, vector<1x1x128xf32>
    %208 = vector.shape_cast %207 : vector<1x1x128xf32> to vector<1x128xf32>
    %209 = vector.broadcast %208 : vector<1x128xf32> to vector<256x128xf32>
    %210 = arith.addf %206, %209 : vector<256x128xf32>
    %c1_166 = arith.constant 1 : index
    %c0_167 = arith.constant 0 : index
    %c0_168 = arith.constant 0 : index
    %211 = vector.load %arg8[%c1_166, %c0_167, %c0_168] : memref<4x128x128xbf16, #tpu.memory_space<vmem>>, vector<1x128x128xbf16>
    %212 = vector.shape_cast %211 : vector<1x128x128xbf16> to vector<128x128xbf16>
    %213 = arith.truncf %74 : vector<64x128xf32> to vector<64x128xbf16>
    %cst_169 = arith.constant dense<0.000000e+00> : vector<64x128xf32>
    %214 = tpu.matmul %213, %212, %cst_169 {dimension_numbers = #tpu.dot_dimension_numbers<[1], [0], [0], [1], [0, 0, 1, 1], [], []>} : vector<64x128xbf16>, vector<128x128xbf16>, vector<64x128xf32> -> vector<64x128xf32>
    %c1_170 = arith.constant 1 : index
    %c0_171 = arith.constant 0 : index
    %c0_172 = arith.constant 0 : index
    %215 = vector.load %arg9[%c1_170, %c0_171, %c0_172] : memref<4x1x128xf32, #tpu.memory_space<vmem>>, vector<1x1x128xf32>
    %216 = vector.shape_cast %215 : vector<1x1x128xf32> to vector<1x128xf32>
    %217 = vector.broadcast %216 : vector<1x128xf32> to vector<64x128xf32>
    %218 = arith.addf %214, %217 : vector<64x128xf32>
    %c2_173 = arith.constant 2 : index
    %c0_174 = arith.constant 0 : index
    %c0_175 = arith.constant 0 : index
    %219 = vector.load %arg8[%c2_173, %c0_174, %c0_175] : memref<4x128x128xbf16, #tpu.memory_space<vmem>>, vector<1x128x128xbf16>
    %220 = vector.shape_cast %219 : vector<1x128x128xbf16> to vector<128x128xbf16>
    %221 = arith.truncf %138 : vector<16x128xf32> to vector<16x128xbf16>
    %cst_176 = arith.constant dense<0.000000e+00> : vector<16x128xf32>
    %222 = tpu.matmul %221, %220, %cst_176 {dimension_numbers = #tpu.dot_dimension_numbers<[1], [0], [0], [1], [0, 0, 1, 1], [], []>} : vector<16x128xbf16>, vector<128x128xbf16>, vector<16x128xf32> -> vector<16x128xf32>
    %c2_177 = arith.constant 2 : index
    %c0_178 = arith.constant 0 : index
    %c0_179 = arith.constant 0 : index
    %223 = vector.load %arg9[%c2_177, %c0_178, %c0_179] : memref<4x1x128xf32, #tpu.memory_space<vmem>>, vector<1x1x128xf32>
    %224 = vector.shape_cast %223 : vector<1x1x128xf32> to vector<1x128xf32>
    %225 = vector.broadcast %224 : vector<1x128xf32> to vector<16x128xf32>
    %226 = arith.addf %222, %225 : vector<16x128xf32>
    %c3_180 = arith.constant 3 : index
    %c0_181 = arith.constant 0 : index
    %c0_182 = arith.constant 0 : index
    %227 = vector.load %arg8[%c3_180, %c0_181, %c0_182] : memref<4x128x128xbf16, #tpu.memory_space<vmem>>, vector<1x128x128xbf16>
    %228 = vector.shape_cast %227 : vector<1x128x128xbf16> to vector<128x128xbf16>
    %229 = arith.truncf %202 : vector<4x128xf32> to vector<4x128xbf16>
    %cst_183 = arith.constant dense<0.000000e+00> : vector<4x128xf32>
    %230 = tpu.matmul %229, %228, %cst_183 {dimension_numbers = #tpu.dot_dimension_numbers<[1], [0], [0], [1], [0, 0, 1, 1], [], []>} : vector<4x128xbf16>, vector<128x128xbf16>, vector<4x128xf32> -> vector<4x128xf32>
    %c3_184 = arith.constant 3 : index
    %c0_185 = arith.constant 0 : index
    %c0_186 = arith.constant 0 : index
    %231 = vector.load %arg9[%c3_184, %c0_185, %c0_186] : memref<4x1x128xf32, #tpu.memory_space<vmem>>, vector<1x1x128xf32>
    %232 = vector.shape_cast %231 : vector<1x1x128xf32> to vector<1x128xf32>
    %233 = vector.broadcast %232 : vector<1x128xf32> to vector<4x128xf32>
    %234 = arith.addf %230, %233 : vector<4x128xf32>
    %c0_187 = arith.constant 0 : index
    %c0_188 = arith.constant 0 : index
    %235 = vector.load %arg12[%c0_187, %c0_188] : memref<16x4xbf16, #tpu.memory_space<vmem>>, vector<16x4xbf16>
    %236 = arith.truncf %234 : vector<4x128xf32> to vector<4x128xbf16>
    %cst_189 = arith.constant dense<0.000000e+00> : vector<16x128xf32>
    %237 = tpu.matmul %235, %236, %cst_189 {dimension_numbers = #tpu.dot_dimension_numbers<[1], [0], [0], [1], [0, 0, 1, 1], [], []>} : vector<16x4xbf16>, vector<4x128xbf16>, vector<16x128xf32> -> vector<16x128xf32>
    %238 = arith.addf %226, %237 : vector<16x128xf32>
    %cst_190 = arith.constant 0.000000e+00 : f32
    %239 = vector.broadcast %cst_190 : f32 to vector<16x128xf32>
    %c0_191 = arith.constant 0 : index
    %c0_192 = arith.constant 0 : index
    %240 = vector.load %arg13[%c0_191, %c0_192] : memref<144x16xbf16, #tpu.memory_space<vmem>>, vector<144x16xbf16>
    %241 = arith.truncf %238 : vector<16x128xf32> to vector<16x128xbf16>
    %cst_193 = arith.constant dense<0.000000e+00> : vector<144x128xf32>
    %242 = tpu.matmul %240, %241, %cst_193 {dimension_numbers = #tpu.dot_dimension_numbers<[1], [0], [0], [1], [0, 0, 1, 1], [], []>} : vector<144x16xbf16>, vector<16x128xbf16>, vector<144x128xf32> -> vector<144x128xf32>
    %243 = vector.extract_strided_slice %242 {offsets = [0, 0], sizes = [16, 128], strides = [1, 1]} : vector<144x128xf32> to vector<16x128xf32>
    %c2_194 = arith.constant 2 : index
    %c0_195 = arith.constant 0 : index
    %c0_196 = arith.constant 0 : index
    %c0_197 = arith.constant 0 : index
    %244 = vector.load %arg14[%c2_194, %c0_195, %c0_196, %c0_197] : memref<3x9x128x128xbf16, #tpu.memory_space<vmem>>, vector<1x1x128x128xbf16>
    %245 = vector.shape_cast %244 : vector<1x1x128x128xbf16> to vector<128x128xbf16>
    %246 = arith.truncf %243 : vector<16x128xf32> to vector<16x128xbf16>
    %cst_198 = arith.constant dense<0.000000e+00> : vector<16x128xf32>
    %247 = tpu.matmul %246, %245, %cst_198 {dimension_numbers = #tpu.dot_dimension_numbers<[1], [0], [0], [1], [0, 0, 1, 1], [], []>} : vector<16x128xbf16>, vector<128x128xbf16>, vector<16x128xf32> -> vector<16x128xf32>
    %248 = arith.addf %239, %247 : vector<16x128xf32>
    %249 = vector.extract_strided_slice %242 {offsets = [16, 0], sizes = [16, 128], strides = [1, 1]} : vector<144x128xf32> to vector<16x128xf32>
    %c2_199 = arith.constant 2 : index
    %c1_200 = arith.constant 1 : index
    %c0_201 = arith.constant 0 : index
    %c0_202 = arith.constant 0 : index
    %250 = vector.load %arg14[%c2_199, %c1_200, %c0_201, %c0_202] : memref<3x9x128x128xbf16, #tpu.memory_space<vmem>>, vector<1x1x128x128xbf16>
    %251 = vector.shape_cast %250 : vector<1x1x128x128xbf16> to vector<128x128xbf16>
    %252 = arith.truncf %249 : vector<16x128xf32> to vector<16x128xbf16>
    %cst_203 = arith.constant dense<0.000000e+00> : vector<16x128xf32>
    %253 = tpu.matmul %252, %251, %cst_203 {dimension_numbers = #tpu.dot_dimension_numbers<[1], [0], [0], [1], [0, 0, 1, 1], [], []>} : vector<16x128xbf16>, vector<128x128xbf16>, vector<16x128xf32> -> vector<16x128xf32>
    %254 = arith.addf %248, %253 : vector<16x128xf32>
    %255 = vector.extract_strided_slice %242 {offsets = [32, 0], sizes = [16, 128], strides = [1, 1]} : vector<144x128xf32> to vector<16x128xf32>
    %c2_204 = arith.constant 2 : index
    %c2_205 = arith.constant 2 : index
    %c0_206 = arith.constant 0 : index
    %c0_207 = arith.constant 0 : index
    %256 = vector.load %arg14[%c2_204, %c2_205, %c0_206, %c0_207] : memref<3x9x128x128xbf16, #tpu.memory_space<vmem>>, vector<1x1x128x128xbf16>
    %257 = vector.shape_cast %256 : vector<1x1x128x128xbf16> to vector<128x128xbf16>
    %258 = arith.truncf %255 : vector<16x128xf32> to vector<16x128xbf16>
    %cst_208 = arith.constant dense<0.000000e+00> : vector<16x128xf32>
    %259 = tpu.matmul %258, %257, %cst_208 {dimension_numbers = #tpu.dot_dimension_numbers<[1], [0], [0], [1], [0, 0, 1, 1], [], []>} : vector<16x128xbf16>, vector<128x128xbf16>, vector<16x128xf32> -> vector<16x128xf32>
    %260 = arith.addf %254, %259 : vector<16x128xf32>
    %261 = vector.extract_strided_slice %242 {offsets = [48, 0], sizes = [16, 128], strides = [1, 1]} : vector<144x128xf32> to vector<16x128xf32>
    %c2_209 = arith.constant 2 : index
    %c3_210 = arith.constant 3 : index
    %c0_211 = arith.constant 0 : index
    %c0_212 = arith.constant 0 : index
    %262 = vector.load %arg14[%c2_209, %c3_210, %c0_211, %c0_212] : memref<3x9x128x128xbf16, #tpu.memory_space<vmem>>, vector<1x1x128x128xbf16>
    %263 = vector.shape_cast %262 : vector<1x1x128x128xbf16> to vector<128x128xbf16>
    %264 = arith.truncf %261 : vector<16x128xf32> to vector<16x128xbf16>
    %cst_213 = arith.constant dense<0.000000e+00> : vector<16x128xf32>
    %265 = tpu.matmul %264, %263, %cst_213 {dimension_numbers = #tpu.dot_dimension_numbers<[1], [0], [0], [1], [0, 0, 1, 1], [], []>} : vector<16x128xbf16>, vector<128x128xbf16>, vector<16x128xf32> -> vector<16x128xf32>
    %266 = arith.addf %260, %265 : vector<16x128xf32>
    %267 = vector.extract_strided_slice %242 {offsets = [64, 0], sizes = [16, 128], strides = [1, 1]} : vector<144x128xf32> to vector<16x128xf32>
    %c2_214 = arith.constant 2 : index
    %c4_215 = arith.constant 4 : index
    %c0_216 = arith.constant 0 : index
    %c0_217 = arith.constant 0 : index
    %268 = vector.load %arg14[%c2_214, %c4_215, %c0_216, %c0_217] : memref<3x9x128x128xbf16, #tpu.memory_space<vmem>>, vector<1x1x128x128xbf16>
    %269 = vector.shape_cast %268 : vector<1x1x128x128xbf16> to vector<128x128xbf16>
    %270 = arith.truncf %267 : vector<16x128xf32> to vector<16x128xbf16>
    %cst_218 = arith.constant dense<0.000000e+00> : vector<16x128xf32>
    %271 = tpu.matmul %270, %269, %cst_218 {dimension_numbers = #tpu.dot_dimension_numbers<[1], [0], [0], [1], [0, 0, 1, 1], [], []>} : vector<16x128xbf16>, vector<128x128xbf16>, vector<16x128xf32> -> vector<16x128xf32>
    %272 = arith.addf %266, %271 : vector<16x128xf32>
    %273 = vector.extract_strided_slice %242 {offsets = [80, 0], sizes = [16, 128], strides = [1, 1]} : vector<144x128xf32> to vector<16x128xf32>
    %c2_219 = arith.constant 2 : index
    %c5_220 = arith.constant 5 : index
    %c0_221 = arith.constant 0 : index
    %c0_222 = arith.constant 0 : index
    %274 = vector.load %arg14[%c2_219, %c5_220, %c0_221, %c0_222] : memref<3x9x128x128xbf16, #tpu.memory_space<vmem>>, vector<1x1x128x128xbf16>
    %275 = vector.shape_cast %274 : vector<1x1x128x128xbf16> to vector<128x128xbf16>
    %276 = arith.truncf %273 : vector<16x128xf32> to vector<16x128xbf16>
    %cst_223 = arith.constant dense<0.000000e+00> : vector<16x128xf32>
    %277 = tpu.matmul %276, %275, %cst_223 {dimension_numbers = #tpu.dot_dimension_numbers<[1], [0], [0], [1], [0, 0, 1, 1], [], []>} : vector<16x128xbf16>, vector<128x128xbf16>, vector<16x128xf32> -> vector<16x128xf32>
    %278 = arith.addf %272, %277 : vector<16x128xf32>
    %279 = vector.extract_strided_slice %242 {offsets = [96, 0], sizes = [16, 128], strides = [1, 1]} : vector<144x128xf32> to vector<16x128xf32>
    %c2_224 = arith.constant 2 : index
    %c6_225 = arith.constant 6 : index
    %c0_226 = arith.constant 0 : index
    %c0_227 = arith.constant 0 : index
    %280 = vector.load %arg14[%c2_224, %c6_225, %c0_226, %c0_227] : memref<3x9x128x128xbf16, #tpu.memory_space<vmem>>, vector<1x1x128x128xbf16>
    %281 = vector.shape_cast %280 : vector<1x1x128x128xbf16> to vector<128x128xbf16>
    %282 = arith.truncf %279 : vector<16x128xf32> to vector<16x128xbf16>
    %cst_228 = arith.constant dense<0.000000e+00> : vector<16x128xf32>
    %283 = tpu.matmul %282, %281, %cst_228 {dimension_numbers = #tpu.dot_dimension_numbers<[1], [0], [0], [1], [0, 0, 1, 1], [], []>} : vector<16x128xbf16>, vector<128x128xbf16>, vector<16x128xf32> -> vector<16x128xf32>
    %284 = arith.addf %278, %283 : vector<16x128xf32>
    %285 = vector.extract_strided_slice %242 {offsets = [112, 0], sizes = [16, 128], strides = [1, 1]} : vector<144x128xf32> to vector<16x128xf32>
    %c2_229 = arith.constant 2 : index
    %c7_230 = arith.constant 7 : index
    %c0_231 = arith.constant 0 : index
    %c0_232 = arith.constant 0 : index
    %286 = vector.load %arg14[%c2_229, %c7_230, %c0_231, %c0_232] : memref<3x9x128x128xbf16, #tpu.memory_space<vmem>>, vector<1x1x128x128xbf16>
    %287 = vector.shape_cast %286 : vector<1x1x128x128xbf16> to vector<128x128xbf16>
    %288 = arith.truncf %285 : vector<16x128xf32> to vector<16x128xbf16>
    %cst_233 = arith.constant dense<0.000000e+00> : vector<16x128xf32>
    %289 = tpu.matmul %288, %287, %cst_233 {dimension_numbers = #tpu.dot_dimension_numbers<[1], [0], [0], [1], [0, 0, 1, 1], [], []>} : vector<16x128xbf16>, vector<128x128xbf16>, vector<16x128xf32> -> vector<16x128xf32>
    %290 = arith.addf %284, %289 : vector<16x128xf32>
    %291 = vector.extract_strided_slice %242 {offsets = [128, 0], sizes = [16, 128], strides = [1, 1]} : vector<144x128xf32> to vector<16x128xf32>
    %c2_234 = arith.constant 2 : index
    %c8_235 = arith.constant 8 : index
    %c0_236 = arith.constant 0 : index
    %c0_237 = arith.constant 0 : index
    %292 = vector.load %arg14[%c2_234, %c8_235, %c0_236, %c0_237] : memref<3x9x128x128xbf16, #tpu.memory_space<vmem>>, vector<1x1x128x128xbf16>
    %293 = vector.shape_cast %292 : vector<1x1x128x128xbf16> to vector<128x128xbf16>
    %294 = arith.truncf %291 : vector<16x128xf32> to vector<16x128xbf16>
    %cst_238 = arith.constant dense<0.000000e+00> : vector<16x128xf32>
    %295 = tpu.matmul %294, %293, %cst_238 {dimension_numbers = #tpu.dot_dimension_numbers<[1], [0], [0], [1], [0, 0, 1, 1], [], []>} : vector<16x128xbf16>, vector<128x128xbf16>, vector<16x128xf32> -> vector<16x128xf32>
    %296 = arith.addf %290, %295 : vector<16x128xf32>
    %c2_239 = arith.constant 2 : index
    %c0_240 = arith.constant 0 : index
    %c0_241 = arith.constant 0 : index
    %297 = vector.load %arg15[%c2_239, %c0_240, %c0_241] : memref<3x1x128xf32, #tpu.memory_space<vmem>>, vector<1x1x128xf32>
    %298 = vector.shape_cast %297 : vector<1x1x128xf32> to vector<1x128xf32>
    %299 = vector.broadcast %298 : vector<1x128xf32> to vector<16x128xf32>
    %300 = arith.addf %296, %299 : vector<16x128xf32>
    %cst_242 = arith.constant 0.000000e+00 : f32
    %301 = vector.broadcast %cst_242 : f32 to vector<16x128xf32>
    %302 = arith.maximumf %300, %301 : vector<16x128xf32>
    %c0_243 = arith.constant 0 : index
    %c0_244 = arith.constant 0 : index
    %303 = vector.load %arg11[%c0_243, %c0_244] : memref<64x16xbf16, #tpu.memory_space<vmem>>, vector<64x16xbf16>
    %304 = arith.truncf %302 : vector<16x128xf32> to vector<16x128xbf16>
    %cst_245 = arith.constant dense<0.000000e+00> : vector<64x128xf32>
    %305 = tpu.matmul %303, %304, %cst_245 {dimension_numbers = #tpu.dot_dimension_numbers<[1], [0], [0], [1], [0, 0, 1, 1], [], []>} : vector<64x16xbf16>, vector<16x128xbf16>, vector<64x128xf32> -> vector<64x128xf32>
    %306 = arith.addf %218, %305 : vector<64x128xf32>
    %cst_246 = arith.constant 0.000000e+00 : f32
    %307 = vector.broadcast %cst_246 : f32 to vector<64x128xf32>
    %cst_247 = arith.constant 0.000000e+00 : f32
    %308 = vector.broadcast %cst_247 : f32 to vector<10x10x128xf32>
    %c0_248 = arith.constant 0 : index
    %c0_249 = arith.constant 0 : index
    %c0_250 = arith.constant 0 : index
    %309 = vector.load %arg18[%c0_248, %c0_249, %c0_250] : memref<10x10x128xf32, #tpu.memory_space<vmem>>, vector<10x10x128xf32>
    tpu.vector_store %arg18[%c0_248, %c0_249, %c0_250], %308 {strides = array<i32>} : memref<10x10x128xf32, #tpu.memory_space<vmem>>, vector<10x10x128xf32>,
    %310 = vector.shape_cast %306 : vector<64x128xf32> to vector<8x8x128xf32>
    %c1_251 = arith.constant 1 : index
    %c1_252 = arith.constant 1 : index
    %c0_253 = arith.constant 0 : index
    %311 = vector.load %arg18[%c1_251, %c1_252, %c0_253] : memref<10x10x128xf32, #tpu.memory_space<vmem>>, vector<8x8x128xf32>
    tpu.vector_store %arg18[%c1_251, %c1_252, %c0_253], %310 {strides = array<i32>} : memref<10x10x128xf32, #tpu.memory_space<vmem>>, vector<8x8x128xf32>,
    %c0_254 = arith.constant 0 : index
    %c0_255 = arith.constant 0 : index
    %c0_256 = arith.constant 0 : index
    %312 = vector.load %arg18[%c0_254, %c0_255, %c0_256] : memref<10x10x128xf32, #tpu.memory_space<vmem>>, vector<8x8x128xf32>
    %313 = vector.shape_cast %312 : vector<8x8x128xf32> to vector<64x128xf32>
    %c1_257 = arith.constant 1 : index
    %c0_258 = arith.constant 0 : index
    %c0_259 = arith.constant 0 : index
    %c0_260 = arith.constant 0 : index
    %314 = vector.load %arg14[%c1_257, %c0_258, %c0_259, %c0_260] : memref<3x9x128x128xbf16, #tpu.memory_space<vmem>>, vector<1x1x128x128xbf16>
    %315 = vector.shape_cast %314 : vector<1x1x128x128xbf16> to vector<128x128xbf16>
    %316 = arith.truncf %313 : vector<64x128xf32> to vector<64x128xbf16>
    %cst_261 = arith.constant dense<0.000000e+00> : vector<64x128xf32>
    %317 = tpu.matmul %316, %315, %cst_261 {dimension_numbers = #tpu.dot_dimension_numbers<[1], [0], [0], [1], [0, 0, 1, 1], [], []>} : vector<64x128xbf16>, vector<128x128xbf16>, vector<64x128xf32> -> vector<64x128xf32>
    %318 = arith.addf %307, %317 : vector<64x128xf32>
    %c0_262 = arith.constant 0 : index
    %c1_263 = arith.constant 1 : index
    %c0_264 = arith.constant 0 : index
    %319 = vector.load %arg18[%c0_262, %c1_263, %c0_264] : memref<10x10x128xf32, #tpu.memory_space<vmem>>, vector<8x8x128xf32>
    %320 = vector.shape_cast %319 : vector<8x8x128xf32> to vector<64x128xf32>
    %c1_265 = arith.constant 1 : index
    %c1_266 = arith.constant 1 : index
    %c0_267 = arith.constant 0 : index
    %c0_268 = arith.constant 0 : index
    %321 = vector.load %arg14[%c1_265, %c1_266, %c0_267, %c0_268] : memref<3x9x128x128xbf16, #tpu.memory_space<vmem>>, vector<1x1x128x128xbf16>
    %322 = vector.shape_cast %321 : vector<1x1x128x128xbf16> to vector<128x128xbf16>
    %323 = arith.truncf %320 : vector<64x128xf32> to vector<64x128xbf16>
    %cst_269 = arith.constant dense<0.000000e+00> : vector<64x128xf32>
    %324 = tpu.matmul %323, %322, %cst_269 {dimension_numbers = #tpu.dot_dimension_numbers<[1], [0], [0], [1], [0, 0, 1, 1], [], []>} : vector<64x128xbf16>, vector<128x128xbf16>, vector<64x128xf32> -> vector<64x128xf32>
    %325 = arith.addf %318, %324 : vector<64x128xf32>
    %c0_270 = arith.constant 0 : index
    %c2_271 = arith.constant 2 : index
    %c0_272 = arith.constant 0 : index
    %326 = vector.load %arg18[%c0_270, %c2_271, %c0_272] : memref<10x10x128xf32, #tpu.memory_space<vmem>>, vector<8x8x128xf32>
    %327 = vector.shape_cast %326 : vector<8x8x128xf32> to vector<64x128xf32>
    %c1_273 = arith.constant 1 : index
    %c2_274 = arith.constant 2 : index
    %c0_275 = arith.constant 0 : index
    %c0_276 = arith.constant 0 : index
    %328 = vector.load %arg14[%c1_273, %c2_274, %c0_275, %c0_276] : memref<3x9x128x128xbf16, #tpu.memory_space<vmem>>, vector<1x1x128x128xbf16>
    %329 = vector.shape_cast %328 : vector<1x1x128x128xbf16> to vector<128x128xbf16>
    %330 = arith.truncf %327 : vector<64x128xf32> to vector<64x128xbf16>
    %cst_277 = arith.constant dense<0.000000e+00> : vector<64x128xf32>
    %331 = tpu.matmul %330, %329, %cst_277 {dimension_numbers = #tpu.dot_dimension_numbers<[1], [0], [0], [1], [0, 0, 1, 1], [], []>} : vector<64x128xbf16>, vector<128x128xbf16>, vector<64x128xf32> -> vector<64x128xf32>
    %332 = arith.addf %325, %331 : vector<64x128xf32>
    %c1_278 = arith.constant 1 : index
    %c0_279 = arith.constant 0 : index
    %c0_280 = arith.constant 0 : index
    %333 = vector.load %arg18[%c1_278, %c0_279, %c0_280] : memref<10x10x128xf32, #tpu.memory_space<vmem>>, vector<8x8x128xf32>
    %334 = vector.shape_cast %333 : vector<8x8x128xf32> to vector<64x128xf32>
    %c1_281 = arith.constant 1 : index
    %c3_282 = arith.constant 3 : index
    %c0_283 = arith.constant 0 : index
    %c0_284 = arith.constant 0 : index
    %335 = vector.load %arg14[%c1_281, %c3_282, %c0_283, %c0_284] : memref<3x9x128x128xbf16, #tpu.memory_space<vmem>>, vector<1x1x128x128xbf16>
    %336 = vector.shape_cast %335 : vector<1x1x128x128xbf16> to vector<128x128xbf16>
    %337 = arith.truncf %334 : vector<64x128xf32> to vector<64x128xbf16>
    %cst_285 = arith.constant dense<0.000000e+00> : vector<64x128xf32>
    %338 = tpu.matmul %337, %336, %cst_285 {dimension_numbers = #tpu.dot_dimension_numbers<[1], [0], [0], [1], [0, 0, 1, 1], [], []>} : vector<64x128xbf16>, vector<128x128xbf16>, vector<64x128xf32> -> vector<64x128xf32>
    %339 = arith.addf %332, %338 : vector<64x128xf32>
    %c1_286 = arith.constant 1 : index
    %c1_287 = arith.constant 1 : index
    %c0_288 = arith.constant 0 : index
    %340 = vector.load %arg18[%c1_286, %c1_287, %c0_288] : memref<10x10x128xf32, #tpu.memory_space<vmem>>, vector<8x8x128xf32>
    %341 = vector.shape_cast %340 : vector<8x8x128xf32> to vector<64x128xf32>
    %c1_289 = arith.constant 1 : index
    %c4_290 = arith.constant 4 : index
    %c0_291 = arith.constant 0 : index
    %c0_292 = arith.constant 0 : index
    %342 = vector.load %arg14[%c1_289, %c4_290, %c0_291, %c0_292] : memref<3x9x128x128xbf16, #tpu.memory_space<vmem>>, vector<1x1x128x128xbf16>
    %343 = vector.shape_cast %342 : vector<1x1x128x128xbf16> to vector<128x128xbf16>
    %344 = arith.truncf %341 : vector<64x128xf32> to vector<64x128xbf16>
    %cst_293 = arith.constant dense<0.000000e+00> : vector<64x128xf32>
    %345 = tpu.matmul %344, %343, %cst_293 {dimension_numbers = #tpu.dot_dimension_numbers<[1], [0], [0], [1], [0, 0, 1, 1], [], []>} : vector<64x128xbf16>, vector<128x128xbf16>, vector<64x128xf32> -> vector<64x128xf32>
    %346 = arith.addf %339, %345 : vector<64x128xf32>
    %c1_294 = arith.constant 1 : index
    %c2_295 = arith.constant 2 : index
    %c0_296 = arith.constant 0 : index
    %347 = vector.load %arg18[%c1_294, %c2_295, %c0_296] : memref<10x10x128xf32, #tpu.memory_space<vmem>>, vector<8x8x128xf32>
    %348 = vector.shape_cast %347 : vector<8x8x128xf32> to vector<64x128xf32>
    %c1_297 = arith.constant 1 : index
    %c5_298 = arith.constant 5 : index
    %c0_299 = arith.constant 0 : index
    %c0_300 = arith.constant 0 : index
    %349 = vector.load %arg14[%c1_297, %c5_298, %c0_299, %c0_300] : memref<3x9x128x128xbf16, #tpu.memory_space<vmem>>, vector<1x1x128x128xbf16>
    %350 = vector.shape_cast %349 : vector<1x1x128x128xbf16> to vector<128x128xbf16>
    %351 = arith.truncf %348 : vector<64x128xf32> to vector<64x128xbf16>
    %cst_301 = arith.constant dense<0.000000e+00> : vector<64x128xf32>
    %352 = tpu.matmul %351, %350, %cst_301 {dimension_numbers = #tpu.dot_dimension_numbers<[1], [0], [0], [1], [0, 0, 1, 1], [], []>} : vector<64x128xbf16>, vector<128x128xbf16>, vector<64x128xf32> -> vector<64x128xf32>
    %353 = arith.addf %346, %352 : vector<64x128xf32>
    %c2_302 = arith.constant 2 : index
    %c0_303 = arith.constant 0 : index
    %c0_304 = arith.constant 0 : index
    %354 = vector.load %arg18[%c2_302, %c0_303, %c0_304] : memref<10x10x128xf32, #tpu.memory_space<vmem>>, vector<8x8x128xf32>
    %355 = vector.shape_cast %354 : vector<8x8x128xf32> to vector<64x128xf32>
    %c1_305 = arith.constant 1 : index
    %c6_306 = arith.constant 6 : index
    %c0_307 = arith.constant 0 : index
    %c0_308 = arith.constant 0 : index
    %356 = vector.load %arg14[%c1_305, %c6_306, %c0_307, %c0_308] : memref<3x9x128x128xbf16, #tpu.memory_space<vmem>>, vector<1x1x128x128xbf16>
    %357 = vector.shape_cast %356 : vector<1x1x128x128xbf16> to vector<128x128xbf16>
    %358 = arith.truncf %355 : vector<64x128xf32> to vector<64x128xbf16>
    %cst_309 = arith.constant dense<0.000000e+00> : vector<64x128xf32>
    %359 = tpu.matmul %358, %357, %cst_309 {dimension_numbers = #tpu.dot_dimension_numbers<[1], [0], [0], [1], [0, 0, 1, 1], [], []>} : vector<64x128xbf16>, vector<128x128xbf16>, vector<64x128xf32> -> vector<64x128xf32>
    %360 = arith.addf %353, %359 : vector<64x128xf32>
    %c2_310 = arith.constant 2 : index
    %c1_311 = arith.constant 1 : index
    %c0_312 = arith.constant 0 : index
    %361 = vector.load %arg18[%c2_310, %c1_311, %c0_312] : memref<10x10x128xf32, #tpu.memory_space<vmem>>, vector<8x8x128xf32>
    %362 = vector.shape_cast %361 : vector<8x8x128xf32> to vector<64x128xf32>
    %c1_313 = arith.constant 1 : index
    %c7_314 = arith.constant 7 : index
    %c0_315 = arith.constant 0 : index
    %c0_316 = arith.constant 0 : index
    %363 = vector.load %arg14[%c1_313, %c7_314, %c0_315, %c0_316] : memref<3x9x128x128xbf16, #tpu.memory_space<vmem>>, vector<1x1x128x128xbf16>
    %364 = vector.shape_cast %363 : vector<1x1x128x128xbf16> to vector<128x128xbf16>
    %365 = arith.truncf %362 : vector<64x128xf32> to vector<64x128xbf16>
    %cst_317 = arith.constant dense<0.000000e+00> : vector<64x128xf32>
    %366 = tpu.matmul %365, %364, %cst_317 {dimension_numbers = #tpu.dot_dimension_numbers<[1], [0], [0], [1], [0, 0, 1, 1], [], []>} : vector<64x128xbf16>, vector<128x128xbf16>, vector<64x128xf32> -> vector<64x128xf32>
    %367 = arith.addf %360, %366 : vector<64x128xf32>
    %c2_318 = arith.constant 2 : index
    %c2_319 = arith.constant 2 : index
    %c0_320 = arith.constant 0 : index
    %368 = vector.load %arg18[%c2_318, %c2_319, %c0_320] : memref<10x10x128xf32, #tpu.memory_space<vmem>>, vector<8x8x128xf32>
    %369 = vector.shape_cast %368 : vector<8x8x128xf32> to vector<64x128xf32>
    %c1_321 = arith.constant 1 : index
    %c8_322 = arith.constant 8 : index
    %c0_323 = arith.constant 0 : index
    %c0_324 = arith.constant 0 : index
    %370 = vector.load %arg14[%c1_321, %c8_322, %c0_323, %c0_324] : memref<3x9x128x128xbf16, #tpu.memory_space<vmem>>, vector<1x1x128x128xbf16>
    %371 = vector.shape_cast %370 : vector<1x1x128x128xbf16> to vector<128x128xbf16>
    %372 = arith.truncf %369 : vector<64x128xf32> to vector<64x128xbf16>
    %cst_325 = arith.constant dense<0.000000e+00> : vector<64x128xf32>
    %373 = tpu.matmul %372, %371, %cst_325 {dimension_numbers = #tpu.dot_dimension_numbers<[1], [0], [0], [1], [0, 0, 1, 1], [], []>} : vector<64x128xbf16>, vector<128x128xbf16>, vector<64x128xf32> -> vector<64x128xf32>
    %374 = arith.addf %367, %373 : vector<64x128xf32>
    %c1_326 = arith.constant 1 : index
    %c0_327 = arith.constant 0 : index
    %c0_328 = arith.constant 0 : index
    %375 = vector.load %arg15[%c1_326, %c0_327, %c0_328] : memref<3x1x128xf32, #tpu.memory_space<vmem>>, vector<1x1x128xf32>
    %376 = vector.shape_cast %375 : vector<1x1x128xf32> to vector<1x128xf32>
    %377 = vector.broadcast %376 : vector<1x128xf32> to vector<64x128xf32>
    %378 = arith.addf %374, %377 : vector<64x128xf32>
    %cst_329 = arith.constant 0.000000e+00 : f32
    %379 = vector.broadcast %cst_329 : f32 to vector<64x128xf32>
    %380 = arith.maximumf %378, %379 : vector<64x128xf32>
    %c0_330 = arith.constant 0 : index
    %c0_331 = arith.constant 0 : index
    %381 = vector.load %arg10[%c0_330, %c0_331] : memref<256x64xbf16, #tpu.memory_space<vmem>>, vector<256x64xbf16>
    %382 = arith.truncf %380 : vector<64x128xf32> to vector<64x128xbf16>
    %cst_332 = arith.constant dense<0.000000e+00> : vector<256x128xf32>
    %383 = tpu.matmul %381, %382, %cst_332 {dimension_numbers = #tpu.dot_dimension_numbers<[1], [0], [0], [1], [0, 0, 1, 1], [], []>} : vector<256x64xbf16>, vector<64x128xbf16>, vector<256x128xf32> -> vector<256x128xf32>
    %384 = arith.addf %210, %383 : vector<256x128xf32>
    %cst_333 = arith.constant 0.000000e+00 : f32
    %385 = vector.broadcast %cst_333 : f32 to vector<256x128xf32>
    %cst_334 = arith.constant 0.000000e+00 : f32
    %386 = vector.broadcast %cst_334 : f32 to vector<18x18x128xf32>
    %c0_335 = arith.constant 0 : index
    %c0_336 = arith.constant 0 : index
    %c0_337 = arith.constant 0 : index
    %387 = vector.load %arg17[%c0_335, %c0_336, %c0_337] : memref<18x18x128xf32, #tpu.memory_space<vmem>>, vector<18x18x128xf32>
    tpu.vector_store %arg17[%c0_335, %c0_336, %c0_337], %386 {strides = array<i32>} : memref<18x18x128xf32, #tpu.memory_space<vmem>>, vector<18x18x128xf32>,
    %388 = vector.shape_cast %384 : vector<256x128xf32> to vector<16x16x128xf32>
    %c1_338 = arith.constant 1 : index
    %c1_339 = arith.constant 1 : index
    %c0_340 = arith.constant 0 : index
    %389 = vector.load %arg17[%c1_338, %c1_339, %c0_340] : memref<18x18x128xf32, #tpu.memory_space<vmem>>, vector<16x16x128xf32>
    tpu.vector_store %arg17[%c1_338, %c1_339, %c0_340], %388 {strides = array<i32>} : memref<18x18x128xf32, #tpu.memory_space<vmem>>, vector<16x16x128xf32>,
    %c0_341 = arith.constant 0 : index
    %c0_342 = arith.constant 0 : index
    %c0_343 = arith.constant 0 : index
    %390 = vector.load %arg17[%c0_341, %c0_342, %c0_343] : memref<18x18x128xf32, #tpu.memory_space<vmem>>, vector<16x16x128xf32>
    %391 = vector.shape_cast %390 : vector<16x16x128xf32> to vector<256x128xf32>
    %c0_344 = arith.constant 0 : index
    %c0_345 = arith.constant 0 : index
    %c0_346 = arith.constant 0 : index
    %c0_347 = arith.constant 0 : index
    %392 = vector.load %arg14[%c0_344, %c0_345, %c0_346, %c0_347] : memref<3x9x128x128xbf16, #tpu.memory_space<vmem>>, vector<1x1x128x128xbf16>
    %393 = vector.shape_cast %392 : vector<1x1x128x128xbf16> to vector<128x128xbf16>
    %394 = arith.truncf %391 : vector<256x128xf32> to vector<256x128xbf16>
    %cst_348 = arith.constant dense<0.000000e+00> : vector<256x128xf32>
    %395 = tpu.matmul %394, %393, %cst_348 {dimension_numbers = #tpu.dot_dimension_numbers<[1], [0], [0], [1], [0, 0, 1, 1], [], []>} : vector<256x128xbf16>, vector<128x128xbf16>, vector<256x128xf32> -> vector<256x128xf32>
    %396 = arith.addf %385, %395 : vector<256x128xf32>
    %c0_349 = arith.constant 0 : index
    %c1_350 = arith.constant 1 : index
    %c0_351 = arith.constant 0 : index
    %397 = vector.load %arg17[%c0_349, %c1_350, %c0_351] : memref<18x18x128xf32, #tpu.memory_space<vmem>>, vector<16x16x128xf32>
    %398 = vector.shape_cast %397 : vector<16x16x128xf32> to vector<256x128xf32>
    %c0_352 = arith.constant 0 : index
    %c1_353 = arith.constant 1 : index
    %c0_354 = arith.constant 0 : index
    %c0_355 = arith.constant 0 : index
    %399 = vector.load %arg14[%c0_352, %c1_353, %c0_354, %c0_355] : memref<3x9x128x128xbf16, #tpu.memory_space<vmem>>, vector<1x1x128x128xbf16>
    %400 = vector.shape_cast %399 : vector<1x1x128x128xbf16> to vector<128x128xbf16>
    %401 = arith.truncf %398 : vector<256x128xf32> to vector<256x128xbf16>
    %cst_356 = arith.constant dense<0.000000e+00> : vector<256x128xf32>
    %402 = tpu.matmul %401, %400, %cst_356 {dimension_numbers = #tpu.dot_dimension_numbers<[1], [0], [0], [1], [0, 0, 1, 1], [], []>} : vector<256x128xbf16>, vector<128x128xbf16>, vector<256x128xf32> -> vector<256x128xf32>
    %403 = arith.addf %396, %402 : vector<256x128xf32>
    %c0_357 = arith.constant 0 : index
    %c2_358 = arith.constant 2 : index
    %c0_359 = arith.constant 0 : index
    %404 = vector.load %arg17[%c0_357, %c2_358, %c0_359] : memref<18x18x128xf32, #tpu.memory_space<vmem>>, vector<16x16x128xf32>
    %405 = vector.shape_cast %404 : vector<16x16x128xf32> to vector<256x128xf32>
    %c0_360 = arith.constant 0 : index
    %c2_361 = arith.constant 2 : index
    %c0_362 = arith.constant 0 : index
    %c0_363 = arith.constant 0 : index
    %406 = vector.load %arg14[%c0_360, %c2_361, %c0_362, %c0_363] : memref<3x9x128x128xbf16, #tpu.memory_space<vmem>>, vector<1x1x128x128xbf16>
    %407 = vector.shape_cast %406 : vector<1x1x128x128xbf16> to vector<128x128xbf16>
    %408 = arith.truncf %405 : vector<256x128xf32> to vector<256x128xbf16>
    %cst_364 = arith.constant dense<0.000000e+00> : vector<256x128xf32>
    %409 = tpu.matmul %408, %407, %cst_364 {dimension_numbers = #tpu.dot_dimension_numbers<[1], [0], [0], [1], [0, 0, 1, 1], [], []>} : vector<256x128xbf16>, vector<128x128xbf16>, vector<256x128xf32> -> vector<256x128xf32>
    %410 = arith.addf %403, %409 : vector<256x128xf32>
    %c1_365 = arith.constant 1 : index
    %c0_366 = arith.constant 0 : index
    %c0_367 = arith.constant 0 : index
    %411 = vector.load %arg17[%c1_365, %c0_366, %c0_367] : memref<18x18x128xf32, #tpu.memory_space<vmem>>, vector<16x16x128xf32>
    %412 = vector.shape_cast %411 : vector<16x16x128xf32> to vector<256x128xf32>
    %c0_368 = arith.constant 0 : index
    %c3_369 = arith.constant 3 : index
    %c0_370 = arith.constant 0 : index
    %c0_371 = arith.constant 0 : index
    %413 = vector.load %arg14[%c0_368, %c3_369, %c0_370, %c0_371] : memref<3x9x128x128xbf16, #tpu.memory_space<vmem>>, vector<1x1x128x128xbf16>
    %414 = vector.shape_cast %413 : vector<1x1x128x128xbf16> to vector<128x128xbf16>
    %415 = arith.truncf %412 : vector<256x128xf32> to vector<256x128xbf16>
    %cst_372 = arith.constant dense<0.000000e+00> : vector<256x128xf32>
    %416 = tpu.matmul %415, %414, %cst_372 {dimension_numbers = #tpu.dot_dimension_numbers<[1], [0], [0], [1], [0, 0, 1, 1], [], []>} : vector<256x128xbf16>, vector<128x128xbf16>, vector<256x128xf32> -> vector<256x128xf32>
    %417 = arith.addf %410, %416 : vector<256x128xf32>
    %c1_373 = arith.constant 1 : index
    %c1_374 = arith.constant 1 : index
    %c0_375 = arith.constant 0 : index
    %418 = vector.load %arg17[%c1_373, %c1_374, %c0_375] : memref<18x18x128xf32, #tpu.memory_space<vmem>>, vector<16x16x128xf32>
    %419 = vector.shape_cast %418 : vector<16x16x128xf32> to vector<256x128xf32>
    %c0_376 = arith.constant 0 : index
    %c4_377 = arith.constant 4 : index
    %c0_378 = arith.constant 0 : index
    %c0_379 = arith.constant 0 : index
    %420 = vector.load %arg14[%c0_376, %c4_377, %c0_378, %c0_379] : memref<3x9x128x128xbf16, #tpu.memory_space<vmem>>, vector<1x1x128x128xbf16>
    %421 = vector.shape_cast %420 : vector<1x1x128x128xbf16> to vector<128x128xbf16>
    %422 = arith.truncf %419 : vector<256x128xf32> to vector<256x128xbf16>
    %cst_380 = arith.constant dense<0.000000e+00> : vector<256x128xf32>
    %423 = tpu.matmul %422, %421, %cst_380 {dimension_numbers = #tpu.dot_dimension_numbers<[1], [0], [0], [1], [0, 0, 1, 1], [], []>} : vector<256x128xbf16>, vector<128x128xbf16>, vector<256x128xf32> -> vector<256x128xf32>
    %424 = arith.addf %417, %423 : vector<256x128xf32>
    %c1_381 = arith.constant 1 : index
    %c2_382 = arith.constant 2 : index
    %c0_383 = arith.constant 0 : index
    %425 = vector.load %arg17[%c1_381, %c2_382, %c0_383] : memref<18x18x128xf32, #tpu.memory_space<vmem>>, vector<16x16x128xf32>
    %426 = vector.shape_cast %425 : vector<16x16x128xf32> to vector<256x128xf32>
    %c0_384 = arith.constant 0 : index
    %c5_385 = arith.constant 5 : index
    %c0_386 = arith.constant 0 : index
    %c0_387 = arith.constant 0 : index
    %427 = vector.load %arg14[%c0_384, %c5_385, %c0_386, %c0_387] : memref<3x9x128x128xbf16, #tpu.memory_space<vmem>>, vector<1x1x128x128xbf16>
    %428 = vector.shape_cast %427 : vector<1x1x128x128xbf16> to vector<128x128xbf16>
    %429 = arith.truncf %426 : vector<256x128xf32> to vector<256x128xbf16>
    %cst_388 = arith.constant dense<0.000000e+00> : vector<256x128xf32>
    %430 = tpu.matmul %429, %428, %cst_388 {dimension_numbers = #tpu.dot_dimension_numbers<[1], [0], [0], [1], [0, 0, 1, 1], [], []>} : vector<256x128xbf16>, vector<128x128xbf16>, vector<256x128xf32> -> vector<256x128xf32>
    %431 = arith.addf %424, %430 : vector<256x128xf32>
    %c2_389 = arith.constant 2 : index
    %c0_390 = arith.constant 0 : index
    %c0_391 = arith.constant 0 : index
    %432 = vector.load %arg17[%c2_389, %c0_390, %c0_391] : memref<18x18x128xf32, #tpu.memory_space<vmem>>, vector<16x16x128xf32>
    %433 = vector.shape_cast %432 : vector<16x16x128xf32> to vector<256x128xf32>
    %c0_392 = arith.constant 0 : index
    %c6_393 = arith.constant 6 : index
    %c0_394 = arith.constant 0 : index
    %c0_395 = arith.constant 0 : index
    %434 = vector.load %arg14[%c0_392, %c6_393, %c0_394, %c0_395] : memref<3x9x128x128xbf16, #tpu.memory_space<vmem>>, vector<1x1x128x128xbf16>
    %435 = vector.shape_cast %434 : vector<1x1x128x128xbf16> to vector<128x128xbf16>
    %436 = arith.truncf %433 : vector<256x128xf32> to vector<256x128xbf16>
    %cst_396 = arith.constant dense<0.000000e+00> : vector<256x128xf32>
    %437 = tpu.matmul %436, %435, %cst_396 {dimension_numbers = #tpu.dot_dimension_numbers<[1], [0], [0], [1], [0, 0, 1, 1], [], []>} : vector<256x128xbf16>, vector<128x128xbf16>, vector<256x128xf32> -> vector<256x128xf32>
    %438 = arith.addf %431, %437 : vector<256x128xf32>
    %c2_397 = arith.constant 2 : index
    %c1_398 = arith.constant 1 : index
    %c0_399 = arith.constant 0 : index
    %439 = vector.load %arg17[%c2_397, %c1_398, %c0_399] : memref<18x18x128xf32, #tpu.memory_space<vmem>>, vector<16x16x128xf32>
    %440 = vector.shape_cast %439 : vector<16x16x128xf32> to vector<256x128xf32>
    %c0_400 = arith.constant 0 : index
    %c7_401 = arith.constant 7 : index
    %c0_402 = arith.constant 0 : index
    %c0_403 = arith.constant 0 : index
    %441 = vector.load %arg14[%c0_400, %c7_401, %c0_402, %c0_403] : memref<3x9x128x128xbf16, #tpu.memory_space<vmem>>, vector<1x1x128x128xbf16>
    %442 = vector.shape_cast %441 : vector<1x1x128x128xbf16> to vector<128x128xbf16>
    %443 = arith.truncf %440 : vector<256x128xf32> to vector<256x128xbf16>
    %cst_404 = arith.constant dense<0.000000e+00> : vector<256x128xf32>
    %444 = tpu.matmul %443, %442, %cst_404 {dimension_numbers = #tpu.dot_dimension_numbers<[1], [0], [0], [1], [0, 0, 1, 1], [], []>} : vector<256x128xbf16>, vector<128x128xbf16>, vector<256x128xf32> -> vector<256x128xf32>
    %445 = arith.addf %438, %444 : vector<256x128xf32>
    %c2_405 = arith.constant 2 : index
    %c2_406 = arith.constant 2 : index
    %c0_407 = arith.constant 0 : index
    %446 = vector.load %arg17[%c2_405, %c2_406, %c0_407] : memref<18x18x128xf32, #tpu.memory_space<vmem>>, vector<16x16x128xf32>
    %447 = vector.shape_cast %446 : vector<16x16x128xf32> to vector<256x128xf32>
    %c0_408 = arith.constant 0 : index
    %c8_409 = arith.constant 8 : index
    %c0_410 = arith.constant 0 : index
    %c0_411 = arith.constant 0 : index
    %448 = vector.load %arg14[%c0_408, %c8_409, %c0_410, %c0_411] : memref<3x9x128x128xbf16, #tpu.memory_space<vmem>>, vector<1x1x128x128xbf16>
    %449 = vector.shape_cast %448 : vector<1x1x128x128xbf16> to vector<128x128xbf16>
    %450 = arith.truncf %447 : vector<256x128xf32> to vector<256x128xbf16>
    %cst_412 = arith.constant dense<0.000000e+00> : vector<256x128xf32>
    %451 = tpu.matmul %450, %449, %cst_412 {dimension_numbers = #tpu.dot_dimension_numbers<[1], [0], [0], [1], [0, 0, 1, 1], [], []>} : vector<256x128xbf16>, vector<128x128xbf16>, vector<256x128xf32> -> vector<256x128xf32>
    %452 = arith.addf %445, %451 : vector<256x128xf32>
    %c0_413 = arith.constant 0 : index
    %c0_414 = arith.constant 0 : index
    %c0_415 = arith.constant 0 : index
    %453 = vector.load %arg15[%c0_413, %c0_414, %c0_415] : memref<3x1x128xf32, #tpu.memory_space<vmem>>, vector<1x1x128xf32>
    %454 = vector.shape_cast %453 : vector<1x1x128xf32> to vector<1x128xf32>
    %455 = vector.broadcast %454 : vector<1x128xf32> to vector<256x128xf32>
    %456 = arith.addf %452, %455 : vector<256x128xf32>
    %cst_416 = arith.constant 0.000000e+00 : f32
    %457 = vector.broadcast %cst_416 : f32 to vector<256x128xf32>
    %458 = arith.maximumf %456, %457 : vector<256x128xf32>
    %c0_417 = arith.constant 0 : index
    %c0_418 = arith.constant 0 : index
    %c0_419 = arith.constant 0 : index
    %459 = vector.load %arg16[%c0_417, %c0_418, %c0_419] : memref<1x256x128xf32, #tpu.memory_space<vmem>>, vector<1x256x128xf32>
    %460 = vector.shape_cast %459 : vector<1x256x128xf32> to vector<256x128xf32>
    %461 = vector.shape_cast %458 : vector<256x128xf32> to vector<1x256x128xf32>
    tpu.vector_store %arg16[%c0_417, %c0_418, %c0_419], %461 {strides = array<i32>} : memref<1x256x128xf32, #tpu.memory_space<vmem>>, vector<1x256x128xf32>,
    return
  }
  func.func @transform_0(%arg0: i32) -> (i32, i32, i32) {
    %c0_i32 = arith.constant 0 : i32
    %c0_i32_0 = arith.constant 0 : i32
    %c0_i32_1 = arith.constant 0 : i32
    return %arg0, %c0_i32, %c0_i32_0 : i32, i32, i32
  }
  func.func @transform_1(%arg0: i32) -> (i32, i32) {
    %c0_i32 = arith.constant 0 : i32
    %c0_i32_0 = arith.constant 0 : i32
    %c0_i32_1 = arith.constant 0 : i32
    return %c0_i32, %c0_i32_0 : i32, i32
  }
  func.func @transform_2(%arg0: i32) -> (i32, i32, i32, i32) {
    %c0_i32 = arith.constant 0 : i32
    %c0_i32_0 = arith.constant 0 : i32
    %c0_i32_1 = arith.constant 0 : i32
    %c0_i32_2 = arith.constant 0 : i32
    %c0_i32_3 = arith.constant 0 : i32
    return %c0_i32, %c0_i32_0, %c0_i32_1, %c0_i32_2 : i32, i32, i32, i32
  }
  func.func @transform_3(%arg0: i32) -> (i32, i32, i32) {
    %c0_i32 = arith.constant 0 : i32
    %c0_i32_0 = arith.constant 0 : i32
    %c0_i32_1 = arith.constant 0 : i32
    %c0_i32_2 = arith.constant 0 : i32
    return %c0_i32, %c0_i32_0, %c0_i32_1 : i32, i32, i32
  }
  func.func @transform_4(%arg0: i32) -> (i32, i32) {
    %c0_i32 = arith.constant 0 : i32
    %c0_i32_0 = arith.constant 0 : i32
    %c0_i32_1 = arith.constant 0 : i32
    return %c0_i32, %c0_i32_0 : i32, i32
  }
  func.func @transform_5(%arg0: i32) -> (i32, i32) {
    %c0_i32 = arith.constant 0 : i32
    %c0_i32_0 = arith.constant 0 : i32
    %c0_i32_1 = arith.constant 0 : i32
    return %c0_i32, %c0_i32_0 : i32, i32
  }
  func.func @transform_6(%arg0: i32) -> (i32, i32) {
    %c0_i32 = arith.constant 0 : i32
    %c0_i32_0 = arith.constant 0 : i32
    %c0_i32_1 = arith.constant 0 : i32
    return %c0_i32, %c0_i32_0 : i32, i32
  }
  func.func @transform_7(%arg0: i32) -> (i32, i32, i32) {
    %c0_i32 = arith.constant 0 : i32
    %c0_i32_0 = arith.constant 0 : i32
    %c0_i32_1 = arith.constant 0 : i32
    %c0_i32_2 = arith.constant 0 : i32
    return %c0_i32, %c0_i32_0, %c0_i32_1 : i32, i32, i32
  }
  func.func @transform_8(%arg0: i32) -> (i32, i32, i32) {
    %c0_i32 = arith.constant 0 : i32
    %c0_i32_0 = arith.constant 0 : i32
    %c0_i32_1 = arith.constant 0 : i32
    %c0_i32_2 = arith.constant 0 : i32
    return %c0_i32, %c0_i32_0, %c0_i32_1 : i32, i32, i32
  }
  func.func @transform_9(%arg0: i32) -> (i32, i32) {
    %c0_i32 = arith.constant 0 : i32
    %c0_i32_0 = arith.constant 0 : i32
    %c0_i32_1 = arith.constant 0 : i32
    return %c0_i32, %c0_i32_0 : i32, i32
  }
  func.func @transform_10(%arg0: i32) -> (i32, i32) {
    %c0_i32 = arith.constant 0 : i32
    %c0_i32_0 = arith.constant 0 : i32
    %c0_i32_1 = arith.constant 0 : i32
    return %c0_i32, %c0_i32_0 : i32, i32
  }
  func.func @transform_11(%arg0: i32) -> (i32, i32) {
    %c0_i32 = arith.constant 0 : i32
    %c0_i32_0 = arith.constant 0 : i32
    %c0_i32_1 = arith.constant 0 : i32
    return %c0_i32, %c0_i32_0 : i32, i32
  }
  func.func @transform_12(%arg0: i32) -> (i32, i32) {
    %c0_i32 = arith.constant 0 : i32
    %c0_i32_0 = arith.constant 0 : i32
    %c0_i32_1 = arith.constant 0 : i32
    return %c0_i32, %c0_i32_0 : i32, i32
  }
  func.func @transform_13(%arg0: i32) -> (i32, i32, i32, i32) {
    %c0_i32 = arith.constant 0 : i32
    %c0_i32_0 = arith.constant 0 : i32
    %c0_i32_1 = arith.constant 0 : i32
    %c0_i32_2 = arith.constant 0 : i32
    %c0_i32_3 = arith.constant 0 : i32
    return %c0_i32, %c0_i32_0, %c0_i32_1, %c0_i32_2 : i32, i32, i32, i32
  }
  func.func @transform_14(%arg0: i32) -> (i32, i32, i32) {
    %c0_i32 = arith.constant 0 : i32
    %c0_i32_0 = arith.constant 0 : i32
    %c0_i32_1 = arith.constant 0 : i32
    %c0_i32_2 = arith.constant 0 : i32
    return %c0_i32, %c0_i32_0, %c0_i32_1 : i32, i32, i32
  }
  func.func @transform_15(%arg0: i32) -> (i32, i32, i32) {
    %c0_i32 = arith.constant 0 : i32
    %c0_i32_0 = arith.constant 0 : i32
    %c0_i32_1 = arith.constant 0 : i32
    return %arg0, %c0_i32, %c0_i32_0 : i32, i32, i32
  }
}

</mosaic_0001>

<bundles_post_ra>
// kernel: _forward.1
= control target key start
LH: loop header
LB: loop body
LE: loop exit
PB: predicated region body
PF: predicated region fallthrough
CT: control target
= control target key end

     0   :  { %s16845_s0 = inlined_call_operand.vmem [shape: f32[2,256,27], index: 0, kind: input, shape index: {}]   ;;  %s16846_s1 = inlined_call_operand.vmem [shape: bf16[27,128], index: 1, kind: input, shape index: {}]   ;;  %s16847_s2 = inlined_call_operand.vmem [shape: bf16[3,9,128,128], index: 2, kind: input, shape index: {}]   ;;  %s16848_s3 = inlined_call_operand.vmem [shape: f32[4,1,128], index: 3, kind: input, shape index: {}]   ;;  %s16849_s4 = inlined_call_operand.vmem [shape: bf16[576,256], index: 4, kind: input, shape index: {}]   ;;  %s16850_s5 = inlined_call_operand.vmem [shape: bf16[144,64], index: 5, kind: input, shape index: {}]   ;;  %s16851_s6 = inlined_call_operand.vmem [shape: bf16[36,16], index: 6, kind: input, shape index: {}]   ;;  %s16852_s7 = inlined_call_operand.vmem [shape: bf16[4,128,128], index: 7, kind: input, shape index: {}]   ;;  %s16853_s8 = inlined_call_operand.vmem [shape: f32[4,1,128], index: 8, kind: input, shape index: {}]   ;;  %s16854_s9 = inlined_call_operand.vmem [shape: bf16[256,64], index: 9, kind: input, shape index: {}]   ;;  %s16855_s10 = inlined_call_operand.vmem [shape: bf16[64,16], index: 10, kind: input, shape index: {}]   ;;  %s16856_s11 = inlined_call_operand.vmem [shape: bf16[16,4], index: 11, kind: input, shape index: {}]   ;;  %s16857_s12 = inlined_call_operand.vmem [shape: bf16[144,16], index: 12, kind: input, shape index: {}]   ;;  %s16858_s13 = inlined_call_operand.vmem [shape: bf16[3,9,128,128], index: 13, kind: input, shape index: {}]   ;;  %s16859_s14 = inlined_call_operand.vmem [shape: f32[3,1,128], index: 14, kind: input, shape index: {}]   ;;  %s16860_s15 = inlined_call_operand.hbm [shape: f32[2,256,128], index: 15, kind: output, shape index: {}]  }
   0x1   :  { %16866 = sst [smem:[#allocation36_spill]] %s16845_s0 }
   0x2   :  { %16867 = sst [smem:[#allocation37_spill]] %s16846_s1 }
   0x3   :  { %20 = vsyncpa [#allocation5], 0 }
   0x4   :  { %22 = vsyncpa [#allocation5 + $0x1], 0  ;;  %s13339_s18 = smov 0   ;;  %s13341_s19 = smov 0  }
   0x5   :  { %s13343_s20 = smov 0   ;;  %s13345_s21 = smov 0  }
   0x6 LB: > { %16868 = sst [smem:[#allocation7_spill]] %s13249_s20  ;;  %s13360_s22 = sadd.s32 4294967295, %s13253_s21   ;;  %s13253_s21 = sphi %s13345_s21, %s16929_s21   ;;  %s13249_s20 = sphi %s13343_s20, %s16931_s20   ;;  %s13245_s19 = sphi %s13341_s19, %s16933_s19   ;;  %s13241_s18 = sphi %s13339_s18, %s16932_s18  }
   0x7   : > { %s9274_s23 = sadd.s32 4294967294, %s13253_s21   ;;  %s13364_s24 = sadd.s32 1, %s13253_s21  }
   0x8   : > { %16869 = sst [smem:[#allocation8_spill]] %s13364_s24  ;;  %s355_s25 = sadd.s32 1, %s13249_s20 }
   0x9   : > { %s352_s26 = ssub.s32 %s13253_s21, %s13364_s24  ;;  %p365_p0 = scmp.ne.s32.totalorder %s13249_s20, %s13245_s19 }
   0xa   : > { %p353_p1 = scmp.eq.s32.totalorder %s352_s26, 0  ;;  %p366_p2 = scmp.eq.s32.totalorder %s13360_s22, 1 }
   0xb   : > { %p371_p3 = scmp.ne.s32.totalorder %s13245_s19, %s13241_s18  ;;  %p372_p4 = scmp.eq.s32.totalorder %s9274_s23, 1 }
   0xc   : > { %s13375_s27 = scalar_select %p353_p1, %s13249_s20, %s355_s25  }
   0xd   : > { %p13377_p5 = por %p366_p2, %p365_p0  ;;  %p13381_p6 = por %p372_p4, %p371_p3 }
   0xe   : > { %16870 = sst [smem:[#allocation9_spill]] %s13375_s27  ;;  %p9277_p7 = scmp.ge.s32.totalorder %s13253_s21, 1 }
   0xf   : > { %s16872_s29 = scalar_select %p13381_p6, 1, 0 }
  0x10   : > { %p440_p8 = scmp.lt.s32.totalorder %s13253_s21, 3 }
  0x11   : > { %16873 = sst [smem:[#allocation10_spill]] %s16872_s29 }
  0x12   : > { %p441_p9 = pnand %p9277_p7, %p440_p8 }
  0x14   : > { %444 = sbr.rel (%p441_p9) target bundleno = 4089 (0xff9), region = 80 }
  0x19   : > { %s16874_s1 = sld [smem:[#allocation37_spill]]  ;;  %vm610_vm0 = vcmask 1044480   ;;  %vm611_vm1 = vcmask 1045504   ;;  %p488_p10 = scmp.lt.s32.totalorder %s13360_s22, 1  ;;  %v13255_v3 = vmov 65535   ;;  %vm561_vm2 = vcmask 220160  }
  0x1a   : > { %v612_v4 = vsel %vm610_vm0, 4294967295, %v13255_v3  ;;  %s16875_s0 = sld [smem:[#allocation36_spill]]  ;;  %vm2589_vm3 = vcmask 523264   ;;  %vm3433_vm4 = vcmask 130048   ;;  %vm4635_vm5 = vcmask 1041408   ;;  %s13128_s30 = sshll.u32 %s13360_s22, 8 }
  0x1b   : > { %v613_v5 = vsel %vm611_vm1, %v612_v4, 0  ;;  %s489_s25 = scalar_select %p488_p10, %s13360_s22, 1  ;;  %vm4631_vm6 = vcmask 31744  }
  0x1c   : > { %s9208_s20 = scalar_lea.hbm %s16860_s15, %s13128_s30  ;;  %s13211_s30 = scalar_lea.hbm %s16860_s15, 512 }
  0x1d   : > { %s12548_s26 = sshll.u32 %s489_s25, 8  ;;  %s9211_s24 = sshll.u32 %s9208_s20, 4  ;;  %s9212_s24 = int_to_ptr.hbm [resolvable:$true] %s9211_s24 }
  0x1e   : > { %s13205_s29 = sshra.s32 %s9212_s24, 4  ;;  %s13206_s29 = int_to_ptr.hbm [resolvable:$true] %s13205_s29 }
  0x1f   : > { %v9287_v0 = vld [vmem:[%s16874_s1 + $0x8] sm:$0xf]  ;;  %v12550_v1 = vld [vmem:[%s16874_s1 + $0x8] sm:$0x30]  ;;  %v12549_v7 = vld [vmem:[%s16874_s1] sm:$0xff]  ;;  %s13207_s1 = scalar_lea.hbm %s13206_s29, 256  ;;  %p13212_p0 = scmp.lt.s32.totalorder %s13206_s29, %s16860_s15 }
  0x20   : > { %v9288_v2 = vor.u32 %v12550_v1, %v9287_v0  ;;  %s13401_s17 = scalar_lea.vmem %s16875_s0, %s12548_s26  ;;  %s485_s0 = sand.u32 1, %s13245_s19  }
  0x21   : > { %v494_v8 = vld [vmem:[%s13401_s17] sm:$0xff]  ;;  %v495_v9 = vld [vmem:[%s13401_s17 + $0x8] sm:$0xff]  ;;  %v496_v14 = vld [vmem:[%s13401_s17 + $0x10] sm:$0xff]  ;;  %s9278_s25 = sshll.u32 %s485_s0, 8  ;;  %s9197_s22 = scalar_lea.sflag [#allocation5], %s485_s0 }
  0x22   : > { %v615_v6 = vand.u32 %v9288_v2, %v613_v5  ;;  %v510_v10 = vld [vmem:[%s13401_s17 + $0x80] sm:$0xff]  ;;  %v511_v11 = vld [vmem:[%s13401_s17 + $0x88] sm:$0xff]  ;;  %v530_v12 = vpack.c.bf16 %v495_v9, %v494_v8  ;;  %v497_v15 = vld [vmem:[%s13401_s17 + $0x18] sm:$0xff]  ;;  %s16709_s26 = scalar_lea.vmem [#allocation4], %s9278_s25  ;;  %p13208_p11 = scmp.ne.s32.totalorder %s13206_s29, %s13207_s1 }
  0x23   : > { %v538_v13 = vpack.c.bf16 %v511_v11, %v510_v10  ;;  %v512_v16 = vld [vmem:[%s13401_s17 + $0x90] sm:$0xff]  ;;  %v513_v17 = vld [vmem:[%s13401_s17 + $0x98] sm:$0xff]  ;;  %v531_v18 = vpack.c.bf16 %v497_v15, %v496_v14  ;;  %v498_v20 = vld [vmem:[%s13401_s17 + $0x20] sm:$0xff]  ;;  %s9209_s27 = sshll.u32 %s16709_s26, 4  ;;  %p13213_p1 = scmp.lt.s32.totalorder %s13211_s30, %s13207_s1  ;;  %s9210_s27 = int_to_ptr.vmem [resolvable:$true] %s9209_s27 }
  0x24   : > { %623 = vmatpush.bf16.msra.mxu0 %v615_v6  ;;  %13129 = vmatpush.bf16.msra.mxu1 %v615_v6  ;;  %v539_v19 = vpack.c.bf16 %v513_v17, %v512_v16  ;;  %v499_v21 = vld [vmem:[%s13401_s17 + $0x28] sm:$0xff]  ;;  %v514_v22 = vld [vmem:[%s13401_s17 + $0xa0] sm:$0xff]  ;;  %v500_v26 = vld [vmem:[%s13401_s17 + $0x30] sm:$0xff]  ;;  %p13209_p12 = pnand %p13208_p11, %p13377_p5 }
  0x25   : > { %v515_v23 = vld [vmem:[%s13401_s17 + $0xa8] sm:$0xff]  ;;  %v532_v24 = vpack.c.bf16 %v499_v21, %v498_v20  ;;  %v501_v27 = vld [vmem:[%s13401_s17 + $0x38] sm:$0xff]  ;;  %v516_v28 = vld [vmem:[%s13401_s17 + $0xb0] sm:$0xff]  ;;  %p13214_p2 = por %p13213_p1, %p13212_p0 }
  0x26   : > { %v540_v25 = vpack.c.bf16 %v515_v23, %v514_v22  ;;  %v517_v29 = vld [vmem:[%s13401_s17 + $0xb8] sm:$0xff]  ;;  %v533_v30 = vpack.c.bf16 %v501_v27, %v500_v26  ;;  %v502_v32 = vld [vmem:[%s13401_s17 + $0x40] sm:$0xff]  ;;  %v503_v33 = vld [vmem:[%s13401_s17 + $0x48] sm:$0xff]  ;;  %p13210_p13 = pneg %p13209_p12 }
  0x27   : > { %v541_v31 = vpack.c.bf16 %v517_v29, %v516_v28  ;;  %v518_v34 = vld [vmem:[%s13401_s17 + $0xc0] sm:$0xff]  ;;  %v519_v35 = vld [vmem:[%s13401_s17 + $0xc8] sm:$0xff]  ;;  %v534_v36 = vpack.c.bf16 %v503_v33, %v502_v32  ;;  %v504_v38 = vld [vmem:[%s13401_s17 + $0x50] sm:$0xff] }
  0x28   : > { %624 = vmatpush.bf16.msra.mxu0 %v12549_v7  ;;  %13130 = vmatpush.bf16.msra.mxu1 %v12549_v7  ;;  %v542_v37 = vpack.c.bf16 %v519_v35, %v518_v34  ;;  %v505_v39 = vld [vmem:[%s13401_s17 + $0x58] sm:$0xff]  ;;  %v520_v40 = vld [vmem:[%s13401_s17 + $0xd0] sm:$0xff]  ;;  %v506_v44 = vld [vmem:[%s13401_s17 + $0x60] sm:$0xff]  ;;  %p13215_p3 = pnand %p13214_p2, %p13210_p13 }
  0x29   : > { %v521_v41 = vld [vmem:[%s13401_s17 + $0xd8] sm:$0xff]  ;;  %v535_v42 = vpack.c.bf16 %v505_v39, %v504_v38  ;;  %v507_v45 = vld [vmem:[%s13401_s17 + $0x68] sm:$0xff]  ;;  %v522_v46 = vld [vmem:[%s13401_s17 + $0xe0] sm:$0xff] }
  0x2a   : > { %v543_v43 = vpack.c.bf16 %v521_v41, %v520_v40  ;;  %v523_v47 = vld [vmem:[%s13401_s17 + $0xe8] sm:$0xff]  ;;  %v536_v48 = vpack.c.bf16 %v507_v45, %v506_v44  ;;  %v508_v50 = vld [vmem:[%s13401_s17 + $0x70] sm:$0xff]  ;;  %v509_v51 = vld [vmem:[%s13401_s17 + $0x78] sm:$0xff] }
  0x2b   : > { %9289 = vmatmul.msk.bf16.vlgmr.msra.gmra.mxu0 %vm561_vm2, %v530_v12  ;;  %9297 = vmatmul.msk.bf16.vlgmr.msra.gmra.mxu1 %vm561_vm2, %v538_v13  ;;  %v544_v49 = vpack.c.bf16 %v523_v47, %v522_v46  ;;  %v524_v52 = vld [vmem:[%s13401_s17 + $0xf0] sm:$0xff]  ;;  %v525_v53 = vld [vmem:[%s13401_s17 + $0xf8] sm:$0xff]  ;;  %v537_v54 = vpack.c.bf16 %v509_v51, %v508_v50  ;;  %v13482_v22 = vld [vmem:[%s16848_s3] ss:$0 sm:$0xff] }
  0x2c   : > { %v545_v55 = vpack.c.bf16 %v525_v53, %v524_v52 }
  0x3b   : > { %9290 = vmatmul.msk.bf16.gmra.mxu0 %vm561_vm2, %v531_v18  ;;  %9298 = vmatmul.msk.bf16.gmra.mxu1 %vm561_vm2, %v539_v19 }
  0x4b   : > { %9291 = vmatmul.msk.bf16.gmra.mxu0 %vm561_vm2, %v532_v24  ;;  %9299 = vmatmul.msk.bf16.gmra.mxu1 %vm561_vm2, %v540_v25 }
  0x5b   : > { %9292 = vmatmul.msk.bf16.gmra.mxu0 %vm561_vm2, %v533_v30  ;;  %9300 = vmatmul.msk.bf16.gmra.mxu1 %vm561_vm2, %v541_v31 }
  0x6b   : > { %9293 = vmatmul.msk.bf16.gmra.mxu0 %vm561_vm2, %v534_v36  ;;  %9301 = vmatmul.msk.bf16.gmra.mxu1 %vm561_vm2, %v542_v37 }
  0x7b   : > { %9294 = vmatmul.msk.bf16.gmra.mxu0 %vm561_vm2, %v535_v42  ;;  %9302 = vmatmul.msk.bf16.gmra.mxu1 %vm561_vm2, %v543_v43 }
  0x8b   : > { %9295 = vmatmul.msk.bf16.gmra.mxu0 %vm561_vm2, %v536_v48  ;;  %9303 = vmatmul.msk.bf16.gmra.mxu1 %vm561_vm2, %v544_v49 }
  0x9b   : > { %9296 = vmatmul.msk.bf16.gmra.mxu0 %vm561_vm2, %v537_v54  ;;  %9304 = vmatmul.msk.bf16.gmra.mxu1 %vm561_vm2, %v545_v55 }
  0xa8   : > { %v13451_v56 = vpop.f32.mrf.mxu0  ;;  %v13453_v57 = vpop.f32.mrf.mxu1 }
  0xb0   : > { %v13455_v58 = vpop.f32.mrf.mxu0  ;;  %v13457_v59 = vpop.f32.mrf.mxu1 }
  0xb8   : > { %v13459_v60 = vpop.f32.mrf.mxu0  ;;  %v13461_v61 = vpop.f32.mrf.mxu1 }
  0xc0   : > { %v13463_v62 = vpop.f32.mrf.mxu0  ;;  %v13465_v63 = vpop.f32.mrf.mxu1 }
  0xc8   : > { %v13467_v0 = vpop.f32.mrf.mxu0  ;;  %v13469_v1 = vpop.f32.mrf.mxu1 }
  0xd0   : > { %v13471_v2 = vpop.f32.mrf.mxu0  ;;  %v13473_v3 = vpop.f32.mrf.mxu1 }
  0xd8   : > { %v13475_v4 = vpop.f32.mrf.mxu0  ;;  %v13477_v5 = vpop.f32.mrf.mxu1 }
  0xe0   : > { %v643_v6 = vpop.f32.mrf.mxu0  ;;  %v683_v7 = vpop.f32.mrf.mxu1 }
  0xe8   : > { %v646_v8 = vpop.f32.mrf.mxu0  ;;  %v686_v9 = vpop.f32.mrf.mxu1 }
  0xe9   : > { %v647_v53 = vadd.f32 %v13482_v22, %v646_v8  ;;  %v687_v54 = vadd.f32 %v13482_v22, %v686_v9  ;;  %v642_v8 = vadd.f32 %v13482_v22, %v13475_v4  ;;  %v682_v9 = vadd.f32 %v13482_v22, %v13477_v5 }
  0xea   : > { %v637_v5 = vadd.f32 %v13482_v22, %v13467_v0 }
  0xf0   : > { %v648_v10 = vpop.f32.mrf.mxu0  ;;  %v688_v11 = vpop.f32.mrf.mxu1 }
  0xf1   : > { %v649_v47 = vadd.f32 %v13482_v22, %v648_v10  ;;  %v689_v48 = vadd.f32 %v13482_v22, %v688_v11  ;;  %v644_v10 = vadd.f32 %v13482_v22, %v643_v6  ;;  %v684_v11 = vadd.f32 %v13482_v22, %v683_v7 }
  0xf2   : > { %v639_v6 = vadd.f32 %v13482_v22, %v13471_v2  ;;  %v679_v7 = vadd.f32 %v13482_v22, %v13473_v3  ;;  %v634_v2 = vadd.f32 %v13482_v22, %v13463_v62  ;;  %v674_v3 = vadd.f32 %v13482_v22, %v13465_v63 }
  0xf3   : > { %v629_v62 = vadd.f32 %v13482_v22, %v13455_v58  ;;  %v669_v63 = vadd.f32 %v13482_v22, %v13457_v59 }
  0xf5   : > { %v707_v58 = vmax.f32 %v629_v62, 0.0  ;;  %v723_v59 = vmax.f32 %v669_v63, 0.0  ;;  %v9355_v62 = vld [vmem:[%s16849_s4 + $0x60] sm:$0xf]  ;;  %v12564_v63 = vld [vmem:[%s16849_s4 + $0x64] sm:$0xf0] }
  0xf8   : > { %v651_v12 = vpop.f32.mrf.mxu0  ;;  %v691_v13 = vpop.f32.mrf.mxu1 }
  0xf9   : > { %v652_v43 = vadd.f32 %v13482_v22, %v651_v12  ;;  %v692_v44 = vadd.f32 %v13482_v22, %v691_v13  ;;  %v715_v13 = vmax.f32 %v649_v47, 0.0 }
  0xfb   : > { %v716_v55 = vmax.f32 %v652_v43, 0.0  ;;  %v732_v12 = vmax.f32 %v692_v44, 0.0  ;;  %v9309_v44 = vld [vmem:[%s16849_s4 + $0x8] sm:$0xf0] }
 0x100   : > { %v653_v14 = vpop.f32.mrf.mxu0  ;;  %v693_v15 = vpop.f32.mrf.mxu1 }
 0x101   : > { %v654_v37 = vadd.f32 %v13482_v22, %v653_v14  ;;  %v694_v38 = vadd.f32 %v13482_v22, %v693_v15  ;;  %v731_v14 = vmax.f32 %v689_v48, 0.0 }
 0x103   : > { %v717_v49 = vmax.f32 %v654_v37, 0.0  ;;  %v733_v50 = vmax.f32 %v694_v38, 0.0 }
 0x105   : > { %v13514_v15 = vpack.c.bf16 %v717_v49, %v716_v55  ;;  %v9315_v49 = vld [vmem:[%s16849_s4 + $0x10] sm:$0xf] }
 0x108   : > { %v656_v16 = vpop.f32.mrf.mxu0  ;;  %v696_v17 = vpop.f32.mrf.mxu1 }
 0x109   : > { %v657_v31 = vadd.f32 %v13482_v22, %v656_v16  ;;  %v697_v32 = vadd.f32 %v13482_v22, %v696_v17  ;;  %v13516_v16 = vpack.c.bf16 %v733_v50, %v732_v12  ;;  %v714_v17 = vmax.f32 %v647_v53, 0.0  ;;  %v12554_v50 = vld [vmem:[%s16849_s4 + $0x14] sm:$0xf0]  ;;  %v12553_v53 = vld [vmem:[%s16849_s4 + $0x14] sm:$0xf] }
 0x10a   : > { %v9316_v55 = vor.u32 %v12554_v50, %v9315_v49 }
 0x10b   : > { %v718_v45 = vmax.f32 %v657_v31, 0.0  ;;  %v734_v46 = vmax.f32 %v697_v32, 0.0  ;;  %v709_v32 = vmax.f32 %v634_v2, 0.0 }
 0x110   : > { %v658_v18 = vpop.f32.mrf.mxu0  ;;  %v698_v19 = vpop.f32.mrf.mxu1 }
 0x111   : > { %v659_v27 = vadd.f32 %v13482_v22, %v658_v18  ;;  %v699_v28 = vadd.f32 %v13482_v22, %v698_v19  ;;  %v730_v18 = vmax.f32 %v687_v54, 0.0  ;;  %v713_v19 = vmax.f32 %v644_v10, 0.0  ;;  %v9317_v54 = vld [vmem:[%s16849_s4 + $0x18] sm:$0xf0]  ;;  %v9323_v10 = vld [vmem:[%s16849_s4 + $0x20] sm:$0xf] }
 0x112   : > { %v9320_v12 = vor.u32 %v12553_v53, %v9317_v54 }
 0x113   : > { %v719_v39 = vmax.f32 %v659_v27, 0.0  ;;  %v735_v40 = vmax.f32 %v699_v28, 0.0  ;;  %v13530_v4 = vpack.c.bf16 %v731_v14, %v730_v18  ;;  %v727_v27 = vmax.f32 %v679_v7, 0.0  ;;  %v9325_v14 = vld [vmem:[%s16849_s4 + $0x28] sm:$0xf0] }
 0x114   : > { %v12558_v18 = vld [vmem:[%s16849_s4 + $0x34] sm:$0xf0]  ;;  %v9333_v7 = vld [vmem:[%s16849_s4 + $0x38] sm:$0xf0] }
 0x115   : > { %v13504_v51 = vpack.c.bf16 %v719_v39, %v718_v45  ;;  %v13506_v52 = vpack.c.bf16 %v735_v40, %v734_v46 }
 0x118   : > { %v661_v20 = vpop.f32.mrf.mxu0  ;;  %v701_v21 = vpop.f32.mrf.mxu1 }
 0x119   : > { %v662_v23 = vadd.f32 %v13482_v22, %v661_v20  ;;  %v702_v24 = vadd.f32 %v13482_v22, %v701_v21  ;;  %v729_v20 = vmax.f32 %v684_v11, 0.0  ;;  %v13528_v21 = vpack.c.bf16 %v715_v13, %v714_v17  ;;  %v12556_v11 = vld [vmem:[%s16849_s4 + $0x24] sm:$0xf0]  ;;  %v12555_v13 = vld [vmem:[%s16849_s4 + $0x24] sm:$0xf] }
 0x11a   : > { %v9331_v17 = vld [vmem:[%s16849_s4 + $0x30] sm:$0xf] }
 0x11b   : > { %v720_v33 = vmax.f32 %v662_v23, 0.0  ;;  %v736_v34 = vmax.f32 %v702_v24, 0.0  ;;  %v677_v23 = vadd.f32 %v13482_v22, %v13469_v1  ;;  %v712_v24 = vmax.f32 %v642_v8, 0.0 }
 0x11c   : > { %v632_v1 = vadd.f32 %v13482_v22, %v13459_v60  ;;  %v9324_v8 = vor.u32 %v12556_v11, %v9323_v10  ;;  %v12569_v10 = vld [vmem:[%s16849_s4 + $0x94] sm:$0xf]  ;;  %v9381_v11 = vld [vmem:[%s16849_s4 + $0x98] sm:$0xf0] }
 0x11d   : > { %v13542_v28 = vpack.c.bf16 %v713_v19, %v712_v24  ;;  %v726_v31 = vmax.f32 %v677_v23, 0.0  ;;  %v9332_v19 = vor.u32 %v12558_v18, %v9331_v17  ;;  %v12560_v23 = vld [vmem:[%s16849_s4 + $0x44] sm:$0xf0]  ;;  %v12559_v24 = vld [vmem:[%s16849_s4 + $0x44] sm:$0xf] }
 0x11f   : > { %v13558_v60 = vpack.c.bf16 %v727_v27, %v726_v31  ;;  %v12562_v27 = vld [vmem:[%s16849_s4 + $0x54] sm:$0xf0] }
 0x120   : > { %v663_v25 = vpop.f32.mrf.mxu0  ;;  %v703_v26 = vpop.f32.mrf.mxu1 }
 0x121   : > { %v664_v29 = vadd.f32 %v13482_v22, %v663_v25  ;;  %v704_v30 = vadd.f32 %v13482_v22, %v703_v26  ;;  %v728_v25 = vmax.f32 %v682_v9, 0.0  ;;  %v711_v26 = vmax.f32 %v639_v6, 0.0  ;;  %v12557_v6 = vld [vmem:[%s16849_s4 + $0x34] sm:$0xf] }
 0x122   : > { %v9328_v9 = vor.u32 %v12555_v13, %v9325_v14 }
 0x123   : > { %v721_v35 = vmax.f32 %v664_v29, 0.0  ;;  %v737_v36 = vmax.f32 %v704_v30, 0.0  ;;  %v13544_v0 = vpack.c.bf16 %v729_v20, %v728_v25  ;;  %v672_v29 = vadd.f32 %v13482_v22, %v13461_v61  ;;  %v9341_v25 = vld [vmem:[%s16849_s4 + $0x48] sm:$0xf0] }
 0x124   : > { %v710_v30 = vmax.f32 %v637_v5, 0.0  ;;  %v627_v61 = vadd.f32 %v13482_v22, %v13451_v56  ;;  %v9307_v56 = vld [vmem:[%s16849_s4] sm:$0xf]  ;;  %v9336_v20 = vor.u32 %v12557_v6, %v9333_v7  ;;  %v12638_v6 = vld [vmem:[%s16847_s2 + $0x78] sm:$0xff] }
 0x125   : > { %v13494_v41 = vpack.c.bf16 %v721_v35, %v720_v33  ;;  %v13496_v42 = vpack.c.bf16 %v737_v36, %v736_v34  ;;  %v725_v33 = vmax.f32 %v674_v3, 0.0  ;;  %v667_v35 = vadd.f32 %v13482_v22, %v13453_v57  ;;  %v12552_v57 = vld [vmem:[%s16849_s4 + $0x4] sm:$0xf0]  ;;  %v12551_v22 = vld [vmem:[%s16849_s4 + $0x4] sm:$0xf]  ;;  %1653 = vmatpush.bf16.msra.mxu3 %v12638_v6 }
 0x126   : > { %v13556_v34 = vpack.c.bf16 %v711_v26, %v710_v30  ;;  %v708_v36 = vmax.f32 %v632_v1, 0.0  ;;  %v724_v37 = vmax.f32 %v672_v29, 0.0  ;;  %v706_v40 = vmax.f32 %v627_v61, 0.0  ;;  %v9339_v5 = vld [vmem:[%s16849_s4 + $0x40] sm:$0xf] }
 0x127   : > { %1186 = vmatpush.bf16.msrb.mxu1 %v13494_v41  ;;  %1375 = vmatpush.bf16.msra.mxu2 %v13496_v42  ;;  %v722_v43 = vmax.f32 %v667_v35, 0.0  ;;  %v9308_v47 = vor.u32 %v12552_v57, %v9307_v56  ;;  %v9312_v48 = vor.u32 %v12551_v22, %v9309_v44  ;;  %v9340_v2 = vor.u32 %v12560_v23, %v9339_v5  ;;  %v9347_v26 = vld [vmem:[%s16849_s4 + $0x50] sm:$0xf]  ;;  %v12561_v1 = vld [vmem:[%s16849_s4 + $0x54] sm:$0xf]  ;;  %v12636_v23 = vld [vmem:[%s16847_s2 + $0x68] sm:$0xff] }
 0x128   : > { %v13566_v38 = vpack.c.bf16 %v709_v32, %v708_v36  ;;  %v13568_v39 = vpack.c.bf16 %v725_v33, %v724_v37  ;;  %v13584_v45 = vpack.c.bf16 %v707_v58, %v706_v40  ;;  %v9344_v3 = vor.u32 %v12559_v24, %v9341_v25  ;;  %v9349_v29 = vld [vmem:[%s16849_s4 + $0x58] sm:$0xf0]  ;;  %v12563_v32 = vld [vmem:[%s16849_s4 + $0x64] sm:$0xf]  ;;  %v9357_v33 = vld [vmem:[%s16849_s4 + $0x68] sm:$0xf0] }
 0x129   : > { %v13586_v46 = vpack.c.bf16 %v723_v59, %v722_v43  ;;  %v9348_v30 = vor.u32 %v12562_v27, %v9347_v26  ;;  %v9352_v31 = vor.u32 %v12561_v1, %v9349_v29  ;;  %v9356_v61 = vor.u32 %v12564_v63, %v9355_v62  ;;  %v9363_v36 = vld [vmem:[%s16849_s4 + $0x70] sm:$0xf]  ;;  %v12566_v37 = vld [vmem:[%s16849_s4 + $0x74] sm:$0xf0]  ;;  %v12565_v58 = vld [vmem:[%s16849_s4 + $0x74] sm:$0xf] }
 0x12a   : > { %v9360_v35 = vor.u32 %v12563_v32, %v9357_v33  ;;  %v9365_v59 = vld [vmem:[%s16849_s4 + $0x78] sm:$0xf0]  ;;  %v9364_v40 = vor.u32 %v12566_v37, %v9363_v36  ;;  %v9371_v56 = vld [vmem:[%s16849_s4 + $0x80] sm:$0xf]  ;;  %v12568_v57 = vld [vmem:[%s16849_s4 + $0x84] sm:$0xf0] }
 0x12b   : > { %1187 = vmatpush.bf16.msrb.mxu1 %v13504_v51  ;;  %1376 = vmatpush.bf16.msra.mxu2 %v13506_v52  ;;  %v9368_v43 = vor.u32 %v12565_v58, %v9365_v59  ;;  %v12567_v22 = vld [vmem:[%s16849_s4 + $0x84] sm:$0xf]  ;;  %v9373_v44 = vld [vmem:[%s16849_s4 + $0x88] sm:$0xf0]  ;;  %v9387_v24 = vld [vmem:[%s16849_s4 + $0xa0] sm:$0xf] }
 0x12c   : > { %v12572_v25 = vld [vmem:[%s16849_s4 + $0xa4] sm:$0xf0]  ;;  %v12635_v27 = vld [vmem:[%s16847_s2 + $0x60] sm:$0xff]  ;;  %v12634_v63 = vld [vmem:[%s16847_s2 + $0x58] sm:$0xff] }
 0x12d   : > { %v9388_v29 = vor.u32 %v12572_v25, %v9387_v24  ;;  %v12633_v33 = vld [vmem:[%s16847_s2 + $0x50] sm:$0xff]  ;;  %v12632_v36 = vld [vmem:[%s16847_s2 + $0x48] sm:$0xff]  ;;  %v12574_v58 = vld [vmem:[%s16849_s4 + $0xb4] sm:$0xf0] }
 0x12e   : > { %v9395_v37 = vld [vmem:[%s16849_s4 + $0xb0] sm:$0xf]  ;;  %v12573_v59 = vld [vmem:[%s16849_s4 + $0xb4] sm:$0xf]  ;;  %v12578_v24 = vld [vmem:[%s16849_s4 + $0xd4] sm:$0xf0] }
 0x12f   : > { %1188 = vmatpush.bf16.msrb.mxu1 %v13514_v15  ;;  %1377 = vmatpush.bf16.msra.mxu2 %v13516_v16  ;;  %v12577_v25 = vld [vmem:[%s16849_s4 + $0xd4] sm:$0xf] }
 0x133   : > { %1189 = vmatpush.bf16.msrb.mxu1 %v13528_v21  ;;  %1378 = vmatpush.bf16.msra.mxu2 %v13530_v4 }
 0x137   : > { %1190 = vmatpush.bf16.msrb.mxu1 %v13542_v28  ;;  %1379 = vmatpush.bf16.msra.mxu2 %v13544_v0 }
 0x13b   : > { %1191 = vmatpush.bf16.msrb.mxu1 %v13556_v34  ;;  %1380 = vmatpush.bf16.msra.mxu2 %v13558_v60 }
 0x13f   : > { %1192 = vmatpush.bf16.msrb.mxu1 %v13566_v38  ;;  %1381 = vmatpush.bf16.msra.mxu2 %v13568_v39 }
 0x143   : > { %1193 = vmatpush.bf16.msrb.mxu1 %v13584_v45  ;;  %1382 = vmatpush.bf16.msra.mxu2 %v13586_v46 }
 0x146   : > { %1194 = vmatmul.bf16.vlgmr.msrb.gmra.mxu1 %v9308_v47  ;;  %1383 = vmatmul.bf16.vlgmr.msra.gmra.mxu2 %v9312_v48  ;;  %v9372_v47 = vor.u32 %v12568_v57, %v9371_v56  ;;  %v9376_v48 = vor.u32 %v12567_v22, %v9373_v44  ;;  %v12631_v56 = vld [vmem:[%s16847_s2 + $0x40] sm:$0xff]  ;;  %v9396_v22 = vor.u32 %v12574_v58, %v9395_v37  ;;  %v12628_v37 = vld [vmem:[%s16847_s2 + $0x28] sm:$0xff] }
 0x147   : > { %v9419_v58 = vld [vmem:[%s16849_s4 + $0xe0] sm:$0xf] }
 0x156   : > { %1199 = vmatmul.bf16.gmra.mxu1 %v9316_v55  ;;  %1388 = vmatmul.bf16.gmra.mxu2 %v9320_v12  ;;  %v9379_v55 = vld [vmem:[%s16849_s4 + $0x90] sm:$0xf]  ;;  %v12570_v12 = vld [vmem:[%s16849_s4 + $0x94] sm:$0xf0] }
 0x166   : > { %1204 = vmatmul.bf16.gmra.mxu1 %v9324_v8  ;;  %1393 = vmatmul.bf16.gmra.mxu2 %v9328_v9  ;;  %v9380_v8 = vor.u32 %v12570_v12, %v9379_v55  ;;  %v9384_v9 = vor.u32 %v12569_v10, %v9381_v11  ;;  %v9403_v55 = vld [vmem:[%s16849_s4 + $0xc0] sm:$0xf]  ;;  %v12576_v12 = vld [vmem:[%s16849_s4 + $0xc4] sm:$0xf0]  ;;  %v12575_v10 = vld [vmem:[%s16849_s4 + $0xc4] sm:$0xf] }
 0x167   : > { %v9405_v11 = vld [vmem:[%s16849_s4 + $0xc8] sm:$0xf0] }
 0x176   : > { %1209 = vmatmul.bf16.gmra.mxu1 %v9332_v19  ;;  %1398 = vmatmul.bf16.gmra.mxu2 %v9336_v20  ;;  %v12637_v19 = vld [vmem:[%s16847_s2 + $0x70] sm:$0xff] }
 0x177   : > { %1654 = vmatpush.bf16.msra.mxu3 %v12637_v19 }
 0x17b   : > { %1655 = vmatpush.bf16.msra.mxu3 %v12636_v23  ;;  %v9411_v23 = vld [vmem:[%s16849_s4 + $0xd0] sm:$0xf] }
 0x17f   : > { %1656 = vmatpush.bf16.msra.mxu3 %v12635_v27 }
 0x183   : > { %1657 = vmatpush.bf16.msra.mxu3 %v12634_v63 }
 0x186   : > { %1214 = vmatmul.bf16.gmra.mxu1 %v9340_v2  ;;  %1403 = vmatmul.bf16.gmra.mxu2 %v9344_v3  ;;  %v12571_v2 = vld [vmem:[%s16849_s4 + $0xa4] sm:$0xf]  ;;  %v9389_v3 = vld [vmem:[%s16849_s4 + $0xa8] sm:$0xf0] }
 0x187   : > { %1658 = vmatpush.bf16.msra.mxu3 %v12633_v33 }
 0x18b   : > { %1659 = vmatpush.bf16.msra.mxu3 %v12632_v36 }
 0x18f   : > { %1660 = vmatpush.bf16.msra.mxu3 %v12631_v56 }
 0x196   : > { %1219 = vmatmul.bf16.gmra.mxu1 %v9348_v30  ;;  %1408 = vmatmul.bf16.gmra.mxu2 %v9352_v31  ;;  %v9392_v30 = vor.u32 %v12571_v2, %v9389_v3  ;;  %v9413_v2 = vld [vmem:[%s16849_s4 + $0xd8] sm:$0xf0] }
 0x1a6   : > { %1224 = vmatmul.bf16.gmra.mxu1 %v9356_v61  ;;  %1413 = vmatmul.bf16.gmra.mxu2 %v9360_v35 }
 0x1b6   : > { %1229 = vmatmul.bf16.gmra.mxu1 %v9364_v40  ;;  %1418 = vmatmul.bf16.gmra.mxu2 %v9368_v43  ;;  %v9397_v40 = vld [vmem:[%s16849_s4 + $0xb8] sm:$0xf0] }
 0x1b7   : > { %v9400_v44 = vor.u32 %v12573_v59, %v9397_v40  ;;  %v12580_v59 = vld [vmem:[%s16849_s4 + $0xe4] sm:$0xf0]  ;;  %v12579_v40 = vld [vmem:[%s16849_s4 + $0xe4] sm:$0xf] }
 0x1c3   : > { %v1195_v49 = vpop.f32.mrf.mxu1 }
 0x1c6   : > { %1234 = vmatmul.bf16.gmra.mxu1 %v9372_v47  ;;  %1423 = vmatmul.bf16.gmra.mxu2 %v9376_v48 }
 0x1c9   : > { %v1384_v50 = vpop.f32.mrf.mxu2 }
 0x1ca   : > { %v13686_v53 = vadd.f32 %v1384_v50, %v1195_v49 }
 0x1cb   : > { %v1197_v54 = vpop.f32.mrf.mxu1 }
 0x1d1   : > { %v1386_v13 = vpop.f32.mrf.mxu2 }
 0x1d2   : > { %v13700_v14 = vadd.f32 %v1386_v13, %v1197_v54 }
 0x1d3   : > { %v1200_v17 = vpop.f32.mrf.mxu1 }
 0x1d4   : > { %v1580_v18 = vpack.c.bf16 %v13700_v14, %v13686_v53  ;;  %v12588_v53 = vld [vmem:[%s16849_s4 + $0x124] sm:$0xf0]  ;;  %v12587_v14 = vld [vmem:[%s16849_s4 + $0x124] sm:$0xf] }
 0x1d6   : > { %1239 = vmatmul.bf16.gmra.mxu1 %v9380_v8  ;;  %1428 = vmatmul.bf16.gmra.mxu2 %v9384_v9  ;;  %v9404_v9 = vor.u32 %v12576_v12, %v9403_v55 }
 0x1d9   : > { %v1389_v7 = vpop.f32.mrf.mxu2 }
 0x1da   : > { %v13710_v20 = vadd.f32 %v1389_v7, %v1200_v17  ;;  %v9408_v17 = vor.u32 %v12575_v10, %v9405_v11  ;;  %v12626_v10 = vld [vmem:[%s16847_s2 + $0x18] sm:$0xff] }
 0x1db   : > { %v1202_v5 = vpop.f32.mrf.mxu1 }
 0x1e1   : > { %v1391_v26 = vpop.f32.mrf.mxu2 }
 0x1e2   : > { %v13730_v1 = vadd.f32 %v1391_v26, %v1202_v5 }
 0x1e3   : > { %v1205_v31 = vpop.f32.mrf.mxu1 }
 0x1e4   : > { %v1581_v62 = vpack.c.bf16 %v13730_v1, %v13710_v20  ;;  %v12590_v20 = vld [vmem:[%s16849_s4 + $0x134] sm:$0xf0]  ;;  %v12589_v1 = vld [vmem:[%s16849_s4 + $0x134] sm:$0xf] }
 0x1e6   : > { %1244 = vmatmul.bf16.gmra.mxu1 %v9388_v29  ;;  %1433 = vmatmul.bf16.gmra.mxu2 %v9392_v30  ;;  %v9412_v29 = vor.u32 %v12578_v24, %v9411_v23  ;;  %v9416_v30 = vor.u32 %v12577_v25, %v9413_v2  ;;  %v9429_v23 = vld [vmem:[%s16849_s4 + $0xf8] sm:$0xf0] }
 0x1e9   : > { %v1394_v32 = vpop.f32.mrf.mxu2 }
 0x1ea   : > { %v13740_v61 = vadd.f32 %v1394_v32, %v1205_v31  ;;  %v12630_v32 = vld [vmem:[%s16847_s2 + $0x38] sm:$0xff] }
 0x1eb   : > { %v1207_v35 = vpop.f32.mrf.mxu1  ;;  %1730 = vmatpush.bf16.msrb.mxu3 %v12630_v32  ;;  %v9435_v32 = vld [vmem:[%s16849_s4 + $0x100] sm:$0xf] }
 0x1f1   : > { %v1396_v43 = vpop.f32.mrf.mxu2 }
 0x1f2   : > { %v13760_v57 = vadd.f32 %v1396_v43, %v1207_v35  ;;  %v12629_v35 = vld [vmem:[%s16847_s2 + $0x30] sm:$0xff]  ;;  %v9421_v43 = vld [vmem:[%s16849_s4 + $0xe8] sm:$0xf0] }
 0x1f3   : > { %v1210_v47 = vpop.f32.mrf.mxu1  ;;  %1731 = vmatpush.bf16.msrb.mxu3 %v12629_v35  ;;  %v12583_v35 = vld [vmem:[%s16849_s4 + $0x104] sm:$0xf] }
 0x1f4   : > { %v1582_v48 = vpack.c.bf16 %v13760_v57, %v13740_v61  ;;  %v9469_v61 = vld [vmem:[%s16849_s4 + $0x148] sm:$0xf0] }
 0x1f6   : > { %1249 = vmatmul.bf16.gmra.mxu1 %v9396_v22  ;;  %1438 = vmatmul.bf16.gmra.mxu2 %v9400_v44 }
 0x1f7   : > { %1732 = vmatpush.bf16.msrb.mxu3 %v12628_v37 }
 0x1f9   : > { %v1399_v49 = vpop.f32.mrf.mxu2 }
 0x1fa   : > { %v13764_v50 = vadd.f32 %v1399_v49, %v1210_v47  ;;  %v9420_v47 = vor.u32 %v12580_v59, %v9419_v58  ;;  %v9424_v49 = vor.u32 %v12579_v40, %v9421_v43 }
 0x1fb   : > { %v1212_v54 = vpop.f32.mrf.mxu1 }
 0x201   : > { %v1401_v13 = vpop.f32.mrf.mxu2 }
 0x202   : > { %v13778_v8 = vadd.f32 %v1401_v13, %v1212_v54  ;;  %v12627_v54 = vld [vmem:[%s16847_s2 + $0x20] sm:$0xff]  ;;  %v12625_v13 = vld [vmem:[%s16847_s2 + $0x10] sm:$0xff] }
 0x203   : > { %v1215_v6 = vpop.f32.mrf.mxu1  ;;  %1733 = vmatpush.bf16.msrb.mxu3 %v12627_v54  ;;  %v9443_v54 = vld [vmem:[%s16849_s4 + $0x110] sm:$0xf] }
 0x204   : > { %v1583_v7 = vpack.c.bf16 %v13778_v8, %v13764_v50  ;;  %v9477_v50 = vld [vmem:[%s16849_s4 + $0x158] sm:$0xf0] }
 0x206   : > { %1254 = vmatmul.bf16.gmra.mxu1 %v9404_v9  ;;  %1443 = vmatmul.bf16.gmra.mxu2 %v9408_v17  ;;  %v12624_v17 = vld [vmem:[%s16847_s2 + $0x8] sm:$0xff] }
 0x207   : > { %1734 = vmatpush.bf16.msrb.mxu3 %v12626_v10  ;;  %v9445_v10 = vld [vmem:[%s16849_s4 + $0x118] sm:$0xf0] }
 0x209   : > { %v1404_v19 = vpop.f32.mrf.mxu2 }
 0x20a   : > { %v1405_v26 = vadd.f32 %v1404_v19, %v1215_v6  ;;  %v9427_v6 = vld [vmem:[%s16849_s4 + $0xf0] sm:$0xf]  ;;  %v12582_v19 = vld [vmem:[%s16849_s4 + $0xf4] sm:$0xf0] }
 0x20b   : > { %v1217_v5 = vpop.f32.mrf.mxu1  ;;  %1735 = vmatpush.bf16.msrb.mxu3 %v12625_v13 }
 0x20f   : > { %1736 = vmatpush.bf16.msrb.mxu3 %v12624_v17 }
 0x211   : > { %v1406_v3 = vpop.f32.mrf.mxu2 }
 0x212   : > { %v1407_v27 = vadd.f32 %v1406_v3, %v1217_v5  ;;  %v12581_v5 = vld [vmem:[%s16849_s4 + $0xf4] sm:$0xf]  ;;  %v9428_v3 = vor.u32 %v12582_v19, %v9427_v6 }
 0x213   : > { %v1220_v31 = vpop.f32.mrf.mxu1 }
 0x214   : > { %v1601_v63 = vpack.c.bf16 %v1407_v27, %v1405_v26  ;;  %v9432_v26 = vor.u32 %v12581_v5, %v9429_v23  ;;  %v12623_v27 = vld [vmem:[%s16847_s2] sm:$0xff]  ;;  %v12646_v5 = vld [vmem:[%s16847_s2 + $0xb8] sm:$0xff] }
 0x215   : > { %1737 = vmatpush.bf16.msrb.mxu3 %v12623_v27 }
 0x216   : > { %1259 = vmatmul.bf16.gmra.mxu1 %v9412_v29  ;;  %1448 = vmatmul.bf16.gmra.mxu2 %v9416_v30 }
 0x217   : > { %1661 = vmatmul.bf16.vlgmr.msra.gmra.mxu3 %v1601_v63 }
 0x219   : > { %v1409_v33 = vpop.f32.mrf.mxu2  ;;  %1828 = vmatpush.bf16.msra.mxu3 %v12646_v5  ;;  %v12591_v5 = vld [vmem:[%s16849_s4 + $0x144] sm:$0xf] }
 0x21a   : > { %v1410_v22 = vadd.f32 %v1409_v33, %v1220_v31  ;;  %v12584_v33 = vld [vmem:[%s16849_s4 + $0x104] sm:$0xf0] }
 0x21b   : > { %v1222_v36 = vpop.f32.mrf.mxu1  ;;  %v9436_v40 = vor.u32 %v12584_v33, %v9435_v32 }
 0x221   : > { %v1411_v56 = vpop.f32.mrf.mxu2 }
 0x222   : > { %v1412_v44 = vadd.f32 %v1411_v56, %v1222_v36  ;;  %v9437_v36 = vld [vmem:[%s16849_s4 + $0x108] sm:$0xf0] }
 0x223   : > { %v1225_v55 = vpop.f32.mrf.mxu1  ;;  %v9440_v43 = vor.u32 %v12583_v35, %v9437_v36  ;;  %v12642_v35 = vld [vmem:[%s16847_s2 + $0x98] sm:$0xff] }
 0x224   : > { %v1602_v12 = vpack.c.bf16 %v1412_v44, %v1410_v22 }
 0x226   : > { %1264 = vmatmul.bf16.gmra.mxu1 %v9420_v47  ;;  %1453 = vmatmul.bf16.gmra.mxu2 %v9424_v49 }
 0x227   : > { %1666 = vmatmul.bf16.gmra.mxu3 %v1602_v12  ;;  %v12585_v12 = vld [vmem:[%s16849_s4 + $0x114] sm:$0xf] }
 0x228   : > { %v9448_v17 = vor.u32 %v12585_v12, %v9445_v10 }
 0x229   : > { %v1414_v11 = vpop.f32.mrf.mxu2 }
 0x22a   : > { %v1415_v25 = vadd.f32 %v1414_v11, %v1225_v55  ;;  %v12586_v55 = vld [vmem:[%s16849_s4 + $0x114] sm:$0xf0] }
 0x22b   : > { %v1227_v9 = vpop.f32.mrf.mxu1 }
 0x231   : > { %v1416_v24 = vpop.f32.mrf.mxu2 }
 0x232   : > { %v1417_v2 = vadd.f32 %v1416_v24, %v1227_v9  ;;  %v9444_v9 = vor.u32 %v12586_v55, %v9443_v54  ;;  %v12639_v54 = vld [vmem:[%s16847_s2 + $0x80] sm:$0xff] }
 0x233   : > { %v1230_v29 = vpop.f32.mrf.mxu1 }
 0x234   : > { %v1603_v30 = vpack.c.bf16 %v1417_v2, %v1415_v25  ;;  %v12645_v25 = vld [vmem:[%s16847_s2 + $0xb0] sm:$0xff] }
 0x235   : > { %1829 = vmatpush.bf16.msra.mxu3 %v12645_v25  ;;  %v9472_v25 = vor.u32 %v12591_v5, %v9469_v61  ;;  %v12659_v5 = vld [vmem:[%s16847_s2 + $0x120] sm:$0xff] }
 0x236   : > { %1269 = vmatmul.bf16.gmra.mxu1 %v9428_v3  ;;  %1458 = vmatmul.bf16.gmra.mxu2 %v9432_v26  ;;  %v12644_v3 = vld [vmem:[%s16847_s2 + $0xa8] sm:$0xff]  ;;  %v9451_v26 = vld [vmem:[%s16849_s4 + $0x120] sm:$0xf] }
 0x237   : > { %1671 = vmatmul.bf16.gmra.mxu3 %v1603_v30  ;;  %v9452_v30 = vor.u32 %v12588_v53, %v9451_v26 }
 0x239   : > { %v1419_v31 = vpop.f32.mrf.mxu2  ;;  %1830 = vmatpush.bf16.msra.mxu3 %v12644_v3 }
 0x23a   : > { %v1420_v58 = vadd.f32 %v1419_v31, %v1230_v29 }
 0x23b   : > { %v1232_v63 = vpop.f32.mrf.mxu1 }
 0x241   : > { %v1421_v37 = vpop.f32.mrf.mxu2 }
 0x242   : > { %v1422_v59 = vadd.f32 %v1421_v37, %v1232_v63  ;;  %v12643_v63 = vld [vmem:[%s16847_s2 + $0xa0] sm:$0xff] }
 0x243   : > { %v1235_v56 = vpop.f32.mrf.mxu1  ;;  %1831 = vmatpush.bf16.msra.mxu3 %v12643_v63 }
 0x244   : > { %v1604_v22 = vpack.c.bf16 %v1422_v59, %v1420_v58  ;;  %v12641_v58 = vld [vmem:[%s16847_s2 + $0x90] sm:$0xff] }
 0x246   : > { %1274 = vmatmul.bf16.gmra.mxu1 %v9436_v40  ;;  %1463 = vmatmul.bf16.gmra.mxu2 %v9440_v43  ;;  %v12640_v40 = vld [vmem:[%s16847_s2 + $0x88] sm:$0xff]  ;;  %v9459_v43 = vld [vmem:[%s16849_s4 + $0x130] sm:$0xf] }
 0x247   : > { %1676 = vmatmul.bf16.gmra.mxu3 %v1604_v22 }
 0x248   : > { %1832 = vmatpush.bf16.msra.mxu3 %v12642_v35 }
 0x249   : > { %v1424_v44 = vpop.f32.mrf.mxu2 }
 0x24a   : > { %v13854_v47 = vadd.f32 %v1424_v44, %v1235_v56  ;;  %v9460_v44 = vor.u32 %v12590_v20, %v9459_v43  ;;  %v12653_v20 = vld [vmem:[%s16847_s2 + $0xf0] sm:$0xff] }
 0x24b   : > { %v1237_v49 = vpop.f32.mrf.mxu1 }
 0x24c   : > { %1833 = vmatpush.bf16.msra.mxu3 %v12641_v58  ;;  %v12662_v58 = vld [vmem:[%s16847_s2 + $0x138] sm:$0xff] }
 0x24d   : > { %2040 = vmatpush.bf16.msrb.mxu0 %v12662_v58 }
 0x250   : > { %1834 = vmatpush.bf16.msra.mxu3 %v12640_v40 }
 0x251   : > { %v1426_v11 = vpop.f32.mrf.mxu2 }
 0x252   : > { %v13868_v13 = vadd.f32 %v1426_v11, %v1237_v49 }
 0x253   : > { %v1240_v6 = vpop.f32.mrf.mxu1 }
 0x254   : > { %v1776_v19 = vpack.c.bf16 %v13868_v13, %v13854_v47  ;;  %1835 = vmatpush.bf16.msra.mxu3 %v12639_v54  ;;  %v12652_v47 = vld [vmem:[%s16847_s2 + $0xe8] sm:$0xff] }
 0x255   : > { %v12660_v13 = vld [vmem:[%s16847_s2 + $0x128] sm:$0xff] }
 0x256   : > { %1279 = vmatmul.bf16.gmra.mxu1 %v9444_v9  ;;  %1468 = vmatmul.bf16.gmra.mxu2 %v9448_v17  ;;  %v9467_v17 = vld [vmem:[%s16849_s4 + $0x140] sm:$0xf] }
 0x257   : > { %1738 = vmatmul.bf16.vlgmr.msrb.gmra.mxu3 %v1580_v18  ;;  %v9453_v18 = vld [vmem:[%s16849_s4 + $0x128] sm:$0xf0] }
 0x258   : > { %v9456_v31 = vor.u32 %v12587_v14, %v9453_v18  ;;  %v9475_v18 = vld [vmem:[%s16849_s4 + $0x150] sm:$0xf] }
 0x259   : > { %v1429_v23 = vpop.f32.mrf.mxu2 }
 0x25a   : > { %v13878_v24 = vadd.f32 %v1429_v23, %v1240_v6  ;;  %v12592_v6 = vld [vmem:[%s16849_s4 + $0x144] sm:$0xf0] }
 0x25b   : > { %v1242_v2 = vpop.f32.mrf.mxu1  ;;  %v9468_v23 = vor.u32 %v12592_v6, %v9467_v17  ;;  %v12651_v6 = vld [vmem:[%s16847_s2 + $0xe0] sm:$0xff] }
 0x261   : > { %v1431_v27 = vpop.f32.mrf.mxu2 }
 0x262   : > { %v13898_v29 = vadd.f32 %v1431_v27, %v1242_v2  ;;  %v12594_v27 = vld [vmem:[%s16849_s4 + $0x154] sm:$0xf0] }
 0x263   : > { %v1245_v32 = vpop.f32.mrf.mxu1 }
 0x264   : > { %v1777_v33 = vpack.c.bf16 %v13898_v29, %v13878_v24  ;;  %v12648_v24 = vld [vmem:[%s16847_s2 + $0xc8] sm:$0xff] }
 0x265   : > { %v12656_v29 = vld [vmem:[%s16847_s2 + $0x108] sm:$0xff] }
 0x266   : > { %1284 = vmatmul.bf16.gmra.mxu1 %v9452_v30  ;;  %1473 = vmatmul.bf16.gmra.mxu2 %v9456_v31  ;;  %v12593_v30 = vld [vmem:[%s16849_s4 + $0x154] sm:$0xf]  ;;  %v9476_v31 = vor.u32 %v12594_v27, %v9475_v18 }
 0x267   : > { %1743 = vmatmul.bf16.gmra.mxu3 %v1581_v62  ;;  %v9461_v62 = vld [vmem:[%s16849_s4 + $0x138] sm:$0xf0]  ;;  %v9480_v63 = vor.u32 %v12593_v30, %v9477_v50  ;;  %v12649_v18 = vld [vmem:[%s16847_s2 + $0xd0] sm:$0xff]  ;;  %v12598_v50 = vld [vmem:[%s16849_s4 + $0x174] sm:$0xf0] }
 0x268   : > { %v9464_v49 = vor.u32 %v12589_v1, %v9461_v62  ;;  %v12661_v1 = vld [vmem:[%s16847_s2 + $0x130] sm:$0xff] }
 0x269   : > { %v1434_v36 = vpop.f32.mrf.mxu2  ;;  %2041 = vmatpush.bf16.msrb.mxu0 %v12661_v1  ;;  %v12657_v27 = vld [vmem:[%s16847_s2 + $0x110] sm:$0xff]  ;;  %v12655_v1 = vld [vmem:[%s16847_s2 + $0x100] sm:$0xff] }
 0x26a   : > { %v13911_v37 = vadd.f32 %v1434_v36, %v1245_v32  ;;  %v12654_v36 = vld [vmem:[%s16847_s2 + $0xf8] sm:$0xff] }
 0x26b   : > { %v1247_v59 = vpop.f32.mrf.mxu1  ;;  %1934 = vmatpush.bf16.msrb.mxu3 %v12654_v36 }
 0x26d   : > { %2042 = vmatpush.bf16.msrb.mxu0 %v12660_v13 }
 0x26f   : > { %1935 = vmatpush.bf16.msrb.mxu3 %v12653_v20  ;;  %v12647_v20 = vld [vmem:[%s16847_s2 + $0xc0] sm:$0xff] }
 0x271   : > { %v1436_v56 = vpop.f32.mrf.mxu2  ;;  %2043 = vmatpush.bf16.msrb.mxu0 %v12659_v5 }
 0x272   : > { %v13931_v22 = vadd.f32 %v1436_v56, %v1247_v59  ;;  %v12596_v56 = vld [vmem:[%s16849_s4 + $0x164] sm:$0xf0] }
 0x273   : > { %v1250_v55 = vpop.f32.mrf.mxu1  ;;  %1936 = vmatpush.bf16.msrb.mxu3 %v12652_v47 }
 0x274   : > { %v1778_v12 = vpack.c.bf16 %v13931_v22, %v13911_v37  ;;  %v9501_v37 = vld [vmem:[%s16849_s4 + $0x188] sm:$0xf0] }
 0x276   : > { %1289 = vmatmul.bf16.gmra.mxu1 %v9460_v44  ;;  %1478 = vmatmul.bf16.gmra.mxu2 %v9464_v49  ;;  %v12595_v44 = vld [vmem:[%s16849_s4 + $0x164] sm:$0xf]  ;;  %v9485_v49 = vld [vmem:[%s16849_s4 + $0x168] sm:$0xf0] }
 0x277   : > { %1748 = vmatmul.bf16.gmra.mxu3 %v1582_v48  ;;  %v9488_v17 = vor.u32 %v12595_v44, %v9485_v49  ;;  %v9499_v49 = vld [vmem:[%s16849_s4 + $0x180] sm:$0xf] }
 0x278   : > { %1937 = vmatpush.bf16.msrb.mxu3 %v12651_v6 }
 0x279   : > { %v1439_v10 = vpop.f32.mrf.mxu2 }
 0x27a   : > { %v13941_v11 = vadd.f32 %v1439_v10, %v1250_v55 }
 0x27b   : > { %v1252_v9 = vpop.f32.mrf.mxu1 }
 0x281   : > { %v1441_v57 = vpop.f32.mrf.mxu2 }
 0x282   : > { %v13955_v48 = vadd.f32 %v1441_v57, %v1252_v9 }
 0x283   : > { %v1255_v2 = vpop.f32.mrf.mxu1 }
 0x284   : > { %v1779_v3 = vpack.c.bf16 %v13955_v48, %v13941_v11  ;;  %v9509_v11 = vld [vmem:[%s16849_s4 + $0x198] sm:$0xf0] }
 0x286   : > { %1294 = vmatmul.bf16.gmra.mxu1 %v9468_v23  ;;  %1483 = vmatmul.bf16.gmra.mxu2 %v9472_v25  ;;  %v12650_v23 = vld [vmem:[%s16847_s2 + $0xd8] sm:$0xff] }
 0x287   : > { %1753 = vmatmul.bf16.gmra.mxu3 %v1583_v7  ;;  %v12658_v25 = vld [vmem:[%s16847_s2 + $0x118] sm:$0xff] }
 0x288   : > { %1938 = vmatpush.bf16.msrb.mxu3 %v12650_v23  ;;  %2044 = vmatpush.bf16.msrb.mxu0 %v12658_v25 }
 0x289   : > { %v1444_v26 = vpop.f32.mrf.mxu2 }
 0x28a   : > { %v13962_v53 = vadd.f32 %v1444_v26, %v1255_v2 }
 0x28b   : > { %v1257_v14 = vpop.f32.mrf.mxu1 }
 0x28c   : > { %1939 = vmatpush.bf16.msrb.mxu3 %v12649_v18  ;;  %2045 = vmatpush.bf16.msrb.mxu0 %v12657_v27  ;;  %v9507_v27 = vld [vmem:[%s16849_s4 + $0x190] sm:$0xf] }
 0x290   : > { %1940 = vmatpush.bf16.msrb.mxu3 %v12648_v24  ;;  %2046 = vmatpush.bf16.msrb.mxu0 %v12656_v29  ;;  %v12601_v24 = vld [vmem:[%s16849_s4 + $0x194] sm:$0xf] }
 0x291   : > { %v1446_v8 = vpop.f32.mrf.mxu2 }
 0x292   : > { %v13976_v7 = vadd.f32 %v1446_v8, %v1257_v14  ;;  %v12597_v8 = vld [vmem:[%s16849_s4 + $0x174] sm:$0xf] }
 0x293   : > { %v1260_v32 = vpop.f32.mrf.mxu1 }
 0x294   : > { %v1882_v35 = vpack.c.bf16 %v13976_v7, %v13962_v53  ;;  %1941 = vmatpush.bf16.msrb.mxu3 %v12647_v20  ;;  %2047 = vmatpush.bf16.msrb.mxu0 %v12655_v1  ;;  %v12669_v1 = vld [vmem:[%s16847_s2 + $0x170] sm:$0xff]  ;;  %v9515_v53 = vld [vmem:[%s16849_s4 + $0x1a0] sm:$0xf]  ;;  %v12604_v7 = vld [vmem:[%s16849_s4 + $0x1a4] sm:$0xf0] }
 0x296   : > { %1299 = vmatmul.bf16.gmra.mxu1 %v9476_v31  ;;  %1488 = vmatmul.bf16.gmra.mxu2 %v9480_v63  ;;  %v9493_v31 = vld [vmem:[%s16849_s4 + $0x178] sm:$0xf0] }
 0x297   : > { %1836 = vmatmul.bf16.vlgmr.msra.gmra.mxu3 %v1776_v19  ;;  %v9483_v19 = vld [vmem:[%s16849_s4 + $0x160] sm:$0xf] }
 0x298   : > { %v9484_v9 = vor.u32 %v12596_v56, %v9483_v19 }
 0x299   : > { %v1449_v59 = vpop.f32.mrf.mxu2 }
 0x29a   : > { %v13989_v40 = vadd.f32 %v1449_v59, %v1260_v32  ;;  %v13991_v43 = vpop.f32.mrf.mxu3  ;;  %v9496_v59 = vor.u32 %v12597_v8, %v9493_v31  ;;  %v9512_v8 = vor.u32 %v12601_v24, %v9509_v11 }
 0x29b   : > { %v1262_v62 = vpop.f32.mrf.mxu1 }
 0x2a1   : > { %v1451_v54 = vpop.f32.mrf.mxu2 }
 0x2a2   : > { %v14017_v55 = vadd.f32 %v1451_v54, %v1262_v62  ;;  %v14019_v10 = vpop.f32.mrf.mxu3  ;;  %v12600_v54 = vld [vmem:[%s16849_s4 + $0x184] sm:$0xf0] }
 0x2a3   : > { %v1265_v61 = vpop.f32.mrf.mxu1  ;;  %v9500_v6 = vor.u32 %v12600_v54, %v9499_v49 }
 0x2a4   : > { %v1883_v57 = vpack.c.bf16 %v14017_v55, %v13989_v40  ;;  %v9523_v40 = vld [vmem:[%s16849_s4 + $0x1b0] sm:$0xf]  ;;  %v12606_v55 = vld [vmem:[%s16849_s4 + $0x1b4] sm:$0xf0] }
 0x2a6   : > { %1304 = vmatmul.bf16.gmra.mxu1 %v9484_v9  ;;  %1493 = vmatmul.bf16.gmra.mxu2 %v9488_v17  ;;  %v12599_v9 = vld [vmem:[%s16849_s4 + $0x184] sm:$0xf] }
 0x2a7   : > { %1841 = vmatmul.bf16.gmra.mxu3 %v1777_v33  ;;  %v9491_v33 = vld [vmem:[%s16849_s4 + $0x170] sm:$0xf]  ;;  %v9504_v5 = vor.u32 %v12599_v9, %v9501_v37 }
 0x2a8   : > { %v9492_v58 = vor.u32 %v12598_v50, %v9491_v33 }
 0x2a9   : > { %v1454_v2 = vpop.f32.mrf.mxu2 }
 0x2aa   : > { %v14038_v26 = vadd.f32 %v1454_v2, %v1265_v61  ;;  %v14040_v14 = vpop.f32.mrf.mxu3 }
 0x2ab   : > { %v1267_v30 = vpop.f32.mrf.mxu1 }
 0x2b1   : > { %v1456_v63 = vpop.f32.mrf.mxu2 }
 0x2b2   : > { %v14066_v32 = vadd.f32 %v1456_v63, %v1267_v30  ;;  %v14068_v36 = vpop.f32.mrf.mxu3  ;;  %v12602_v30 = vld [vmem:[%s16849_s4 + $0x194] sm:$0xf0] }
 0x2b3   : > { %v1270_v62 = vpop.f32.mrf.mxu1  ;;  %v9508_v50 = vor.u32 %v12602_v30, %v9507_v27  ;;  %v12666_v27 = vld [vmem:[%s16847_s2 + $0x158] sm:$0xff] }
 0x2b4   : > { %v1884_v47 = vpack.c.bf16 %v14066_v32, %v14038_v26  ;;  %v12607_v26 = vld [vmem:[%s16849_s4 + $0x1c4] sm:$0xf]  ;;  %v9533_v32 = vld [vmem:[%s16849_s4 + $0x1c8] sm:$0xf0] }
 0x2b6   : > { %1309 = vmatmul.bf16.gmra.mxu1 %v9492_v58  ;;  %1498 = vmatmul.bf16.gmra.mxu2 %v9496_v59  ;;  %v12670_v58 = vld [vmem:[%s16847_s2 + $0x178] sm:$0xff] }
 0x2b7   : > { %1846 = vmatmul.bf16.gmra.mxu3 %v1778_v12 }
 0x2b8   : > { %2146 = vmatpush.bf16.msra.mxu3 %v12670_v58 }
 0x2b9   : > { %v1459_v13 = vpop.f32.mrf.mxu2 }
 0x2ba   : > { %v14081_v19 = vadd.f32 %v1459_v13, %v1270_v62  ;;  %v14083_v56 = vpop.f32.mrf.mxu3 }
 0x2bb   : > { %v1272_v44 = vpop.f32.mrf.mxu1 }
 0x2bc   : > { %2147 = vmatpush.bf16.msra.mxu3 %v12669_v1 }
 0x2c1   : > { %v1461_v22 = vpop.f32.mrf.mxu2 }
 0x2c2   : > { %v14097_v12 = vadd.f32 %v1461_v22, %v1272_v44  ;;  %v14099_v17 = vpop.f32.mrf.mxu3  ;;  %v12668_v44 = vld [vmem:[%s16847_s2 + $0x168] sm:$0xff]  ;;  %v9516_v22 = vor.u32 %v12604_v7, %v9515_v53 }
 0x2c3   : > { %v1275_v61 = vpop.f32.mrf.mxu1  ;;  %2148 = vmatpush.bf16.msra.mxu3 %v12668_v44 }
 0x2c4   : > { %v1885_v23 = vpack.c.bf16 %v14097_v12, %v14081_v19  ;;  %v12609_v19 = vld [vmem:[%s16849_s4 + $0x1d4] sm:$0xf]  ;;  %v9541_v12 = vld [vmem:[%s16849_s4 + $0x1d8] sm:$0xf0] }
 0x2c6   : > { %1314 = vmatmul.bf16.gmra.mxu1 %v9500_v6  ;;  %1503 = vmatmul.bf16.gmra.mxu2 %v9504_v5  ;;  %v12667_v5 = vld [vmem:[%s16847_s2 + $0x160] sm:$0xff] }
 0x2c7   : > { %1851 = vmatmul.bf16.gmra.mxu3 %v1779_v3 }
 0x2c8   : > { %2149 = vmatpush.bf16.msra.mxu3 %v12667_v5 }
 0x2c9   : > { %v1464_v25 = vpop.f32.mrf.mxu2 }
 0x2ca   : > { %v14106_v2 = vpop.f32.mrf.mxu3  ;;  %v1465_v3 = vadd.f32 %v1464_v25, %v1275_v61 }
 0x2cb   : > { %v1277_v18 = vpop.f32.mrf.mxu1 }
 0x2cc   : > { %2150 = vmatpush.bf16.msra.mxu3 %v12666_v27 }
 0x2d1   : > { %v1466_v48 = vpop.f32.mrf.mxu2 }
 0x2d2   : > { %v1467_v29 = vadd.f32 %v1466_v48, %v1277_v18  ;;  %v14120_v33 = vpop.f32.mrf.mxu3 }
 0x2d3   : > { %v1280_v31 = vpop.f32.mrf.mxu1 }
 0x2d4   : > { %v1988_v63 = vpack.c.bf16 %v1467_v29, %v1465_v3  ;;  %v12664_v3 = vld [vmem:[%s16847_s2 + $0x148] sm:$0xff] }
 0x2d6   : > { %1319 = vmatmul.bf16.gmra.mxu1 %v9508_v50  ;;  %1508 = vmatmul.bf16.gmra.mxu2 %v9512_v8 }
 0x2d7   : > { %1942 = vmatmul.bf16.vlgmr.msrb.gmra.mxu3 %v1882_v35  ;;  %2048 = vmatmul.bf16.vlgmr.msrb.gmra.mxu0 %v1988_v63  ;;  %v12603_v35 = vld [vmem:[%s16849_s4 + $0x1a4] sm:$0xf]  ;;  %v9524_v63 = vor.u32 %v12606_v55, %v9523_v40  ;;  %v9544_v40 = vor.u32 %v12609_v19, %v9541_v12 }
 0x2d9   : > { %v1469_v59 = vpop.f32.mrf.mxu2 }
 0x2da   : > { %v1739_v20 = vpop.f32.mrf.mxu3  ;;  %v1470_v54 = vadd.f32 %v1469_v59, %v1280_v31  ;;  %v12663_v59 = vld [vmem:[%s16847_s2 + $0x140] sm:$0xff] }
 0x2db   : > { %v14132_v62 = vadd.f32 %v1739_v20, %v13991_v43  ;;  %v1282_v13 = vpop.f32.mrf.mxu1  ;;  %v9517_v43 = vld [vmem:[%s16849_s4 + $0x1a8] sm:$0xf0] }
 0x2dc   : > { %v9520_v6 = vor.u32 %v12603_v35, %v9517_v43  ;;  %v12608_v43 = vld [vmem:[%s16849_s4 + $0x1c4] sm:$0xf0] }
 0x2e1   : > { %v1471_v49 = vpop.f32.mrf.mxu2 }
 0x2e2   : > { %v1472_v9 = vadd.f32 %v1471_v49, %v1282_v13  ;;  %v1741_v37 = vpop.f32.mrf.mxu3 }
 0x2e3   : > { %v14153_v61 = vadd.f32 %v1741_v37, %v14019_v10  ;;  %v1285_v25 = vpop.f32.mrf.mxu1  ;;  %v12665_v10 = vld [vmem:[%s16847_s2 + $0x150] sm:$0xff]  ;;  %v9536_v37 = vor.u32 %v12607_v26, %v9533_v32  ;;  %v12675_v32 = vld [vmem:[%s16847_s2 + $0x1a0] sm:$0xff] }
 0x2e4   : > { %v1989_v18 = vpack.c.bf16 %v1472_v9, %v1470_v54  ;;  %2151 = vmatpush.bf16.msra.mxu3 %v12665_v10 }
 0x2e6   : > { %1324 = vmatmul.bf16.gmra.mxu1 %v9516_v22  ;;  %1513 = vmatmul.bf16.gmra.mxu2 %v9520_v6 }
 0x2e7   : > { %1947 = vmatmul.bf16.gmra.mxu3 %v1883_v57  ;;  %2053 = vmatmul.bf16.gmra.mxu0 %v1989_v18  ;;  %v12605_v57 = vld [vmem:[%s16849_s4 + $0x1b4] sm:$0xf] }
 0x2e8   : > { %2152 = vmatpush.bf16.msra.mxu3 %v12664_v3 }
 0x2e9   : > { %v1474_v30 = vpop.f32.mrf.mxu2 }
 0x2ea   : > { %v1744_v24 = vpop.f32.mrf.mxu3  ;;  %v1475_v50 = vadd.f32 %v1474_v30, %v1285_v25 }
 0x2eb   : > { %v14165_v11 = vadd.f32 %v1744_v24, %v14040_v14  ;;  %v1287_v48 = vpop.f32.mrf.mxu1  ;;  %v9525_v14 = vld [vmem:[%s16849_s4 + $0x1b8] sm:$0xf0]  ;;  %v12610_v24 = vld [vmem:[%s16849_s4 + $0x1d4] sm:$0xf0] }
 0x2ec   : > { %v9528_v58 = vor.u32 %v12605_v57, %v9525_v14  ;;  %2153 = vmatpush.bf16.msra.mxu3 %v12663_v59  ;;  %v9547_v59 = vld [vmem:[%s16849_s4 + $0x1e0] sm:$0xf] }
 0x2f1   : > { %v1476_v29 = vpop.f32.mrf.mxu2 }
 0x2f2   : > { %v1477_v8 = vadd.f32 %v1476_v29, %v1287_v48  ;;  %v1746_v31 = vpop.f32.mrf.mxu3  ;;  %v12678_v29 = vld [vmem:[%s16847_s2 + $0x1b8] sm:$0xff] }
 0x2f3   : > { %v14186_v20 = vadd.f32 %v1746_v31, %v14068_v36  ;;  %v1290_v1 = vpop.f32.mrf.mxu1  ;;  %v9531_v36 = vld [vmem:[%s16849_s4 + $0x1c0] sm:$0xf]  ;;  %2252 = vmatpush.bf16.msra.mxu0 %v12678_v29  ;;  %v12677_v31 = vld [vmem:[%s16847_s2 + $0x1b0] sm:$0xff] }
 0x2f4   : > { %v1990_v13 = vpack.c.bf16 %v1477_v8, %v1475_v50  ;;  %v9532_v9 = vor.u32 %v12608_v43, %v9531_v36 }
 0x2f6   : > { %1329 = vmatmul.bf16.gmra.mxu1 %v9524_v63  ;;  %1518 = vmatmul.bf16.gmra.mxu2 %v9528_v58  ;;  %v12676_v58 = vld [vmem:[%s16847_s2 + $0x1a8] sm:$0xff] }
 0x2f7   : > { %1952 = vmatmul.bf16.gmra.mxu3 %v1884_v47  ;;  %2058 = vmatmul.bf16.gmra.mxu0 %v1990_v13  ;;  %v12611_v13 = vld [vmem:[%s16849_s4 + $0x1e4] sm:$0xf] }
 0x2f8   : > { %2253 = vmatpush.bf16.msra.mxu0 %v12677_v31  ;;  %v12616_v31 = vld [vmem:[%s16849_s4 + $0x204] sm:$0xf0] }
 0x2f9   : > { %v1479_v44 = vpop.f32.mrf.mxu2 }
 0x2fa   : > { %v1749_v53 = vpop.f32.mrf.mxu3 }
 0x2fb   : > { %v14192_v7 = vadd.f32 %v1749_v53, %v14083_v56  ;;  %v1292_v35 = vpop.f32.mrf.mxu1  ;;  %v1480_v56 = vadd.f32 %v1479_v44, %v1290_v1  ;;  %v12612_v1 = vld [vmem:[%s16849_s4 + $0x1e4] sm:$0xf0] }
 0x2fc   : > { %2254 = vmatpush.bf16.msra.mxu0 %v12676_v58  ;;  %v9548_v43 = vor.u32 %v12612_v1, %v9547_v59  ;;  %v9565_v58 = vld [vmem:[%s16849_s4 + $0x208] sm:$0xf0] }
 0x300   : > { %2255 = vmatpush.bf16.msra.mxu0 %v12675_v32 }
 0x301   : > { %v1481_v47 = vpop.f32.mrf.mxu2 }
 0x302   : > { %v1482_v49 = vadd.f32 %v1481_v47, %v1292_v35  ;;  %v1751_v54 = vpop.f32.mrf.mxu3 }
 0x303   : > { %v14207_v22 = vadd.f32 %v1751_v54, %v14099_v17  ;;  %v1295_v6 = vpop.f32.mrf.mxu1  ;;  %v9539_v17 = vld [vmem:[%s16849_s4 + $0x1d0] sm:$0xf] }
 0x304   : > { %v1991_v5 = vpack.c.bf16 %v1482_v49, %v1480_v56  ;;  %v9540_v3 = vor.u32 %v12610_v24, %v9539_v17  ;;  %v12674_v49 = vld [vmem:[%s16847_s2 + $0x198] sm:$0xff]  ;;  %v12613_v17 = vld [vmem:[%s16849_s4 + $0x1f4] sm:$0xf] }
 0x305   : > { %2256 = vmatpush.bf16.msra.mxu0 %v12674_v49  ;;  %v12618_v49 = vld [vmem:[%s16849_s4 + $0x214] sm:$0xf0] }
 0x306   : > { %1334 = vmatmul.bf16.gmra.mxu1 %v9532_v9  ;;  %1523 = vmatmul.bf16.gmra.mxu2 %v9536_v37  ;;  %v12673_v37 = vld [vmem:[%s16847_s2 + $0x190] sm:$0xff] }
 0x307   : > { %1957 = vmatmul.bf16.gmra.mxu3 %v1885_v23  ;;  %2063 = vmatmul.bf16.gmra.mxu0 %v1991_v5 }
 0x309   : > { %v1484_v25 = vpop.f32.mrf.mxu2  ;;  %2257 = vmatpush.bf16.msra.mxu0 %v12673_v37 }
 0x30a   : > { %v1754_v18 = vpop.f32.mrf.mxu3 }
 0x30b   : > { %v14213_v27 = vadd.f32 %v1754_v18, %v14106_v2  ;;  %v1297_v30 = vpop.f32.mrf.mxu1  ;;  %v1485_v2 = vadd.f32 %v1484_v25, %v1295_v6  ;;  %v12672_v25 = vld [vmem:[%s16847_s2 + $0x188] sm:$0xff]  ;;  %v9555_v18 = vld [vmem:[%s16849_s4 + $0x1f0] sm:$0xf] }
 0x30d   : > { %2258 = vmatpush.bf16.msra.mxu0 %v12672_v25 }
 0x311   : > { %v1486_v23 = vpop.f32.mrf.mxu2 }
 0x312   : > { %v1487_v10 = vadd.f32 %v1486_v23, %v1297_v30  ;;  %v1756_v48 = vpop.f32.mrf.mxu3  ;;  %v12614_v30 = vld [vmem:[%s16849_s4 + $0x1f4] sm:$0xf0] }
 0x313   : > { %v14228_v55 = vadd.f32 %v1756_v48, %v14120_v33  ;;  %v1300_v57 = vpop.f32.mrf.mxu1  ;;  %v12671_v48 = vld [vmem:[%s16847_s2 + $0x180] sm:$0xff] }
 0x314   : > { %v2094_v14 = vpack.c.bf16 %v1487_v10, %v1485_v2  ;;  %v9556_v2 = vor.u32 %v12614_v30, %v9555_v18  ;;  %2259 = vmatpush.bf16.msra.mxu0 %v12671_v48 }
 0x316   : > { %1339 = vmatmul.bf16.gmra.mxu1 %v9540_v3  ;;  %1528 = vmatmul.bf16.gmra.mxu2 %v9544_v40 }
 0x317   : > { %2154 = vmatmul.bf16.vlgmr.msra.gmra.mxu3 %v2094_v14 }
 0x319   : > { %v1489_v50 = vpop.f32.mrf.mxu2 }
 0x31a   : > { %v1837_v8 = vpop.f32.mrf.mxu3  ;;  %v1490_v53 = vadd.f32 %v1489_v50, %v1300_v57 }
 0x31b   : > { %v14237_v63 = vadd.f32 %v1837_v8, %v14132_v62  ;;  %v1302_v33 = vpop.f32.mrf.mxu1  ;;  %v9549_v62 = vld [vmem:[%s16849_s4 + $0x1e8] sm:$0xf0]  ;;  %v9563_v8 = vld [vmem:[%s16849_s4 + $0x200] sm:$0xf] }
 0x31c   : > { %v9552_v26 = vor.u32 %v12611_v13, %v9549_v62  ;;  %v9564_v62 = vor.u32 %v12616_v31, %v9563_v8  ;;  %v12620_v8 = vld [vmem:[%s16849_s4 + $0x224] sm:$0xf0]  ;;  %v9581_v31 = vld [vmem:[%s16849_s4 + $0x228] sm:$0xf0] }
 0x321   : > { %v1491_v44 = vpop.f32.mrf.mxu2 }
 0x322   : > { %v1492_v35 = vadd.f32 %v1491_v44, %v1302_v33  ;;  %v14254_v36 = vpop.f32.mrf.mxu3  ;;  %v12615_v33 = vld [vmem:[%s16849_s4 + $0x204] sm:$0xf] }
 0x323   : > { %v1305_v47 = vpop.f32.mrf.mxu1  ;;  %v9568_v44 = vor.u32 %v12615_v33, %v9565_v58 }
 0x324   : > { %v2095_v56 = vpack.c.bf16 %v1492_v35, %v1490_v53 }
 0x326   : > { %1344 = vmatmul.bf16.gmra.mxu1 %v9548_v43  ;;  %1533 = vmatmul.bf16.gmra.mxu2 %v9552_v26 }
 0x327   : > { %2159 = vmatmul.bf16.gmra.mxu3 %v2095_v56  ;;  %v9571_v56 = vld [vmem:[%s16849_s4 + $0x210] sm:$0xf] }
 0x328   : > { %v9572_v18 = vor.u32 %v12618_v49, %v9571_v56  ;;  %v12681_v49 = vld [vmem:[%s16847_s2 + $0x1d0] sm:$0xff] }
 0x329   : > { %v1494_v54 = vpop.f32.mrf.mxu2 }
 0x32a   : > { %v1842_v9 = vpop.f32.mrf.mxu3  ;;  %v1495_v19 = vadd.f32 %v1494_v54, %v1305_v47  ;;  %v12617_v54 = vld [vmem:[%s16849_s4 + $0x214] sm:$0xf] }
 0x32b   : > { %v14266_v6 = vadd.f32 %v1842_v9, %v14165_v11  ;;  %v1307_v5 = vpop.f32.mrf.mxu1  ;;  %v9557_v11 = vld [vmem:[%s16849_s4 + $0x1f8] sm:$0xf0] }
 0x32c   : > { %v9560_v10 = vor.u32 %v12613_v17, %v9557_v11  ;;  %v9573_v9 = vld [vmem:[%s16849_s4 + $0x218] sm:$0xf0] }
 0x32d   : > { %v9576_v30 = vor.u32 %v12617_v54, %v9573_v9 }
 0x331   : > { %v1496_v24 = vpop.f32.mrf.mxu2 }
 0x332   : > { %v1497_v12 = vadd.f32 %v1496_v24, %v1307_v5  ;;  %v14283_v23 = vpop.f32.mrf.mxu3 }
 0x333   : > { %v1310_v3 = vpop.f32.mrf.mxu1 }
 0x334   : > { %v2096_v40 = vpack.c.bf16 %v1497_v12, %v1495_v19  ;;  %v12686_v19 = vld [vmem:[%s16847_s2 + $0x1f8] sm:$0xff] }
 0x335   : > { %2358 = vmatpush.bf16.msrb.mxu3 %v12686_v19 }
 0x336   : > { %1349 = vmatmul.bf16.gmra.mxu1 %v9556_v2  ;;  %1538 = vmatmul.bf16.gmra.mxu2 %v9560_v10  ;;  %v12685_v10 = vld [vmem:[%s16847_s2 + $0x1f0] sm:$0xff] }
 0x337   : > { %2164 = vmatmul.bf16.gmra.mxu3 %v2096_v40 }
 0x339   : > { %v1499_v57 = vpop.f32.mrf.mxu2  ;;  %2359 = vmatpush.bf16.msrb.mxu3 %v12685_v10 }
 0x33a   : > { %v1847_v14 = vpop.f32.mrf.mxu3 }
 0x33b   : > { %v14289_v29 = vadd.f32 %v1847_v14, %v14192_v7  ;;  %v1312_v50 = vpop.f32.mrf.mxu1  ;;  %v1500_v7 = vadd.f32 %v1499_v57, %v1310_v3  ;;  %v12684_v57 = vld [vmem:[%s16847_s2 + $0x1e8] sm:$0xff] }
 0x33d   : > { %2360 = vmatpush.bf16.msrb.mxu3 %v12684_v57 }
 0x341   : > { %v1501_v59 = vpop.f32.mrf.mxu2 }
 0x342   : > { %v1502_v1 = vadd.f32 %v1501_v59, %v1312_v50  ;;  %v14303_v13 = vpop.f32.mrf.mxu3  ;;  %v9579_v50 = vld [vmem:[%s16849_s4 + $0x220] sm:$0xf] }
 0x343   : > { %v1315_v53 = vpop.f32.mrf.mxu1 }
 0x344   : > { %v2097_v35 = vpack.c.bf16 %v1502_v1, %v1500_v7  ;;  %v9580_v1 = vor.u32 %v12620_v8, %v9579_v50 }
 0x346   : > { %1354 = vmatmul.bf16.gmra.mxu1 %v9564_v62  ;;  %1543 = vmatmul.bf16.gmra.mxu2 %v9568_v44  ;;  %v12683_v44 = vld [vmem:[%s16847_s2 + $0x1e0] sm:$0xff] }
 0x347   : > { %2169 = vmatmul.bf16.gmra.mxu3 %v2097_v35 }
 0x348   : > { %2361 = vmatpush.bf16.msrb.mxu3 %v12683_v44 }
 0x349   : > { %v1504_v43 = vpop.f32.mrf.mxu2 }
 0x34a   : > { %v1852_v26 = vpop.f32.mrf.mxu3 }
 0x34b   : > { %v14306_v32 = vadd.f32 %v1852_v26, %v14213_v27  ;;  %v1317_v47 = vpop.f32.mrf.mxu1  ;;  %v1505_v27 = vadd.f32 %v1504_v43, %v1315_v53  ;;  %v12682_v26 = vld [vmem:[%s16847_s2 + $0x1d8] sm:$0xff] }
 0x34c   : > { %2362 = vmatpush.bf16.msrb.mxu3 %v12682_v26 }
 0x350   : > { %2363 = vmatpush.bf16.msrb.mxu3 %v12681_v49 }
 0x351   : > { %v1506_v37 = vpop.f32.mrf.mxu2 }
 0x352   : > { %v1507_v5 = vadd.f32 %v1506_v37, %v1317_v47  ;;  %v14320_v25 = vpop.f32.mrf.mxu3  ;;  %v12680_v37 = vld [vmem:[%s16847_s2 + $0x1c8] sm:$0xff] }
 0x353   : > { %v1320_v17 = vpop.f32.mrf.mxu1 }
 0x354   : > { %v2200_v11 = vpack.c.bf16 %v1507_v5, %v1505_v27  ;;  %v2049_v24 = vpop.f32.mrf.mxu0  ;;  %2364 = vmatpush.bf16.msrb.mxu3 %v12680_v37 }
 0x356   : > { %1359 = vmatmul.bf16.gmra.mxu1 %v9572_v18  ;;  %1548 = vmatmul.bf16.gmra.mxu2 %v9576_v30  ;;  %v9587_v18 = vld [vmem:[%s16849_s4 + $0x230] sm:$0xf]  ;;  %v12622_v30 = vld [vmem:[%s16849_s4 + $0x234] sm:$0xf0] }
 0x357   : > { %2260 = vmatmul.bf16.vlgmr.msra.gmra.mxu0 %v2200_v11 }
 0x359   : > { %v1509_v12 = vpop.f32.mrf.mxu2 }
 0x35a   : > { %v1943_v2 = vpop.f32.mrf.mxu3  ;;  %v1510_v58 = vadd.f32 %v1509_v12, %v1320_v17  ;;  %v9589_v17 = vld [vmem:[%s16849_s4 + $0x238] sm:$0xf0] }
 0x35b   : > { %v1963_v48 = vadd.f32 %v1943_v2, %v14237_v63  ;;  %v1322_v3 = vpop.f32.mrf.mxu1  ;;  %v12619_v63 = vld [vmem:[%s16849_s4 + $0x224] sm:$0xf]  ;;  %v9588_v2 = vor.u32 %v12622_v30, %v9587_v18 }
 0x35c   : > { %v14329_v40 = vpop.f32.mrf.mxu0  ;;  %v9584_v62 = vor.u32 %v12619_v63, %v9581_v31 }
 0x35d   : > { %v14334_v14 = vadd.f32 %v2049_v24, %v1963_v48  ;;  %v12679_v48 = vld [vmem:[%s16847_s2 + $0x1c0] sm:$0xff] }
 0x35e   : > { %2365 = vmatpush.bf16.msrb.mxu3 %v12679_v48  ;;  %v12692_v48 = vld [vmem:[%s16847_s2 + $0x228] sm:$0xff] }
 0x361   : > { %v1511_v33 = vpop.f32.mrf.mxu2 }
 0x362   : > { %v1512_v59 = vadd.f32 %v1511_v33, %v1322_v3  ;;  %v14348_v7 = vpop.f32.mrf.mxu3 }
 0x363   : > { %v1325_v53 = vpop.f32.mrf.mxu1 }
 0x364   : > { %v2201_v35 = vpack.c.bf16 %v1512_v59, %v1510_v58  ;;  %v2054_v43 = vpop.f32.mrf.mxu0 }
 0x366   : > { %1364 = vmatmul.bf16.gmra.mxu1 %v9580_v1  ;;  %1553 = vmatmul.bf16.gmra.mxu2 %v9584_v62 }
 0x367   : > { %2265 = vmatmul.bf16.gmra.mxu0 %v2201_v35 }
 0x369   : > { %v1514_v47 = vpop.f32.mrf.mxu2 }
 0x36a   : > { %v1948_v56 = vpop.f32.mrf.mxu3  ;;  %v1515_v24 = vadd.f32 %v1514_v47, %v1325_v53 }
 0x36b   : > { %v1965_v54 = vadd.f32 %v1948_v56, %v14266_v6  ;;  %v1327_v9 = vpop.f32.mrf.mxu1  ;;  %v12621_v6 = vld [vmem:[%s16849_s4 + $0x234] sm:$0xf] }
 0x36c   : > { %v14365_v5 = vpop.f32.mrf.mxu0  ;;  %v9592_v10 = vor.u32 %v12621_v6, %v9589_v17 }
 0x36d   : > { %v14363_v27 = vadd.f32 %v2054_v43, %v1965_v54 }
 0x371   : > { %v1516_v11 = vpop.f32.mrf.mxu2 }
 0x372   : > { %v1517_v19 = vadd.f32 %v1516_v11, %v1327_v9  ;;  %v14379_v12 = vpop.f32.mrf.mxu3  ;;  %v12694_v11 = vld [vmem:[%s16847_s2 + $0x238] sm:$0xff] }
 0x373   : > { %v1330_v3 = vpop.f32.mrf.mxu1  ;;  %2464 = vmatpush.bf16.msrb.mxu0 %v12694_v11 }
 0x374   : > { %v2202_v57 = vpack.c.bf16 %v1517_v19, %v1515_v24  ;;  %v2059_v50 = vpop.f32.mrf.mxu0 }
 0x376   : > { %1369 = vmatmul.bf16.gmra.mxu1 %v9588_v2  ;;  %1558 = vmatmul.bf16.gmra.mxu2 %v9592_v10 }
 0x377   : > { %2270 = vmatmul.bf16.gmra.mxu0 %v2202_v57 }
 0x379   : > { %v1519_v8 = vpop.f32.mrf.mxu2 }
 0x37a   : > { %v1953_v63 = vpop.f32.mrf.mxu3  ;;  %v1520_v1 = vadd.f32 %v1519_v8, %v1330_v3 }
 0x37b   : > { %v1967_v31 = vadd.f32 %v1953_v63, %v14289_v29  ;;  %v1332_v33 = vpop.f32.mrf.mxu1  ;;  %v12691_v63 = vld [vmem:[%s16847_s2 + $0x220] sm:$0xff] }
 0x37c   : > { %v14385_v62 = vpop.f32.mrf.mxu0 }
 0x37d   : > { %v2073_v58 = vadd.f32 %v2059_v50, %v1967_v31 }
 0x381   : > { %v1521_v59 = vpop.f32.mrf.mxu2 }
 0x382   : > { %v1522_v44 = vadd.f32 %v1521_v59, %v1332_v33  ;;  %v14387_v53 = vpop.f32.mrf.mxu3 }
 0x383   : > { %v1335_v35 = vpop.f32.mrf.mxu1 }
 0x384   : > { %v2203_v43 = vpack.c.bf16 %v1522_v44, %v1520_v1  ;;  %v2064_v54 = vpop.f32.mrf.mxu0  ;;  %v12689_v44 = vld [vmem:[%s16847_s2 + $0x210] sm:$0xff] }
 0x387   : > { %2275 = vmatmul.bf16.gmra.mxu0 %v2203_v43 }
 0x389   : > { %v1524_v26 = vpop.f32.mrf.mxu2 }
 0x38a   : > { %v1958_v47 = vpop.f32.mrf.mxu3  ;;  %v1525_v37 = vadd.f32 %v1524_v26, %v1335_v35  ;;  %v12688_v26 = vld [vmem:[%s16847_s2 + $0x208] sm:$0xff] }
 0x38b   : > { %v1969_v56 = vadd.f32 %v1958_v47, %v14306_v32  ;;  %v1337_v49 = vpop.f32.mrf.mxu1  ;;  %v12693_v32 = vld [vmem:[%s16847_s2 + $0x230] sm:$0xff] }
 0x38c   : > { %2465 = vmatpush.bf16.msrb.mxu0 %v12693_v32 }
 0x38d   : > { %v2075_v9 = vadd.f32 %v2064_v54, %v1969_v56 }
 0x390   : > { %2466 = vmatpush.bf16.msrb.mxu0 %v12692_v48 }
 0x391   : > { %v1526_v29 = vpop.f32.mrf.mxu2 }
 0x392   : > { %v1527_v18 = vadd.f32 %v1526_v29, %v1337_v49  ;;  %v14390_v30 = vpop.f32.mrf.mxu3  ;;  %v12687_v29 = vld [vmem:[%s16847_s2 + $0x200] sm:$0xff] }
 0x393   : > { %v1340_v6 = vpop.f32.mrf.mxu1 }
 0x394   : > { %v2306_v17 = vpack.c.bf16 %v1527_v18, %v1525_v37  ;;  %2467 = vmatpush.bf16.msrb.mxu0 %v12691_v63 }
 0x396   : > { %2366 = vmatmul.bf16.vlgmr.msrb.gmra.mxu3 %v2306_v17 }
 0x399   : > { %v1529_v24 = vpop.f32.mrf.mxu2 }
 0x39a   : > { %v2155_v19 = vpop.f32.mrf.mxu3  ;;  %v1530_v57 = vadd.f32 %v1529_v24, %v1340_v6 }
 0x39b   : > { %v2175_v2 = vadd.f32 %v2155_v19, %v14334_v14  ;;  %v1342_v10 = vpop.f32.mrf.mxu1  ;;  %v12690_v14 = vld [vmem:[%s16847_s2 + $0x218] sm:$0xff] }
 0x39c   : > { %2468 = vmatpush.bf16.msrb.mxu0 %v12690_v14 }
 0x3a0   : > { %2469 = vmatpush.bf16.msrb.mxu0 %v12689_v44 }
 0x3a1   : > { %v1531_v3 = vpop.f32.mrf.mxu2 }
 0x3a2   : > { %v1532_v50 = vadd.f32 %v1531_v3, %v1342_v10  ;;  %v14402_v8 = vpop.f32.mrf.mxu3 }
 0x3a3   : > { %v1345_v31 = vpop.f32.mrf.mxu1 }
 0x3a4   : > { %v2307_v33 = vpack.c.bf16 %v1532_v50, %v1530_v57  ;;  %2470 = vmatpush.bf16.msrb.mxu0 %v12688_v26 }
 0x3a6   : > { %2371 = vmatmul.bf16.gmra.mxu3 %v2307_v33  ;;  %v14424_v33 = vpop.f32.mrf.mxu0 }
 0x3a8   : > { %2471 = vmatpush.bf16.msrb.mxu0 %v12687_v29 }
 0x3a9   : > { %v1534_v59 = vpop.f32.mrf.mxu2 }
 0x3aa   : > { %v2160_v1 = vpop.f32.mrf.mxu3  ;;  %v1535_v56 = vadd.f32 %v1534_v59, %v1345_v31 }
 0x3ab   : > { %v2177_v35 = vadd.f32 %v2160_v1, %v14363_v27  ;;  %v1347_v43 = vpop.f32.mrf.mxu1 }
 0x3b1   : > { %v1536_v47 = vpop.f32.mrf.mxu2 }
 0x3b2   : > { %v1537_v49 = vadd.f32 %v1536_v47, %v1347_v43  ;;  %v14417_v54 = vpop.f32.mrf.mxu3 }
 0x3b3   : > { %v1350_v37 = vpop.f32.mrf.mxu1 }
 0x3b4   : > { %v2308_v18 = vpack.c.bf16 %v1537_v49, %v1535_v56 }
 0x3b6   : > { %2376 = vmatmul.bf16.gmra.mxu3 %v2308_v18 }
 0x3b9   : > { %v1539_v27 = vpop.f32.mrf.mxu2 }
 0x3ba   : > { %v2165_v6 = vpop.f32.mrf.mxu3  ;;  %v1540_v19 = vadd.f32 %v1539_v27, %v1350_v37 }
 0x3bb   : > { %v2179_v17 = vadd.f32 %v2165_v6, %v2073_v58  ;;  %v1352_v11 = vpop.f32.mrf.mxu1 }
 0x3c1   : > { %v1541_v24 = vpop.f32.mrf.mxu2 }
 0x3c2   : > { %v1542_v32 = vadd.f32 %v1541_v24, %v1352_v11  ;;  %v14422_v10 = vpop.f32.mrf.mxu3 }
 0x3c3   : > { %v1355_v48 = vpop.f32.mrf.mxu1 }
 0x3c4   : > { %v2309_v3 = vpack.c.bf16 %v1542_v32, %v1540_v19 }
 0x3c6   : > { %2381 = vmatmul.bf16.gmra.mxu3 %v2309_v3 }
 0x3c9   : > { %v1544_v57 = vpop.f32.mrf.mxu2 }
 0x3ca   : > { %v2170_v50 = vpop.f32.mrf.mxu3  ;;  %v1545_v59 = vadd.f32 %v1544_v57, %v1355_v48 }
 0x3cb   : > { %v2181_v63 = vadd.f32 %v2170_v50, %v2075_v9  ;;  %v1357_v31 = vpop.f32.mrf.mxu1 }
 0x3d1   : > { %v1546_v14 = vpop.f32.mrf.mxu2 }
 0x3d2   : > { %v1547_v1 = vadd.f32 %v1546_v14, %v1357_v31 }
 0x3d3   : > { %v1360_v44 = vpop.f32.mrf.mxu1 }
 0x3d4   : > { %v2412_v58 = vpack.c.bf16 %v1547_v1, %v1545_v59  ;;  %v2261_v43 = vpop.f32.mrf.mxu0 }
 0x3d5   : > { %v2281_v26 = vadd.f32 %v2261_v43, %v2175_v2 }
 0x3d6   : > { %2472 = vmatmul.bf16.vlgmr.msrb.gmra.mxu0 %v2412_v58 }
 0x3d9   : > { %v1549_v47 = vpop.f32.mrf.mxu2 }
 0x3da   : > { %v1550_v37 = vadd.f32 %v1549_v47, %v1360_v44 }
 0x3db   : > { %v1362_v56 = vpop.f32.mrf.mxu1 }
 0x3dc   : > { %v2263_v49 = vpop.f32.mrf.mxu0 }
 0x3e1   : > { %v1551_v29 = vpop.f32.mrf.mxu2 }
 0x3e2   : > { %v1552_v18 = vadd.f32 %v1551_v29, %v1362_v56 }
 0x3e3   : > { %v1365_v27 = vpop.f32.mrf.mxu1 }
 0x3e4   : > { %v2413_v6 = vpack.c.bf16 %v1552_v18, %v1550_v37  ;;  %v2266_v9 = vpop.f32.mrf.mxu0  ;;  %v2172_v37 = vpop.f32.mrf.mxu3 }
 0x3e5   : > { %v2283_v11 = vadd.f32 %v2266_v9, %v2177_v35 }
 0x3e6   : > { %2477 = vmatmul.bf16.gmra.mxu0 %v2413_v6 }
 0x3e9   : > { %v1554_v24 = vpop.f32.mrf.mxu2 }
 0x3ea   : > { %v1555_v3 = vadd.f32 %v1554_v24, %v1365_v27 }
 0x3eb   : > { %v1367_v32 = vpop.f32.mrf.mxu1 }
 0x3ec   : > { %v2268_v19 = vpop.f32.mrf.mxu0 }
 0x3f1   : > { %v1556_v48 = vpop.f32.mrf.mxu2 }
 0x3f2   : > { %v1557_v57 = vadd.f32 %v1556_v48, %v1367_v32 }
 0x3f3   : > { %v1370_v14 = vpop.f32.mrf.mxu1 }
 0x3f4   : > { %v2414_v50 = vpack.c.bf16 %v1557_v57, %v1555_v3  ;;  %v2271_v2 = vpop.f32.mrf.mxu0 }
 0x3f5   : > { %v2285_v31 = vadd.f32 %v2271_v2, %v2179_v17  ;;  %v1858_v17 = vadd.f32 %v14254_v36, %v14153_v61  ;;  %v13179_v2 = vld [vmem:[%s16848_s3 + $0x1] ss:$0 sm:$0xff]  ;;  %v1860_v61 = vadd.f32 %v14283_v23, %v14186_v20 }
 0x3f6   : > { %2482 = vmatmul.bf16.gmra.mxu0 %v2414_v50 }
 0x3f7   : > { %v1964_v24 = vadd.f32 %v14348_v7, %v1858_v17 }
 0x3f9   : > { %v1559_v59 = vpop.f32.mrf.mxu2  ;;  %v2070_v48 = vadd.f32 %v14329_v40, %v1964_v24  ;;  %v1966_v40 = vadd.f32 %v14379_v12, %v1860_v61  ;;  %v1862_v12 = vadd.f32 %v14303_v13, %v14207_v22 }
 0x3fa   : > { %v1560_v43 = vadd.f32 %v1559_v59, %v1370_v14 }
 0x3fb   : > { %v1372_v44 = vpop.f32.mrf.mxu1  ;;  %v2176_v50 = vadd.f32 %v14402_v8, %v2070_v48  ;;  %v1968_v48 = vadd.f32 %v14387_v53, %v1862_v12  ;;  %v1864_v53 = vadd.f32 %v14320_v25, %v14228_v55  ;;  %v12718_v12 = vld [vmem:[%s16847_s2 + $0x2b0] sm:$0xff] }
 0x3fc   : > { %v2273_v1 = vpop.f32.mrf.mxu0 }
 0x401   : > { %v1561_v58 = vpop.f32.mrf.mxu2 }
 0x402   : > { %v1562_v47 = vadd.f32 %v1561_v58, %v1372_v44 }
 0x404   : > { %v2415_v56 = vpack.c.bf16 %v1562_v47, %v1560_v43  ;;  %v2276_v35 = vpop.f32.mrf.mxu0 }
 0x405   : > { %v14426_v29 = vadd.f32 %v2276_v35, %v2181_v63  ;;  %v2282_v63 = vadd.f32 %v2263_v49, %v2176_v50  ;;  %v2072_v49 = vadd.f32 %v14365_v5, %v1966_v40 }
 0x406   : > { %2487 = vmatmul.bf16.gmra.mxu0 %v2415_v56 }
 0x407   : > { %v2178_v56 = vadd.f32 %v14417_v54, %v2072_v49 }
 0x40c   : > { %v2278_v6 = vpop.f32.mrf.mxu0 }
 0x419   : > { %v2367_v18 = vpop.f32.mrf.mxu3 }
 0x41a   : > { %v2387_v27 = vadd.f32 %v2367_v18, %v2281_v26  ;;  %v2284_v18 = vadd.f32 %v2268_v19, %v2178_v56 }
 0x421   : > { %v2369_v9 = vpop.f32.mrf.mxu3 }
 0x422   : > { %v2388_v26 = vadd.f32 %v2369_v9, %v2282_v63 }
 0x429   : > { %v2372_v57 = vpop.f32.mrf.mxu3 }
 0x42a   : > { %v2389_v35 = vadd.f32 %v2372_v57, %v2283_v11  ;;  %v2074_v11 = vadd.f32 %v14385_v62, %v1968_v48  ;;  %v12716_v48 = vld [vmem:[%s16847_s2 + $0x2a0] sm:$0xff] }
 0x42c   : > { %v2180_v19 = vadd.f32 %v14422_v10, %v2074_v11  ;;  %v12712_v11 = vld [vmem:[%s16847_s2 + $0x280] sm:$0xff] }
 0x431   : > { %v2374_v7 = vpop.f32.mrf.mxu3 }
 0x432   : > { %v2390_v17 = vadd.f32 %v2374_v7, %v2284_v18  ;;  %v1970_v7 = vadd.f32 %v14390_v30, %v1864_v53 }
 0x434   : > { %v2076_v10 = vadd.f32 %v14424_v33, %v1970_v7  ;;  %v12695_v33 = vld [vmem:[%s16850_s5] sm:$0xff]  ;;  %v12743_v7 = vld [vmem:[%s16847_s2 + $0x378] sm:$0xff] }
 0x439   : > { %v2377_v9 = vpop.f32.mrf.mxu3 }
 0x43a   : > { %v2391_v57 = vadd.f32 %v2377_v9, %v2285_v31  ;;  %v2182_v31 = vadd.f32 %v2172_v37, %v2076_v10  ;;  %v12697_v37 = vld [vmem:[%s16850_s5 + $0x10] sm:$0xff]  ;;  %v12767_v10 = vld [vmem:[%s16847_s2 + $0x438] sm:$0xff] }
 0x43b   : > { %3307 = vmatpush.bf16.msra.mxu1 %v12767_v10 }
 0x43c   : > { %v2288_v49 = vadd.f32 %v2278_v6, %v2182_v31  ;;  %v12702_v6 = vld [vmem:[%s16850_s5 + $0x38] sm:$0xff]  ;;  %v12740_v31 = vld [vmem:[%s16847_s2 + $0x360] sm:$0xff] }
 0x441   : > { %v2379_v5 = vpop.f32.mrf.mxu3 }
 0x449   : > { %v2382_v13 = vpop.f32.mrf.mxu3 }
 0x453   : > { %v2473_v32 = vpop.f32.mrf.mxu0 }
 0x454   : > { %v2493_v3 = vadd.f32 %v2473_v32, %v2387_v27 }
 0x456   : > { %v2506_v59 = vadd.f32 %v13179_v2, %v2493_v3 }
 0x458   : > { %v2514_v58 = vmax.f32 %v2506_v59, 0.0 }
 0x45b   : > { %v2475_v14 = vpop.f32.mrf.mxu0 }
 0x45c   : > { %v2494_v44 = vadd.f32 %v2475_v14, %v2388_v26  ;;  %v2286_v26 = vadd.f32 %v2273_v1, %v2180_v19  ;;  %v2393_v1 = vadd.f32 %v2382_v13, %v14426_v29  ;;  %v12696_v29 = vld [vmem:[%s16850_s5 + $0x8] sm:$0xff]  ;;  %v12711_v19 = vld [vmem:[%s16847_s2 + $0x278] sm:$0xff]  ;;  %v12704_v13 = vld [vmem:[%s16847_s2 + $0x240] sm:$0xff] }
 0x45e   : > { %v2507_v36 = vadd.f32 %v13179_v2, %v2494_v44  ;;  %v2392_v59 = vadd.f32 %v2379_v5, %v2286_v26  ;;  %v12714_v5 = vld [vmem:[%s16847_s2 + $0x290] sm:$0xff] }
 0x45f   : > { %v12710_v26 = vld [vmem:[%s16847_s2 + $0x270] sm:$0xff] }
 0x460   : > { %v2515_v43 = vmax.f32 %v2507_v36, 0.0 }
 0x462   : > { %v14439_v47 = vpack.c.bf16 %v2515_v43, %v2514_v58 }
 0x463   : > { %v2478_v8 = vpop.f32.mrf.mxu0 }
 0x464   : > { %v2495_v27 = vadd.f32 %v2478_v8, %v2389_v35  ;;  %v2384_v8 = vpop.f32.mrf.mxu3 }
 0x465   : > { %v2394_v35 = vadd.f32 %v2384_v8, %v2288_v49  ;;  %v12727_v8 = vld [vmem:[%s16847_s2 + $0x2f8] sm:$0xff]  ;;  %v12766_v49 = vld [vmem:[%s16847_s2 + $0x430] sm:$0xff] }
 0x466   : > { %v2508_v20 = vadd.f32 %v13179_v2, %v2495_v27  ;;  %3308 = vmatpush.bf16.msra.mxu1 %v12766_v49  ;;  %v12754_v49 = vld [vmem:[%s16847_s2 + $0x3d0] sm:$0xff] }
 0x468   : > { %v2516_v3 = vmax.f32 %v2508_v20, 0.0  ;;  %v12703_v20 = vld [vmem:[%s16850_s5 + $0x40] sm:$0xff] }
 0x46b   : > { %v2480_v24 = vpop.f32.mrf.mxu0 }
 0x46c   : > { %v2496_v23 = vadd.f32 %v2480_v24, %v2390_v17  ;;  %v12719_v24 = vld [vmem:[%s16847_s2 + $0x2b8] sm:$0xff] }
 0x46d   : > { %2755 = vmatpush.bf16.msra.mxu0 %v12719_v24  ;;  %v12723_v24 = vld [vmem:[%s16847_s2 + $0x2d8] sm:$0xff] }
 0x46e   : > { %v2509_v32 = vadd.f32 %v13179_v2, %v2496_v23  ;;  %v12699_v23 = vld [vmem:[%s16850_s5 + $0x20] sm:$0xff] }
 0x470   : > { %v2517_v50 = vmax.f32 %v2509_v32, 0.0  ;;  %v12717_v32 = vld [vmem:[%s16847_s2 + $0x2a8] sm:$0xff] }
 0x471   : > { %2756 = vmatpush.bf16.msra.mxu0 %v12718_v12  ;;  %v12762_v12 = vld [vmem:[%s16847_s2 + $0x410] sm:$0xff] }
 0x472   : > { %v14446_v63 = vpack.c.bf16 %v2517_v50, %v2516_v3  ;;  %v12715_v3 = vld [vmem:[%s16847_s2 + $0x298] sm:$0xff]  ;;  %v12700_v50 = vld [vmem:[%s16850_s5 + $0x28] sm:$0xff] }
 0x473   : > { %v2483_v54 = vpop.f32.mrf.mxu0 }
 0x474   : > { %v2497_v14 = vadd.f32 %v2483_v54, %v2391_v57  ;;  %v12713_v54 = vld [vmem:[%s16847_s2 + $0x288] sm:$0xff]  ;;  %v12701_v57 = vld [vmem:[%s16850_s5 + $0x30] sm:$0xff] }
 0x475   : > { %2757 = vmatpush.bf16.msra.mxu0 %v12717_v32 }
 0x476   : > { %v2510_v61 = vadd.f32 %v13179_v2, %v2497_v14  ;;  %v12709_v14 = vld [vmem:[%s16847_s2 + $0x268] sm:$0xff] }
 0x478   : > { %v2518_v40 = vmax.f32 %v2510_v61, 0.0  ;;  %v12706_v61 = vld [vmem:[%s16847_s2 + $0x250] sm:$0xff] }
 0x479   : > { %2758 = vmatpush.bf16.msra.mxu0 %v12716_v48 }
 0x47b   : > { %v2485_v44 = vpop.f32.mrf.mxu0 }
 0x47c   : > { %v2498_v22 = vadd.f32 %v2485_v44, %v2392_v59  ;;  %v12708_v59 = vld [vmem:[%s16847_s2 + $0x260] sm:$0xff]  ;;  %v12707_v44 = vld [vmem:[%s16847_s2 + $0x258] sm:$0xff] }
 0x47d   : > { %2759 = vmatpush.bf16.msra.mxu0 %v12715_v3  ;;  %v12759_v3 = vld [vmem:[%s16847_s2 + $0x3f8] sm:$0xff] }
 0x47e   : > { %v2511_v36 = vadd.f32 %v13179_v2, %v2498_v22  ;;  %v12705_v22 = vld [vmem:[%s16847_s2 + $0x248] sm:$0xff] }
 0x480   : > { %v2519_v58 = vmax.f32 %v2511_v36, 0.0 }
 0x481   : > { %2760 = vmatpush.bf16.msra.mxu0 %v12714_v5  ;;  %v12773_v5 = vld [vmem:[%s16847_s2 + $0x468] sm:$0xff] }
 0x482   : > { %v14453_v43 = vpack.c.bf16 %v2519_v58, %v2518_v40  ;;  %v12742_v40 = vld [vmem:[%s16847_s2 + $0x370] sm:$0xff] }
 0x483   : > { %v2488_v62 = vpop.f32.mrf.mxu0 }
 0x484   : > { %v2499_v56 = vadd.f32 %v2488_v62, %v2393_v1  ;;  %v12741_v62 = vld [vmem:[%s16847_s2 + $0x368] sm:$0xff] }
 0x485   : > { %2761 = vmatpush.bf16.msra.mxu0 %v12713_v54  ;;  %v12761_v54 = vld [vmem:[%s16847_s2 + $0x408] sm:$0xff] }
 0x486   : > { %v2512_v27 = vadd.f32 %v13179_v2, %v2499_v56 }
 0x488   : > { %v2520_v9 = vmax.f32 %v2512_v27, 0.0  ;;  %v12765_v27 = vld [vmem:[%s16847_s2 + $0x428] sm:$0xff] }
 0x489   : > { %2762 = vmatpush.bf16.msra.mxu0 %v12712_v11  ;;  %3309 = vmatpush.bf16.msra.mxu1 %v12765_v27  ;;  %v12758_v11 = vld [vmem:[%s16847_s2 + $0x3f0] sm:$0xff] }
 0x48b   : > { %v2490_v18 = vpop.f32.mrf.mxu0 }
 0x48c   : > { %v2500_v55 = vadd.f32 %v2490_v18, %v2394_v35  ;;  %v12739_v35 = vld [vmem:[%s16847_s2 + $0x358] sm:$0xff]  ;;  %v12726_v18 = vld [vmem:[%s16847_s2 + $0x2f0] sm:$0xff] }
 0x48d   : > { %2817 = vmatpush.bf16.msrb.mxu0 %v12711_v19  ;;  %v12721_v19 = vld [vmem:[%s16847_s2 + $0x2c8] sm:$0xff] }
 0x48e   : > { %v2513_v25 = vadd.f32 %v13179_v2, %v2500_v55  ;;  %v12698_v2 = vld [vmem:[%s16850_s5 + $0x18] sm:$0xff]  ;;  %v12738_v55 = vld [vmem:[%s16847_s2 + $0x350] sm:$0xff] }
 0x490   : > { %v2521_v30 = vmax.f32 %v2513_v25, 0.0  ;;  %v12725_v25 = vld [vmem:[%s16847_s2 + $0x2e8] sm:$0xff] }
 0x491   : > { %2818 = vmatpush.bf16.msrb.mxu0 %v12710_v26  ;;  %v12772_v26 = vld [vmem:[%s16847_s2 + $0x460] sm:$0xff] }
 0x492   : > { %v14457_v17 = vpack.c.bf16 %v2521_v30, %v2520_v9  ;;  %v12764_v30 = vld [vmem:[%s16847_s2 + $0x420] sm:$0xff] }
 0x493   : > { %3310 = vmatpush.bf16.msra.mxu1 %v12764_v30  ;;  %v12752_v30 = vld [vmem:[%s16847_s2 + $0x3c0] sm:$0xff] }
 0x494   : > { %2621 = vmatpush.bf16.msrb.mxu2 %v14457_v17  ;;  %13131 = vmatpush.bf16.msra.mxu3 %v14457_v17 }
 0x495   : > { %2819 = vmatpush.bf16.msrb.mxu0 %v12709_v14  ;;  %v12760_v14 = vld [vmem:[%s16847_s2 + $0x400] sm:$0xff] }
 0x498   : > { %2622 = vmatpush.bf16.msrb.mxu2 %v14453_v43  ;;  %13132 = vmatpush.bf16.msra.mxu3 %v14453_v43 }
 0x499   : > { %2820 = vmatpush.bf16.msrb.mxu0 %v12708_v59 }
 0x49c   : > { %2623 = vmatpush.bf16.msrb.mxu2 %v14446_v63  ;;  %13133 = vmatpush.bf16.msra.mxu3 %v14446_v63 }
 0x49d   : > { %2821 = vmatpush.bf16.msrb.mxu0 %v12707_v44  ;;  %v12757_v44 = vld [vmem:[%s16847_s2 + $0x3e8] sm:$0xff] }
 0x4a0   : > { %2624 = vmatpush.bf16.msrb.mxu2 %v14439_v47  ;;  %13134 = vmatpush.bf16.msra.mxu3 %v14439_v47 }
 0x4a1   : > { %2822 = vmatpush.bf16.msrb.mxu0 %v12706_v61 }
 0x4a3   : > { %10046 = vmatmul.msk.bf16.vlgmr.msrb.gmra.mxu2 %vm2589_vm3, %v12695_v33  ;;  %10053 = vmatmul.msk.bf16.vlgmr.msra.gmra.mxu3 %vm2589_vm3, %v12702_v6  ;;  %v12737_v33 = vld [vmem:[%s16847_s2 + $0x348] sm:$0xff]  ;;  %v12763_v6 = vld [vmem:[%s16847_s2 + $0x418] sm:$0xff] }
 0x4a4   : > { %3061 = vmatpush.bf16.msrb.mxu3 %v12743_v7  ;;  %3311 = vmatpush.bf16.msra.mxu1 %v12763_v6  ;;  %v12729_v6 = vld [vmem:[%s16847_s2 + $0x308] sm:$0xff] }
 0x4a5   : > { %2823 = vmatpush.bf16.msrb.mxu0 %v12705_v22  ;;  %v12720_v22 = vld [vmem:[%s16847_s2 + $0x2c0] sm:$0xff] }
 0x4a8   : > { %3062 = vmatpush.bf16.msrb.mxu3 %v12742_v40  ;;  %3312 = vmatpush.bf16.msra.mxu1 %v12762_v12  ;;  %v12770_v40 = vld [vmem:[%s16847_s2 + $0x450] sm:$0xff] }
 0x4a9   : > { %2824 = vmatpush.bf16.msrb.mxu0 %v12704_v13  ;;  %v12771_v13 = vld [vmem:[%s16847_s2 + $0x458] sm:$0xff]  ;;  %v12750_v12 = vld [vmem:[%s16847_s2 + $0x3b0] sm:$0xff] }
 0x4ac   : > { %3063 = vmatpush.bf16.msrb.mxu3 %v12741_v62  ;;  %3313 = vmatpush.bf16.msra.mxu1 %v12761_v54  ;;  %v12734_v62 = vld [vmem:[%s16847_s2 + $0x330] sm:$0xff] }
 0x4ad   : > { %v12746_v54 = vld [vmem:[%s16847_s2 + $0x390] sm:$0xff] }
 0x4b0   : > { %3064 = vmatpush.bf16.msrb.mxu3 %v12740_v31  ;;  %3314 = vmatpush.bf16.msra.mxu1 %v12760_v14  ;;  %v12755_v31 = vld [vmem:[%s16847_s2 + $0x3d8] sm:$0xff] }
 0x4b3   : > { %10047 = vmatmul.msk.bf16.gmra.mxu2 %vm2589_vm3, %v12696_v29  ;;  %10054 = vmatmul.msk.bf16.gmra.mxu3 %vm2589_vm3, %v12703_v20  ;;  %v12724_v29 = vld [vmem:[%s16847_s2 + $0x2e0] sm:$0xff] }
 0x4b4   : > { %3065 = vmatpush.bf16.msrb.mxu3 %v12739_v35  ;;  %v12768_v35 = vld [vmem:[%s16847_s2 + $0x440] sm:$0xff] }
 0x4b8   : > { %3066 = vmatpush.bf16.msrb.mxu3 %v12738_v55  ;;  %v12753_v55 = vld [vmem:[%s16847_s2 + $0x3c8] sm:$0xff] }
 0x4bc   : > { %3067 = vmatpush.bf16.msrb.mxu3 %v12737_v33 }
 0x4c3   : > { %10048 = vmatmul.msk.bf16.gmra.mxu2 %vm2589_vm3, %v12697_v37  ;;  %v12775_v37 = vld [vmem:[%s16847_s2 + $0x478] sm:$0xff] }
 0x4c4   : > { %3389 = vmatpush.bf16.msra.mxu2 %v12775_v37 }
 0x4d3   : > { %10049 = vmatmul.msk.bf16.gmra.mxu2 %vm2589_vm3, %v12698_v2  ;;  %v12736_v2 = vld [vmem:[%s16847_s2 + $0x340] sm:$0xff] }
 0x4d4   : > { %3068 = vmatpush.bf16.msrb.mxu3 %v12736_v2 }
 0x4d8   : > { %3225 = vmatpush.bf16.msra.mxu3 %v12759_v3  ;;  %v12748_v3 = vld [vmem:[%s16847_s2 + $0x3a0] sm:$0xff] }
 0x4dc   : > { %3226 = vmatpush.bf16.msra.mxu3 %v12758_v11 }
 0x4e0   : > { %3227 = vmatpush.bf16.msra.mxu3 %v12757_v44 }
 0x4e3   : > { %10050 = vmatmul.msk.bf16.gmra.mxu2 %vm2589_vm3, %v12699_v23  ;;  %v12774_v23 = vld [vmem:[%s16847_s2 + $0x470] sm:$0xff] }
 0x4e4   : > { %3390 = vmatpush.bf16.msra.mxu2 %v12774_v23 }
 0x4e8   : > { %3391 = vmatpush.bf16.msra.mxu2 %v12773_v5  ;;  %v12747_v5 = vld [vmem:[%s16847_s2 + $0x398] sm:$0xff] }
 0x4ec   : > { %3392 = vmatpush.bf16.msra.mxu2 %v12772_v26  ;;  %v12744_v26 = vld [vmem:[%s16847_s2 + $0x380] sm:$0xff] }
 0x4f0   : > { %3393 = vmatpush.bf16.msra.mxu2 %v12771_v13 }
 0x4f3   : > { %10051 = vmatmul.msk.bf16.gmra.mxu2 %vm2589_vm3, %v12700_v50  ;;  %v12722_v50 = vld [vmem:[%s16847_s2 + $0x2d0] sm:$0xff] }
 0x4f4   : > { %3394 = vmatpush.bf16.msra.mxu2 %v12770_v40 }
 0x503   : > { %10052 = vmatmul.msk.bf16.gmra.mxu2 %vm2589_vm3, %v12701_v57 }
 0x526   : > { %v2626_v53 = vpop.f32.mrf.mxu2  ;;  %v2661_v48 = vpop.f32.mrf.mxu3 }
 0x52e   : > { %v2628_v36 = vpop.f32.mrf.mxu2  ;;  %v2663_v59 = vpop.f32.mrf.mxu3 }
 0x52f   : > { %v2688_v32 = vpack.c.bf16 %v2628_v36, %v2626_v53  ;;  %v3258_v61 = vpack.c.bf16 %v2663_v59, %v2661_v48  ;;  %v12735_v53 = vld [vmem:[%s16847_s2 + $0x338] sm:$0xff]  ;;  %v12756_v36 = vld [vmem:[%s16847_s2 + $0x3e0] sm:$0xff]  ;;  %v12749_v48 = vld [vmem:[%s16847_s2 + $0x3a8] sm:$0xff] }
 0x530   : > { %3228 = vmatpush.bf16.msra.mxu3 %v12756_v36 }
 0x531   : > { %3315 = vmatmul.bf16.vlgmr.msra.gmra.mxu1 %v3258_v61 }
 0x534   : > { %3229 = vmatpush.bf16.msra.mxu3 %v12755_v31 }
 0x536   : > { %v2631_v58 = vpop.f32.mrf.mxu2  ;;  %v2666_v10 = vpop.f32.mrf.mxu3 }
 0x538   : > { %3230 = vmatpush.bf16.msra.mxu3 %v12754_v49 }
 0x53c   : > { %3231 = vmatpush.bf16.msra.mxu3 %v12753_v55 }
 0x53e   : > { %v2633_v1 = vpop.f32.mrf.mxu2  ;;  %v2668_v27 = vpop.f32.mrf.mxu3 }
 0x53f   : > { %v2706_v56 = vpack.c.bf16 %v2633_v1, %v2631_v58  ;;  %v12769_v1 = vld [vmem:[%s16847_s2 + $0x448] sm:$0xff] }
 0x540   : > { %3395 = vmatpush.bf16.msra.mxu2 %v12769_v1  ;;  %3232 = vmatpush.bf16.msra.mxu3 %v12752_v30 }
 0x541   : > { %2763 = vmatmul.bf16.vlgmr.msra.gmra.mxu0 %v2706_v56 }
 0x542   : > { %2897 = vmatpush.bf16.msra.mxu0 %v12727_v8  ;;  %v12733_v8 = vld [vmem:[%s16847_s2 + $0x328] sm:$0xff] }
 0x544   : > { %3396 = vmatpush.bf16.msra.mxu2 %v12768_v35 }
 0x546   : > { %2898 = vmatpush.bf16.msra.mxu0 %v12726_v18  ;;  %v2636_v9 = vpop.f32.mrf.mxu2  ;;  %v12732_v18 = vld [vmem:[%s16847_s2 + $0x320] sm:$0xff] }
 0x54a   : > { %2899 = vmatpush.bf16.msra.mxu0 %v12725_v25  ;;  %v3340_v25 = vpack.c.bf16 %v2668_v27, %v2666_v10 }
 0x54c   : > { %3397 = vmatmul.bf16.vlgmr.msra.gmra.mxu2 %v3340_v25 }
 0x54e   : > { %2900 = vmatpush.bf16.msra.mxu0 %v12724_v29  ;;  %v2638_v20 = vpop.f32.mrf.mxu2  ;;  %v12730_v29 = vld [vmem:[%s16847_s2 + $0x310] sm:$0xff] }
 0x54f   : > { %v2848_v58 = vpack.c.bf16 %v2638_v20, %v2636_v9  ;;  %v12731_v9 = vld [vmem:[%s16847_s2 + $0x318] sm:$0xff] }
 0x550   : > { %v12751_v20 = vld [vmem:[%s16847_s2 + $0x3b8] sm:$0xff] }
 0x551   : > { %2825 = vmatmul.bf16.vlgmr.msrb.gmra.mxu0 %v2688_v32 }
 0x552   : > { %2901 = vmatpush.bf16.msra.mxu0 %v12723_v24  ;;  %v12728_v24 = vld [vmem:[%s16847_s2 + $0x300] sm:$0xff] }
 0x556   : > { %2902 = vmatpush.bf16.msra.mxu0 %v12722_v50  ;;  %v14632_v57 = vpop.f32.mrf.mxu2 }
 0x55a   : > { %2903 = vmatpush.bf16.msra.mxu0 %v12721_v19 }
 0x55e   : > { %2904 = vmatpush.bf16.msra.mxu0 %v12720_v22  ;;  %v2643_v7 = vpop.f32.mrf.mxu2 }
 0x55f   : > { %v2930_v23 = vpack.c.bf16 %v2643_v7, %v14632_v57  ;;  %v12745_v57 = vld [vmem:[%s16847_s2 + $0x388] sm:$0xff] }
 0x561   : > { %2905 = vmatmul.bf16.vlgmr.msra.gmra.mxu0 %v2848_v58 }
 0x562   : > { %2979 = vmatpush.bf16.msrb.mxu0 %v12735_v53 }
 0x566   : > { %2980 = vmatpush.bf16.msrb.mxu0 %v12734_v62  ;;  %v2646_v56 = vpop.f32.mrf.mxu2 }
 0x56a   : > { %2981 = vmatpush.bf16.msrb.mxu0 %v12733_v8 }
 0x56e   : > { %2982 = vmatpush.bf16.msrb.mxu0 %v12732_v18  ;;  %v2648_v33 = vpop.f32.mrf.mxu2 }
 0x56f   : > { %v3012_v37 = vpack.c.bf16 %v2648_v33, %v2646_v56 }
 0x571   : > { %3069 = vmatmul.bf16.vlgmr.msrb.gmra.mxu3 %v3012_v37 }
 0x572   : > { %2983 = vmatpush.bf16.msrb.mxu0 %v12731_v9 }
 0x576   : > { %2984 = vmatpush.bf16.msrb.mxu0 %v12730_v29  ;;  %v2651_v2 = vpop.f32.mrf.mxu2 }
 0x57a   : > { %2985 = vmatpush.bf16.msrb.mxu0 %v12729_v6 }
 0x57e   : > { %2986 = vmatpush.bf16.msrb.mxu0 %v12728_v24  ;;  %v2653_v32 = vpop.f32.mrf.mxu2  ;;  %v13180_v24 = vld [vmem:[%s16848_s3 + $0x2] ss:$0 sm:$0xff] }
 0x57f   : > { %v3094_v14 = vpack.c.bf16 %v2653_v32, %v2651_v2 }
 0x581   : > { %2987 = vmatmul.bf16.vlgmr.msrb.gmra.mxu0 %v2930_v23 }
 0x582   : > { %3143 = vmatpush.bf16.msra.mxu0 %v12751_v20 }
 0x586   : > { %3144 = vmatpush.bf16.msra.mxu0 %v12750_v12  ;;  %v2656_v50 = vpop.f32.mrf.mxu2 }
 0x58a   : > { %3145 = vmatpush.bf16.msra.mxu0 %v12749_v48 }
 0x58e   : > { %3146 = vmatpush.bf16.msra.mxu0 %v12748_v3  ;;  %v2658_v11 = vpop.f32.mrf.mxu2 }
 0x58f   : > { %v3176_v19 = vpack.c.bf16 %v2658_v11, %v2656_v50 }
 0x591   : > { %3233 = vmatmul.bf16.vlgmr.msra.gmra.mxu3 %v3176_v19  ;;  %v12776_v19 = vld [vmem:[%s16851_s6] sm:$0xff] }
 0x592   : > { %3147 = vmatpush.bf16.msra.mxu0 %v12747_v5 }
 0x596   : > { %3148 = vmatpush.bf16.msra.mxu0 %v12746_v54 }
 0x59a   : > { %3149 = vmatpush.bf16.msra.mxu0 %v12745_v57  ;;  %v12793_v57 = vld [vmem:[%s16847_s2 + $0x4f8] sm:$0xff] }
 0x59b   : > { %3552 = vmatpush.bf16.msrb.mxu3 %v12793_v57  ;;  %v12822_v57 = vld [vmem:[%s16847_s2 + $0x5e0] sm:$0xff] }
 0x59e   : > { %3150 = vmatpush.bf16.msra.mxu0 %v12744_v26  ;;  %v12785_v26 = vld [vmem:[%s16847_s2 + $0x4b8] sm:$0xff] }
 0x59f   : > { %3613 = vmatpush.bf16.msrb.mxu1 %v12785_v26  ;;  %v12830_v26 = vld [vmem:[%s16847_s2 + $0x620] sm:$0xff] }
 0x5a1   : > { %3151 = vmatmul.bf16.vlgmr.msra.gmra.mxu0 %v3094_v14  ;;  %v12801_v14 = vld [vmem:[%s16847_s2 + $0x538] sm:$0xff] }
 0x5a2   : > { %3692 = vmatpush.bf16.msrb.mxu2 %v12801_v14  ;;  %v12813_v14 = vld [vmem:[%s16847_s2 + $0x598] sm:$0xff] }
 0x5ae   : > { %v3316_v27 = vpop.f32.mrf.mxu1 }
 0x5b6   : > { %v3318_v23 = vpop.f32.mrf.mxu1 }
 0x5be   : > { %v2764_v59 = vpop.f32.mrf.mxu0 }
 0x5c6   : > { %v2766_v44 = vpop.f32.mrf.mxu0 }
 0x5ce   : > { %v2826_v61 = vpop.f32.mrf.mxu0 }
 0x5cf   : > { %v2827_v40 = vadd.f32 %v2826_v61, %v2764_v59  ;;  %v3398_v9 = vpop.f32.mrf.mxu2  ;;  %v12792_v59 = vld [vmem:[%s16847_s2 + $0x4f0] sm:$0xff] }
 0x5d0   : > { %v12800_v61 = vld [vmem:[%s16847_s2 + $0x530] sm:$0xff]  ;;  %3553 = vmatpush.bf16.msrb.mxu3 %v12792_v59  ;;  %v12821_v59 = vld [vmem:[%s16847_s2 + $0x5d8] sm:$0xff] }
 0x5d1   : > { %3693 = vmatpush.bf16.msrb.mxu2 %v12800_v61  ;;  %v12812_v61 = vld [vmem:[%s16847_s2 + $0x590] sm:$0xff] }
 0x5d6   : > { %v2828_v22 = vpop.f32.mrf.mxu0 }
 0x5d7   : > { %v2829_v1 = vadd.f32 %v2828_v22, %v2766_v44  ;;  %v3400_v32 = vpop.f32.mrf.mxu2  ;;  %v12784_v44 = vld [vmem:[%s16847_s2 + $0x4b0] sm:$0xff]  ;;  %v12791_v22 = vld [vmem:[%s16847_s2 + $0x4e8] sm:$0xff] }
 0x5d8   : > { %3614 = vmatpush.bf16.msrb.mxu1 %v12784_v44  ;;  %3554 = vmatpush.bf16.msrb.mxu3 %v12791_v22  ;;  %v12829_v44 = vld [vmem:[%s16847_s2 + $0x618] sm:$0xff]  ;;  %v12820_v22 = vld [vmem:[%s16847_s2 + $0x5d0] sm:$0xff] }
 0x5de   : > { %v2906_v13 = vpop.f32.mrf.mxu0 }
 0x5df   : > { %v2911_v10 = vadd.f32 %v2906_v13, %v2827_v40  ;;  %v12783_v13 = vld [vmem:[%s16847_s2 + $0x4a8] sm:$0xff]  ;;  %v12782_v40 = vld [vmem:[%s16847_s2 + $0x4a0] sm:$0xff] }
 0x5e0   : > { %3615 = vmatpush.bf16.msrb.mxu1 %v12783_v13  ;;  %v12804_v13 = vld [vmem:[%s16847_s2 + $0x550] sm:$0xff] }
 0x5e4   : > { %3616 = vmatpush.bf16.msrb.mxu1 %v12782_v40  ;;  %v12840_v40 = vld [vmem:[%s16847_s2 + $0x670] sm:$0xff] }
 0x5e6   : > { %v2908_v53 = vpop.f32.mrf.mxu0 }
 0x5e7   : > { %v2912_v35 = vadd.f32 %v2908_v53, %v2829_v1  ;;  %v12799_v53 = vld [vmem:[%s16847_s2 + $0x528] sm:$0xff]  ;;  %v12781_v1 = vld [vmem:[%s16847_s2 + $0x498] sm:$0xff] }
 0x5e8   : > { %3694 = vmatpush.bf16.msrb.mxu2 %v12799_v53  ;;  %3617 = vmatpush.bf16.msrb.mxu1 %v12781_v1  ;;  %v12803_v53 = vld [vmem:[%s16847_s2 + $0x548] sm:$0xff]  ;;  %v12837_v1 = vld [vmem:[%s16847_s2 + $0x658] sm:$0xff] }
 0x5f4   : > { %v3070_v7 = vpop.f32.mrf.mxu3 }
 0x5fc   : > { %v3072_v62 = vpop.f32.mrf.mxu3 }
 0x5fe   : > { %v2988_v36 = vpop.f32.mrf.mxu0 }
 0x5ff   : > { %v2993_v31 = vadd.f32 %v2988_v36, %v2911_v10  ;;  %v12809_v36 = vld [vmem:[%s16847_s2 + $0x578] sm:$0xff]  ;;  %v12777_v10 = vld [vmem:[%s16851_s6 + $0x8] sm:$0xff] }
 0x601   : > { %v3075_v8 = vadd.f32 %v3070_v7, %v2993_v31  ;;  %v12790_v7 = vld [vmem:[%s16847_s2 + $0x4e0] sm:$0xff]  ;;  %v12789_v31 = vld [vmem:[%s16847_s2 + $0x4d8] sm:$0xff] }
 0x602   : > { %3555 = vmatpush.bf16.msrb.mxu3 %v12790_v7  ;;  %v12841_v7 = vld [vmem:[%s16847_s2 + $0x678] sm:$0xff] }
 0x606   : > { %v2990_v58 = vpop.f32.mrf.mxu0  ;;  %3556 = vmatpush.bf16.msrb.mxu3 %v12789_v31  ;;  %v12819_v31 = vld [vmem:[%s16847_s2 + $0x5c8] sm:$0xff] }
 0x607   : > { %v2994_v55 = vadd.f32 %v2990_v58, %v2912_v35  ;;  %v12798_v58 = vld [vmem:[%s16847_s2 + $0x520] sm:$0xff]  ;;  %v12780_v35 = vld [vmem:[%s16847_s2 + $0x490] sm:$0xff] }
 0x608   : > { %3695 = vmatpush.bf16.msrb.mxu2 %v12798_v58  ;;  %3618 = vmatpush.bf16.msrb.mxu1 %v12780_v35  ;;  %v12839_v58 = vld [vmem:[%s16847_s2 + $0x668] sm:$0xff]  ;;  %v12836_v35 = vld [vmem:[%s16847_s2 + $0x650] sm:$0xff] }
 0x609   : > { %v3076_v30 = vadd.f32 %v3072_v62, %v2994_v55  ;;  %v12808_v62 = vld [vmem:[%s16847_s2 + $0x570] sm:$0xff] }
 0x60a   : > { %v3418_v55 = vld [vmem:[%s16851_s6 + $0x10] sm:$0x3] }
 0x614   : > { %v3234_v56 = vpop.f32.mrf.mxu3 }
 0x61c   : > { %v3236_v6 = vpop.f32.mrf.mxu3 }
 0x61e   : > { %v3152_v49 = vpop.f32.mrf.mxu0 }
 0x61f   : > { %v3157_v18 = vadd.f32 %v3152_v49, %v3075_v8  ;;  %v12797_v8 = vld [vmem:[%s16847_s2 + $0x518] sm:$0xff]  ;;  %v12807_v49 = vld [vmem:[%s16847_s2 + $0x568] sm:$0xff] }
 0x620   : > { %3696 = vmatpush.bf16.msrb.mxu2 %v12797_v8  ;;  %v12828_v8 = vld [vmem:[%s16847_s2 + $0x610] sm:$0xff] }
 0x621   : > { %v3239_v25 = vadd.f32 %v3234_v56, %v3157_v18  ;;  %v12788_v56 = vld [vmem:[%s16847_s2 + $0x4d0] sm:$0xff] }
 0x622   : > { %v12796_v18 = vld [vmem:[%s16847_s2 + $0x510] sm:$0xff]  ;;  %3557 = vmatpush.bf16.msrb.mxu3 %v12788_v56  ;;  %v12818_v56 = vld [vmem:[%s16847_s2 + $0x5c0] sm:$0xff] }
 0x623   : > { %v3321_v33 = vadd.f32 %v3316_v27, %v3239_v25  ;;  %v12806_v27 = vld [vmem:[%s16847_s2 + $0x560] sm:$0xff]  ;;  %v12787_v25 = vld [vmem:[%s16847_s2 + $0x4c8] sm:$0xff] }
 0x624   : > { %3697 = vmatpush.bf16.msrb.mxu2 %v12796_v18  ;;  %v12827_v18 = vld [vmem:[%s16847_s2 + $0x608] sm:$0xff] }
 0x625   : > { %v3403_v2 = vadd.f32 %v3398_v9, %v3321_v33  ;;  %v12779_v9 = vld [vmem:[%s16847_s2 + $0x488] sm:$0xff]  ;;  %v12805_v33 = vld [vmem:[%s16847_s2 + $0x558] sm:$0xff] }
 0x626   : > { %v3154_v29 = vpop.f32.mrf.mxu0  ;;  %3558 = vmatpush.bf16.msrb.mxu3 %v12787_v25  ;;  %3619 = vmatpush.bf16.msrb.mxu1 %v12779_v9  ;;  %v12834_v25 = vld [vmem:[%s16847_s2 + $0x640] sm:$0xff] }
 0x627   : > { %v3158_v37 = vadd.f32 %v3154_v29, %v3076_v30  ;;  %v3410_v48 = vadd.f32 %v13180_v24, %v3403_v2  ;;  %v12795_v30 = vld [vmem:[%s16847_s2 + $0x508] sm:$0xff]  ;;  %v3429_v29 = vunpack.c.l.b16 %v3418_v55  ;;  %v12817_v2 = vld [vmem:[%s16847_s2 + $0x5b8] sm:$0xff]  ;;  %v12826_v55 = vld [vmem:[%s16847_s2 + $0x600] sm:$0xff] }
 0x628   : > { %3698 = vmatpush.bf16.msrb.mxu2 %v12795_v30  ;;  %v12857_v30 = vld [vmem:[%s16852_s7 + $0x38] sm:$0xff] }
 0x629   : > { %v3240_v20 = vadd.f32 %v3236_v6, %v3158_v37  ;;  %v3412_v5 = vmax.f32 %v3410_v48, 0.0  ;;  %v12786_v37 = vld [vmem:[%s16847_s2 + $0x4c0] sm:$0xff]  ;;  %v12824_v48 = vld [vmem:[%s16847_s2 + $0x5f0] sm:$0xff] }
 0x62a   : > { %v12778_v6 = vld [vmem:[%s16847_s2 + $0x480] sm:$0xff]  ;;  %3559 = vmatpush.bf16.msrb.mxu3 %v12786_v37 }
 0x62b   : > { %v3322_v12 = vadd.f32 %v3318_v23, %v3240_v20  ;;  %v3432_v20 = vpack.c.b16 %v3429_v29, %v3429_v29  ;;  %v12794_v23 = vld [vmem:[%s16847_s2 + $0x500] sm:$0xff]  ;;  %3620 = vmatpush.bf16.msrb.mxu1 %v12778_v6  ;;  %v12849_v29 = vld [vmem:[%s16847_s2 + $0x6b8] sm:$0xff]  ;;  %v12856_v6 = vld [vmem:[%s16852_s7 + $0x30] sm:$0xff] }
 0x62c   : > { %3699 = vmatpush.bf16.msrb.mxu2 %v12794_v23  ;;  %v12855_v23 = vld [vmem:[%s16852_s7 + $0x28] sm:$0xff] }
 0x62d   : > { %v3404_v3 = vadd.f32 %v3400_v32, %v3322_v12  ;;  %v12833_v12 = vld [vmem:[%s16847_s2 + $0x638] sm:$0xff]  ;;  %v12816_v32 = vld [vmem:[%s16847_s2 + $0x5b0] sm:$0xff] }
 0x62e   : > { %3854 = vmatpush.bf16.msra.mxu3 %v12817_v2  ;;  %v12848_v2 = vld [vmem:[%s16847_s2 + $0x6b0] sm:$0xff] }
 0x62f   : > { %v3411_v50 = vadd.f32 %v13180_v24, %v3404_v3  ;;  %v12825_v24 = vld [vmem:[%s16847_s2 + $0x5f8] sm:$0xff]  ;;  %v12832_v3 = vld [vmem:[%s16847_s2 + $0x630] sm:$0xff] }
 0x630   : > { %3936 = vmatpush.bf16.msra.mxu1 %v12825_v24  ;;  %4016 = vmatpush.bf16.msra.mxu2 %v12833_v12 }
 0x631   : > { %v3413_v54 = vmax.f32 %v3411_v50, 0.0  ;;  %v12815_v50 = vld [vmem:[%s16847_s2 + $0x5a8] sm:$0xff] }
 0x632   : > { %3855 = vmatpush.bf16.msra.mxu3 %v12816_v32  ;;  %v12847_v32 = vld [vmem:[%s16847_s2 + $0x6a8] sm:$0xff] }
 0x633   : > { %v14725_v11 = vpack.c.bf16 %v3413_v54, %v3412_v5  ;;  %v12823_v5 = vld [vmem:[%s16847_s2 + $0x5e8] sm:$0xff] }
 0x634   : > { %3937 = vmatpush.bf16.msra.mxu1 %v12824_v48  ;;  %4017 = vmatpush.bf16.msra.mxu2 %v12832_v3  ;;  %v12831_v54 = vld [vmem:[%s16847_s2 + $0x628] sm:$0xff]  ;;  %v12873_v48 = vld [vmem:[%s16852_s7 + $0xb8] sm:$0xff] }
 0x635   : > { %3450 = vmatpush.bf16.msrb.mxu0 %v14725_v11 }
 0x636   : > { %3856 = vmatpush.bf16.msra.mxu3 %v12815_v50  ;;  %v12864_v50 = vld [vmem:[%s16852_s7 + $0x70] sm:$0xff] }
 0x638   : > { %10496 = vmatmul.msk.bf16.vlgmr.msrb.gmra.mxu0 %vm3433_vm4, %v12776_v19  ;;  %3938 = vmatpush.bf16.msra.mxu1 %v12823_v5  ;;  %v12814_v19 = vld [vmem:[%s16847_s2 + $0x5a0] sm:$0xff] }
 0x639   : > { %3774 = vmatpush.bf16.msra.mxu0 %v12809_v36  ;;  %4018 = vmatpush.bf16.msra.mxu2 %v12831_v54  ;;  %v12802_v36 = vld [vmem:[%s16847_s2 + $0x540] sm:$0xff] }
 0x63a   : > { %3857 = vmatpush.bf16.msra.mxu3 %v12814_v19  ;;  %v12854_v5 = vld [vmem:[%s16852_s7 + $0x20] sm:$0xff]  ;;  %v12872_v19 = vld [vmem:[%s16852_s7 + $0xb0] sm:$0xff] }
 0x63b   : > { %v12846_v54 = vld [vmem:[%s16847_s2 + $0x6a0] sm:$0xff] }
 0x63c   : > { %3939 = vmatpush.bf16.msra.mxu1 %v12822_v57 }
 0x63d   : > { %3775 = vmatpush.bf16.msra.mxu0 %v12808_v62  ;;  %4019 = vmatpush.bf16.msra.mxu2 %v12830_v26  ;;  %v12838_v62 = vld [vmem:[%s16847_s2 + $0x660] sm:$0xff]  ;;  %v12863_v26 = vld [vmem:[%s16852_s7 + $0x68] sm:$0xff] }
 0x63e   : > { %3858 = vmatpush.bf16.msra.mxu3 %v12813_v14  ;;  %v12853_v14 = vld [vmem:[%s16852_s7 + $0x18] sm:$0xff] }
 0x640   : > { %3940 = vmatpush.bf16.msra.mxu1 %v12821_v59 }
 0x641   : > { %3776 = vmatpush.bf16.msra.mxu0 %v12807_v49  ;;  %4020 = vmatpush.bf16.msra.mxu2 %v12829_v44  ;;  %v12810_v49 = vld [vmem:[%s16847_s2 + $0x580] sm:$0xff]  ;;  %v12845_v44 = vld [vmem:[%s16847_s2 + $0x698] sm:$0xff] }
 0x642   : > { %3859 = vmatpush.bf16.msra.mxu3 %v12812_v61  ;;  %v12871_v61 = vld [vmem:[%s16852_s7 + $0xa8] sm:$0xff] }
 0x644   : > { %3941 = vmatpush.bf16.msra.mxu1 %v12820_v22 }
 0x645   : > { %3777 = vmatpush.bf16.msra.mxu0 %v12806_v27  ;;  %4021 = vmatpush.bf16.msra.mxu2 %v12828_v8  ;;  %v12835_v27 = vld [vmem:[%s16847_s2 + $0x648] sm:$0xff] }
 0x648   : > { %10497 = vmatmul.msk.bf16.gmra.mxu0 %vm3433_vm4, %v12777_v10  ;;  %v12811_v10 = vld [vmem:[%s16847_s2 + $0x588] sm:$0xff]  ;;  %3942 = vmatpush.bf16.msra.mxu1 %v12819_v31 }
 0x649   : > { %3778 = vmatpush.bf16.msra.mxu0 %v12805_v33  ;;  %3860 = vmatpush.bf16.msra.mxu3 %v12811_v10  ;;  %v12843_v31 = vld [vmem:[%s16847_s2 + $0x688] sm:$0xff] }
 0x64a   : > { %4022 = vmatpush.bf16.msra.mxu2 %v12827_v18  ;;  %v12868_v18 = vld [vmem:[%s16852_s7 + $0x90] sm:$0xff] }
 0x64c   : > { %3943 = vmatpush.bf16.msra.mxu1 %v12818_v56  ;;  %v12850_v56 = vld [vmem:[%s16852_s7] sm:$0xff] }
 0x64d   : > { %3779 = vmatpush.bf16.msra.mxu0 %v12804_v13  ;;  %3861 = vmatpush.bf16.msra.mxu3 %v12810_v49  ;;  %v12862_v13 = vld [vmem:[%s16852_s7 + $0x60] sm:$0xff]  ;;  %v12860_v49 = vld [vmem:[%s16852_s7 + $0x50] sm:$0xff] }
 0x64e   : > { %4023 = vmatpush.bf16.msra.mxu2 %v12826_v55  ;;  %v12859_v55 = vld [vmem:[%s16852_s7 + $0x48] sm:$0xff] }
 0x651   : > { %3780 = vmatpush.bf16.msra.mxu0 %v12803_v53  ;;  %v12852_v53 = vld [vmem:[%s16852_s7 + $0x10] sm:$0xff] }
 0x655   : > { %3781 = vmatpush.bf16.msra.mxu0 %v12802_v36  ;;  %v12844_v36 = vld [vmem:[%s16847_s2 + $0x690] sm:$0xff] }
 0x658   : > { %10498 = vmatmul.msk.bf16.gmra.mxu0 %vm3433_vm4, %v3432_v20  ;;  %v12865_v20 = vld [vmem:[%s16852_s7 + $0x78] sm:$0xff] }
 0x659   : > { %4098 = vmatpush.bf16.msrb.mxu0 %v12841_v7  ;;  %v12870_v7 = vld [vmem:[%s16852_s7 + $0xa0] sm:$0xff] }
 0x65d   : > { %4099 = vmatpush.bf16.msrb.mxu0 %v12840_v40 }
 0x661   : > { %4100 = vmatpush.bf16.msrb.mxu0 %v12839_v58  ;;  %v12861_v58 = vld [vmem:[%s16852_s7 + $0x58] sm:$0xff] }
 0x665   : > { %4101 = vmatpush.bf16.msrb.mxu0 %v12838_v62  ;;  %v12851_v62 = vld [vmem:[%s16852_s7 + $0x8] sm:$0xff] }
 0x669   : > { %4102 = vmatpush.bf16.msrb.mxu0 %v12837_v1  ;;  %v12869_v1 = vld [vmem:[%s16852_s7 + $0x98] sm:$0xff] }
 0x66d   : > { %4103 = vmatpush.bf16.msrb.mxu0 %v12836_v35  ;;  %v12842_v35 = vld [vmem:[%s16847_s2 + $0x680] sm:$0xff] }
 0x671   : > { %4104 = vmatpush.bf16.msrb.mxu0 %v12835_v27 }
 0x675   : > { %4105 = vmatpush.bf16.msrb.mxu0 %v12834_v25 }
 0x6b5   : > { %v3452_v9 = vpop.f32.mrf.mxu0 }
 0x6b6   : > { %v3483_v33 = vpack.c.bf16 %v3452_v9, %v3452_v9  ;;  %v12867_v9 = vld [vmem:[%s16852_s7 + $0x88] sm:$0xff] }
 0x6b8   : > { %v3502_v37 = vrot.slane %v3483_v33, 2  ;;  %3621 = vmatmul.bf16.vlgmr.msrb.gmra.mxu1 %v3483_v33  ;;  %v12866_v33 = vld [vmem:[%s16852_s7 + $0x80] sm:$0xff] }
 0x6b9   : > { %4267 = vmatpush.bf16.msrb.mxu1 %v12857_v30  ;;  %v12858_v30 = vld [vmem:[%s16852_s7 + $0x40] sm:$0xff] }
 0x6ba   : > { %3560 = vmatmul.bf16.vlgmr.msrb.gmra.mxu3 %v3502_v37  ;;  %v12874_v37 = vld [vmem:[%s16852_s7 + $0xc0] sm:$0xff] }
 0x6bb   : > { %4178 = vmatpush.bf16.msrb.mxu3 %v12849_v29 }
 0x6bd   : > { %v3454_v24 = vpop.f32.mrf.mxu0  ;;  %4268 = vmatpush.bf16.msrb.mxu1 %v12856_v6 }
 0x6be   : > { %v3643_v12 = vpack.c.bf16 %v3454_v24, %v3454_v24 }
 0x6bf   : > { %4179 = vmatpush.bf16.msrb.mxu3 %v12848_v2 }
 0x6c0   : > { %v3724_v3 = vrot.slane %v3643_v12, 2  ;;  %3700 = vmatmul.bf16.vlgmr.msrb.gmra.mxu2 %v3643_v12 }
 0x6c1   : > { %4426 = vmatpush.bf16.msrb.mxu2 %v12865_v20  ;;  %4269 = vmatpush.bf16.msrb.mxu1 %v12855_v23 }
 0x6c2   : > { %3782 = vmatmul.bf16.vlgmr.msra.gmra.mxu0 %v3724_v3 }
 0x6c3   : > { %4180 = vmatpush.bf16.msrb.mxu3 %v12847_v32  ;;  %4525 = vmatpush.bf16.msra.mxu0 %v12873_v48 }
 0x6c5   : > { %v3457_v57 = vpop.f32.mrf.mxu0  ;;  %4427 = vmatpush.bf16.msrb.mxu2 %v12864_v50  ;;  %4270 = vmatpush.bf16.msrb.mxu1 %v12854_v5 }
 0x6c6   : > { %v3805_v59 = vpack.c.bf16 %v3457_v57, %v3457_v57 }
 0x6c7   : > { %4181 = vmatpush.bf16.msrb.mxu3 %v12846_v54  ;;  %4526 = vmatpush.bf16.msra.mxu0 %v12872_v19 }
 0x6c8   : > { %v3886_v22 = vrot.slane %v3805_v59, 2 }
 0x6c9   : > { %4428 = vmatpush.bf16.msrb.mxu2 %v12863_v26  ;;  %4271 = vmatpush.bf16.msrb.mxu1 %v12853_v14 }
 0x6ca   : > { %3862 = vmatmul.bf16.vlgmr.msra.gmra.mxu3 %v3805_v59  ;;  %3944 = vmatmul.bf16.vlgmr.msra.gmra.mxu1 %v3886_v22 }
 0x6cb   : > { %4182 = vmatpush.bf16.msrb.mxu3 %v12845_v44  ;;  %4527 = vmatpush.bf16.msra.mxu0 %v12871_v61 }
 0x6cd   : > { %v3459_v40 = vpop.f32.mrf.mxu0  ;;  %4429 = vmatpush.bf16.msrb.mxu2 %v12862_v13  ;;  %4272 = vmatpush.bf16.msrb.mxu1 %v12852_v53 }
 0x6ce   : > { %v3967_v10 = vpack.c.bf16 %v3459_v40, %v3459_v40 }
 0x6cf   : > { %4183 = vmatpush.bf16.msrb.mxu3 %v12844_v36  ;;  %4528 = vmatpush.bf16.msra.mxu0 %v12870_v7 }
 0x6d0   : > { %v4048_v8 = vrot.slane %v3967_v10, 2  ;;  %4024 = vmatmul.bf16.vlgmr.msra.gmra.mxu2 %v3967_v10 }
 0x6d1   : > { %4430 = vmatpush.bf16.msrb.mxu2 %v12861_v58  ;;  %4273 = vmatpush.bf16.msrb.mxu1 %v12851_v62 }
 0x6d2   : > { %4106 = vmatmul.bf16.vlgmr.msrb.gmra.mxu0 %v4048_v8 }
 0x6d3   : > { %4184 = vmatpush.bf16.msrb.mxu3 %v12843_v31  ;;  %4529 = vmatpush.bf16.msra.mxu0 %v12869_v1 }
 0x6d5   : > { %4431 = vmatpush.bf16.msrb.mxu2 %v12860_v49  ;;  %v3462_v27 = vpop.f32.mrf.mxu0  ;;  %4274 = vmatpush.bf16.msrb.mxu1 %v12850_v56  ;;  %v12882_v49 = vld [vmem:[%s16856_s11] sm:$0xff] }
 0x6d6   : > { %v4129_v25 = vpack.c.bf16 %v3462_v27, %v3462_v27 }
 0x6d7   : > { %4185 = vmatpush.bf16.msrb.mxu3 %v12842_v35  ;;  %4530 = vmatpush.bf16.msra.mxu0 %v12868_v18  ;;  %v13185_v18 = vld [vmem:[%s16853_s8 + $0x2] ss:$0 sm:$0xff] }
 0x6d9   : > { %4432 = vmatpush.bf16.msrb.mxu2 %v12859_v55 }
 0x6da   : > { %4186 = vmatmul.bf16.vlgmr.msrb.gmra.mxu3 %v4129_v25  ;;  %4275 = vmatmul.bf16.vlgmr.msrb.gmra.mxu1 %v13584_v45  ;;  %v12881_v45 = vld [vmem:[%s16852_s7 + $0xf8] sm:$0xff] }
 0x6db   : > { %4531 = vmatpush.bf16.msra.mxu0 %v12867_v9  ;;  %4610 = vmatpush.bf16.msra.mxu3 %v12881_v45  ;;  %v12884_v45 = vld [vmem:[%s16857_s12 + $0x8] sm:$0xff] }
 0x6dd   : > { %4433 = vmatpush.bf16.msrb.mxu2 %v12858_v30  ;;  %v3464_v29 = vpop.f32.mrf.mxu0 }
 0x6de   : > { %v12883_v29 = vld [vmem:[%s16857_s12] sm:$0xff] }
 0x6df   : > { %4532 = vmatpush.bf16.msra.mxu0 %v12866_v33 }
 0x6e0   : > { %4434 = vmatmul.bf16.vlgmr.msrb.gmra.mxu2 %v14439_v47  ;;  %v12877_v47 = vld [vmem:[%s16852_s7 + $0xd8] sm:$0xff] }
 0x6e2   : > { %4533 = vmatmul.bf16.vlgmr.msra.gmra.mxu0 %v14725_v11 }
 0x6ea   : > { %4280 = vmatmul.bf16.gmra.mxu1 %v13566_v38  ;;  %v12880_v38 = vld [vmem:[%s16852_s7 + $0xf0] sm:$0xff] }
 0x6eb   : > { %4611 = vmatpush.bf16.msra.mxu3 %v12880_v38  ;;  %v12885_v38 = vld [vmem:[%s16857_s12 + $0x10] sm:$0xff] }
 0x6f0   : > { %4439 = vmatmul.bf16.gmra.mxu2 %v14446_v63 }
 0x6fa   : > { %4285 = vmatmul.bf16.gmra.mxu1 %v13556_v34 }
 0x700   : > { %4444 = vmatmul.bf16.gmra.mxu2 %v14453_v43 }
 0x70a   : > { %4290 = vmatmul.bf16.gmra.mxu1 %v13542_v28  ;;  %v12879_v28 = vld [vmem:[%s16852_s7 + $0xe8] sm:$0xff] }
 0x70b   : > { %4612 = vmatpush.bf16.msra.mxu3 %v12879_v28  ;;  %v12886_v28 = vld [vmem:[%s16857_s12 + $0x18] sm:$0xff] }
 0x710   : > { %4449 = vmatmul.bf16.gmra.mxu2 %v14457_v17  ;;  %v12875_v17 = vld [vmem:[%s16852_s7 + $0xc8] sm:$0xff] }
 0x71a   : > { %4295 = vmatmul.bf16.gmra.mxu1 %v13528_v21  ;;  %v12878_v21 = vld [vmem:[%s16852_s7 + $0xe0] sm:$0xff] }
 0x71b   : > { %4613 = vmatpush.bf16.msra.mxu3 %v12878_v21  ;;  %v12887_v21 = vld [vmem:[%s16857_s12 + $0x20] sm:$0xff] }
 0x71f   : > { %4614 = vmatpush.bf16.msra.mxu3 %v12877_v47  ;;  %v12899_v47 = vld [vmem:[%s16858_s13 + $0x4b8] sm:$0xff] }
 0x720   : > { %4946 = vmatpush.bf16.msra.mxu2 %v12899_v47 }
 0x72a   : > { %4300 = vmatmul.bf16.gmra.mxu1 %v13514_v15  ;;  %v12876_v15 = vld [vmem:[%s16852_s7 + $0xd0] sm:$0xff] }
 0x72b   : > { %4615 = vmatpush.bf16.msra.mxu3 %v12876_v15  ;;  %v12907_v15 = vld [vmem:[%s16858_s13 + $0x4f8] sm:$0xff] }
 0x72f   : > { %4616 = vmatpush.bf16.msra.mxu3 %v12875_v17  ;;  %v12897_v17 = vld [vmem:[%s16858_s13 + $0x4a8] sm:$0xff] }
 0x733   : > { %4617 = vmatpush.bf16.msra.mxu3 %v12874_v37  ;;  %v12896_v37 = vld [vmem:[%s16858_s13 + $0x4a0] sm:$0xff] }
 0x735   : > { %v3622_v34 = vpop.f32.mrf.mxu1 }
 0x73a   : > { %4305 = vmatmul.bf16.gmra.mxu1 %v13504_v51 }
 0x73d   : > { %v3561_v63 = vpop.f32.mrf.mxu3  ;;  %v3624_v43 = vpop.f32.mrf.mxu1 }
 0x73e   : > { %v3623_v23 = vadd.f32 %v3622_v34, %v3561_v63  ;;  %v12888_v34 = vld [vmem:[%s16857_s12 + $0x28] sm:$0xff]  ;;  %v12898_v63 = vld [vmem:[%s16858_s13 + $0x4b0] sm:$0xff] }
 0x73f   : > { %v3783_v11 = vpop.f32.mrf.mxu0  ;;  %4947 = vmatpush.bf16.msra.mxu2 %v12898_v63  ;;  %v12906_v43 = vld [vmem:[%s16858_s13 + $0x4f0] sm:$0xff]  ;;  %v12933_v63 = vld [vmem:[%s16858_s13 + $0x5c8] sm:$0xff] }
 0x743   : > { %v3701_v6 = vpop.f32.mrf.mxu2  ;;  %4948 = vmatpush.bf16.msra.mxu2 %v12897_v17  ;;  %v12947_v17 = vld [vmem:[%s16858_s13 + $0x638] sm:$0xff] }
 0x744   : > { %v3705_v12 = vadd.f32 %v3701_v6, %v3623_v23  ;;  %v12889_v6 = vld [vmem:[%s16857_s12 + $0x30] sm:$0xff] }
 0x745   : > { %v3563_v2 = vpop.f32.mrf.mxu3  ;;  %v12894_v23 = vld [vmem:[%s16858_s13 + $0x490] sm:$0xff] }
 0x746   : > { %v3787_v50 = vadd.f32 %v3783_v11, %v3705_v12  ;;  %v12905_v11 = vld [vmem:[%s16858_s13 + $0x4e8] sm:$0xff]  ;;  %v12904_v2 = vld [vmem:[%s16858_s13 + $0x4e0] sm:$0xff] }
 0x747   : > { %v3945_v24 = vpop.f32.mrf.mxu1  ;;  %v3785_v20 = vpop.f32.mrf.mxu0  ;;  %4949 = vmatpush.bf16.msra.mxu2 %v12896_v37  ;;  %v12893_v12 = vld [vmem:[%s16858_s13 + $0x488] sm:$0xff] }
 0x748   : > { %v12903_v20 = vld [vmem:[%s16858_s13 + $0x4d8] sm:$0xff] }
 0x74a   : > { %4310 = vmatmul.bf16.gmra.mxu1 %v13494_v41  ;;  %v13182_v41 = vld [vmem:[%s16848_s3 + $0x3] ss:$0 sm:$0xff] }
 0x74b   : > { %v3703_v51 = vpop.f32.mrf.mxu2 }
 0x74c   : > { %v12902_v51 = vld [vmem:[%s16858_s13 + $0x4d0] sm:$0xff] }
 0x74d   : > { %v3863_v32 = vpop.f32.mrf.mxu3 }
 0x74e   : > { %v3867_v5 = vadd.f32 %v3863_v32, %v3787_v50  ;;  %v12901_v32 = vld [vmem:[%s16858_s13 + $0x4c8] sm:$0xff]  ;;  %v12900_v50 = vld [vmem:[%s16858_s13 + $0x4c0] sm:$0xff] }
 0x74f   : > { %v3947_v48 = vpop.f32.mrf.mxu1  ;;  %v4107_v3 = vpop.f32.mrf.mxu0 }
 0x750   : > { %v3949_v57 = vadd.f32 %v3945_v24, %v3867_v5  ;;  %v12895_v24 = vld [vmem:[%s16858_s13 + $0x498] sm:$0xff]  ;;  %v12892_v48 = vld [vmem:[%s16858_s13 + $0x480] sm:$0xff] }
 0x751   : > { %4950 = vmatpush.bf16.msra.mxu2 %v12895_v24  ;;  %v12915_v5 = vld [vmem:[%s16858_s13 + $0x538] sm:$0xff] }
 0x752   : > { %v12955_v24 = vld [vmem:[%s16858_s13 + $0x678] sm:$0xff] }
 0x753   : > { %v4025_v54 = vpop.f32.mrf.mxu2 }
 0x754   : > { %v4029_v14 = vadd.f32 %v4025_v54, %v3949_v57  ;;  %v12914_v54 = vld [vmem:[%s16858_s13 + $0x530] sm:$0xff]  ;;  %v12912_v57 = vld [vmem:[%s16858_s13 + $0x520] sm:$0xff] }
 0x755   : > { %v3865_v19 = vpop.f32.mrf.mxu3  ;;  %4951 = vmatpush.bf16.msra.mxu2 %v12894_v23  ;;  %v12954_v23 = vld [vmem:[%s16858_s13 + $0x670] sm:$0xff] }
 0x756   : > { %v4111_v44 = vadd.f32 %v4107_v3, %v4029_v14  ;;  %v12890_v3 = vld [vmem:[%s16857_s12 + $0x38] sm:$0xff]  ;;  %v12913_v19 = vld [vmem:[%s16858_s13 + $0x528] sm:$0xff] }
 0x757   : > { %v4109_v26 = vpop.f32.mrf.mxu0  ;;  %v15071_v40 = vpop.f32.mrf.mxu1  ;;  %v12923_v14 = vld [vmem:[%s16858_s13 + $0x578] sm:$0xff] }
 0x758   : > { %v12891_v26 = vld [vmem:[%s16857_s12 + $0x40] sm:$0xff] }
 0x759   : > { %4952 = vmatpush.bf16.msra.mxu2 %v12893_v12  ;;  %v12944_v12 = vld [vmem:[%s16858_s13 + $0x620] sm:$0xff] }
 0x75a   : > { %4315 = vmatmul.bf16.gmra.mxu1 %v13586_v46 }
 0x75b   : > { %v4027_v59 = vpop.f32.mrf.mxu2 }
 0x75c   : > { %v12911_v59 = vld [vmem:[%s16858_s13 + $0x518] sm:$0xff] }
 0x75d   : > { %v4187_v61 = vpop.f32.mrf.mxu3  ;;  %4953 = vmatpush.bf16.msra.mxu2 %v12892_v48  ;;  %v12943_v48 = vld [vmem:[%s16858_s13 + $0x618] sm:$0xff] }
 0x75e   : > { %v4191_v22 = vadd.f32 %v4187_v61, %v4111_v44  ;;  %v12922_v44 = vld [vmem:[%s16858_s13 + $0x570] sm:$0xff] }
 0x75f   : > { %v15074_v46 = vpop.f32.mrf.mxu1  ;;  %v4534_v56 = vpop.f32.mrf.mxu0 }
 0x760   : > { %v4197_v13 = vadd.f32 %v13182_v41, %v4191_v22  ;;  %v4535_v27 = vadd.f32 %v13185_v18, %v4534_v56  ;;  %v12910_v41 = vld [vmem:[%s16858_s13 + $0x510] sm:$0xff]  ;;  %v12921_v22 = vld [vmem:[%s16858_s13 + $0x568] sm:$0xff]  ;;  %v12931_v56 = vld [vmem:[%s16858_s13 + $0x5b8] sm:$0xff] }
 0x761   : > { %5108 = vmatpush.bf16.msrb.mxu2 %v12923_v14  ;;  %v12962_v14 = vld [vmem:[%s16858_s13 + $0x6b0] sm:$0xff] }
 0x762   : > { %v4198_v53 = vmax.f32 %v4197_v13, 0.0  ;;  %v12909_v13 = vld [vmem:[%s16858_s13 + $0x508] sm:$0xff] }
 0x764   : > { %v4556_v36 = vpack.c.bf16 %v4198_v53, %v4198_v53  ;;  %v12920_v53 = vld [vmem:[%s16858_s13 + $0x560] sm:$0xff] }
 0x765   : > { %v4189_v7 = vpop.f32.mrf.mxu3  ;;  %5109 = vmatpush.bf16.msrb.mxu2 %v12922_v44 }
 0x766   : > { %4618 = vmatmul.bf16.vlgmr.msra.gmra.mxu3 %v4556_v36  ;;  %v12908_v36 = vld [vmem:[%s16858_s13 + $0x500] sm:$0xff] }
 0x767   : > { %v15076_v58 = vpop.f32.mrf.mxu1  ;;  %v4536_v35 = vpop.f32.mrf.mxu0 }
 0x768   : > { %v4537_v55 = vadd.f32 %v13185_v18, %v4536_v35  ;;  %v12930_v18 = vld [vmem:[%s16858_s13 + $0x5b0] sm:$0xff] }
 0x769   : > { %5110 = vmatpush.bf16.msrb.mxu2 %v12921_v22  ;;  %v12949_v22 = vld [vmem:[%s16858_s13 + $0x648] sm:$0xff] }
 0x76a   : > { %4320 = vmatmul.bf16.gmra.mxu1 %v13568_v39 }
 0x76d   : > { %5111 = vmatpush.bf16.msrb.mxu2 %v12920_v53  ;;  %v12948_v53 = vld [vmem:[%s16858_s13 + $0x640] sm:$0xff] }
 0x76f   : > { %v15079_v62 = vpop.f32.mrf.mxu1 }
 0x777   : > { %v15082_v10 = vpop.f32.mrf.mxu1 }
 0x77a   : > { %4325 = vmatmul.bf16.gmra.mxu1 %v13558_v60 }
 0x77f   : > { %v15084_v31 = vpop.f32.mrf.mxu1 }
 0x787   : > { %v15087_v60 = vpop.f32.mrf.mxu1 }
 0x78a   : > { %4330 = vmatmul.bf16.gmra.mxu1 %v13544_v0 }
 0x78f   : > { %v15089_v39 = vpop.f32.mrf.mxu1 }
 0x790   : > { %16876 = vst [vmem:[#allocation11_spill] sm:$0xff] %v15089_v39 }
 0x79a   : > { %4335 = vmatmul.bf16.gmra.mxu1 %v13530_v4  ;;  %v13184_v4 = vld [vmem:[%s16853_s8 + $0x3] ss:$0 sm:$0xff] }
 0x7aa   : > { %4340 = vmatmul.bf16.gmra.mxu1 %v13516_v16 }
 0x7ba   : > { %4345 = vmatmul.bf16.gmra.mxu1 %v13506_v52 }
 0x7ca   : > { %4350 = vmatmul.bf16.gmra.mxu1 %v13496_v42 }
 0x7e9   : > { %v4619_v0 = vpop.f32.mrf.mxu3 }
 0x7ea   : > { %v4620_v1 = vadd.f32 %v13184_v4, %v4619_v0  ;;  %v12919_v0 = vld [vmem:[%s16858_s13 + $0x558] sm:$0xff] }
 0x7eb   : > { %5112 = vmatpush.bf16.msrb.mxu2 %v12919_v0  ;;  %v12958_v0 = vld [vmem:[%s16858_s13 + $0x690] sm:$0xff] }
 0x7ec   : > { %v4625_v16 = vpack.c.bf16 %v4620_v1, %v4620_v1  ;;  %v12918_v1 = vld [vmem:[%s16858_s13 + $0x550] sm:$0xff] }
 0x7ee   : > { %v4637_v8 = vsel %vm4635_vm5, %v4625_v16, 0 }
 0x7ef   : > { %4646 = vmatpush.bf16.msrb.mxu0 %v4637_v8  ;;  %5113 = vmatpush.bf16.msrb.mxu2 %v12918_v1  ;;  %v12917_v8 = vld [vmem:[%s16858_s13 + $0x548] sm:$0xff] }
 0x7f1   : > { %v4621_v52 = vpop.f32.mrf.mxu3 }
 0x7f2   : > { %11115 = vmatmul.msk.bf16.vlgmr.msrb.gmra.mxu0 %vm4631_vm6, %v12882_v49  ;;  %v12916_v49 = vld [vmem:[%s16858_s13 + $0x540] sm:$0xff] }
 0x7f3   : > { %4884 = vmatpush.bf16.msra.mxu0 %v12907_v15  ;;  %5114 = vmatpush.bf16.msrb.mxu2 %v12917_v8  ;;  %v12925_v15 = vld [vmem:[%s16858_s13 + $0x588] sm:$0xff]  ;;  %v12956_v8 = vld [vmem:[%s16858_s13 + $0x680] sm:$0xff] }
 0x7f7   : > { %4885 = vmatpush.bf16.msra.mxu0 %v12906_v43  ;;  %5115 = vmatpush.bf16.msrb.mxu2 %v12916_v49  ;;  %v12924_v43 = vld [vmem:[%s16858_s13 + $0x580] sm:$0xff] }
 0x7fb   : > { %4886 = vmatpush.bf16.msra.mxu0 %v12905_v11  ;;  %v12932_v11 = vld [vmem:[%s16858_s13 + $0x5c0] sm:$0xff] }
 0x7ff   : > { %4887 = vmatpush.bf16.msra.mxu0 %v12904_v2  ;;  %v12946_v2 = vld [vmem:[%s16858_s13 + $0x630] sm:$0xff] }
 0x803   : > { %4888 = vmatpush.bf16.msra.mxu0 %v12903_v20  ;;  %v12945_v20 = vld [vmem:[%s16858_s13 + $0x628] sm:$0xff] }
 0x807   : > { %4889 = vmatpush.bf16.msra.mxu0 %v12902_v51 }
 0x80b   : > { %4890 = vmatpush.bf16.msra.mxu0 %v12901_v32  ;;  %v12953_v32 = vld [vmem:[%s16858_s13 + $0x668] sm:$0xff] }
 0x80f   : > { %4891 = vmatpush.bf16.msra.mxu0 %v12900_v50 }
 0x813   : > { %5026 = vmatpush.bf16.msrb.mxu0 %v12915_v5 }
 0x817   : > { %5027 = vmatpush.bf16.msrb.mxu0 %v12914_v54  ;;  %v12963_v54 = vld [vmem:[%s16858_s13 + $0x6b8] sm:$0xff] }
 0x81b   : > { %5028 = vmatpush.bf16.msrb.mxu0 %v12913_v19  ;;  %v12942_v19 = vld [vmem:[%s16858_s13 + $0x610] sm:$0xff] }
 0x81f   : > { %5029 = vmatpush.bf16.msrb.mxu0 %v12912_v57  ;;  %v12951_v57 = vld [vmem:[%s16858_s13 + $0x658] sm:$0xff] }
 0x823   : > { %5030 = vmatpush.bf16.msrb.mxu0 %v12911_v59  ;;  %v12950_v59 = vld [vmem:[%s16858_s13 + $0x650] sm:$0xff] }
 0x827   : > { %5031 = vmatpush.bf16.msrb.mxu0 %v12910_v41  ;;  %v12961_v41 = vld [vmem:[%s16858_s13 + $0x6a8] sm:$0xff] }
 0x82b   : > { %5032 = vmatpush.bf16.msrb.mxu0 %v12909_v13  ;;  %v12960_v13 = vld [vmem:[%s16858_s13 + $0x6a0] sm:$0xff] }
 0x82f   : > { %5033 = vmatpush.bf16.msrb.mxu0 %v12908_v36 }
 0x86f   : > { %v4648_v42 = vpop.f32.mrf.mxu0 }
 0x870   : > { %v4653_v9 = vadd.f32 %v4648_v42, %v4535_v27  ;;  %v12939_v42 = vld [vmem:[%s16858_s13 + $0x5f8] sm:$0xff]  ;;  %v12938_v27 = vld [vmem:[%s16858_s13 + $0x5f0] sm:$0xff] }
 0x877   : > { %v4650_v25 = vpop.f32.mrf.mxu0 }
 0x878   : > { %v4654_v30 = vadd.f32 %v4650_v25, %v4537_v55  ;;  %v12929_v25 = vld [vmem:[%s16858_s13 + $0x5a8] sm:$0xff] }
 0x87a   : > { %v4673_v33 = vpack.c.bf16 %v4654_v30, %v4653_v9  ;;  %v12937_v9 = vld [vmem:[%s16858_s13 + $0x5e8] sm:$0xff]  ;;  %v12928_v30 = vld [vmem:[%s16858_s13 + $0x5a0] sm:$0xff] }
 0x87c   : > { %4753 = vmatpush.bf16.msrb.mxu3 %v4673_v33  ;;  %v12936_v33 = vld [vmem:[%s16858_s13 + $0x5e0] sm:$0xff] }
 0x87f   : > { %11152 = vmatmul.msk.bf16.vlgmr.msrb.gmra.mxu3 %vm3433_vm4, %v12883_v29 }
 0x880   : > { %5518 = vmatpush.bf16.msra.mxu3 %v12963_v54 }
 0x884   : > { %5519 = vmatpush.bf16.msra.mxu3 %v12962_v14 }
 0x888   : > { %5520 = vmatpush.bf16.msra.mxu3 %v12961_v41 }
 0x88c   : > { %5521 = vmatpush.bf16.msra.mxu3 %v12960_v13 }
 0x88f   : > { %11153 = vmatmul.msk.bf16.gmra.mxu3 %vm3433_vm4, %v12884_v45  ;;  %v12927_v45 = vld [vmem:[%s16858_s13 + $0x598] sm:$0xff] }
 0x89f   : > { %11154 = vmatmul.msk.bf16.gmra.mxu3 %vm3433_vm4, %v12885_v38 }
 0x8af   : > { %11155 = vmatmul.msk.bf16.gmra.mxu3 %vm3433_vm4, %v12886_v28  ;;  %v12935_v28 = vld [vmem:[%s16858_s13 + $0x5d8] sm:$0xff] }
 0x8bf   : > { %11156 = vmatmul.msk.bf16.gmra.mxu3 %vm3433_vm4, %v12887_v21  ;;  %v12926_v21 = vld [vmem:[%s16858_s13 + $0x590] sm:$0xff] }
 0x8cf   : > { %11157 = vmatmul.msk.bf16.gmra.mxu3 %vm3433_vm4, %v12888_v34  ;;  %v12934_v34 = vld [vmem:[%s16858_s13 + $0x5d0] sm:$0xff] }
 0x8df   : > { %11158 = vmatmul.msk.bf16.gmra.mxu3 %vm3433_vm4, %v12889_v6 }
 0x8ef   : > { %11159 = vmatmul.msk.bf16.gmra.mxu3 %vm3433_vm4, %v12890_v3  ;;  %v12952_v3 = vld [vmem:[%s16858_s13 + $0x660] sm:$0xff] }
 0x8ff   : > { %11160 = vmatmul.msk.bf16.gmra.mxu3 %vm3433_vm4, %v12891_v26  ;;  %v12941_v26 = vld [vmem:[%s16858_s13 + $0x608] sm:$0xff] }
 0x902   : > { %v4755_v61 = vpop.f32.mrf.mxu3 }
 0x90a   : > { %v4757_v7 = vpop.f32.mrf.mxu3 }
 0x90b   : > { %v4817_v4 = vpack.c.bf16 %v4757_v7, %v4755_v61  ;;  %v12940_v61 = vld [vmem:[%s16858_s13 + $0x600] sm:$0xff] }
 0x90d   : > { %4954 = vmatmul.bf16.vlgmr.msra.gmra.mxu2 %v4817_v4  ;;  %v12959_v4 = vld [vmem:[%s16858_s13 + $0x698] sm:$0xff] }
 0x90e   : > { %5272 = vmatpush.bf16.msra.mxu2 %v12939_v42  ;;  %5522 = vmatpush.bf16.msra.mxu3 %v12959_v4 }
 0x912   : > { %v4760_v16 = vpop.f32.mrf.mxu3  ;;  %5273 = vmatpush.bf16.msra.mxu2 %v12938_v27  ;;  %5523 = vmatpush.bf16.msra.mxu3 %v12958_v0  ;;  %v15353_v27 = vpop.f32.mrf.mxu2 }
 0x916   : > { %5274 = vmatpush.bf16.msra.mxu2 %v12937_v9 }
 0x91a   : > { %v4762_v52 = vpop.f32.mrf.mxu3  ;;  %5275 = vmatpush.bf16.msra.mxu2 %v12936_v33  ;;  %v15355_v9 = vpop.f32.mrf.mxu2 }
 0x91b   : > { %v4835_v35 = vpack.c.bf16 %v4762_v52, %v4760_v16  ;;  %v12957_v16 = vld [vmem:[%s16858_s13 + $0x688] sm:$0xff] }
 0x91c   : > { %5524 = vmatpush.bf16.msra.mxu3 %v12957_v16 }
 0x91d   : > { %4892 = vmatmul.bf16.vlgmr.msra.gmra.mxu0 %v4835_v35 }
 0x91e   : > { %5190 = vmatpush.bf16.msra.mxu0 %v12931_v56  ;;  %5276 = vmatpush.bf16.msra.mxu2 %v12935_v28 }
 0x920   : > { %5525 = vmatpush.bf16.msra.mxu3 %v12956_v8 }
 0x922   : > { %v4765_v55 = vpop.f32.mrf.mxu3  ;;  %5191 = vmatpush.bf16.msra.mxu0 %v12930_v18  ;;  %5277 = vmatpush.bf16.msra.mxu2 %v12934_v34 }
 0x926   : > { %5192 = vmatpush.bf16.msra.mxu0 %v12929_v25  ;;  %5278 = vmatpush.bf16.msra.mxu2 %v12933_v63 }
 0x92a   : > { %v4767_v29 = vpop.f32.mrf.mxu3  ;;  %5193 = vmatpush.bf16.msra.mxu0 %v12928_v30  ;;  %5279 = vmatpush.bf16.msra.mxu2 %v12932_v11  ;;  %v15357_v30 = vpop.f32.mrf.mxu2 }
 0x92b   : > { %v4977_v38 = vpack.c.bf16 %v4767_v29, %v4765_v55 }
 0x92d   : > { %5034 = vmatmul.bf16.vlgmr.msrb.gmra.mxu0 %v4977_v38 }
 0x92e   : > { %5194 = vmatpush.bf16.msra.mxu0 %v12927_v45 }
 0x932   : > { %v4770_v47 = vpop.f32.mrf.mxu3  ;;  %5195 = vmatpush.bf16.msra.mxu0 %v12926_v21  ;;  %v15359_v33 = vpop.f32.mrf.mxu2 }
 0x936   : > { %5196 = vmatpush.bf16.msra.mxu0 %v12925_v15 }
 0x93a   : > { %v4772_v37 = vpop.f32.mrf.mxu3  ;;  %5197 = vmatpush.bf16.msra.mxu0 %v12924_v43  ;;  %v15361_v29 = vpop.f32.mrf.mxu2 }
 0x93b   : > { %v5059_v6 = vpack.c.bf16 %v4772_v37, %v4770_v47 }
 0x93d   : > { %5116 = vmatmul.bf16.vlgmr.msrb.gmra.mxu2 %v5059_v6 }
 0x93e   : > { %5354 = vmatpush.bf16.msrb.mxu0 %v12947_v17  ;;  %5436 = vmatpush.bf16.msrb.mxu2 %v12955_v24 }
 0x942   : > { %5355 = vmatpush.bf16.msrb.mxu0 %v12946_v2  ;;  %v4775_v51 = vpop.f32.mrf.mxu3  ;;  %5437 = vmatpush.bf16.msrb.mxu2 %v12954_v23  ;;  %v15363_v45 = vpop.f32.mrf.mxu2 }
 0x946   : > { %5356 = vmatpush.bf16.msrb.mxu0 %v12945_v20  ;;  %5438 = vmatpush.bf16.msrb.mxu2 %v12953_v32 }
 0x94a   : > { %5357 = vmatpush.bf16.msrb.mxu0 %v12944_v12  ;;  %v4777_v50 = vpop.f32.mrf.mxu3  ;;  %5439 = vmatpush.bf16.msrb.mxu2 %v12952_v3  ;;  %v15365_v38 = vpop.f32.mrf.mxu2 }
 0x94b   : > { %v5141_v5 = vpack.c.bf16 %v4777_v50, %v4775_v51 }
 0x94d   : > { %5198 = vmatmul.bf16.vlgmr.msra.gmra.mxu0 %v5141_v5 }
 0x94e   : > { %5358 = vmatpush.bf16.msrb.mxu0 %v12943_v48  ;;  %5440 = vmatpush.bf16.msrb.mxu2 %v12951_v57 }
 0x952   : > { %5359 = vmatpush.bf16.msrb.mxu0 %v12942_v19  ;;  %v4780_v44 = vpop.f32.mrf.mxu3  ;;  %5441 = vmatpush.bf16.msrb.mxu2 %v12950_v59  ;;  %v15367_v28 = vpop.f32.mrf.mxu2 }
 0x956   : > { %5360 = vmatpush.bf16.msrb.mxu0 %v12941_v26  ;;  %5442 = vmatpush.bf16.msrb.mxu2 %v12949_v22  ;;  %v13186_v22 = vld [vmem:[%s16859_s14 + $0x2] ss:$0 sm:$0xff] }
 0x95a   : > { %5361 = vmatpush.bf16.msrb.mxu0 %v12940_v61  ;;  %v4782_v36 = vpop.f32.mrf.mxu3  ;;  %5443 = vmatpush.bf16.msrb.mxu2 %v12948_v53 }
 0x95b   : > { %v5223_v7 = vpack.c.bf16 %v4782_v36, %v4780_v44 }
 0x95d   : > { %5280 = vmatmul.bf16.vlgmr.msra.gmra.mxu2 %v5223_v7 }
 0x962   : > { %v4785_v1 = vpop.f32.mrf.mxu3 }
 0x96a   : > { %v4787_v49 = vpop.f32.mrf.mxu3 }
 0x96b   : > { %v5305_v52 = vpack.c.bf16 %v4787_v49, %v4785_v1  ;;  %v12964_v49 = vld [vmem:[%s16855_s10] sm:$0xff] }
 0x96d   : > { %5362 = vmatmul.bf16.vlgmr.msrb.gmra.mxu0 %v5305_v52  ;;  %v12965_v52 = vld [vmem:[%s16855_s10 + $0x8] sm:$0xff] }
 0x972   : > { %v4790_v56 = vpop.f32.mrf.mxu3 }
 0x97a   : > { %v4792_v35 = vpop.f32.mrf.mxu3 }
 0x97b   : > { %v5387_v42 = vpack.c.bf16 %v4792_v35, %v4790_v56  ;;  %v12983_v56 = vld [vmem:[%s16858_s13 + $0x2b8] sm:$0xff] }
 0x97c   : > { %v12975_v35 = vld [vmem:[%s16858_s13 + $0x278] sm:$0xff]  ;;  %5756 = vmatpush.bf16.msra.mxu2 %v12983_v56 }
 0x97d   : > { %5444 = vmatmul.bf16.vlgmr.msrb.gmra.mxu2 %v5387_v42  ;;  %v12991_v42 = vld [vmem:[%s16858_s13 + $0x2f8] sm:$0xff]  ;;  %5833 = vmatpush.bf16.msrb.mxu3 %v12975_v35 }
 0x982   : > { %v4795_v18 = vpop.f32.mrf.mxu3 }
 0x98a   : > { %v4797_v55 = vpop.f32.mrf.mxu3 }
 0x98b   : > { %v5469_v25 = vpack.c.bf16 %v4797_v55, %v4795_v18  ;;  %v12982_v18 = vld [vmem:[%s16858_s13 + $0x2b0] sm:$0xff] }
 0x98c   : > { %v12974_v55 = vld [vmem:[%s16858_s13 + $0x270] sm:$0xff]  ;;  %5757 = vmatpush.bf16.msra.mxu2 %v12982_v18  ;;  %v12992_v18 = vld [vmem:[%s16858_s13 + $0x300] sm:$0xff] }
 0x98d   : > { %5526 = vmatmul.bf16.vlgmr.msra.gmra.mxu3 %v5469_v25  ;;  %v12990_v25 = vld [vmem:[%s16858_s13 + $0x2f0] sm:$0xff] }
 0x98e   : > { %5834 = vmatpush.bf16.msrb.mxu3 %v12974_v55 }
 0x990   : > { %v4955_v34 = vpop.f32.mrf.mxu2 }
 0x998   : > { %v4957_v15 = vpop.f32.mrf.mxu2 }
 0x99a   : > { %v4893_v21 = vpop.f32.mrf.mxu0 }
 0x99b   : > { %v4956_v20 = vadd.f32 %v4955_v34, %v4893_v21  ;;  %v12999_v21 = vld [vmem:[%s16858_s13 + $0x338] sm:$0xff]  ;;  %v12998_v34 = vld [vmem:[%s16858_s13 + $0x330] sm:$0xff] }
 0x99c   : > { %6053 = vmatpush.bf16.msra.mxu1 %v12999_v21 }
 0x9a0   : > { %6054 = vmatpush.bf16.msra.mxu1 %v12998_v34 }
 0x9a2   : > { %v4895_v47 = vpop.f32.mrf.mxu0 }
 0x9a3   : > { %v4958_v32 = vadd.f32 %v4957_v15, %v4895_v47  ;;  %v12981_v47 = vld [vmem:[%s16858_s13 + $0x2a8] sm:$0xff] }
 0x9a4   : > { %v12973_v15 = vld [vmem:[%s16858_s13 + $0x268] sm:$0xff]  ;;  %5758 = vmatpush.bf16.msra.mxu2 %v12981_v47 }
 0x9a5   : > { %5835 = vmatpush.bf16.msrb.mxu3 %v12973_v15 }
 0x9aa   : > { %v5035_v63 = vpop.f32.mrf.mxu0 }
 0x9ab   : > { %v5040_v51 = vadd.f32 %v5035_v63, %v4956_v20  ;;  %v12989_v63 = vld [vmem:[%s16858_s13 + $0x2e8] sm:$0xff]  ;;  %v12987_v20 = vld [vmem:[%s16858_s13 + $0x2d8] sm:$0xff] }
 0x9b2   : > { %v5037_v17 = vpop.f32.mrf.mxu0 }
 0x9b3   : > { %v5041_v3 = vadd.f32 %v5037_v17, %v4958_v32  ;;  %v12980_v17 = vld [vmem:[%s16858_s13 + $0x2a0] sm:$0xff] }
 0x9b4   : > { %5759 = vmatpush.bf16.msra.mxu2 %v12980_v17 }
 0x9c0   : > { %v5117_v43 = vpop.f32.mrf.mxu2 }
 0x9c1   : > { %v5122_v48 = vadd.f32 %v5117_v43, %v5040_v51  ;;  %v12997_v43 = vld [vmem:[%s16858_s13 + $0x328] sm:$0xff]  ;;  %v15442_v51 = vpop.f32.mrf.mxu1 }
 0x9c2   : > { %6055 = vmatpush.bf16.msra.mxu1 %v12997_v43  ;;  %16877 = vst [vmem:[#allocation12_spill] sm:$0xff] %v15442_v51 }
 0x9c8   : > { %v5119_v11 = vpop.f32.mrf.mxu2 }
 0x9c9   : > { %v5123_v5 = vadd.f32 %v5119_v11, %v5041_v3  ;;  %v12972_v11 = vld [vmem:[%s16858_s13 + $0x260] sm:$0xff]  ;;  %v13256_v3 = vmov 0.0  }
 0x9ca   : > { %v5199_v37 = vpop.f32.mrf.mxu0  ;;  %5836 = vmatpush.bf16.msrb.mxu3 %v12972_v11  ;;  %5623 = vst [vmem:[#allocation3 + $0x10] sm:$0xff] %v13256_v3 }
 0x9cb   : > { %v5204_v50 = vadd.f32 %v5199_v37, %v5122_v48  ;;  %v12988_v37 = vld [vmem:[%s16858_s13 + $0x2e0] sm:$0xff]  ;;  %v12978_v48 = vld [vmem:[%s16858_s13 + $0x290] sm:$0xff]  ;;  %5624 = vst [vmem:[#allocation3 + $0x18] sm:$0x3] %v13256_v3 }
 0x9cc   : > { %5621 = vst [vmem:[#allocation3] sm:$0xff] %v13256_v3 }
 0x9cd   : > { %5622 = vst [vmem:[#allocation3 + $0x8] sm:$0x3] %v13256_v3 }
 0x9ce   : > { %5625 = vst [vmem:[#allocation3 + $0x20] sm:$0xff] %v13256_v3 }
 0x9cf   : > { %5626 = vst [vmem:[#allocation3 + $0x28] sm:$0x3] %v13256_v3 }
 0x9d0   : > { %5627 = vst [vmem:[#allocation3 + $0x30] sm:$0xff] %v13256_v3 }
 0x9d1   : > { %5628 = vst [vmem:[#allocation3 + $0x38] sm:$0x3] %v13256_v3 }
 0x9d2   : > { %v5201_v2 = vpop.f32.mrf.mxu0  ;;  %5629 = vst [vmem:[#allocation3 + $0x40] sm:$0xff] %v13256_v3 }
 0x9d3   : > { %v5205_v57 = vadd.f32 %v5201_v2, %v5123_v5  ;;  %v12979_v2 = vld [vmem:[%s16858_s13 + $0x298] sm:$0xff]  ;;  %5630 = vst [vmem:[#allocation3 + $0x48] sm:$0x3] %v13256_v3 }
 0x9d4   : > { %5760 = vmatpush.bf16.msra.mxu2 %v12979_v2  ;;  %5631 = vst [vmem:[#allocation3 + $0x50] sm:$0xff] %v13256_v3  ;;  %v5862_v56 = vld [vmem:[#allocation3 + $0x2] sm:$0xff] }
 0x9d5   : > { %5632 = vst [vmem:[#allocation3 + $0x58] sm:$0x3] %v13256_v3 }
 0x9d6   : > { %5633 = vst [vmem:[#allocation3 + $0x60] sm:$0xff] %v13256_v3 }
 0x9d7   : > { %5634 = vst [vmem:[#allocation3 + $0x68] sm:$0x3] %v13256_v3 }
 0x9d8   : > { %5761 = vmatpush.bf16.msra.mxu2 %v12978_v48  ;;  %5635 = vst [vmem:[#allocation3 + $0x70] sm:$0xff] %v13256_v3 }
 0x9d9   : > { %5636 = vst [vmem:[#allocation3 + $0x78] sm:$0x3] %v13256_v3 }
 0x9da   : > { %5637 = vst [vmem:[#allocation3 + $0x80] sm:$0xff] %v13256_v3 }
 0x9db   : > { %5638 = vst [vmem:[#allocation3 + $0x88] sm:$0x3] %v13256_v3 }
 0x9dc   : > { %5639 = vst [vmem:[#allocation3 + $0x90] sm:$0xff] %v13256_v3 }
 0x9dd   : > { %5640 = vst [vmem:[#allocation3 + $0x98] sm:$0x3] %v13256_v3 }
 0x9de   : > { %6967 = vst [vmem:[#allocation2] sm:$0xff] %v13256_v3 }
 0x9df   : > { %6968 = vst [vmem:[#allocation2 + $0x8] sm:$0xff] %v13256_v3 }
 0x9e0   : > { %v5281_v6 = vpop.f32.mrf.mxu2  ;;  %6969 = vst [vmem:[#allocation2 + $0x10] sm:$0x3] %v13256_v3 }
 0x9e1   : > { %v5286_v54 = vadd.f32 %v5281_v6, %v5204_v50  ;;  %v12966_v6 = vld [vmem:[%s16855_s10 + $0x10] sm:$0xff]  ;;  %v12977_v50 = vld [vmem:[%s16858_s13 + $0x288] sm:$0xff]  ;;  %6970 = vst [vmem:[#allocation2 + $0x18] sm:$0xff] %v13256_v3 }
 0x9e2   : > { %5762 = vmatpush.bf16.msra.mxu2 %v12977_v50  ;;  %6971 = vst [vmem:[#allocation2 + $0x20] sm:$0xff] %v13256_v3 }
 0x9e3   : > { %6972 = vst [vmem:[#allocation2 + $0x28] sm:$0x3] %v13256_v3 }
 0x9e4   : > { %6973 = vst [vmem:[#allocation2 + $0x30] sm:$0xff] %v13256_v3 }
 0x9e5   : > { %6974 = vst [vmem:[#allocation2 + $0x38] sm:$0xff] %v13256_v3 }
 0x9e6   : > { %6975 = vst [vmem:[#allocation2 + $0x40] sm:$0x3] %v13256_v3 }
 0x9e7   : > { %6976 = vst [vmem:[#allocation2 + $0x48] sm:$0xff] %v13256_v3 }
 0x9e8   : > { %v5283_v24 = vpop.f32.mrf.mxu2  ;;  %6977 = vst [vmem:[#allocation2 + $0x50] sm:$0xff] %v13256_v3 }
 0x9e9   : > { %v5287_v59 = vadd.f32 %v5283_v24, %v5205_v57  ;;  %v12971_v24 = vld [vmem:[%s16858_s13 + $0x258] sm:$0xff]  ;;  %v12996_v57 = vld [vmem:[%s16858_s13 + $0x320] sm:$0xff]  ;;  %6978 = vst [vmem:[#allocation2 + $0x58] sm:$0x3] %v13256_v3 }
 0x9ea   : > { %v5363_v23 = vpop.f32.mrf.mxu0  ;;  %5837 = vmatpush.bf16.msrb.mxu3 %v12971_v24  ;;  %6056 = vmatpush.bf16.msra.mxu1 %v12996_v57  ;;  %6979 = vst [vmem:[#allocation2 + $0x60] sm:$0xff] %v13256_v3 }
 0x9eb   : > { %v5368_v26 = vadd.f32 %v5363_v23, %v5286_v54  ;;  %v12967_v23 = vld [vmem:[%s16855_s10 + $0x18] sm:$0xff]  ;;  %v12970_v54 = vld [vmem:[%s16858_s13 + $0x250] sm:$0xff]  ;;  %6980 = vst [vmem:[#allocation2 + $0x68] sm:$0xff] %v13256_v3 }
 0x9ec   : > { %6981 = vst [vmem:[#allocation2 + $0x70] sm:$0x3] %v13256_v3 }
 0x9ed   : > { %6982 = vst [vmem:[#allocation2 + $0x78] sm:$0xff] %v13256_v3 }
 0x9ee   : > { %5838 = vmatpush.bf16.msrb.mxu3 %v12970_v54  ;;  %6983 = vst [vmem:[#allocation2 + $0x80] sm:$0xff] %v13256_v3  ;;  %v13014_v54 = vld [vmem:[%s16858_s13 + $0x3b0] sm:$0xff] }
 0x9ef   : > { %6984 = vst [vmem:[#allocation2 + $0x88] sm:$0x3] %v13256_v3 }
 0x9f0   : > { %6985 = vst [vmem:[#allocation2 + $0x90] sm:$0xff] %v13256_v3 }
 0x9f1   : > { %6986 = vst [vmem:[#allocation2 + $0x98] sm:$0xff] %v13256_v3 }
 0x9f2   : > { %v5365_v14 = vpop.f32.mrf.mxu0  ;;  %6987 = vst [vmem:[#allocation2 + $0xa0] sm:$0x3] %v13256_v3 }
 0x9f3   : > { %v5369_v13 = vadd.f32 %v5365_v14, %v5287_v59  ;;  %v12985_v14 = vld [vmem:[%s16858_s13 + $0x2c8] sm:$0xff]  ;;  %v12995_v59 = vld [vmem:[%s16858_s13 + $0x318] sm:$0xff]  ;;  %6988 = vst [vmem:[#allocation2 + $0xa8] sm:$0xff] %v13256_v3 }
 0x9f4   : > { %6057 = vmatpush.bf16.msra.mxu1 %v12995_v59  ;;  %6989 = vst [vmem:[#allocation2 + $0xb0] sm:$0xff] %v13256_v3 }
 0x9f5   : > { %6990 = vst [vmem:[#allocation2 + $0xb8] sm:$0x3] %v13256_v3 }
 0x9f6   : > { %6991 = vst [vmem:[#allocation2 + $0xc0] sm:$0xff] %v13256_v3 }
 0x9f7   : > { %6992 = vst [vmem:[#allocation2 + $0xc8] sm:$0xff] %v13256_v3 }
 0x9f8   : > { %6993 = vst [vmem:[#allocation2 + $0xd0] sm:$0x3] %v13256_v3 }
 0x9f9   : > { %6994 = vst [vmem:[#allocation2 + $0xd8] sm:$0xff] %v13256_v3 }
 0x9fa   : > { %6995 = vst [vmem:[#allocation2 + $0xe0] sm:$0xff] %v13256_v3 }
 0x9fb   : > { %6996 = vst [vmem:[#allocation2 + $0xe8] sm:$0x3] %v13256_v3 }
 0x9fc   : > { %6997 = vst [vmem:[#allocation2 + $0xf0] sm:$0xff] %v13256_v3 }
 0x9fd   : > { %6998 = vst [vmem:[#allocation2 + $0xf8] sm:$0xff] %v13256_v3 }
 0x9fe   : > { %6999 = vst [vmem:[#allocation2 + $0x100] sm:$0x3] %v13256_v3 }
 0x9ff   : > { %7000 = vst [vmem:[#allocation2 + $0x108] sm:$0xff] %v13256_v3 }
 0xa00   : > { %v5445_v12 = vpop.f32.mrf.mxu2  ;;  %7001 = vst [vmem:[#allocation2 + $0x110] sm:$0xff] %v13256_v3 }
 0xa01   : > { %v5450_v44 = vadd.f32 %v5445_v12, %v5368_v26  ;;  %v15444_v12 = vpop.f32.mrf.mxu1  ;;  %v12969_v26 = vld [vmem:[%s16858_s13 + $0x248] sm:$0xff]  ;;  %7002 = vst [vmem:[#allocation2 + $0x118] sm:$0x3] %v13256_v3 }
 0xa02   : > { %16878 = vst [vmem:[#allocation13_spill] sm:$0xff] %v15444_v12  ;;  %5839 = vmatpush.bf16.msrb.mxu3 %v12969_v26  ;;  %v13005_v26 = vld [vmem:[%s16858_s13 + $0x368] sm:$0xff] }
 0xa03   : > { %7003 = vst [vmem:[#allocation2 + $0x120] sm:$0xff] %v13256_v3 }
 0xa04   : > { %7004 = vst [vmem:[#allocation2 + $0x128] sm:$0xff] %v13256_v3 }
 0xa05   : > { %7005 = vst [vmem:[#allocation2 + $0x130] sm:$0x3] %v13256_v3 }
 0xa06   : > { %7006 = vst [vmem:[#allocation2 + $0x138] sm:$0xff] %v13256_v3 }
 0xa07   : > { %7007 = vst [vmem:[#allocation2 + $0x140] sm:$0xff] %v13256_v3 }
 0xa08   : > { %v5447_v41 = vpop.f32.mrf.mxu2  ;;  %7008 = vst [vmem:[#allocation2 + $0x148] sm:$0x3] %v13256_v3 }
 0xa09   : > { %v5451_v53 = vadd.f32 %v5447_v41, %v5369_v13  ;;  %v15446_v32 = vpop.f32.mrf.mxu1  ;;  %v12976_v13 = vld [vmem:[%s16858_s13 + $0x280] sm:$0xff]  ;;  %7009 = vst [vmem:[#allocation2 + $0x150] sm:$0xff] %v13256_v3 }
 0xa0a   : > { %16879 = vst [vmem:[#allocation14_spill] sm:$0xff] %v15446_v32  ;;  %5763 = vmatpush.bf16.msra.mxu2 %v12976_v13 }
 0xa0b   : > { %7010 = vst [vmem:[#allocation2 + $0x158] sm:$0xff] %v13256_v3 }
 0xa0c   : > { %7011 = vst [vmem:[#allocation2 + $0x160] sm:$0x3] %v13256_v3 }
 0xa0d   : > { %7012 = vst [vmem:[#allocation2 + $0x168] sm:$0xff] %v13256_v3 }
 0xa0e   : > { %7013 = vst [vmem:[#allocation2 + $0x170] sm:$0xff] %v13256_v3 }
 0xa0f   : > { %7014 = vst [vmem:[#allocation2 + $0x178] sm:$0x3] %v13256_v3 }
 0xa10   : > { %v5527_v19 = vpop.f32.mrf.mxu3  ;;  %7015 = vst [vmem:[#allocation2 + $0x180] sm:$0xff] %v13256_v3 }
 0xa11   : > { %v5532_v61 = vadd.f32 %v5527_v19, %v5450_v44  ;;  %v15456_v5 = vpop.f32.mrf.mxu1  ;;  %v12986_v19 = vld [vmem:[%s16858_s13 + $0x2d0] sm:$0xff]  ;;  %7016 = vst [vmem:[#allocation2 + $0x188] sm:$0xff] %v13256_v3 }
 0xa12   : > { %16880 = vst [vmem:[#allocation15_spill] sm:$0xff] %v15456_v5 }
 0xa13   : > { %v5539_v7 = vadd.f32 %v13186_v22, %v5532_v61  ;;  %v15513_v61 = vld [vmem:[%s16853_s8 + $0x1] ss:$0 sm:$0xff]  ;;  %7017 = vst [vmem:[#allocation2 + $0x190] sm:$0x3] %v13256_v3 }
 0xa14   : > { %v4438_v21 = vadd.f32 %v15513_v61, %v15355_v9  ;;  %v4441_v34 = vadd.f32 %v15513_v61, %v15357_v30  ;;  %v4443_v11 = vadd.f32 %v15513_v61, %v15359_v33  ;;  %v13015_v33 = vld [vmem:[%s16858_s13 + $0x3b8] sm:$0xff]  ;;  %7018 = vst [vmem:[#allocation2 + $0x198] sm:$0xff] %v13256_v3  ;;  %v4448_v57 = vadd.f32 %v15513_v61, %v15363_v45  ;;  %v13004_v45 = vld [vmem:[%s16858_s13 + $0x360] sm:$0xff] }
 0xa15   : > { %v5541_v1 = vmax.f32 %v5539_v7, 0.0  ;;  %v5679_v7 = vld [vmem:[#allocation3 + $0x1] sm:$0xff]  ;;  %7019 = vst [vmem:[#allocation2 + $0x1a0] sm:$0xff] %v13256_v3 }
 0xa16   : > { %7020 = vst [vmem:[#allocation2 + $0x1a8] sm:$0x3] %v13256_v3 }
 0xa18   : > { %v5529_v36 = vpop.f32.mrf.mxu3 }
 0xa19   : > { %v5533_v4 = vadd.f32 %v5529_v36, %v5451_v53  ;;  %v15486_v44 = vpop.f32.mrf.mxu1  ;;  %v4436_v53 = vadd.f32 %v15513_v61, %v15353_v27  ;;  %v12984_v27 = vld [vmem:[%s16858_s13 + $0x2c0] sm:$0xff] }
 0xa1a   : > { %16881 = vst [vmem:[#allocation16_spill] sm:$0xff] %v15486_v44 }
 0xa1b   : > { %v5540_v0 = vadd.f32 %v13186_v22, %v5533_v4 }
 0xa1d   : > { %v5542_v16 = vmax.f32 %v5540_v0, 0.0  ;;  %v12968_v0 = vld [vmem:[%s16858_s13 + $0x240] sm:$0xff] }
 0xa1e   : > { %5840 = vmatpush.bf16.msrb.mxu3 %v12968_v0 }
 0xa1f   : > { %v5551_v8 = vpack.c.bf16 %v5542_v16, %v5541_v1  ;;  %v12994_v1 = vld [vmem:[%s16858_s13 + $0x310] sm:$0xff] }
 0xa20   : > { %6058 = vmatpush.bf16.msra.mxu1 %v12994_v1 }
 0xa21   : > { %5591 = vmatpush.bf16.msra.mxu0 %v5551_v8  ;;  %v15498_v41 = vpop.f32.mrf.mxu1 }
 0xa22   : > { %16882 = vst [vmem:[#allocation17_spill] sm:$0xff] %v15498_v41  ;;  %6281 = vmatpush.bf16.msra.mxu3 %v13015_v33 }
 0xa24   : > { %11610 = vmatmul.msk.bf16.vlgmr.msra.gmra.mxu0 %vm3433_vm4, %v12964_v49  ;;  %v12993_v49 = vld [vmem:[%s16858_s13 + $0x308] sm:$0xff] }
 0xa25   : > { %5939 = vmatpush.bf16.msrb.mxu0 %v12991_v42  ;;  %6059 = vmatpush.bf16.msra.mxu1 %v12993_v49  ;;  %v13013_v49 = vld [vmem:[%s16858_s13 + $0x3a8] sm:$0xff] }
 0xa26   : > { %6282 = vmatpush.bf16.msra.mxu3 %v13014_v54 }
 0xa29   : > { %5940 = vmatpush.bf16.msrb.mxu0 %v12990_v25  ;;  %v15515_v22 = vpop.f32.mrf.mxu1  ;;  %6060 = vmatpush.bf16.msra.mxu1 %v12992_v18  ;;  %v13012_v18 = vld [vmem:[%s16858_s13 + $0x3a0] sm:$0xff] }
 0xa2a   : > { %16883 = vst [vmem:[#allocation18_spill] sm:$0xff] %v15515_v22  ;;  %6283 = vmatpush.bf16.msra.mxu3 %v13013_v49  ;;  %v13017_v49 = vld [vmem:[%s16858_s13 + $0x3c8] sm:$0xff] }
 0xa2d   : > { %5941 = vmatpush.bf16.msrb.mxu0 %v12989_v63 }
 0xa2e   : > { %6284 = vmatpush.bf16.msra.mxu3 %v13012_v18  ;;  %v13016_v18 = vld [vmem:[%s16858_s13 + $0x3c0] sm:$0xff] }
 0xa31   : > { %5942 = vmatpush.bf16.msrb.mxu0 %v12988_v37  ;;  %v15544_v8 = vpop.f32.mrf.mxu1  ;;  %v4446_v37 = vadd.f32 %v15513_v61, %v15361_v29  ;;  %v13023_v29 = vld [vmem:[%s16858_s13 + $0x3f8] sm:$0xff] }
 0xa32   : > { %16884 = vst [vmem:[#allocation19_spill] sm:$0xff] %v15544_v8 }
 0xa34   : > { %11611 = vmatmul.msk.bf16.gmra.mxu0 %vm3433_vm4, %v12965_v52 }
 0xa35   : > { %5943 = vmatpush.bf16.msrb.mxu0 %v12987_v20 }
 0xa39   : > { %5944 = vmatpush.bf16.msrb.mxu0 %v12986_v19  ;;  %v15573_v47 = vpop.f32.mrf.mxu1  ;;  %v13022_v19 = vld [vmem:[%s16858_s13 + $0x3f0] sm:$0xff] }
 0xa3a   : > { %16885 = vst [vmem:[#allocation20_spill] sm:$0xff] %v15573_v47 }
 0xa3d   : > { %5945 = vmatpush.bf16.msrb.mxu0 %v12985_v14 }
 0xa41   : > { %5946 = vmatpush.bf16.msrb.mxu0 %v12984_v27  ;;  %v15594_v17 = vpop.f32.mrf.mxu1  ;;  %v4451_v27 = vadd.f32 %v15513_v61, %v15365_v38 }
 0xa42   : > { %16886 = vst [vmem:[#allocation21_spill] sm:$0xff] %v15594_v17 }
 0xa44   : > { %11612 = vmatmul.msk.bf16.gmra.mxu0 %vm3433_vm4, %v12966_v6  ;;  %v13007_v6 = vld [vmem:[%s16858_s13 + $0x378] sm:$0xff] }
 0xa45   : > { %6167 = vmatpush.bf16.msrb.mxu2 %v13007_v6  ;;  %6396 = vmatpush.bf16.msra.mxu0 %v13023_v29 }
 0xa49   : > { %v15626_v48 = vpop.f32.mrf.mxu1  ;;  %6397 = vmatpush.bf16.msra.mxu0 %v13022_v19  ;;  %v13001_v19 = vld [vmem:[%s16858_s13 + $0x348] sm:$0xff] }
 0xa4a   : > { %16887 = vst [vmem:[#allocation22_spill] sm:$0xff] %v15626_v48 }
 0xa51   : > { %v15657_v59 = vpop.f32.mrf.mxu1 }
 0xa52   : > { %16888 = vst [vmem:[#allocation23_spill] sm:$0xff] %v15657_v59 }
 0xa54   : > { %11613 = vmatmul.msk.bf16.gmra.mxu0 %vm3433_vm4, %v12967_v23  ;;  %v13006_v23 = vld [vmem:[%s16858_s13 + $0x370] sm:$0xff] }
 0xa55   : > { %6168 = vmatpush.bf16.msrb.mxu2 %v13006_v23 }
 0xa59   : > { %6169 = vmatpush.bf16.msrb.mxu2 %v13005_v26  ;;  %v15713_v6 = vpop.f32.mrf.mxu1  ;;  %v13028_v26 = vld [vmem:[%s16858_s13 + $0x420] sm:$0xff] }
 0xa5a   : > { %16889 = vst [vmem:[#allocation24_spill] sm:$0xff] %v15713_v6 }
 0xa5d   : > { %6170 = vmatpush.bf16.msrb.mxu2 %v13004_v45 }
 0xaa1   : > { %v5593_v36 = vpop.f32.mrf.mxu0 }
 0xaa2   : > { %v15528_v4 = vadd.f32 %v5593_v36, %v4436_v53 }
 0xaa4   : > { %5642 = vst [vmem:[#allocation3 + $0x11] sm:$0xff] %v15528_v4  ;;  %v5704_v16 = vpack.c.bf16 %v15528_v4, %v5679_v7 }
 0xaa6   : > { %5764 = vmatmul.bf16.vlgmr.msra.gmra.mxu2 %v5704_v16 }
 0xaa9   : > { %v5595_v52 = vpop.f32.mrf.mxu0 }
 0xaaa   : > { %v15578_v63 = vadd.f32 %v5595_v52, %v4438_v21 }
 0xaab   : > { %v15555_v35 = vld [vmem:[#allocation3 + $0x10] sm:$0xff] }
 0xaac   : > { %v15557_v42 = vld [vmem:[#allocation3 + $0x12] sm:$0xff]  ;;  %v5675_v55 = vpack.c.bf16 %v15555_v35, %v13256_v3  ;;  %5643 = vst [vmem:[#allocation3 + $0x21] sm:$0xff] %v15578_v63 }
 0xaad   : > { %v5887_v25 = vpack.c.bf16 %v15557_v42, %v5862_v56  ;;  %v13021_v56 = vld [vmem:[%s16858_s13 + $0x3e8] sm:$0xff] }
 0xaae   : > { %5841 = vmatmul.bf16.vlgmr.msrb.gmra.mxu3 %v5675_v55  ;;  %6398 = vmatpush.bf16.msra.mxu0 %v13021_v56  ;;  %v13020_v55 = vld [vmem:[%s16858_s13 + $0x3e0] sm:$0xff]  ;;  %v15756_v56 = vpop.f32.mrf.mxu1 }
 0xaaf   : > { %5947 = vmatmul.bf16.vlgmr.msrb.gmra.mxu0 %v5887_v25  ;;  %v13030_v25 = vld [vmem:[%s16858_s13 + $0x430] sm:$0xff]  ;;  %16890 = vst [vmem:[#allocation25_spill] sm:$0xff] %v15756_v56 }
 0xab1   : > { %v5598_v15 = vpop.f32.mrf.mxu0 }
 0xab2   : > { %v15580_v43 = vadd.f32 %v5598_v15, %v4441_v34  ;;  %v13003_v34 = vld [vmem:[%s16858_s13 + $0x358] sm:$0xff]  ;;  %v13002_v15 = vld [vmem:[%s16858_s13 + $0x350] sm:$0xff]  ;;  %6399 = vmatpush.bf16.msra.mxu0 %v13020_v55 }
 0xab3   : > { %v5977_v13 = vld [vmem:[#allocation3 + $0x20] sm:$0xff]  ;;  %6171 = vmatpush.bf16.msrb.mxu2 %v13003_v34  ;;  %v13025_v34 = vld [vmem:[%s16858_s13 + $0x408] sm:$0xff] }
 0xab4   : > { %v15586_v9 = vpack.c.bf16 %v15580_v43, %v15578_v63  ;;  %5644 = vst [vmem:[#allocation3 + $0x31] sm:$0xff] %v15580_v43  ;;  %v6001_v53 = vpack.c.bf16 %v5977_v13, %v15555_v35  ;;  %v15660_v7 = vld [vmem:[#allocation3 + $0x22] sm:$0xff] }
 0xab5   : > { %v13031_v35 = vld [vmem:[%s16858_s13 + $0x438] sm:$0xff]  ;;  %v13026_v55 = vld [vmem:[%s16858_s13 + $0x410] sm:$0xff] }
 0xab6   : > { %5769 = vmatmul.bf16.gmra.mxu2 %v15586_v9  ;;  %6061 = vmatmul.bf16.vlgmr.msra.gmra.mxu1 %v6001_v53 }
 0xab7   : > { %6510 = vmatpush.bf16.msrb.mxu1 %v13031_v35  ;;  %6172 = vmatpush.bf16.msrb.mxu2 %v13002_v15  ;;  %v13008_v35 = vld [vmem:[%s16858_s13 + $0x380] sm:$0xff] }
 0xab9   : > { %v5600_v30 = vpop.f32.mrf.mxu0 }
 0xaba   : > { %v15612_v24 = vadd.f32 %v5600_v30, %v4443_v11  ;;  %v13011_v30 = vld [vmem:[%s16858_s13 + $0x398] sm:$0xff] }
 0xabb   : > { %v5653_v36 = vld [vmem:[#allocation3 + $0x30] sm:$0xff]  ;;  %v13019_v11 = vld [vmem:[%s16858_s13 + $0x3d8] sm:$0xff]  ;;  %6511 = vmatpush.bf16.msrb.mxu1 %v13030_v25  ;;  %6285 = vmatpush.bf16.msra.mxu3 %v13011_v30  ;;  %v6115_v25 = vpack.c.bf16 %v15578_v63, %v15528_v4 }
 0xabc   : > { %5645 = vst [vmem:[#allocation3 + $0x41] sm:$0xff] %v15612_v24  ;;  %v15662_v0 = vld [vmem:[#allocation3 + $0x32] sm:$0xff]  ;;  %v15666_v1 = vpack.c.bf16 %v5653_v36, %v5977_v13  ;;  %6400 = vmatpush.bf16.msra.mxu0 %v13019_v11  ;;  %6173 = vmatpush.bf16.msrb.mxu2 %v13001_v19 }
 0xabd   : > { %v15670_v16 = vpack.c.bf16 %v15662_v0, %v15660_v7 }
 0xabe   : > { %5846 = vmatmul.bf16.gmra.mxu3 %v15666_v1 }
 0xabf   : > { %5952 = vmatmul.bf16.gmra.mxu0 %v15670_v16 }
 0xac1   : > { %v5603_v2 = vpop.f32.mrf.mxu0 }
 0xac2   : > { %v15614_v20 = vadd.f32 %v5603_v2, %v4446_v37  ;;  %v4453_v37 = vadd.f32 %v15513_v61, %v15367_v28  ;;  %v13029_v2 = vld [vmem:[%s16858_s13 + $0x428] sm:$0xff]  ;;  %v13010_v61 = vld [vmem:[%s16858_s13 + $0x390] sm:$0xff] }
 0xac3   : > { %v5979_v29 = vld [vmem:[#allocation3 + $0x40] sm:$0xff]  ;;  %6512 = vmatpush.bf16.msrb.mxu1 %v13029_v2  ;;  %6286 = vmatpush.bf16.msra.mxu3 %v13010_v61  ;;  %v13024_v2 = vld [vmem:[%s16858_s13 + $0x400] sm:$0xff]  ;;  %v6116_v61 = vpack.c.bf16 %v15612_v24, %v15580_v43 }
 0xac4   : > { %v15631_v50 = vpack.c.bf16 %v15614_v20, %v15612_v24  ;;  %5646 = vst [vmem:[#allocation3 + $0x51] sm:$0xff] %v15614_v20  ;;  %v15736_v45 = vld [vmem:[#allocation3 + $0x42] sm:$0xff] }
 0xac5   : > { %v13038_v43 = vld [vmem:[%s16858_s13 + $0x470] sm:$0xff] }
 0xac6   : > { %5774 = vmatmul.bf16.gmra.mxu2 %v15631_v50 }
 0xac7   : > { %6513 = vmatpush.bf16.msrb.mxu1 %v13028_v26 }
 0xac9   : > { %v5605_v14 = vpop.f32.mrf.mxu0 }
 0xaca   : > { %v15651_v3 = vadd.f32 %v5605_v14, %v4448_v57  ;;  %v13018_v57 = vld [vmem:[%s16858_s13 + $0x3d0] sm:$0xff]  ;;  %v6002_v14 = vpack.c.bf16 %v5979_v29, %v5653_v36  ;;  %v13009_v36 = vld [vmem:[%s16858_s13 + $0x388] sm:$0xff] }
 0xacb   : > { %v5655_v23 = vld [vmem:[#allocation3 + $0x50] sm:$0xff]  ;;  %6401 = vmatpush.bf16.msra.mxu0 %v13018_v57  ;;  %6287 = vmatpush.bf16.msra.mxu3 %v13009_v36  ;;  %v6230_v36 = vpack.c.bf16 %v15736_v45, %v15662_v0  ;;  %v13033_v0 = vld [vmem:[%s16858_s13 + $0x448] sm:$0xff] }
 0xacc   : > { %5647 = vst [vmem:[#allocation3 + $0x61] sm:$0xff] %v15651_v3  ;;  %v15724_v28 = vld [vmem:[#allocation3 + $0x52] sm:$0xff]  ;;  %v15738_v13 = vpack.c.bf16 %v5655_v23, %v5979_v29  ;;  %6066 = vmatmul.bf16.gmra.mxu1 %v6002_v14  ;;  %v6117_v24 = vpack.c.bf16 %v15651_v3, %v15614_v20  ;;  %v13035_v20 = vld [vmem:[%s16858_s13 + $0x458] sm:$0xff] }
 0xacd   : > { %v15742_v53 = vpack.c.bf16 %v15724_v28, %v15736_v45 }
 0xace   : > { %5851 = vmatmul.bf16.gmra.mxu3 %v15738_v13 }
 0xacf   : > { %5957 = vmatmul.bf16.gmra.mxu0 %v15742_v53  ;;  %6288 = vmatpush.bf16.msra.mxu3 %v13008_v35 }
 0xad0   : > { %6402 = vmatpush.bf16.msra.mxu0 %v13017_v49 }
 0xad1   : > { %v5608_v52 = vpop.f32.mrf.mxu0 }
 0xad2   : > { %v15680_v38 = vadd.f32 %v5608_v52, %v4451_v27  ;;  %v13000_v27 = vld [vmem:[%s16858_s13 + $0x340] sm:$0xff]  ;;  %v13027_v52 = vld [vmem:[%s16858_s13 + $0x418] sm:$0xff] }
 0xad3   : > { %6514 = vmatpush.bf16.msrb.mxu1 %v13027_v52  ;;  %6174 = vmatpush.bf16.msrb.mxu2 %v13000_v27  ;;  %v5981_v15 = vld [vmem:[#allocation3 + $0x60] sm:$0xff]  ;;  %v13039_v27 = vld [vmem:[%s16858_s13 + $0x478] sm:$0xff] }
 0xad4   : > { %5648 = vst [vmem:[#allocation3 + $0x71] sm:$0xff] %v15680_v38  ;;  %v15697_v21 = vpack.c.bf16 %v15680_v38, %v15651_v3  ;;  %6403 = vmatpush.bf16.msra.mxu0 %v13016_v18  ;;  %v5868_v4 = vld [vmem:[#allocation3 + $0x62] sm:$0xff] }
 0xad5   : > { %v13034_v3 = vld [vmem:[%s16858_s13 + $0x450] sm:$0xff] }
 0xad6   : > { %5779 = vmatmul.bf16.gmra.mxu2 %v15697_v21 }
 0xad7   : > { %6515 = vmatpush.bf16.msrb.mxu1 %v13026_v55  ;;  %6624 = vmatpush.bf16.msra.mxu2 %v13039_v27 }
 0xad9   : > { %v5610_v33 = vpop.f32.mrf.mxu0 }
 0xada   : > { %v15719_v54 = vadd.f32 %v5610_v33, %v4453_v37  ;;  %v15774_v37 = vpop.f32.mrf.mxu1  ;;  %v6003_v33 = vpack.c.bf16 %v5981_v15, %v5655_v23  ;;  %v6229_v23 = vpack.c.bf16 %v15660_v7, %v15557_v42  ;;  %v13037_v42 = vld [vmem:[%s16858_s13 + $0x468] sm:$0xff] }
 0xadb   : > { %v5657_v30 = vld [vmem:[#allocation3 + $0x70] sm:$0xff]  ;;  %16891 = vst [vmem:[#allocation26_spill] sm:$0xff] %v15774_v37  ;;  %6516 = vmatpush.bf16.msrb.mxu1 %v13025_v34  ;;  %6625 = vmatpush.bf16.msra.mxu2 %v13038_v43 }
 0xadc   : > { %5649 = vst [vmem:[#allocation3 + $0x81] sm:$0xff] %v15719_v54  ;;  %v5869_v11 = vld [vmem:[#allocation3 + $0x72] sm:$0xff]  ;;  %v5678_v63 = vpack.c.bf16 %v5657_v30, %v5981_v15  ;;  %6071 = vmatmul.bf16.gmra.mxu1 %v6003_v33  ;;  %v6118_v52 = vpack.c.bf16 %v15719_v54, %v15680_v38 }
 0xadd   : > { %v15779_v29 = vpack.c.bf16 %v5869_v11, %v5868_v4 }
 0xade   : > { %5856 = vmatmul.bf16.gmra.mxu3 %v5678_v63 }
 0xadf   : > { %6517 = vmatpush.bf16.msrb.mxu1 %v13024_v2  ;;  %5962 = vmatmul.bf16.gmra.mxu0 %v15779_v29 }
 0xae0   : > { %6626 = vmatpush.bf16.msra.mxu2 %v13037_v42 }
 0xae2   : > { %v15782_v19 = vpop.f32.mrf.mxu1 }
 0xae3   : > { %16892 = vst [vmem:[#allocation27_spill] sm:$0xff] %v15782_v19  ;;  %v5983_v57 = vld [vmem:[#allocation3 + $0x80] sm:$0xff] }
 0xae4   : > { %v6004_v26 = vpack.c.bf16 %v5983_v57, %v5657_v30  ;;  %v6211_v18 = vld [vmem:[#allocation3 + $0x82] sm:$0xff] }
 0xae5   : > { %v6232_v55 = vpack.c.bf16 %v6211_v18, %v5869_v11 }
 0xae6   : > { %6175 = vmatmul.bf16.vlgmr.msrb.gmra.mxu2 %v6115_v25  ;;  %v6347_v25 = vpack.c.bf16 0.0, %v5983_v57 }
 0xaea   : > { %v15786_v14 = vpop.f32.mrf.mxu1 }
 0xaeb   : > { %16893 = vst [vmem:[#allocation28_spill] sm:$0xff] %v15786_v14 }
 0xaec   : > { %6076 = vmatmul.bf16.gmra.mxu1 %v6004_v26 }
 0xaee   : > { %6289 = vmatmul.bf16.vlgmr.msra.gmra.mxu3 %v6229_v23 }
 0xaef   : > { %6404 = vmatmul.bf16.vlgmr.msra.gmra.mxu0 %v15666_v1  ;;  %v13036_v1 = vld [vmem:[%s16858_s13 + $0x460] sm:$0xff] }
 0xaf0   : > { %6627 = vmatpush.bf16.msra.mxu2 %v13036_v1 }
 0xaf2   : > { %v15802_v7 = vpop.f32.mrf.mxu1 }
 0xaf3   : > { %16894 = vst [vmem:[#allocation29_spill] sm:$0xff] %v15802_v7 }
 0xaf4   : > { %6628 = vmatpush.bf16.msra.mxu2 %v13035_v20 }
 0xaf6   : > { %6180 = vmatmul.bf16.gmra.mxu2 %v6116_v61 }
 0xaf8   : > { %6629 = vmatpush.bf16.msra.mxu2 %v13034_v3 }
 0xafa   : > { %v15817_v49 = vpop.f32.mrf.mxu1 }
 0xafb   : > { %16895 = vst [vmem:[#allocation30_spill] sm:$0xff] %v15817_v49 }
 0xafc   : > { %6518 = vmatmul.bf16.vlgmr.msrb.gmra.mxu1 %v15586_v9  ;;  %6630 = vmatpush.bf16.msra.mxu2 %v13033_v0  ;;  %v13032_v9 = vld [vmem:[%s16858_s13 + $0x440] sm:$0xff] }
 0xafe   : > { %6294 = vmatmul.bf16.gmra.mxu3 %v6230_v36 }
 0xaff   : > { %6409 = vmatmul.bf16.gmra.mxu0 %v15738_v13  ;;  %v6231_v13 = vpack.c.bf16 %v5868_v4, %v15724_v28  ;;  %v6440_v4 = vld [vmem:[#allocation3 + $0x91] sm:$0xff] }
 0xb00   : > { %6631 = vmatpush.bf16.msra.mxu2 %v13032_v9  ;;  %v6461_v11 = vpack.c.bf16 %v6440_v4, %v15719_v54 }
 0xb02   : > { %v15827_v45 = vpop.f32.mrf.mxu1 }
 0xb03   : > { %16896 = vst [vmem:[#allocation31_spill] sm:$0xff] %v15827_v45 }
 0xb06   : > { %6185 = vmatmul.bf16.gmra.mxu2 %v6117_v24  ;;  %v6554_v24 = vld [vmem:[#allocation3 + $0x92] sm:$0xff] }
 0xb07   : > { %v6575_v36 = vpack.c.bf16 %v6554_v24, %v6211_v18 }
 0xb0a   : > { %v15831_v38 = vpop.f32.mrf.mxu1 }
 0xb0b   : > { %16897 = vst [vmem:[#allocation32_spill] sm:$0xff] %v15831_v38 }
 0xb0c   : > { %6523 = vmatmul.bf16.gmra.mxu1 %v15631_v50 }
 0xb0e   : > { %6299 = vmatmul.bf16.gmra.mxu3 %v6231_v13 }
 0xb0f   : > { %6414 = vmatmul.bf16.gmra.mxu0 %v5678_v63 }
 0xb12   : > { %v15835_v15 = vpop.f32.mrf.mxu1 }
 0xb13   : > { %16898 = vst [vmem:[#allocation33_spill] sm:$0xff] %v15835_v15 }
 0xb16   : > { %6190 = vmatmul.bf16.gmra.mxu2 %v6118_v52 }
 0xb1c   : > { %6528 = vmatmul.bf16.gmra.mxu1 %v15697_v21 }
 0xb1e   : > { %6304 = vmatmul.bf16.gmra.mxu3 %v6232_v55 }
 0xb1f   : > { %6419 = vmatmul.bf16.gmra.mxu0 %v6347_v25 }
 0xb26   : > { %6632 = vmatmul.bf16.vlgmr.msra.gmra.mxu2 %v15670_v16  ;;  %v15840_v16 = vpop.f32.mrf.mxu1 }
 0xb27   : > { %16899 = vst [vmem:[#allocation34_spill] sm:$0xff] %v15840_v16 }
 0xb29   : > { %v5765_v35 = vpop.f32.mrf.mxu2 }
 0xb2c   : > { %v5948_v50 = vpop.f32.mrf.mxu0  ;;  %6533 = vmatmul.bf16.gmra.mxu1 %v6461_v11 }
 0xb2e   : > { %v15847_v61 = vpop.f32.mrf.mxu1 }
 0xb2f   : > { %16900 = vst [vmem:[#allocation35_spill] sm:$0xff] %v15847_v61 }
 0xb31   : > { %v5842_v34 = vpop.f32.mrf.mxu3  ;;  %v15837_v30 = vpop.f32.mrf.mxu2 }
 0xb32   : > { %v5843_v28 = vadd.f32 %v5842_v34, %v5765_v35 }
 0xb34   : > { %v5968_v2 = vadd.f32 %v5948_v50, %v5843_v28  ;;  %v15845_v63 = vpop.f32.mrf.mxu0 }
 0xb36   : > { %6637 = vmatmul.bf16.gmra.mxu2 %v15742_v53  ;;  %v6062_v23 = vpop.f32.mrf.mxu1 }
 0xb37   : > { %v6082_v53 = vadd.f32 %v6062_v23, %v5968_v2 }
 0xb39   : > { %v5770_v33 = vpop.f32.mrf.mxu2  ;;  %v15850_v26 = vpop.f32.mrf.mxu3 }
 0xb3a   : > { %v5845_v22 = vadd.f32 %v15850_v26, %v15837_v30 }
 0xb3c   : > { %v5953_v27 = vpop.f32.mrf.mxu0 }
 0xb3e   : > { %v15854_v54 = vpop.f32.mrf.mxu1 }
 0xb41   : > { %v15843_v21 = vpop.f32.mrf.mxu2  ;;  %v5847_v42 = vpop.f32.mrf.mxu3 }
 0xb42   : > { %v5848_v1 = vadd.f32 %v5847_v42, %v5770_v33 }
 0xb44   : > { %v15856_v20 = vpop.f32.mrf.mxu0  ;;  %v5970_v3 = vadd.f32 %v5953_v27, %v5848_v1 }
 0xb46   : > { %6642 = vmatmul.bf16.gmra.mxu2 %v15779_v29 }
 0xb49   : > { %v5775_v57 = vpop.f32.mrf.mxu2  ;;  %v15858_v29 = vpop.f32.mrf.mxu3 }
 0xb4a   : > { %v6067_v0 = vpop.f32.mrf.mxu1  ;;  %v5850_v17 = vadd.f32 %v15858_v29, %v15843_v21 }
 0xb4b   : > { %v6084_v9 = vadd.f32 %v6067_v0, %v5970_v3 }
 0xb4c   : > { %v5958_v13 = vpop.f32.mrf.mxu0  ;;  %v5971_v5 = vadd.f32 %v15856_v20, %v5850_v17 }
 0xb51   : > { %v15852_v43 = vpop.f32.mrf.mxu2  ;;  %v5852_v55 = vpop.f32.mrf.mxu3 }
 0xb52   : > { %v15860_v25 = vpop.f32.mrf.mxu1  ;;  %v5853_v34 = vadd.f32 %v5852_v55, %v5775_v57 }
 0xb54   : > { %v5972_v28 = vadd.f32 %v5958_v13, %v5853_v34  ;;  %v5960_v50 = vpop.f32.mrf.mxu0 }
 0xb56   : > { %6647 = vmatmul.bf16.gmra.mxu2 %v6575_v36 }
 0xb59   : > { %v5780_v52 = vpop.f32.mrf.mxu2  ;;  %v5854_v18 = vpop.f32.mrf.mxu3 }
 0xb5a   : > { %v6072_v4 = vpop.f32.mrf.mxu1  ;;  %v5855_v59 = vadd.f32 %v5854_v18, %v15852_v43  ;;  %v5969_v43 = vadd.f32 %v15845_v63, %v5845_v22 }
 0xb5b   : > { %v6086_v11 = vadd.f32 %v6072_v4, %v5972_v28 }
 0xb5c   : > { %v5963_v23 = vpop.f32.mrf.mxu0  ;;  %v5973_v47 = vadd.f32 %v5960_v50, %v5855_v59  ;;  %v6083_v26 = vadd.f32 %v15854_v54, %v5969_v43 }
 0xb61   : > { %v5782_v35 = vpop.f32.mrf.mxu2  ;;  %v5857_v24 = vpop.f32.mrf.mxu3 }
 0xb62   : > { %v6074_v42 = vpop.f32.mrf.mxu1  ;;  %v5858_v1 = vadd.f32 %v5857_v24, %v5780_v52 }
 0xb63   : > { %v6087_v32 = vadd.f32 %v6074_v42, %v5973_v47 }
 0xb64   : > { %v5974_v36 = vadd.f32 %v5963_v23, %v5858_v1  ;;  %v5965_v61 = vpop.f32.mrf.mxu0 }
 0xb69   : > { %v6176_v2 = vpop.f32.mrf.mxu2  ;;  %v5859_v16 = vpop.f32.mrf.mxu3 }
 0xb6a   : > { %v6196_v33 = vadd.f32 %v6176_v2, %v6082_v53  ;;  %v6077_v57 = vpop.f32.mrf.mxu1  ;;  %v5860_v48 = vadd.f32 %v5859_v16, %v5782_v35  ;;  %v6085_v35 = vadd.f32 %v15860_v25, %v5971_v5 }
 0xb6b   : > { %v6088_v13 = vadd.f32 %v6077_v57, %v5974_v36 }
 0xb6c   : > { %v6405_v15 = vpop.f32.mrf.mxu0  ;;  %v5975_v8 = vadd.f32 %v5965_v61, %v5860_v48 }
 0xb71   : > { %v15862_v27 = vpop.f32.mrf.mxu2  ;;  %v6290_v34 = vpop.f32.mrf.mxu3 }
 0xb72   : > { %v6079_v53 = vpop.f32.mrf.mxu1  ;;  %v6310_v2 = vadd.f32 %v6290_v34, %v6196_v33 }
 0xb73   : > { %v6089_v12 = vadd.f32 %v6079_v53, %v5975_v8 }
 0xb74   : > { %v6425_v28 = vadd.f32 %v6405_v15, %v6310_v2 }
 0xb79   : > { %v6181_v3 = vpop.f32.mrf.mxu2  ;;  %v6292_v52 = vpop.f32.mrf.mxu3 }
 0xb7a   : > { %v15864_v0 = vadd.f32 %v6181_v3, %v6084_v9  ;;  %v6519_v45 = vpop.f32.mrf.mxu1  ;;  %v15866_v9 = vpop.f32.mrf.mxu0 }
 0xb7b   : > { %v6539_v49 = vadd.f32 %v6519_v45, %v6425_v28 }
 0xb81   : > { %v6183_v55 = vpop.f32.mrf.mxu2  ;;  %v6295_v3 = vpop.f32.mrf.mxu3 }
 0xb82   : > { %v15868_v14 = vpop.f32.mrf.mxu1  ;;  %v6410_v36 = vpop.f32.mrf.mxu0  ;;  %v6199_v48 = vadd.f32 %v6183_v55, %v6085_v35  ;;  %v6312_v22 = vadd.f32 %v6295_v3, %v15864_v0 }
 0xb89   : > { %v6186_v4 = vpop.f32.mrf.mxu2  ;;  %v6297_v33 = vpop.f32.mrf.mxu3 }
 0xb8a   : > { %v6200_v38 = vadd.f32 %v6186_v4, %v6086_v11  ;;  %v15872_v15 = vpop.f32.mrf.mxu1  ;;  %v6412_v45 = vpop.f32.mrf.mxu0  ;;  %v6313_v17 = vadd.f32 %v6297_v33, %v6199_v48  ;;  %v13043_v48 = vld [vmem:[%s16854_s9 + $0x18] sm:$0xff] }
 0xb91   : > { %v6188_v7 = vpop.f32.mrf.mxu2  ;;  %v6300_v34 = vpop.f32.mrf.mxu3 }
 0xb92   : > { %v6526_v2 = vpop.f32.mrf.mxu1  ;;  %v6201_v51 = vadd.f32 %v6188_v7, %v6087_v32  ;;  %v6314_v61 = vadd.f32 %v6300_v34, %v6200_v38  ;;  %v6197_v32 = vadd.f32 %v15862_v27, %v6083_v26  ;;  %v13079_v26 = vld [vmem:[%s16858_s13 + $0xb8] sm:$0xff] }
 0xb93   : > { %7570 = vmatpush.bf16.msrb.mxu2 %v13079_v26 }
 0xb94   : > { %v6311_v5 = vadd.f32 %v6292_v52, %v6197_v32  ;;  %v13045_v32 = vld [vmem:[%s16854_s9 + $0x28] sm:$0xff] }
 0xb96   : > { %v6426_v27 = vadd.f32 %v15866_v9, %v6311_v5  ;;  %v13076_v5 = vld [vmem:[%s16858_s13 + $0xa0] sm:$0xff] }
 0xb99   : > { %v6191_v23 = vpop.f32.mrf.mxu2  ;;  %v6302_v4 = vpop.f32.mrf.mxu3 }
 0xb9a   : > { %v6202_v24 = vadd.f32 %v6191_v23, %v6088_v13  ;;  %v6415_v13 = vpop.f32.mrf.mxu0  ;;  %v6529_v23 = vpop.f32.mrf.mxu1  ;;  %v6315_v21 = vadd.f32 %v6302_v4, %v6201_v51  ;;  %v6428_v51 = vadd.f32 %v6412_v45, %v6313_v17  ;;  %v13062_v17 = vld [vmem:[%s16858_s13 + $0x30] sm:$0xff] }
 0xb9b   : > { %v6429_v7 = vadd.f32 %v6415_v13, %v6314_v61  ;;  %v13044_v61 = vld [vmem:[%s16854_s9 + $0x20] sm:$0xff] }
 0xb9c   : > { %v6542_v0 = vadd.f32 %v6526_v2, %v6428_v51  ;;  %v13067_v51 = vld [vmem:[%s16858_s13 + $0x58] sm:$0xff] }
 0xba1   : > { %v6193_v1 = vpop.f32.mrf.mxu2 }
 0xba2   : > { %v6417_v56 = vpop.f32.mrf.mxu0  ;;  %v6203_v59 = vadd.f32 %v6193_v1, %v6089_v12 }
 0xba3   : > { %v6430_v47 = vadd.f32 %v6417_v56, %v6315_v21  ;;  %v13187_v56 = vld [vmem:[%s16859_s14 + $0x1] ss:$0 sm:$0xff] }
 0xba9   : > { %v6633_v57 = vpop.f32.mrf.mxu2 }
 0xbaa   : > { %v15870_v19 = vadd.f32 %v6633_v57, %v6539_v49  ;;  %v6531_v49 = vpop.f32.mrf.mxu1  ;;  %v6305_v57 = vpop.f32.mrf.mxu3 }
 0xbab   : > { %v6420_v41 = vpop.f32.mrf.mxu0  ;;  %v6316_v39 = vadd.f32 %v6305_v57, %v6202_v24  ;;  %v6544_v12 = vadd.f32 %v6531_v49, %v6430_v47  ;;  %v13078_v47 = vld [vmem:[%s16858_s13 + $0xb0] sm:$0xff] }
 0xbac   : > { %7571 = vmatpush.bf16.msrb.mxu2 %v13078_v47 }
 0xbad   : > { %v6431_v29 = vadd.f32 %v6420_v41, %v6316_v39  ;;  %v6427_v39 = vadd.f32 %v6410_v36, %v6312_v22  ;;  %v6543_v41 = vadd.f32 %v6529_v23, %v6429_v7  ;;  %v6540_v36 = vadd.f32 %v15868_v14, %v6426_v27  ;;  %v13061_v22 = vld [vmem:[%s16858_s13 + $0x28] sm:$0xff] }
 0xbae   : > { %v13077_v7 = vld [vmem:[%s16858_s13 + $0xa8] sm:$0xff] }
 0xbaf   : > { %v6541_v52 = vadd.f32 %v15872_v15, %v6427_v39  ;;  %v13058_v39 = vld [vmem:[%s16858_s13 + $0x10] sm:$0xff]  ;;  %v13073_v27 = vld [vmem:[%s16858_s13 + $0x88] sm:$0xff] }
 0xbb0   : > { %7572 = vmatpush.bf16.msrb.mxu2 %v13077_v7 }
 0xbb1   : > { %v15874_v11 = vpop.f32.mrf.mxu2 }
 0xbb2   : > { %v6534_v18 = vpop.f32.mrf.mxu1  ;;  %v6307_v16 = vpop.f32.mrf.mxu3 }
 0xbb3   : > { %v6317_v30 = vadd.f32 %v6307_v16, %v6203_v59  ;;  %v6422_v8 = vpop.f32.mrf.mxu0  ;;  %v6545_v63 = vadd.f32 %v6534_v18, %v6431_v29  ;;  %v6666_v18 = vadd.f32 %v13187_v56, %v15870_v19  ;;  %v13041_v59 = vld [vmem:[%s16854_s9 + $0x8] sm:$0xff]  ;;  %v13042_v19 = vld [vmem:[%s16854_s9 + $0x10] sm:$0xff]  ;;  %v13071_v29 = vld [vmem:[%s16858_s13 + $0x78] sm:$0xff] }
 0xbb4   : > { %7231 = vmatpush.bf16.msrb.mxu0 %v13071_v29  ;;  %7573 = vmatpush.bf16.msrb.mxu2 %v13076_v5 }
 0xbb5   : > { %v6432_v20 = vadd.f32 %v6422_v8, %v6317_v30  ;;  %v6674_v35 = vmax.f32 %v6666_v18, 0.0  ;;  %v13063_v30 = vld [vmem:[%s16858_s13 + $0x38] sm:$0xff]  ;;  %v13069_v8 = vld [vmem:[%s16858_s13 + $0x68] sm:$0xff] }
 0xbb6   : > { %7368 = vmatpush.bf16.msra.mxu1 %v13063_v30 }
 0xbb9   : > { %v15876_v28 = vpop.f32.mrf.mxu2 }
 0xbba   : > { %v6536_v38 = vpop.f32.mrf.mxu1  ;;  %v6655_v34 = vadd.f32 %v15876_v28, %v6541_v52  ;;  %7369 = vmatpush.bf16.msra.mxu1 %v13062_v17  ;;  %v13189_v52 = vld [vmem:[#allocation3] sm:$0xff] }
 0xbbb   : > { %v6546_v42 = vadd.f32 %v6536_v38, %v6432_v20  ;;  %v13060_v20 = vld [vmem:[%s16858_s13 + $0x20] sm:$0xff]  ;;  %v13066_v38 = vld [vmem:[%s16858_s13 + $0x50] sm:$0xff] }
 0xbbe   : > { %7370 = vmatpush.bf16.msra.mxu1 %v13061_v22 }
 0xbc1   : > { %v6640_v37 = vpop.f32.mrf.mxu2 }
 0xbc2   : > { %v6656_v3 = vadd.f32 %v6640_v37, %v6542_v0  ;;  %7371 = vmatpush.bf16.msra.mxu1 %v13060_v20  ;;  %v13056_v0 = vld [vmem:[%s16858_s13] sm:$0xff] }
 0xbc4   : > { %v6669_v9 = vadd.f32 %v13187_v56, %v6656_v3  ;;  %v7102_v3 = vpack.c.bf16 %v13189_v52, %v13189_v52 }
 0xbc6   : > { %v6677_v15 = vmax.f32 %v6669_v9, 0.0 }
 0xbc9   : > { %v6643_v6 = vpop.f32.mrf.mxu2 }
 0xbca   : > { %v6657_v53 = vadd.f32 %v6643_v6, %v6543_v41  ;;  %v6668_v6 = vadd.f32 %v13187_v56, %v6655_v34  ;;  %v13074_v41 = vld [vmem:[%s16858_s13 + $0x90] sm:$0xff] }
 0xbcc   : > { %v6670_v13 = vadd.f32 %v13187_v56, %v6657_v53  ;;  %v6676_v16 = vmax.f32 %v6668_v6, 0.0  ;;  %v13072_v53 = vld [vmem:[%s16858_s13 + $0x80] sm:$0xff] }
 0xbce   : > { %v6678_v57 = vmax.f32 %v6670_v13, 0.0  ;;  %v6715_v28 = vpack.c.bf16 %v6677_v15, %v6676_v16  ;;  %v13047_v13 = vld [vmem:[%s16854_s9 + $0x38] sm:$0xff] }
 0xbd1   : > { %v6645_v44 = vpop.f32.mrf.mxu2 }
 0xbd2   : > { %v6658_v54 = vadd.f32 %v6645_v44, %v6544_v12  ;;  %v6654_v44 = vadd.f32 %v15874_v11, %v6540_v36  ;;  %v13040_v11 = vld [vmem:[%s16854_s9] sm:$0xff]  ;;  %v13059_v12 = vld [vmem:[%s16858_s13 + $0x18] sm:$0xff]  ;;  %v7458_v36 = vld [vmem:[#allocation2 + $0xa] sm:$0xff] }
 0xbd3   : > { %7372 = vmatpush.bf16.msra.mxu1 %v13059_v12 }
 0xbd4   : > { %v6671_v33 = vadd.f32 %v13187_v56, %v6658_v54  ;;  %v6667_v43 = vadd.f32 %v13187_v56, %v6654_v44  ;;  %v13057_v54 = vld [vmem:[%s16858_s13 + $0x8] sm:$0xff] }
 0xbd6   : > { %v6679_v49 = vmax.f32 %v6671_v33, 0.0  ;;  %v6675_v14 = vmax.f32 %v6667_v43, 0.0  ;;  %v7457_v33 = vld [vmem:[#allocation2 + $0x2] sm:$0xff] }
 0xbd7   : > { %7373 = vmatpush.bf16.msra.mxu1 %v13058_v39  ;;  %v7506_v34 = vpack.c.bf16 %v7458_v36, %v7457_v33  ;;  %v13049_v43 = vld [vmem:[%s16854_s9 + $0x48] sm:$0xff] }
 0xbd8   : > { %v6716_v37 = vpack.c.bf16 %v6679_v49, %v6678_v57  ;;  %v6714_v21 = vpack.c.bf16 %v6675_v14, %v6674_v35 }
 0xbd9   : > { %v6648_v50 = vpop.f32.mrf.mxu2 }
 0xbda   : > { %v6659_v25 = vadd.f32 %v6648_v50, %v6545_v63  ;;  %v13070_v50 = vld [vmem:[%s16858_s13 + $0x70] sm:$0xff]  ;;  %v13068_v63 = vld [vmem:[%s16858_s13 + $0x60] sm:$0xff] }
 0xbdb   : > { %7232 = vmatpush.bf16.msrb.mxu0 %v13070_v50  ;;  %7374 = vmatpush.bf16.msra.mxu1 %v13057_v54 }
 0xbdc   : > { %v6672_v24 = vadd.f32 %v13187_v56, %v6659_v25  ;;  %v13075_v25 = vld [vmem:[%s16858_s13 + $0x98] sm:$0xff] }
 0xbdd   : > { %7574 = vmatpush.bf16.msrb.mxu2 %v13075_v25 }
 0xbde   : > { %v6680_v4 = vmax.f32 %v6672_v24, 0.0  ;;  %v7118_v24 = vld [vmem:[#allocation2 + $0x1] sm:$0xff] }
 0xbdf   : > { %7233 = vmatpush.bf16.msrb.mxu0 %v13069_v8  ;;  %7375 = vmatpush.bf16.msra.mxu1 %v13056_v0  ;;  %v13087_v0 = vld [vmem:[%s16858_s13 + $0xf8] sm:$0xff] }
 0xbe1   : > { %v6650_v55 = vpop.f32.mrf.mxu2  ;;  %7575 = vmatpush.bf16.msrb.mxu2 %v13074_v41 }
 0xbe2   : > { %v6660_v1 = vadd.f32 %v6650_v55, %v6546_v42  ;;  %v13046_v42 = vld [vmem:[%s16854_s9 + $0x30] sm:$0xff]  ;;  %v13064_v55 = vld [vmem:[%s16858_s13 + $0x40] sm:$0xff]  ;;  %7376 = vmatmul.bf16.vlgmr.msra.gmra.mxu1 %v7102_v3 }
 0xbe3   : > { %7234 = vmatpush.bf16.msrb.mxu0 %v13068_v63 }
 0xbe4   : > { %v6673_v45 = vadd.f32 %v13187_v56, %v6660_v1  ;;  %v13065_v56 = vld [vmem:[%s16858_s13 + $0x48] sm:$0xff] }
 0xbe5   : > { %7576 = vmatpush.bf16.msrb.mxu2 %v13073_v27  ;;  %v7119_v1 = vld [vmem:[#allocation2 + $0x9] sm:$0xff] }
 0xbe6   : > { %v6681_v23 = vmax.f32 %v6673_v45, 0.0  ;;  %v7167_v45 = vpack.c.bf16 %v7119_v1, %v7118_v24 }
 0xbe7   : > { %7235 = vmatpush.bf16.msrb.mxu0 %v13067_v51 }
 0xbe8   : > { %v6717_v2 = vpack.c.bf16 %v6681_v23, %v6680_v4  ;;  %v13048_v4 = vld [vmem:[%s16854_s9 + $0x40] sm:$0xff] }
 0xbe9   : > { %7577 = vmatpush.bf16.msrb.mxu2 %v13072_v53  ;;  %v16008_v23 = vld [vmem:[%s16853_s8] ss:$0 sm:$0xff]  ;;  %v16902_v53 = vld [vmem:[#allocation12_spill] sm:$0xff] }
 0xbea   : > { %6850 = vmatpush.bf16.msrb.mxu3 %v6717_v2  ;;  %v4277_v44 = vadd.f32 %v16008_v23, %v15071_v40  ;;  %v4279_v2 = vadd.f32 %v16008_v23, %v15074_v46  ;;  %v4282_v40 = vadd.f32 %v16008_v23, %v15076_v58  ;;  %v13050_v58 = vld [vmem:[%s16854_s9 + $0x50] sm:$0xff]  ;;  %v4289_v8 = vadd.f32 %v16008_v23, %v15084_v31 }
 0xbeb   : > { %7236 = vmatpush.bf16.msrb.mxu0 %v13066_v38  ;;  %v4292_v20 = vadd.f32 %v16008_v23, %v15087_v60  ;;  %v13052_v60 = vld [vmem:[%s16854_s9 + $0x60] sm:$0xff]  ;;  %v4297_v24 = vadd.f32 %v16008_v23, %v16902_v53  ;;  %v16908_v53 = vld [vmem:[#allocation18_spill] sm:$0xff] }
 0xbec   : > { %7578 = vmatmul.bf16.vlgmr.msrb.gmra.mxu2 %v7506_v34 }
 0xbee   : > { %6851 = vmatpush.bf16.msrb.mxu3 %v6716_v37 }
 0xbef   : > { %7237 = vmatpush.bf16.msrb.mxu0 %v13065_v56 }
 0xbf2   : > { %6852 = vmatpush.bf16.msrb.mxu3 %v6715_v28 }
 0xbf3   : > { %7238 = vmatpush.bf16.msrb.mxu0 %v13064_v55 }
 0xbf6   : > { %6853 = vmatpush.bf16.msrb.mxu3 %v6714_v21  ;;  %7239 = vmatmul.bf16.vlgmr.msrb.gmra.mxu0 %v7167_v45 }
 0xbf9   : > { %12111 = vmatmul.msk.bf16.vlgmr.msrb.gmra.mxu3 %vm2589_vm3, %v13040_v11  ;;  %v4284_v11 = vadd.f32 %v16008_v23, %v15079_v62 }
 0xbfa   : > { %7804 = vmatpush.bf16.msra.mxu3 %v13087_v0 }
 0xc09   : > { %12112 = vmatmul.msk.bf16.gmra.mxu3 %vm2589_vm3, %v13041_v59 }
 0xc19   : > { %12113 = vmatmul.msk.bf16.gmra.mxu3 %vm2589_vm3, %v13042_v19 }
 0xc29   : > { %12114 = vmatmul.msk.bf16.gmra.mxu3 %vm2589_vm3, %v13043_v48 }
 0xc39   : > { %12115 = vmatmul.msk.bf16.gmra.mxu3 %vm2589_vm3, %v13044_v61  ;;  %v4287_v61 = vadd.f32 %v16008_v23, %v15082_v10  ;;  %v13051_v10 = vld [vmem:[%s16854_s9 + $0x58] sm:$0xff] }
 0xc49   : > { %12116 = vmatmul.msk.bf16.gmra.mxu3 %vm2589_vm3, %v13045_v32 }
 0xc59   : > { %12117 = vmatmul.msk.bf16.gmra.mxu3 %vm2589_vm3, %v13046_v42  ;;  %v16901_v42 = vld [vmem:[#allocation11_spill] sm:$0xff] }
 0xc5a   : > { %v4294_v56 = vadd.f32 %v16008_v23, %v16901_v42 }
 0xc69   : > { %12118 = vmatmul.msk.bf16.gmra.mxu3 %vm2589_vm3, %v13047_v13 }
 0xc79   : > { %12119 = vmatmul.msk.bf16.gmra.mxu3 %vm2589_vm3, %v13048_v4  ;;  %v13086_v4 = vld [vmem:[%s16858_s13 + $0xf0] sm:$0xff] }
 0xc7a   : > { %7805 = vmatpush.bf16.msra.mxu3 %v13086_v4 }
 0xc7c   : > { %v6855_v9 = vpop.f32.mrf.mxu3 }
 0xc7d   : > { %v6935_v49 = vadd.f32 %v6855_v9, %v4277_v44  ;;  %v13085_v44 = vld [vmem:[%s16858_s13 + $0xe8] sm:$0xff]  ;;  %v16903_v9 = vld [vmem:[#allocation13_spill] sm:$0xff] }
 0xc7e   : > { %7806 = vmatpush.bf16.msra.mxu3 %v13085_v44  ;;  %v16909_v44 = vld [vmem:[#allocation19_spill] sm:$0xff] }
 0xc7f   : > { %7022 = vst [vmem:[#allocation2 + $0x19] sm:$0xff] %v6935_v49 }
 0xc84   : > { %v6857_v6 = vpop.f32.mrf.mxu3 }
 0xc85   : > { %v6936_v57 = vadd.f32 %v6857_v6, %v4279_v2 }
 0xc86   : > { %v7056_v16 = vld [vmem:[#allocation2 + $0x18] sm:$0xff] }
 0xc87   : > { %7023 = vst [vmem:[#allocation2 + $0x21] sm:$0xff] %v6936_v57  ;;  %v7168_v15 = vpack.c.bf16 %v6936_v57, %v6935_v49  ;;  %v4299_v49 = vadd.f32 %v16008_v23, %v16903_v9  ;;  %v13053_v57 = vld [vmem:[%s16854_s9 + $0x68] sm:$0xff]  ;;  %v4314_v9 = vadd.f32 %v16008_v23, %v16909_v44 }
 0xc89   : > { %12120 = vmatmul.msk.bf16.gmra.mxu3 %vm2589_vm3, %v13049_v43  ;;  %7244 = vmatmul.bf16.gmra.mxu0 %v7168_v15  ;;  %v13084_v15 = vld [vmem:[%s16858_s13 + $0xe0] sm:$0xff] }
 0xc8a   : > { %7807 = vmatpush.bf16.msra.mxu3 %v13084_v15 }
 0xc8c   : > { %v6860_v37 = vpop.f32.mrf.mxu3 }
 0xc8d   : > { %v6937_v18 = vadd.f32 %v6860_v37, %v4282_v40  ;;  %v13083_v40 = vld [vmem:[%s16858_s13 + $0xd8] sm:$0xff]  ;;  %v16904_v37 = vld [vmem:[#allocation14_spill] sm:$0xff] }
 0xc8e   : > { %v7057_v14 = vld [vmem:[#allocation2 + $0x20] sm:$0xff]  ;;  %7808 = vmatpush.bf16.msra.mxu3 %v13083_v40 }
 0xc8f   : > { %v7459_v28 = vld [vmem:[#allocation2 + $0x1a] sm:$0xff]  ;;  %v7460_v46 = vld [vmem:[#allocation2 + $0x22] sm:$0xff]  ;;  %7024 = vst [vmem:[#allocation2 + $0x31] sm:$0xff] %v6937_v18  ;;  %v16021_v35 = vpack.c.bf16 %v7057_v14, %v7056_v16 }
 0xc90   : > { %v7507_v21 = vpack.c.bf16 %v7460_v46, %v7459_v28 }
 0xc91   : > { %7381 = vmatmul.bf16.gmra.mxu1 %v16021_v35 }
 0xc92   : > { %7583 = vmatmul.bf16.gmra.mxu2 %v7507_v21 }
 0xc94   : > { %v6862_v59 = vpop.f32.mrf.mxu3 }
 0xc95   : > { %v6938_v19 = vadd.f32 %v6862_v59, %v4284_v11 }
 0xc96   : > { %v7058_v26 = vld [vmem:[#allocation2 + $0x30] sm:$0xff] }
 0xc97   : > { %7025 = vst [vmem:[#allocation2 + $0x39] sm:$0xff] %v6938_v19  ;;  %v7169_v48 = vpack.c.bf16 %v6938_v19, %v6937_v18  ;;  %v4302_v18 = vadd.f32 %v16008_v23, %v16904_v37 }
 0xc99   : > { %12121 = vmatmul.msk.bf16.gmra.mxu3 %vm2589_vm3, %v13050_v58  ;;  %7249 = vmatmul.bf16.gmra.mxu0 %v7169_v48  ;;  %v13082_v58 = vld [vmem:[%s16858_s13 + $0xd0] sm:$0xff]  ;;  %v13081_v48 = vld [vmem:[%s16858_s13 + $0xc8] sm:$0xff] }
 0xc9a   : > { %7809 = vmatpush.bf16.msra.mxu3 %v13082_v58 }
 0xc9c   : > { %v6865_v29 = vpop.f32.mrf.mxu3 }
 0xc9d   : > { %v6939_v30 = vadd.f32 %v6865_v29, %v4287_v61  ;;  %v16905_v61 = vld [vmem:[#allocation15_spill] sm:$0xff] }
 0xc9e   : > { %v7059_v50 = vld [vmem:[#allocation2 + $0x38] sm:$0xff]  ;;  %v4304_v29 = vadd.f32 %v16008_v23, %v16905_v61  ;;  %7810 = vmatpush.bf16.msra.mxu3 %v13081_v48 }
 0xc9f   : > { %v7461_v17 = vld [vmem:[#allocation2 + $0x32] sm:$0xff]  ;;  %v7462_v62 = vld [vmem:[#allocation2 + $0x3a] sm:$0xff]  ;;  %7026 = vst [vmem:[#allocation2 + $0x49] sm:$0xff] %v6939_v30  ;;  %v16032_v47 = vpack.c.bf16 %v7059_v50, %v7058_v26 }
 0xca0   : > { %v7508_v32 = vpack.c.bf16 %v7462_v62, %v7461_v17  ;;  %v13054_v50 = vld [vmem:[%s16854_s9 + $0x70] sm:$0xff]  ;;  %v13080_v62 = vld [vmem:[%s16858_s13 + $0xc0] sm:$0xff] }
 0xca1   : > { %7386 = vmatmul.bf16.gmra.mxu1 %v16032_v47 }
 0xca2   : > { %7588 = vmatmul.bf16.gmra.mxu2 %v7508_v32  ;;  %7811 = vmatpush.bf16.msra.mxu3 %v13080_v62  ;;  %v16906_v32 = vld [vmem:[#allocation16_spill] sm:$0xff] }
 0xca4   : > { %v6867_v22 = vpop.f32.mrf.mxu3 }
 0xca5   : > { %v6940_v7 = vadd.f32 %v6867_v22, %v4289_v8  ;;  %v4307_v8 = vadd.f32 %v16008_v23, %v16906_v32 }
 0xca6   : > { %v7060_v12 = vld [vmem:[#allocation2 + $0x48] sm:$0xff] }
 0xca7   : > { %7027 = vst [vmem:[#allocation2 + $0x51] sm:$0xff] %v6940_v7  ;;  %v7170_v63 = vpack.c.bf16 %v6940_v7, %v6939_v30 }
 0xca9   : > { %12122 = vmatmul.msk.bf16.gmra.mxu3 %vm2589_vm3, %v13051_v10  ;;  %7254 = vmatmul.bf16.gmra.mxu0 %v7170_v63 }
 0xcac   : > { %v6870_v5 = vpop.f32.mrf.mxu3 }
 0xcad   : > { %v6941_v51 = vadd.f32 %v6870_v5, %v4292_v20 }
 0xcae   : > { %v7061_v25 = vld [vmem:[#allocation2 + $0x50] sm:$0xff] }
 0xcaf   : > { %v7463_v38 = vld [vmem:[#allocation2 + $0x4a] sm:$0xff]  ;;  %v7464_v31 = vld [vmem:[#allocation2 + $0x52] sm:$0xff]  ;;  %7028 = vst [vmem:[#allocation2 + $0x61] sm:$0xff] %v6941_v51  ;;  %v16043_v39 = vpack.c.bf16 %v7061_v25, %v7060_v12  ;;  %v7240_v25 = vpop.f32.mrf.mxu0 }
 0xcb0   : > { %v7509_v41 = vpack.c.bf16 %v7464_v31, %v7463_v38  ;;  %v7377_v38 = vpop.f32.mrf.mxu1 }
 0xcb1   : > { %7391 = vmatmul.bf16.gmra.mxu1 %v16043_v39  ;;  %v7378_v31 = vadd.f32 %v7377_v38, %v7240_v25 }
 0xcb2   : > { %7593 = vmatmul.bf16.gmra.mxu2 %v7509_v41  ;;  %v16907_v41 = vld [vmem:[#allocation17_spill] sm:$0xff] }
 0xcb3   : > { %v4309_v42 = vadd.f32 %v16008_v23, %v16907_v41 }
 0xcb4   : > { %v6872_v54 = vpop.f32.mrf.mxu3 }
 0xcb5   : > { %v6942_v27 = vadd.f32 %v6872_v54, %v4294_v56 }
 0xcb6   : > { %v7062_v3 = vld [vmem:[#allocation2 + $0x60] sm:$0xff] }
 0xcb7   : > { %7029 = vst [vmem:[#allocation2 + $0x69] sm:$0xff] %v6942_v27  ;;  %v7171_v55 = vpack.c.bf16 %v6942_v27, %v6941_v51  ;;  %v13055_v27 = vld [vmem:[%s16854_s9 + $0x78] sm:$0xff] }
 0xcb8   : > { %v16128_v48 = vpop.f32.mrf.mxu1 }
 0xcb9   : > { %12123 = vmatmul.msk.bf16.gmra.mxu3 %vm2589_vm3, %v13052_v60  ;;  %7259 = vmatmul.bf16.gmra.mxu0 %v7171_v55  ;;  %v7579_v55 = vpop.f32.mrf.mxu2 }
 0xcba   : > { %v16109_v0 = vadd.f32 %v7579_v55, %v7378_v31  ;;  %v16914_v55 = vld [vmem:[#allocation24_spill] sm:$0xff] }
 0xcbc   : > { %v6875_v1 = vpop.f32.mrf.mxu3 }
 0xcbd   : > { %v6943_v52 = vadd.f32 %v6875_v1, %v4297_v24  ;;  %v4312_v24 = vadd.f32 %v16008_v23, %v16908_v53  ;;  %v4327_v53 = vadd.f32 %v16008_v23, %v16914_v55 }
 0xcbe   : > { %v7063_v33 = vld [vmem:[#allocation2 + $0x68] sm:$0xff] }
 0xcbf   : > { %v7465_v45 = vld [vmem:[#allocation2 + $0x62] sm:$0xff]  ;;  %v7466_v36 = vld [vmem:[#allocation2 + $0x6a] sm:$0xff]  ;;  %7030 = vst [vmem:[#allocation2 + $0x79] sm:$0xff] %v6943_v52  ;;  %v16057_v34 = vpack.c.bf16 %v7063_v33, %v7062_v3 }
 0xcc0   : > { %v7510_v13 = vpack.c.bf16 %v7466_v36, %v7465_v45 }
 0xcc1   : > { %7396 = vmatmul.bf16.gmra.mxu1 %v16057_v34 }
 0xcc2   : > { %7598 = vmatmul.bf16.gmra.mxu2 %v7510_v13 }
 0xcc4   : > { %v6877_v2 = vpop.f32.mrf.mxu3 }
 0xcc5   : > { %v6944_v6 = vadd.f32 %v6877_v2, %v4299_v49 }
 0xcc6   : > { %v7064_v28 = vld [vmem:[#allocation2 + $0x78] sm:$0xff] }
 0xcc7   : > { %7031 = vst [vmem:[#allocation2 + $0x81] sm:$0xff] %v6944_v6  ;;  %v7172_v43 = vpack.c.bf16 %v6944_v6, %v6943_v52 }
 0xcc9   : > { %12124 = vmatmul.msk.bf16.gmra.mxu3 %vm2589_vm3, %v13053_v57  ;;  %7264 = vmatmul.bf16.gmra.mxu0 %v7172_v43  ;;  %v16910_v57 = vld [vmem:[#allocation20_spill] sm:$0xff] }
 0xcca   : > { %v4317_v43 = vadd.f32 %v16008_v23, %v16910_v57 }
 0xccc   : > { %v6880_v16 = vpop.f32.mrf.mxu3 }
 0xccd   : > { %v6945_v14 = vadd.f32 %v6880_v16, %v4302_v18 }
 0xcce   : > { %v7065_v46 = vld [vmem:[#allocation2 + $0x80] sm:$0xff] }
 0xccf   : > { %v7467_v21 = vld [vmem:[#allocation2 + $0x7a] sm:$0xff]  ;;  %v7468_v11 = vld [vmem:[#allocation2 + $0x82] sm:$0xff]  ;;  %7032 = vst [vmem:[#allocation2 + $0x91] sm:$0xff] %v6945_v14  ;;  %v16080_v59 = vpack.c.bf16 %v7065_v46, %v7064_v28  ;;  %v16121_v28 = vpop.f32.mrf.mxu0 }
 0xcd0   : > { %v7511_v19 = vpack.c.bf16 %v7468_v11, %v7467_v21 }
 0xcd1   : > { %7401 = vmatmul.bf16.gmra.mxu1 %v16080_v59 }
 0xcd2   : > { %7603 = vmatmul.bf16.gmra.mxu2 %v7511_v19 }
 0xcd4   : > { %v6882_v30 = vpop.f32.mrf.mxu3 }
 0xcd5   : > { %v6946_v26 = vadd.f32 %v6882_v30, %v4304_v29  ;;  %v16912_v30 = vld [vmem:[#allocation22_spill] sm:$0xff] }
 0xcd6   : > { %v7066_v10 = vld [vmem:[#allocation2 + $0x90] sm:$0xff] }
 0xcd7   : > { %7033 = vst [vmem:[#allocation2 + $0x99] sm:$0xff] %v6946_v26  ;;  %v7173_v17 = vpack.c.bf16 %v6946_v26, %v6945_v14  ;;  %v4322_v26 = vadd.f32 %v16008_v23, %v16912_v30 }
 0xcd9   : > { %12125 = vmatmul.msk.bf16.gmra.mxu3 %vm2589_vm3, %v13054_v50  ;;  %7269 = vmatmul.bf16.gmra.mxu0 %v7173_v17  ;;  %v16133_v17 = vpop.f32.mrf.mxu2 }
 0xcdc   : > { %v6885_v22 = vpop.f32.mrf.mxu3 }
 0xcdd   : > { %v6947_v7 = vadd.f32 %v6885_v22, %v4307_v8 }
 0xcde   : > { %v7067_v63 = vld [vmem:[#allocation2 + $0x98] sm:$0xff] }
 0xcdf   : > { %v7469_v20 = vld [vmem:[#allocation2 + $0x92] sm:$0xff]  ;;  %v7470_v5 = vld [vmem:[#allocation2 + $0x9a] sm:$0xff]  ;;  %7034 = vst [vmem:[#allocation2 + $0xa9] sm:$0xff] %v6947_v7  ;;  %v16100_v51 = vpack.c.bf16 %v7067_v63, %v7066_v10 }
 0xce0   : > { %v7512_v12 = vpack.c.bf16 %v7470_v5, %v7469_v20 }
 0xce1   : > { %7406 = vmatmul.bf16.gmra.mxu1 %v16100_v51 }
 0xce2   : > { %7608 = vmatmul.bf16.gmra.mxu2 %v7512_v12 }
 0xce4   : > { %v6887_v56 = vpop.f32.mrf.mxu3 }
 0xce5   : > { %v6948_v54 = vadd.f32 %v6887_v56, %v4309_v42 }
 0xce6   : > { %v7068_v3 = vld [vmem:[#allocation2 + $0xa8] sm:$0xff] }
 0xce7   : > { %7035 = vst [vmem:[#allocation2 + $0xb1] sm:$0xff] %v6948_v54  ;;  %v7174_v60 = vpack.c.bf16 %v6948_v54, %v6947_v7 }
 0xce9   : > { %12126 = vmatmul.msk.bf16.gmra.mxu3 %vm2589_vm3, %v13055_v27  ;;  %7274 = vmatmul.bf16.gmra.mxu0 %v7174_v60 }
 0xcec   : > { %v6890_v1 = vpop.f32.mrf.mxu3 }
 0xced   : > { %v6949_v52 = vadd.f32 %v6890_v1, %v4312_v24 }
 0xcee   : > { %v7069_v33 = vld [vmem:[#allocation2 + $0xb0] sm:$0xff] }
 0xcef   : > { %v7471_v45 = vld [vmem:[#allocation2 + $0xaa] sm:$0xff]  ;;  %v7472_v36 = vld [vmem:[#allocation2 + $0xb2] sm:$0xff]  ;;  %7036 = vst [vmem:[#allocation2 + $0xc1] sm:$0xff] %v6949_v52  ;;  %v16113_v13 = vpack.c.bf16 %v7069_v33, %v7068_v3 }
 0xcf0   : > { %v7513_v4 = vpack.c.bf16 %v7472_v36, %v7471_v45 }
 0xcf1   : > { %7411 = vmatmul.bf16.gmra.mxu1 %v16113_v13 }
 0xcf2   : > { %7613 = vmatmul.bf16.gmra.mxu2 %v7513_v4 }
 0xcf4   : > { %v6892_v49 = vpop.f32.mrf.mxu3 }
 0xcf5   : > { %v6950_v2 = vadd.f32 %v6892_v49, %v4314_v9 }
 0xcf6   : > { %v7070_v37 = vld [vmem:[#allocation2 + $0xc0] sm:$0xff] }
 0xcf7   : > { %7037 = vst [vmem:[#allocation2 + $0xc9] sm:$0xff] %v6950_v2  ;;  %v7175_v6 = vpack.c.bf16 %v6950_v2, %v6949_v52 }
 0xcf9   : > { %7812 = vmatmul.bf16.vlgmr.msra.gmra.mxu3 %v16021_v35  ;;  %7279 = vmatmul.bf16.gmra.mxu0 %v7175_v6  ;;  %v16911_v35 = vld [vmem:[#allocation21_spill] sm:$0xff] }
 0xcfa   : > { %v4319_v11 = vadd.f32 %v16008_v23, %v16911_v35  ;;  %v16915_v6 = vld [vmem:[#allocation25_spill] sm:$0xff]  ;;  %v16916_v35 = vld [vmem:[#allocation26_spill] sm:$0xff] }
 0xcfb   : > { %v4329_v57 = vadd.f32 %v16008_v23, %v16915_v6  ;;  %v13111_v6 = vld [vmem:[%s16858_s13 + $0x1b8] sm:$0xff] }
 0xcfc   : > { %v6895_v15 = vpop.f32.mrf.mxu3  ;;  %8507 = vmatpush.bf16.msra.mxu2 %v13111_v6 }
 0xcfd   : > { %v6951_v40 = vadd.f32 %v6895_v15, %v4317_v43 }
 0xcfe   : > { %v7071_v18 = vld [vmem:[#allocation2 + $0xc8] sm:$0xff] }
 0xcff   : > { %v7473_v16 = vld [vmem:[#allocation2 + $0xc2] sm:$0xff]  ;;  %v7474_v14 = vld [vmem:[#allocation2 + $0xca] sm:$0xff]  ;;  %7038 = vst [vmem:[#allocation2 + $0xd9] sm:$0xff] %v6951_v40  ;;  %v16123_v46 = vpack.c.bf16 %v7071_v18, %v7070_v37 }
 0xd00   : > { %v7514_v21 = vpack.c.bf16 %v7474_v14, %v7473_v16 }
 0xd01   : > { %7416 = vmatmul.bf16.gmra.mxu1 %v16123_v46 }
 0xd02   : > { %7618 = vmatmul.bf16.gmra.mxu2 %v7514_v21 }
 0xd04   : > { %v6897_v19 = vpop.f32.mrf.mxu3 }
 0xd05   : > { %v6952_v58 = vadd.f32 %v6897_v19, %v4319_v11  ;;  %v4332_v11 = vadd.f32 %v16008_v23, %v16916_v35 }
 0xd06   : > { %v7245_v61 = vpop.f32.mrf.mxu0  ;;  %v7072_v32 = vld [vmem:[#allocation2 + $0xd8] sm:$0xff] }
 0xd07   : > { %7039 = vst [vmem:[#allocation2 + $0xe1] sm:$0xff] %v6952_v58  ;;  %v7176_v29 = vpack.c.bf16 %v6952_v58, %v6951_v40 }
 0xd09   : > { %7817 = vmatmul.bf16.gmra.mxu3 %v16032_v47  ;;  %7284 = vmatmul.bf16.gmra.mxu0 %v7176_v29  ;;  %v16913_v47 = vld [vmem:[#allocation23_spill] sm:$0xff] }
 0xd0a   : > { %v4324_v25 = vadd.f32 %v16008_v23, %v16913_v47 }
 0xd0c   : > { %v6900_v50 = vpop.f32.mrf.mxu3 }
 0xd0d   : > { %v6953_v62 = vadd.f32 %v6900_v50, %v4322_v26 }
 0xd0e   : > { %v7382_v8 = vpop.f32.mrf.mxu1  ;;  %v7073_v22 = vld [vmem:[#allocation2 + $0xe0] sm:$0xff]  ;;  %v7247_v63 = vpop.f32.mrf.mxu0 }
 0xd0f   : > { %v7475_v7 = vld [vmem:[#allocation2 + $0xda] sm:$0xff]  ;;  %v7476_v10 = vld [vmem:[#allocation2 + $0xe2] sm:$0xff]  ;;  %7040 = vst [vmem:[#allocation2 + $0xf1] sm:$0xff] %v6953_v62  ;;  %v7383_v20 = vadd.f32 %v7382_v8, %v7245_v61  ;;  %v16135_v5 = vpack.c.bf16 %v7073_v22, %v7072_v32 }
 0xd10   : > { %v7515_v12 = vpack.c.bf16 %v7476_v10, %v7475_v7  ;;  %v16917_v10 = vld [vmem:[#allocation27_spill] sm:$0xff] }
 0xd11   : > { %7421 = vmatmul.bf16.gmra.mxu1 %v16135_v5 }
 0xd12   : > { %7623 = vmatmul.bf16.gmra.mxu2 %v7515_v12 }
 0xd14   : > { %v6902_v38 = vpop.f32.mrf.mxu3 }
 0xd15   : > { %v7584_v31 = vpop.f32.mrf.mxu2  ;;  %v6954_v41 = vadd.f32 %v6902_v38, %v4324_v25 }
 0xd16   : > { %v16140_v42 = vadd.f32 %v7584_v31, %v7383_v20  ;;  %v7384_v56 = vpop.f32.mrf.mxu1  ;;  %v7250_v54 = vpop.f32.mrf.mxu0  ;;  %v7074_v33 = vld [vmem:[#allocation2 + $0xf0] sm:$0xff] }
 0xd17   : > { %7041 = vst [vmem:[#allocation2 + $0xf9] sm:$0xff] %v6954_v41  ;;  %v7385_v27 = vadd.f32 %v7384_v56, %v7247_v63  ;;  %v7177_v60 = vpack.c.bf16 %v6954_v41, %v6953_v62  ;;  %v4334_v63 = vadd.f32 %v16008_v23, %v16917_v10 }
 0xd19   : > { %7822 = vmatmul.bf16.gmra.mxu3 %v16043_v39  ;;  %7289 = vmatmul.bf16.gmra.mxu0 %v7177_v60 }
 0xd1c   : > { %v6905_v24 = vpop.f32.mrf.mxu3 }
 0xd1d   : > { %v7586_v1 = vpop.f32.mrf.mxu2  ;;  %v6955_v52 = vadd.f32 %v6905_v24, %v4327_v53 }
 0xd1e   : > { %v16145_v3 = vadd.f32 %v7586_v1, %v7385_v27  ;;  %v7387_v45 = vpop.f32.mrf.mxu1  ;;  %v7075_v36 = vld [vmem:[#allocation2 + $0xf8] sm:$0xff]  ;;  %v7252_v9 = vpop.f32.mrf.mxu0 }
 0xd1f   : > { %v7477_v4 = vld [vmem:[#allocation2 + $0xf2] sm:$0xff]  ;;  %v7478_v44 = vld [vmem:[#allocation2 + $0xfa] sm:$0xff]  ;;  %7042 = vst [vmem:[#allocation2 + $0x109] sm:$0xff] %v6955_v52  ;;  %v7388_v49 = vadd.f32 %v7387_v45, %v7250_v54  ;;  %v16147_v2 = vpack.c.bf16 %v7075_v36, %v7074_v33 }
 0xd20   : > { %v7516_v39 = vpack.c.bf16 %v7478_v44, %v7477_v4  ;;  %v16918_v54 = vld [vmem:[#allocation28_spill] sm:$0xff] }
 0xd21   : > { %7426 = vmatmul.bf16.gmra.mxu1 %v16147_v2  ;;  %v4337_v27 = vadd.f32 %v16008_v23, %v16918_v54  ;;  %v13092_v54 = vld [vmem:[%s16858_s13 + $0x120] sm:$0xff] }
 0xd22   : > { %7628 = vmatmul.bf16.gmra.mxu2 %v7516_v39  ;;  %v13103_v39 = vld [vmem:[%s16858_s13 + $0x178] sm:$0xff] }
 0xd23   : > { %8272 = vmatpush.bf16.msrb.mxu1 %v13103_v39 }
 0xd24   : > { %v6907_v43 = vpop.f32.mrf.mxu3 }
 0xd25   : > { %v7589_v15 = vpop.f32.mrf.mxu2  ;;  %v6956_v40 = vadd.f32 %v6907_v43, %v4329_v57  ;;  %v16919_v57 = vld [vmem:[#allocation29_spill] sm:$0xff] }
 0xd26   : > { %v16152_v37 = vadd.f32 %v7589_v15, %v7388_v49  ;;  %v7389_v18 = vpop.f32.mrf.mxu1  ;;  %v7255_v16 = vpop.f32.mrf.mxu0  ;;  %v7076_v30 = vld [vmem:[#allocation2 + $0x108] sm:$0xff]  ;;  %v13095_v49 = vld [vmem:[%s16858_s13 + $0x138] sm:$0xff]  ;;  %v4339_v43 = vadd.f32 %v16008_v23, %v16919_v57  ;;  %v13090_v57 = vld [vmem:[%s16858_s13 + $0x110] sm:$0xff] }
 0xd27   : > { %7043 = vst [vmem:[#allocation2 + $0x111] sm:$0xff] %v6956_v40  ;;  %v7390_v14 = vadd.f32 %v7389_v18, %v7252_v9  ;;  %v7178_v21 = vpack.c.bf16 %v6956_v40, %v6955_v52  ;;  %8038 = vmatpush.bf16.msra.mxu0 %v13095_v49 }
 0xd29   : > { %7827 = vmatmul.bf16.gmra.mxu3 %v16057_v34  ;;  %7294 = vmatmul.bf16.gmra.mxu0 %v7178_v21 }
 0xd2c   : > { %v6910_v19 = vpop.f32.mrf.mxu3 }
 0xd2d   : > { %v7591_v58 = vpop.f32.mrf.mxu2  ;;  %v6957_v61 = vadd.f32 %v6910_v19, %v4332_v11  ;;  %v13094_v19 = vld [vmem:[%s16858_s13 + $0x130] sm:$0xff] }
 0xd2e   : > { %v16157_v29 = vadd.f32 %v7591_v58, %v7390_v14  ;;  %v7392_v26 = vpop.f32.mrf.mxu1  ;;  %v7077_v50 = vld [vmem:[#allocation2 + $0x110] sm:$0xff]  ;;  %v7257_v8 = vpop.f32.mrf.mxu0  ;;  %8039 = vmatpush.bf16.msra.mxu0 %v13094_v19 }
 0xd2f   : > { %v7479_v62 = vld [vmem:[#allocation2 + $0x10a] sm:$0xff]  ;;  %v7480_v32 = vld [vmem:[#allocation2 + $0x112] sm:$0xff]  ;;  %7044 = vst [vmem:[#allocation2 + $0x121] sm:$0xff] %v6957_v61  ;;  %v7393_v22 = vadd.f32 %v7392_v26, %v7255_v16  ;;  %v16159_v7 = vpack.c.bf16 %v7077_v50, %v7076_v30 }
 0xd30   : > { %v7517_v34 = vpack.c.bf16 %v7480_v32, %v7479_v62  ;;  %v13102_v58 = vld [vmem:[%s16858_s13 + $0x170] sm:$0xff]  ;;  %v13093_v30 = vld [vmem:[%s16858_s13 + $0x128] sm:$0xff] }
 0xd31   : > { %7431 = vmatmul.bf16.gmra.mxu1 %v16159_v7  ;;  %v13101_v26 = vld [vmem:[%s16858_s13 + $0x168] sm:$0xff] }
 0xd32   : > { %7633 = vmatmul.bf16.gmra.mxu2 %v7517_v34  ;;  %8273 = vmatpush.bf16.msrb.mxu1 %v13102_v58  ;;  %v16920_v50 = vld [vmem:[#allocation30_spill] sm:$0xff] }
 0xd33   : > { %v4342_v62 = vadd.f32 %v16008_v23, %v16920_v50  ;;  %v13109_v32 = vld [vmem:[%s16858_s13 + $0x1a8] sm:$0xff]  ;;  %8040 = vmatpush.bf16.msra.mxu0 %v13093_v30 }
 0xd34   : > { %v6912_v20 = vpop.f32.mrf.mxu3 }
 0xd35   : > { %v7594_v12 = vpop.f32.mrf.mxu2  ;;  %v6958_v47 = vadd.f32 %v6912_v20, %v4334_v63 }
 0xd36   : > { %v16164_v25 = vadd.f32 %v7594_v12, %v7393_v22  ;;  %v7394_v38 = vpop.f32.mrf.mxu1  ;;  %v7260_v31 = vpop.f32.mrf.mxu0  ;;  %v7078_v1 = vld [vmem:[#allocation2 + $0x120] sm:$0xff]  ;;  %8274 = vmatpush.bf16.msrb.mxu1 %v13101_v26 }
 0xd37   : > { %7045 = vst [vmem:[#allocation2 + $0x129] sm:$0xff] %v6958_v47  ;;  %v7395_v41 = vadd.f32 %v7394_v38, %v7257_v8  ;;  %v7179_v56 = vpack.c.bf16 %v6958_v47, %v6957_v61  ;;  %v13110_v61 = vld [vmem:[%s16858_s13 + $0x1b0] sm:$0xff]  ;;  %8041 = vmatpush.bf16.msra.mxu0 %v13092_v54 }
 0xd38   : > { %8508 = vmatpush.bf16.msra.mxu2 %v13110_v61 }
 0xd39   : > { %7832 = vmatmul.bf16.gmra.mxu3 %v16080_v59  ;;  %7299 = vmatmul.bf16.gmra.mxu0 %v7179_v56 }
 0xd3c   : > { %v6915_v60 = vpop.f32.mrf.mxu3  ;;  %8509 = vmatpush.bf16.msra.mxu2 %v13109_v32 }
 0xd3d   : > { %v7596_v55 = vpop.f32.mrf.mxu2  ;;  %v6959_v53 = vadd.f32 %v6915_v60, %v4337_v27  ;;  %v13100_v27 = vld [vmem:[%s16858_s13 + $0x160] sm:$0xff] }
 0xd3e   : > { %v16169_v24 = vadd.f32 %v7596_v55, %v7395_v41  ;;  %v7397_v52 = vpop.f32.mrf.mxu1  ;;  %v7079_v33 = vld [vmem:[#allocation2 + $0x128] sm:$0xff]  ;;  %v7262_v4 = vpop.f32.mrf.mxu0  ;;  %v13108_v60 = vld [vmem:[%s16858_s13 + $0x1a0] sm:$0xff]  ;;  %8275 = vmatpush.bf16.msrb.mxu1 %v13100_v27  ;;  %v13091_v55 = vld [vmem:[%s16858_s13 + $0x118] sm:$0xff] }
 0xd3f   : > { %v7481_v45 = vld [vmem:[#allocation2 + $0x122] sm:$0xff]  ;;  %v7482_v36 = vld [vmem:[#allocation2 + $0x12a] sm:$0xff]  ;;  %7046 = vst [vmem:[#allocation2 + $0x139] sm:$0xff] %v6959_v53  ;;  %v7398_v44 = vadd.f32 %v7397_v52, %v7260_v31  ;;  %v16171_v9 = vpack.c.bf16 %v7079_v33, %v7078_v1  ;;  %v13107_v33 = vld [vmem:[%s16858_s13 + $0x198] sm:$0xff]  ;;  %8042 = vmatpush.bf16.msra.mxu0 %v13091_v55 }
 0xd40   : > { %v7518_v59 = vpack.c.bf16 %v7482_v36, %v7481_v45  ;;  %v16921_v1 = vld [vmem:[#allocation31_spill] sm:$0xff]  ;;  %8510 = vmatpush.bf16.msra.mxu2 %v13108_v60 }
 0xd41   : > { %7436 = vmatmul.bf16.gmra.mxu1 %v16171_v9  ;;  %v4344_v52 = vadd.f32 %v16008_v23, %v16921_v1  ;;  %v16924_v1 = vld [vmem:[#allocation34_spill] sm:$0xff] }
 0xd42   : > { %7638 = vmatmul.bf16.gmra.mxu2 %v7518_v59 }
 0xd43   : > { %8043 = vmatpush.bf16.msra.mxu0 %v13090_v57 }
 0xd44   : > { %v6917_v15 = vpop.f32.mrf.mxu3  ;;  %8511 = vmatpush.bf16.msra.mxu2 %v13107_v33 }
 0xd45   : > { %v7599_v40 = vpop.f32.mrf.mxu2  ;;  %v6960_v18 = vadd.f32 %v6917_v15, %v4339_v43  ;;  %v13098_v43 = vld [vmem:[%s16858_s13 + $0x150] sm:$0xff] }
 0xd46   : > { %v16185_v16 = vadd.f32 %v7599_v40, %v7398_v44  ;;  %v7399_v14 = vpop.f32.mrf.mxu1  ;;  %v7265_v21 = vpop.f32.mrf.mxu0  ;;  %v7080_v10 = vld [vmem:[#allocation2 + $0x138] sm:$0xff]  ;;  %v13106_v15 = vld [vmem:[%s16858_s13 + $0x190] sm:$0xff]  ;;  %v13089_v40 = vld [vmem:[%s16858_s13 + $0x108] sm:$0xff] }
 0xd47   : > { %7047 = vst [vmem:[#allocation2 + $0x141] sm:$0xff] %v6960_v18  ;;  %v7400_v35 = vadd.f32 %v7399_v14, %v7262_v4  ;;  %v7180_v11 = vpack.c.bf16 %v6960_v18, %v6959_v53  ;;  %v13099_v53 = vld [vmem:[%s16858_s13 + $0x158] sm:$0xff]  ;;  %v13097_v18 = vld [vmem:[%s16858_s13 + $0x148] sm:$0xff]  ;;  %8044 = vmatpush.bf16.msra.mxu0 %v13089_v40 }
 0xd48   : > { %8276 = vmatpush.bf16.msrb.mxu1 %v13099_v53  ;;  %v16922_v14 = vld [vmem:[#allocation32_spill] sm:$0xff]  ;;  %8512 = vmatpush.bf16.msra.mxu2 %v13106_v15 }
 0xd49   : > { %7837 = vmatmul.bf16.gmra.mxu3 %v16100_v51  ;;  %7304 = vmatmul.bf16.gmra.mxu0 %v7180_v11 }
 0xd4c   : > { %v6920_v51 = vpop.f32.mrf.mxu3  ;;  %8277 = vmatpush.bf16.msrb.mxu1 %v13098_v43 }
 0xd4d   : > { %v7601_v8 = vpop.f32.mrf.mxu2  ;;  %v6961_v22 = vadd.f32 %v6920_v51, %v4342_v62 }
 0xd4e   : > { %v16208_v34 = vadd.f32 %v7601_v8, %v7400_v35  ;;  %v7402_v63 = vpop.f32.mrf.mxu1  ;;  %v7081_v20 = vld [vmem:[#allocation2 + $0x140] sm:$0xff]  ;;  %v7267_v38 = vpop.f32.mrf.mxu0  ;;  %v13105_v35 = vld [vmem:[%s16858_s13 + $0x188] sm:$0xff] }
 0xd4f   : > { %v7483_v12 = vld [vmem:[#allocation2 + $0x13a] sm:$0xff]  ;;  %v7484_v47 = vld [vmem:[#allocation2 + $0x142] sm:$0xff]  ;;  %7048 = vst [vmem:[#allocation2 + $0x151] sm:$0xff] %v6961_v22  ;;  %v7403_v31 = vadd.f32 %v7402_v63, %v7265_v21  ;;  %v16210_v41 = vpack.c.bf16 %v7081_v20, %v7080_v10  ;;  %v4347_v21 = vadd.f32 %v16008_v23, %v16922_v14  ;;  %8513 = vmatpush.bf16.msra.mxu2 %v13105_v35 }
 0xd50   : > { %v7519_v56 = vpack.c.bf16 %v7484_v47, %v7483_v12  ;;  %8278 = vmatpush.bf16.msrb.mxu1 %v13097_v18  ;;  %v13088_v10 = vld [vmem:[%s16858_s13 + $0x100] sm:$0xff]  ;;  %v16925_v18 = vld [vmem:[#allocation35_spill] sm:$0xff] }
 0xd51   : > { %7441 = vmatmul.bf16.gmra.mxu1 %v16210_v41  ;;  %v13096_v63 = vld [vmem:[%s16858_s13 + $0x140] sm:$0xff]  ;;  %8045 = vmatpush.bf16.msra.mxu0 %v13088_v10  ;;  %v4354_v14 = vadd.f32 %v16008_v23, %v16925_v18 }
 0xd52   : > { %7643 = vmatmul.bf16.gmra.mxu2 %v7519_v56  ;;  %v13104_v20 = vld [vmem:[%s16858_s13 + $0x180] sm:$0xff] }
 0xd53   : > { %v16923_v12 = vld [vmem:[#allocation33_spill] sm:$0xff]  ;;  %8514 = vmatpush.bf16.msra.mxu2 %v13104_v20 }
 0xd54   : > { %v6922_v45 = vpop.f32.mrf.mxu3  ;;  %8279 = vmatpush.bf16.msrb.mxu1 %v13096_v63  ;;  %v4349_v47 = vadd.f32 %v16008_v23, %v16923_v12  ;;  %v8160_v10 = vld [vmem:[#allocation2 + $0x22] sm:$0xff] }
 0xd55   : > { %v7604_v36 = vpop.f32.mrf.mxu2  ;;  %v6962_v4 = vadd.f32 %v6922_v45, %v4344_v52  ;;  %v4352_v52 = vadd.f32 %v16008_v23, %v16924_v1  ;;  %v8395_v23 = vld [vmem:[#allocation2 + $0x38] sm:$0xff] }
 0xd56   : > { %v16233_v44 = vadd.f32 %v7604_v36, %v7403_v31  ;;  %v7404_v59 = vpop.f32.mrf.mxu1  ;;  %v7270_v49 = vpop.f32.mrf.mxu0  ;;  %v7082_v61 = vld [vmem:[#allocation2 + $0x150] sm:$0xff] }
 0xd57   : > { %7049 = vst [vmem:[#allocation2 + $0x159] sm:$0xff] %v6962_v4  ;;  %v7405_v39 = vadd.f32 %v7404_v59, %v7267_v38  ;;  %v7181_v6 = vpack.c.bf16 %v6962_v4, %v6961_v22 }
 0xd59   : > { %7842 = vmatmul.bf16.gmra.mxu3 %v16113_v13  ;;  %7309 = vmatmul.bf16.gmra.mxu0 %v7181_v6 }
 0xd5c   : > { %v6925_v13 = vpop.f32.mrf.mxu3 }
 0xd5d   : > { %v7606_v11 = vpop.f32.mrf.mxu2  ;;  %v6963_v19 = vadd.f32 %v6925_v13, %v4347_v21  ;;  %v7926_v13 = vld [vmem:[#allocation2 + $0x21] sm:$0xff] }
 0xd5e   : > { %v16256_v58 = vadd.f32 %v7606_v11, %v7405_v39  ;;  %v7407_v30 = vpop.f32.mrf.mxu1  ;;  %v7083_v26 = vld [vmem:[#allocation2 + $0x158] sm:$0xff]  ;;  %v7272_v32 = vpop.f32.mrf.mxu0 }
 0xd5f   : > { %v7485_v50 = vld [vmem:[#allocation2 + $0x152] sm:$0xff]  ;;  %v7486_v62 = vld [vmem:[#allocation2 + $0x15a] sm:$0xff]  ;;  %7050 = vst [vmem:[#allocation2 + $0x169] sm:$0xff] %v6963_v19  ;;  %v7408_v51 = vadd.f32 %v7407_v30, %v7270_v49  ;;  %v16258_v8 = vpack.c.bf16 %v7083_v26, %v7082_v61 }
 0xd60   : > { %v7520_v22 = vpack.c.bf16 %v7486_v62, %v7485_v50  ;;  %v7925_v26 = vld [vmem:[#allocation2 + $0x19] sm:$0xff] }
 0xd61   : > { %7446 = vmatmul.bf16.gmra.mxu1 %v16258_v8  ;;  %v7974_v62 = vpack.c.bf16 %v7926_v13, %v7925_v26 }
 0xd62   : > { %7648 = vmatmul.bf16.gmra.mxu2 %v7520_v22  ;;  %v8159_v22 = vld [vmem:[#allocation2 + $0x1a] sm:$0xff] }
 0xd64   : > { %v6927_v38 = vpop.f32.mrf.mxu3 }
 0xd65   : > { %v7609_v31 = vpop.f32.mrf.mxu2  ;;  %v6964_v56 = vadd.f32 %v6927_v38, %v4349_v47  ;;  %v8394_v47 = vld [vmem:[#allocation2 + $0x30] sm:$0xff] }
 0xd66   : > { %v16272_v54 = vadd.f32 %v7609_v31, %v7408_v51  ;;  %v7409_v27 = vpop.f32.mrf.mxu1  ;;  %v7275_v60 = vpop.f32.mrf.mxu0  ;;  %v7084_v59 = vld [vmem:[#allocation2 + $0x168] sm:$0xff] }
 0xd67   : > { %7051 = vst [vmem:[#allocation2 + $0x171] sm:$0xff] %v6964_v56  ;;  %v7410_v55 = vadd.f32 %v7409_v27, %v7272_v32  ;;  %v7182_v53 = vpack.c.bf16 %v6964_v56, %v6963_v19  ;;  %v8208_v56 = vpack.c.bf16 %v8160_v10, %v8159_v22  ;;  %v8443_v27 = vpack.c.bf16 %v8395_v23, %v8394_v47  ;;  %v8163_v10 = vld [vmem:[#allocation2 + $0x4a] sm:$0xff]  ;;  %v8164_v23 = vld [vmem:[#allocation2 + $0x52] sm:$0xff] }
 0xd69   : > { %7847 = vmatmul.bf16.gmra.mxu3 %v16123_v46  ;;  %7314 = vmatmul.bf16.gmra.mxu0 %v7182_v53 }
 0xd6c   : > { %v6930_v33 = vpop.f32.mrf.mxu3 }
 0xd6d   : > { %v7611_v45 = vpop.f32.mrf.mxu2  ;;  %v6965_v36 = vadd.f32 %v6930_v33, %v4352_v52  ;;  %v7927_v33 = vld [vmem:[#allocation2 + $0x31] sm:$0xff] }
 0xd6e   : > { %v16277_v4 = vadd.f32 %v7611_v45, %v7410_v55  ;;  %v7412_v49 = vpop.f32.mrf.mxu1  ;;  %v7085_v39 = vld [vmem:[#allocation2 + $0x170] sm:$0xff]  ;;  %v7277_v43 = vpop.f32.mrf.mxu0  ;;  %v7928_v55 = vld [vmem:[#allocation2 + $0x39] sm:$0xff] }
 0xd6f   : > { %v7487_v6 = vld [vmem:[#allocation2 + $0x16a] sm:$0xff]  ;;  %v7488_v57 = vld [vmem:[#allocation2 + $0x172] sm:$0xff]  ;;  %7052 = vst [vmem:[#allocation2 + $0x181] sm:$0xff] %v6965_v36  ;;  %v7413_v15 = vadd.f32 %v7412_v49, %v7275_v60  ;;  %v16279_v40 = vpack.c.bf16 %v7085_v39, %v7084_v59  ;;  %v8162_v39 = vld [vmem:[#allocation2 + $0x3a] sm:$0xff] }
 0xd70   : > { %v7521_v46 = vpack.c.bf16 %v7488_v57, %v7487_v6  ;;  %v8161_v49 = vld [vmem:[#allocation2 + $0x32] sm:$0xff] }
 0xd71   : > { %7451 = vmatmul.bf16.gmra.mxu1 %v16279_v40  ;;  %v8397_v6 = vld [vmem:[#allocation2 + $0x50] sm:$0xff] }
 0xd72   : > { %7653 = vmatmul.bf16.gmra.mxu2 %v7521_v46  ;;  %v8396_v46 = vld [vmem:[#allocation2 + $0x48] sm:$0xff] }
 0xd74   : > { %v6932_v21 = vpop.f32.mrf.mxu3 }
 0xd75   : > { %v7614_v35 = vpop.f32.mrf.mxu2  ;;  %v6966_v11 = vadd.f32 %v6932_v21, %v4354_v14  ;;  %v8209_v21 = vpack.c.bf16 %v8162_v39, %v8161_v49 }
 0xd76   : > { %v16284_v19 = vadd.f32 %v7614_v35, %v7413_v15  ;;  %v7414_v61 = vpop.f32.mrf.mxu1  ;;  %v7280_v30 = vpop.f32.mrf.mxu0  ;;  %v8444_v35 = vpack.c.bf16 %v8397_v6, %v8396_v46  ;;  %v8165_v46 = vld [vmem:[#allocation2 + $0x62] sm:$0xff] }
 0xd77   : > { %7053 = vst [vmem:[#allocation2 + $0x189] sm:$0xff] %v6966_v11  ;;  %v7415_v50 = vadd.f32 %v7414_v61, %v7277_v43  ;;  %v7930_v11 = vld [vmem:[#allocation2 + $0x51] sm:$0xff] }
 0xd79   : > { %7852 = vmatmul.bf16.gmra.mxu3 %v16135_v5  ;;  %8046 = vmatmul.bf16.vlgmr.msra.gmra.mxu0 %v7974_v62 }
 0xd7c   : > { %v7813_v51 = vpop.f32.mrf.mxu3 }
 0xd7d   : > { %v7616_v32 = vpop.f32.mrf.mxu2  ;;  %v16290_v20 = vadd.f32 %v7813_v51, %v16109_v0  ;;  %v16296_v0 = vpack.c.bf16 %v7928_v55, %v7927_v33 }
 0xd7e   : > { %v16287_v63 = vadd.f32 %v7616_v32, %v7415_v50  ;;  %v7417_v12 = vpop.f32.mrf.mxu1  ;;  %v7282_v38 = vpop.f32.mrf.mxu0 }
 0xd7f   : > { %v7418_v31 = vadd.f32 %v7417_v12, %v7280_v30  ;;  %v8399_v12 = vld [vmem:[#allocation2 + $0x68] sm:$0xff] }
 0xd81   : > { %8280 = vmatmul.bf16.vlgmr.msrb.gmra.mxu1 %v8208_v56 }
 0xd82   : > { %8515 = vmatmul.bf16.vlgmr.msra.gmra.mxu2 %v8443_v27 }
 0xd84   : > { %v16292_v60 = vpop.f32.mrf.mxu3 }
 0xd85   : > { %v7619_v5 = vpop.f32.mrf.mxu2 }
 0xd86   : > { %v16294_v53 = vadd.f32 %v7619_v5, %v7418_v31  ;;  %v7419_v1 = vpop.f32.mrf.mxu1  ;;  %v7285_v52 = vpop.f32.mrf.mxu0  ;;  %v8398_v31 = vld [vmem:[#allocation2 + $0x60] sm:$0xff]  ;;  %v8210_v5 = vpack.c.bf16 %v8164_v23, %v8163_v10 }
 0xd87   : > { %v7420_v45 = vadd.f32 %v7419_v1, %v7282_v38  ;;  %v8445_v55 = vpack.c.bf16 %v8399_v12, %v8398_v31  ;;  %v13119_v31 = vld [vmem:[%s16858_s13 + $0x1f8] sm:$0xff] }
 0xd88   : > { %8741 = vmatpush.bf16.msrb.mxu3 %v13119_v31 }
 0xd89   : > { %7857 = vmatmul.bf16.gmra.mxu3 %v16147_v2  ;;  %8051 = vmatmul.bf16.gmra.mxu0 %v16296_v0 }
 0xd8c   : > { %v7818_v59 = vpop.f32.mrf.mxu3 }
 0xd8d   : > { %v7621_v36 = vpop.f32.mrf.mxu2  ;;  %v16303_v43 = vadd.f32 %v7818_v59, %v16140_v42  ;;  %v7929_v42 = vld [vmem:[#allocation2 + $0x49] sm:$0xff] }
 0xd8e   : > { %v16300_v57 = vadd.f32 %v7621_v36, %v7420_v45  ;;  %v7422_v15 = vpop.f32.mrf.mxu1  ;;  %v7287_v18 = vpop.f32.mrf.mxu0  ;;  %v16310_v32 = vpack.c.bf16 %v7930_v11, %v7929_v42 }
 0xd8f   : > { %v7423_v14 = vadd.f32 %v7422_v15, %v7285_v52  ;;  %v7932_v52 = vld [vmem:[#allocation2 + $0x69] sm:$0xff] }
 0xd91   : > { %8285 = vmatmul.bf16.gmra.mxu1 %v8209_v21 }
 0xd92   : > { %8520 = vmatmul.bf16.gmra.mxu2 %v8444_v35 }
 0xd94   : > { %v7820_v13 = vpop.f32.mrf.mxu3 }
 0xd95   : > { %v7624_v2 = vpop.f32.mrf.mxu2  ;;  %v16308_v30 = vadd.f32 %v7820_v13, %v16145_v3 }
 0xd96   : > { %v16305_v61 = vadd.f32 %v7624_v2, %v7423_v14  ;;  %v7424_v26 = vpop.f32.mrf.mxu1  ;;  %v7290_v50 = vpop.f32.mrf.mxu0  ;;  %v8401_v14 = vld [vmem:[#allocation2 + $0x80] sm:$0xff]  ;;  %v8400_v2 = vld [vmem:[#allocation2 + $0x78] sm:$0xff] }
 0xd97   : > { %v7425_v62 = vadd.f32 %v7424_v26, %v7287_v18  ;;  %v8166_v18 = vld [vmem:[#allocation2 + $0x6a] sm:$0xff] }
 0xd98   : > { %v8211_v26 = vpack.c.bf16 %v8166_v18, %v8165_v46  ;;  %v7936_v18 = vld [vmem:[#allocation2 + $0x99] sm:$0xff] }
 0xd99   : > { %7862 = vmatmul.bf16.gmra.mxu3 %v16159_v7  ;;  %8056 = vmatmul.bf16.gmra.mxu0 %v16310_v32 }
 0xd9c   : > { %v7823_v22 = vpop.f32.mrf.mxu3 }
 0xd9d   : > { %v7626_v51 = vpop.f32.mrf.mxu2  ;;  %v16317_v3 = vadd.f32 %v7823_v22, %v16152_v37  ;;  %v7931_v37 = vld [vmem:[#allocation2 + $0x61] sm:$0xff] }
 0xd9e   : > { %v16314_v47 = vadd.f32 %v7626_v51, %v7425_v62  ;;  %v7427_v38 = vpop.f32.mrf.mxu1  ;;  %v7292_v56 = vpop.f32.mrf.mxu0  ;;  %v16324_v39 = vpack.c.bf16 %v7932_v52, %v7931_v37  ;;  %v7934_v62 = vld [vmem:[#allocation2 + $0x81] sm:$0xff] }
 0xd9f   : > { %v7428_v27 = vadd.f32 %v7427_v38, %v7290_v50  ;;  %v8446_v50 = vpack.c.bf16 %v8401_v14, %v8400_v2 }
 0xda1   : > { %8290 = vmatmul.bf16.gmra.mxu1 %v8210_v5  ;;  %v8167_v5 = vld [vmem:[#allocation2 + $0x7a] sm:$0xff] }
 0xda2   : > { %8525 = vmatmul.bf16.gmra.mxu2 %v8445_v55  ;;  %v8403_v55 = vld [vmem:[#allocation2 + $0x98] sm:$0xff] }
 0xda4   : > { %v7825_v1 = vpop.f32.mrf.mxu3 }
 0xda5   : > { %v7629_v7 = vpop.f32.mrf.mxu2  ;;  %v16322_v45 = vadd.f32 %v7825_v1, %v16157_v29 }
 0xda6   : > { %v16319_v33 = vadd.f32 %v7629_v7, %v7428_v27  ;;  %v7429_v36 = vpop.f32.mrf.mxu1  ;;  %v7295_v59 = vpop.f32.mrf.mxu0 }
 0xda7   : > { %v7430_v49 = vadd.f32 %v7429_v36, %v7292_v56  ;;  %v8402_v36 = vld [vmem:[#allocation2 + $0x90] sm:$0xff] }
 0xda9   : > { %7867 = vmatmul.bf16.gmra.mxu3 %v16171_v9  ;;  %8061 = vmatmul.bf16.gmra.mxu0 %v16324_v39 }
 0xdac   : > { %v7828_v15 = vpop.f32.mrf.mxu3 }
 0xdad   : > { %v7631_v6 = vpop.f32.mrf.mxu2  ;;  %v16331_v29 = vadd.f32 %v7828_v15, %v16164_v25  ;;  %v7933_v25 = vld [vmem:[#allocation2 + $0x79] sm:$0xff] }
 0xdae   : > { %v16328_v21 = vadd.f32 %v7631_v6, %v7430_v49  ;;  %v7432_v35 = vpop.f32.mrf.mxu1  ;;  %v7297_v13 = vpop.f32.mrf.mxu0  ;;  %v16338_v38 = vpack.c.bf16 %v7934_v62, %v7933_v25  ;;  %v8447_v49 = vpack.c.bf16 %v8403_v55, %v8402_v36  ;;  %v13118_v6 = vld [vmem:[%s16858_s13 + $0x1f0] sm:$0xff] }
 0xdaf   : > { %v7433_v11 = vadd.f32 %v7432_v35, %v7295_v59  ;;  %8742 = vmatpush.bf16.msrb.mxu3 %v13118_v6  ;;  %v8405_v25 = vld [vmem:[#allocation2 + $0xb0] sm:$0xff] }
 0xdb1   : > { %8295 = vmatmul.bf16.gmra.mxu1 %v8211_v26 }
 0xdb2   : > { %8530 = vmatmul.bf16.gmra.mxu2 %v8446_v50 }
 0xdb4   : > { %v7830_v42 = vpop.f32.mrf.mxu3 }
 0xdb5   : > { %v7634_v9 = vpop.f32.mrf.mxu2  ;;  %v16336_v22 = vadd.f32 %v7830_v42, %v16169_v24  ;;  %v8168_v24 = vld [vmem:[#allocation2 + $0x82] sm:$0xff] }
 0xdb6   : > { %v16333_v51 = vadd.f32 %v7634_v9, %v7433_v11  ;;  %v7434_v10 = vpop.f32.mrf.mxu1  ;;  %v7300_v23 = vpop.f32.mrf.mxu0  ;;  %v16350_v37 = vpack.c.bf16 %v8168_v24, %v8167_v5  ;;  %v7935_v11 = vld [vmem:[#allocation2 + $0x91] sm:$0xff]  ;;  %v13116_v9 = vld [vmem:[%s16858_s13 + $0x1e0] sm:$0xff] }
 0xdb7   : > { %v7435_v12 = vadd.f32 %v7434_v10, %v7297_v13  ;;  %v16364_v50 = vpack.c.bf16 %v7936_v18, %v7935_v11  ;;  %v8169_v10 = vld [vmem:[#allocation2 + $0x92] sm:$0xff] }
 0xdb9   : > { %7872 = vmatmul.bf16.gmra.mxu3 %v16210_v41  ;;  %8066 = vmatmul.bf16.gmra.mxu0 %v16338_v38 }
 0xdbc   : > { %v7833_v27 = vpop.f32.mrf.mxu3 }
 0xdbd   : > { %v7636_v56 = vpop.f32.mrf.mxu2  ;;  %v16348_v1 = vadd.f32 %v7833_v27, %v16185_v16  ;;  %v13117_v16 = vld [vmem:[%s16858_s13 + $0x1e8] sm:$0xff] }
 0xdbe   : > { %v16345_v7 = vadd.f32 %v7636_v56, %v7435_v12  ;;  %v7437_v52 = vpop.f32.mrf.mxu1  ;;  %v7302_v41 = vpop.f32.mrf.mxu0  ;;  %8743 = vmatpush.bf16.msrb.mxu3 %v13117_v16  ;;  %v8404_v27 = vld [vmem:[#allocation2 + $0xa8] sm:$0xff] }
 0xdbf   : > { %v7438_v59 = vadd.f32 %v7437_v52, %v7300_v23  ;;  %v8170_v23 = vld [vmem:[#allocation2 + $0x9a] sm:$0xff]  ;;  %v8448_v55 = vpack.c.bf16 %v8405_v25, %v8404_v27  ;;  %v13114_v52 = vld [vmem:[%s16858_s13 + $0x1d0] sm:$0xff] }
 0xdc0   : > { %v16379_v24 = vpack.c.bf16 %v8170_v23, %v8169_v10  ;;  %v8406_v23 = vld [vmem:[#allocation2 + $0xc0] sm:$0xff] }
 0xdc1   : > { %8300 = vmatmul.bf16.gmra.mxu1 %v16350_v37 }
 0xdc2   : > { %8535 = vmatmul.bf16.gmra.mxu2 %v8447_v49  ;;  %8744 = vmatpush.bf16.msrb.mxu3 %v13116_v9  ;;  %v8172_v9 = vld [vmem:[#allocation2 + $0xb2] sm:$0xff] }
 0xdc4   : > { %v7835_v46 = vpop.f32.mrf.mxu3 }
 0xdc5   : > { %v7639_v15 = vpop.f32.mrf.mxu2  ;;  %v16362_v35 = vadd.f32 %v7835_v46, %v16208_v34  ;;  %v13115_v34 = vld [vmem:[%s16858_s13 + $0x1d8] sm:$0xff]  ;;  %v7937_v46 = vld [vmem:[#allocation2 + $0xa9] sm:$0xff] }
 0xdc6   : > { %v16359_v14 = vadd.f32 %v7639_v15, %v7438_v59  ;;  %v7439_v2 = vpop.f32.mrf.mxu1  ;;  %v7305_v13 = vpop.f32.mrf.mxu0  ;;  %8745 = vmatpush.bf16.msrb.mxu3 %v13115_v34  ;;  %v7938_v59 = vld [vmem:[#allocation2 + $0xb1] sm:$0xff]  ;;  %v8407_v34 = vld [vmem:[#allocation2 + $0xc8] sm:$0xff] }
 0xdc7   : > { %v7440_v26 = vadd.f32 %v7439_v2, %v7302_v41  ;;  %v16393_v2 = vpack.c.bf16 %v7938_v59, %v7937_v46 }
 0xdc9   : > { %7877 = vmatmul.bf16.gmra.mxu3 %v16258_v8  ;;  %8071 = vmatmul.bf16.gmra.mxu0 %v16364_v50 }
 0xdca   : > { %8746 = vmatpush.bf16.msrb.mxu3 %v13114_v52  ;;  %v7940_v52 = vld [vmem:[#allocation2 + $0xc9] sm:$0xff] }
 0xdcc   : > { %v7838_v62 = vpop.f32.mrf.mxu3 }
 0xdcd   : > { %v7641_v42 = vpop.f32.mrf.mxu2  ;;  %v16377_v31 = vadd.f32 %v7838_v62, %v16233_v44  ;;  %v13113_v44 = vld [vmem:[%s16858_s13 + $0x1c8] sm:$0xff] }
 0xdce   : > { %v16374_v12 = vadd.f32 %v7641_v42, %v7440_v26  ;;  %v7442_v56 = vpop.f32.mrf.mxu1  ;;  %v7307_v8 = vpop.f32.mrf.mxu0  ;;  %8747 = vmatpush.bf16.msrb.mxu3 %v13113_v44 }
 0xdcf   : > { %v7443_v5 = vadd.f32 %v7442_v56, %v7305_v13  ;;  %v13112_v13 = vld [vmem:[%s16858_s13 + $0x1c0] sm:$0xff] }
 0xdd1   : > { %8305 = vmatmul.bf16.gmra.mxu1 %v16379_v24 }
 0xdd2   : > { %8540 = vmatmul.bf16.gmra.mxu2 %v8448_v55  ;;  %8748 = vmatpush.bf16.msrb.mxu3 %v13112_v13  ;;  %v7722_v55 = vld [vmem:[#allocation2 + $0x188] sm:$0xff] }
 0xdd4   : > { %v7840_v41 = vpop.f32.mrf.mxu3 }
 0xdd5   : > { %v7644_v36 = vpop.f32.mrf.mxu2  ;;  %v16391_v6 = vadd.f32 %v7840_v41, %v16256_v58  ;;  %v8171_v58 = vld [vmem:[#allocation2 + $0xaa] sm:$0xff]  ;;  %v7721_v41 = vld [vmem:[#allocation2 + $0x180] sm:$0xff] }
 0xdd6   : > { %v16388_v49 = vadd.f32 %v7644_v36, %v7443_v5  ;;  %v7444_v16 = vpop.f32.mrf.mxu1  ;;  %v7310_v15 = vpop.f32.mrf.mxu0  ;;  %v16405_v27 = vpack.c.bf16 %v8172_v9, %v8171_v58  ;;  %v16413_v46 = vpack.c.bf16 %v7722_v55, %v7721_v41  ;;  %v8174_v58 = vld [vmem:[#allocation2 + $0xca] sm:$0xff]  ;;  %v8409_v9 = vld [vmem:[#allocation2 + $0xe0] sm:$0xff] }
 0xdd7   : > { %v7445_v18 = vadd.f32 %v7444_v16, %v7307_v8  ;;  %v7939_v16 = vld [vmem:[#allocation2 + $0xc1] sm:$0xff] }
 0xdd9   : > { %7882 = vmatmul.bf16.gmra.mxu3 %v16279_v40  ;;  %8076 = vmatmul.bf16.gmra.mxu0 %v16393_v2  ;;  %v8449_v40 = vpack.c.bf16 %v8407_v34, %v8406_v23  ;;  %v8408_v23 = vld [vmem:[#allocation2 + $0xd8] sm:$0xff] }
 0xddc   : > { %v7843_v26 = vpop.f32.mrf.mxu3 }
 0xddd   : > { %v7646_v11 = vpop.f32.mrf.mxu2  ;;  %v16403_v62 = vadd.f32 %v7843_v26, %v16272_v54  ;;  %v8173_v26 = vld [vmem:[#allocation2 + $0xc2] sm:$0xff] }
 0xdde   : > { %v16400_v42 = vadd.f32 %v7646_v11, %v7445_v18  ;;  %v7447_v10 = vpop.f32.mrf.mxu1  ;;  %v7312_v25 = vpop.f32.mrf.mxu0  ;;  %v16415_v18 = vpack.c.bf16 %v7940_v52, %v7939_v16  ;;  %v7942_v52 = vld [vmem:[#allocation2 + $0xe1] sm:$0xff] }
 0xddf   : > { %v7448_v56 = vadd.f32 %v7447_v10, %v7310_v15 }
 0xde1   : > { %8310 = vmatmul.bf16.gmra.mxu1 %v16405_v27 }
 0xde2   : > { %8545 = vmatmul.bf16.gmra.mxu2 %v8449_v40  ;;  %v16424_v40 = vpack.c.bf16 %v8174_v58, %v8173_v26 }
 0xde4   : > { %v7845_v5 = vpop.f32.mrf.mxu3 }
 0xde5   : > { %v7649_v8 = vpop.f32.mrf.mxu2  ;;  %v16411_v36 = vadd.f32 %v7845_v5, %v16277_v4 }
 0xde6   : > { %v16408_v44 = vadd.f32 %v7649_v8, %v7448_v56  ;;  %v7449_v54 = vpop.f32.mrf.mxu1  ;;  %v7315_v59 = vpop.f32.mrf.mxu0  ;;  %v8450_v8 = vpack.c.bf16 %v8409_v9, %v8408_v23  ;;  %v8176_v23 = vld [vmem:[#allocation2 + $0xe2] sm:$0xff] }
 0xde7   : > { %v7450_v15 = vadd.f32 %v7449_v54, %v7312_v25 }
 0xde9   : > { %7887 = vmatmul.bf16.gmra.mxu3 %v16413_v46  ;;  %8081 = vmatmul.bf16.gmra.mxu0 %v16415_v18 }
 0xdec   : > { %v7848_v11 = vpop.f32.mrf.mxu3 }
 0xded   : > { %v7651_v13 = vpop.f32.mrf.mxu2  ;;  %v16422_v34 = vadd.f32 %v7848_v11, %v16284_v19 }
 0xdee   : > { %v16419_v4 = vadd.f32 %v7651_v13, %v7450_v15  ;;  %v7452_v10 = vpop.f32.mrf.mxu1  ;;  %v7317_v25 = vpop.f32.mrf.mxu0  ;;  %v7941_v15 = vld [vmem:[#allocation2 + $0xd9] sm:$0xff] }
 0xdef   : > { %v7453_v56 = vadd.f32 %v7452_v10, %v7315_v59  ;;  %v7380_v59 = vadd.f32 %v16128_v48, %v16121_v28  ;;  %v16435_v26 = vpack.c.bf16 %v7942_v52, %v7941_v15  ;;  %v8175_v10 = vld [vmem:[#allocation2 + $0xda] sm:$0xff] }
 0xdf0   : > { %v7944_v15 = vld [vmem:[#allocation2 + $0xf9] sm:$0xff] }
 0xdf1   : > { %8315 = vmatmul.bf16.gmra.mxu1 %v16424_v40  ;;  %v7660_v58 = vadd.f32 %v16133_v17, %v7380_v59 }
 0xdf2   : > { %8550 = vmatmul.bf16.gmra.mxu2 %v8450_v8 }
 0xdf3   : > { %v7894_v8 = vadd.f32 %v16292_v60, %v7660_v58  ;;  %v7943_v58 = vld [vmem:[#allocation2 + $0xf1] sm:$0xff] }
 0xdf4   : > { %v7850_v55 = vpop.f32.mrf.mxu3 }
 0xdf5   : > { %v7654_v5 = vpop.f32.mrf.mxu2  ;;  %v16430_v41 = vadd.f32 %v7850_v55, %v16287_v63  ;;  %v16446_v55 = vpack.c.bf16 %v8176_v23, %v8175_v10 }
 0xdf6   : > { %v16427_v54 = vadd.f32 %v7654_v5, %v7453_v56  ;;  %v7454_v19 = vpop.f32.mrf.mxu1  ;;  %v8047_v16 = vpop.f32.mrf.mxu0  ;;  %v8411_v56 = vld [vmem:[#allocation2 + $0xf8] sm:$0xff] }
 0xdf7   : > { %v7455_v13 = vadd.f32 %v7454_v19, %v7317_v25  ;;  %v8127_v11 = vadd.f32 %v8047_v16, %v16290_v20  ;;  %v8410_v20 = vld [vmem:[#allocation2 + $0xf0] sm:$0xff] }
 0xdf8   : > { %v8451_v52 = vpack.c.bf16 %v8411_v56, %v8410_v20  ;;  %v8177_v56 = vld [vmem:[#allocation2 + $0xf2] sm:$0xff] }
 0xdf9   : > { %8749 = vmatmul.bf16.vlgmr.msrb.gmra.mxu3 %v16296_v0  ;;  %8086 = vmatmul.bf16.gmra.mxu0 %v16435_v26 }
 0xdfc   : > { %v7853_v63 = vpop.f32.mrf.mxu3 }
 0xdfd   : > { %v7656_v9 = vpop.f32.mrf.mxu2  ;;  %v16444_v28 = vadd.f32 %v7853_v63, %v16294_v53  ;;  %v16455_v63 = vpack.c.bf16 %v7944_v15, %v7943_v58 }
 0xdfe   : > { %v16441_v5 = vadd.f32 %v7656_v9, %v7455_v13  ;;  %v8281_v48 = vpop.f32.mrf.mxu1  ;;  %v8049_v25 = vpop.f32.mrf.mxu0 }
 0xdff   : > { %v8361_v0 = vadd.f32 %v8281_v48, %v8127_v11  ;;  %v8128_v17 = vadd.f32 %v8049_v25, %v7894_v8  ;;  %v8178_v8 = vld [vmem:[#allocation2 + $0xfa] sm:$0xff] }
 0xe01   : > { %8320 = vmatmul.bf16.gmra.mxu1 %v16446_v55 }
 0xe02   : > { %8555 = vmatmul.bf16.gmra.mxu2 %v8451_v52 }
 0xe04   : > { %v7855_v19 = vpop.f32.mrf.mxu3 }
 0xe05   : > { %v8516_v16 = vpop.f32.mrf.mxu2  ;;  %v16450_v60 = vadd.f32 %v7855_v19, %v16300_v57  ;;  %v8413_v57 = vld [vmem:[#allocation2 + $0x110] sm:$0xff] }
 0xe06   : > { %v16452_v59 = vadd.f32 %v8516_v16, %v8361_v0  ;;  %v8283_v53 = vpop.f32.mrf.mxu1  ;;  %v8052_v13 = vpop.f32.mrf.mxu0  ;;  %v8412_v0 = vld [vmem:[#allocation2 + $0x108] sm:$0xff] }
 0xe07   : > { %v8362_v9 = vadd.f32 %v8283_v53, %v8128_v17  ;;  %v8129_v11 = vadd.f32 %v8052_v13, %v16303_v43  ;;  %v16464_v17 = vpack.c.bf16 %v8178_v8, %v8177_v56  ;;  %v8452_v19 = vpack.c.bf16 %v8413_v57, %v8412_v0  ;;  %v7946_v53 = vld [vmem:[#allocation2 + $0x111] sm:$0xff] }
 0xe08   : > { %v8179_v57 = vld [vmem:[#allocation2 + $0x10a] sm:$0xff] }
 0xe09   : > { %8754 = vmatmul.bf16.gmra.mxu3 %v16310_v32  ;;  %8091 = vmatmul.bf16.gmra.mxu0 %v16455_v63 }
 0xe0c   : > { %v7858_v10 = vpop.f32.mrf.mxu3 }
 0xe0d   : > { %v8518_v23 = vpop.f32.mrf.mxu2  ;;  %v16460_v48 = vadd.f32 %v7858_v10, %v16305_v61  ;;  %v7945_v10 = vld [vmem:[#allocation2 + $0x109] sm:$0xff] }
 0xe0e   : > { %v16462_v20 = vadd.f32 %v8518_v23, %v8362_v9  ;;  %v8286_v25 = vpop.f32.mrf.mxu1  ;;  %v8054_v52 = vpop.f32.mrf.mxu0  ;;  %v16474_v56 = vpack.c.bf16 %v7946_v53, %v7945_v10 }
 0xe0f   : > { %v8363_v43 = vadd.f32 %v8286_v25, %v8129_v11  ;;  %v8130_v32 = vadd.f32 %v8054_v52, %v16308_v30  ;;  %v8180_v25 = vld [vmem:[#allocation2 + $0x112] sm:$0xff] }
 0xe11   : > { %8325 = vmatmul.bf16.gmra.mxu1 %v16464_v17 }
 0xe12   : > { %8560 = vmatmul.bf16.gmra.mxu2 %v8452_v19  ;;  %v8414_v19 = vld [vmem:[#allocation2 + $0x120] sm:$0xff] }
 0xe14   : > { %v7860_v16 = vpop.f32.mrf.mxu3 }
 0xe15   : > { %v8521_v15 = vpop.f32.mrf.mxu2  ;;  %v16469_v61 = vadd.f32 %v7860_v16, %v16314_v47  ;;  %v8415_v47 = vld [vmem:[#allocation2 + $0x128] sm:$0xff]  ;;  %v16483_v16 = vpack.c.bf16 %v8180_v25, %v8179_v57 }
 0xe16   : > { %v16471_v13 = vadd.f32 %v8521_v15, %v8363_v43  ;;  %v8288_v58 = vpop.f32.mrf.mxu1  ;;  %v8057_v9 = vpop.f32.mrf.mxu0  ;;  %v8453_v15 = vpack.c.bf16 %v8415_v47, %v8414_v19  ;;  %v8182_v19 = vld [vmem:[#allocation2 + $0x12a] sm:$0xff] }
 0xe17   : > { %v8364_v11 = vadd.f32 %v8288_v58, %v8130_v32  ;;  %v8131_v23 = vadd.f32 %v8057_v9, %v16317_v3  ;;  %16926 = vst [vmem:[#allocation11_spill] sm:$0xff] %v16483_v16  ;;  %v7948_v9 = vld [vmem:[#allocation2 + $0x129] sm:$0xff] }
 0xe19   : > { %8759 = vmatmul.bf16.gmra.mxu3 %v16324_v39  ;;  %8096 = vmatmul.bf16.gmra.mxu0 %v16474_v56 }
 0xe1c   : > { %v7863_v30 = vpop.f32.mrf.mxu3 }
 0xe1d   : > { %v8523_v8 = vpop.f32.mrf.mxu2  ;;  %v16479_v0 = vadd.f32 %v7863_v30, %v16319_v33 }
 0xe1e   : > { %v16481_v52 = vadd.f32 %v8523_v8, %v8364_v11  ;;  %v8291_v43 = vpop.f32.mrf.mxu1  ;;  %v8059_v32 = vpop.f32.mrf.mxu0  ;;  %v7947_v8 = vld [vmem:[#allocation2 + $0x121] sm:$0xff] }
 0xe1f   : > { %v8365_v3 = vadd.f32 %v8291_v43, %v8131_v23  ;;  %v8132_v39 = vadd.f32 %v8059_v32, %v16322_v45  ;;  %v16493_v25 = vpack.c.bf16 %v7948_v9, %v7947_v8  ;;  %v8181_v43 = vld [vmem:[#allocation2 + $0x122] sm:$0xff] }
 0xe20   : > { %v7950_v8 = vld [vmem:[#allocation2 + $0x141] sm:$0xff] }
 0xe21   : > { %8330 = vmatmul.bf16.gmra.mxu1 %v16483_v16  ;;  %v7949_v16 = vld [vmem:[#allocation2 + $0x139] sm:$0xff] }
 0xe22   : > { %8565 = vmatmul.bf16.gmra.mxu2 %v8453_v15 }
 0xe24   : > { %v7865_v53 = vpop.f32.mrf.mxu3 }
 0xe25   : > { %v8526_v58 = vpop.f32.mrf.mxu2  ;;  %v16488_v33 = vadd.f32 %v7865_v53, %v16328_v21  ;;  %v8417_v21 = vld [vmem:[#allocation2 + $0x140] sm:$0xff] }
 0xe26   : > { %v16490_v10 = vadd.f32 %v8526_v58, %v8365_v3  ;;  %v8293_v11 = vpop.f32.mrf.mxu1  ;;  %v8062_v30 = vpop.f32.mrf.mxu0  ;;  %v16502_v58 = vpack.c.bf16 %v8182_v19, %v8181_v43  ;;  %v16514_v19 = vpack.c.bf16 %v7950_v8, %v7949_v16 }
 0xe27   : > { %v8366_v23 = vadd.f32 %v8293_v11, %v8132_v39  ;;  %v8133_v57 = vadd.f32 %v8062_v30, %v16331_v29  ;;  %v8416_v39 = vld [vmem:[#allocation2 + $0x138] sm:$0xff] }
 0xe28   : > { %v8454_v9 = vpack.c.bf16 %v8417_v21, %v8416_v39  ;;  %v8419_v39 = vld [vmem:[#allocation2 + $0x158] sm:$0xff] }
 0xe29   : > { %8764 = vmatmul.bf16.gmra.mxu3 %v16338_v38  ;;  %8101 = vmatmul.bf16.gmra.mxu0 %v16493_v25 }
 0xe2c   : > { %v7868_v45 = vpop.f32.mrf.mxu3 }
 0xe2d   : > { %v8528_v47 = vpop.f32.mrf.mxu2  ;;  %v16498_v32 = vadd.f32 %v7868_v45, %v16333_v51 }
 0xe2e   : > { %v16500_v3 = vadd.f32 %v8528_v47, %v8366_v23  ;;  %v8296_v15 = vpop.f32.mrf.mxu1  ;;  %v8064_v53 = vpop.f32.mrf.mxu0 }
 0xe2f   : > { %v8367_v29 = vadd.f32 %v8296_v15, %v8133_v57  ;;  %v8134_v38 = vadd.f32 %v8064_v53, %v16336_v22  ;;  %v8183_v15 = vld [vmem:[#allocation2 + $0x13a] sm:$0xff] }
 0xe31   : > { %8335 = vmatmul.bf16.gmra.mxu1 %v16502_v58 }
 0xe32   : > { %8570 = vmatmul.bf16.gmra.mxu2 %v8454_v9  ;;  %v8418_v9 = vld [vmem:[#allocation2 + $0x150] sm:$0xff] }
 0xe33   : > { %v8455_v16 = vpack.c.bf16 %v8419_v39, %v8418_v9  ;;  %v8420_v9 = vld [vmem:[#allocation2 + $0x168] sm:$0xff] }
 0xe34   : > { %v7870_v11 = vpop.f32.mrf.mxu3 }
 0xe35   : > { %v8531_v30 = vpop.f32.mrf.mxu2  ;;  %v16507_v51 = vadd.f32 %v7870_v11, %v16345_v7  ;;  %v8184_v7 = vld [vmem:[#allocation2 + $0x142] sm:$0xff] }
 0xe36   : > { %v16509_v23 = vadd.f32 %v8531_v30, %v8367_v29  ;;  %v8298_v45 = vpop.f32.mrf.mxu1  ;;  %v8067_v47 = vpop.f32.mrf.mxu0  ;;  %v7952_v30 = vld [vmem:[#allocation2 + $0x159] sm:$0xff] }
 0xe37   : > { %v8368_v57 = vadd.f32 %v8298_v45, %v8134_v38  ;;  %v16512_v43 = vadd.f32 %v8067_v47, %v16348_v1  ;;  %v16523_v1 = vpack.c.bf16 %v8184_v7, %v8183_v15  ;;  %v7951_v47 = vld [vmem:[#allocation2 + $0x151] sm:$0xff]  ;;  %v8186_v7 = vld [vmem:[#allocation2 + $0x15a] sm:$0xff] }
 0xe38   : > { %v8185_v15 = vld [vmem:[#allocation2 + $0x152] sm:$0xff] }
 0xe39   : > { %8769 = vmatmul.bf16.gmra.mxu3 %v16364_v50  ;;  %8106 = vmatmul.bf16.gmra.mxu0 %v16514_v19  ;;  %v13127_v50 = vld [vmem:[%s16858_s13 + $0x238] sm:$0xff] }
 0xe3a   : > { %8975 = vmatpush.bf16.msrb.mxu0 %v13127_v50 }
 0xe3c   : > { %v7873_v22 = vpop.f32.mrf.mxu3 }
 0xe3d   : > { %v8533_v21 = vpop.f32.mrf.mxu2  ;;  %v16519_v53 = vadd.f32 %v7873_v22, %v16359_v14  ;;  %v13126_v22 = vld [vmem:[%s16858_s13 + $0x230] sm:$0xff] }
 0xe3e   : > { %v16521_v29 = vadd.f32 %v8533_v21, %v8368_v57  ;;  %v8069_v38 = vpop.f32.mrf.mxu0  ;;  %8976 = vmatpush.bf16.msrb.mxu0 %v13126_v22 }
 0xe3f   : > { %v16526_v11 = vadd.f32 %v8069_v38, %v16362_v35  ;;  %v16538_v35 = vpack.c.bf16 %v7952_v30, %v7951_v47 }
 0xe41   : > { %8340 = vmatmul.bf16.gmra.mxu1 %v16523_v1 }
 0xe42   : > { %8575 = vmatmul.bf16.gmra.mxu2 %v8455_v16  ;;  %v16551_v16 = vpack.c.bf16 %v8186_v7, %v8185_v15  ;;  %v13122_v15 = vld [vmem:[%s16858_s13 + $0x210] sm:$0xff] }
 0xe44   : > { %v7875_v14 = vpop.f32.mrf.mxu3 }
 0xe45   : > { %v16533_v8 = vadd.f32 %v7875_v14, %v16374_v12  ;;  %v13125_v12 = vld [vmem:[%s16858_s13 + $0x228] sm:$0xff]  ;;  %v13124_v14 = vld [vmem:[%s16858_s13 + $0x220] sm:$0xff] }
 0xe46   : > { %v8072_v45 = vpop.f32.mrf.mxu0  ;;  %8977 = vmatpush.bf16.msrb.mxu0 %v13125_v12 }
 0xe47   : > { %v16536_v57 = vadd.f32 %v8072_v45, %v16377_v31  ;;  %v8421_v31 = vld [vmem:[#allocation2 + $0x170] sm:$0xff] }
 0xe48   : > { %v7954_v45 = vld [vmem:[#allocation2 + $0x171] sm:$0xff] }
 0xe49   : > { %8774 = vmatmul.bf16.gmra.mxu3 %v16393_v2  ;;  %8111 = vmatmul.bf16.gmra.mxu0 %v16538_v35  ;;  %v8456_v2 = vpack.c.bf16 %v8421_v31, %v8420_v9  ;;  %v8187_v31 = vld [vmem:[#allocation2 + $0x16a] sm:$0xff]  ;;  %v8188_v9 = vld [vmem:[#allocation2 + $0x172] sm:$0xff] }
 0xe4a   : > { %8978 = vmatpush.bf16.msrb.mxu0 %v13124_v14 }
 0xe4c   : > { %v7878_v21 = vpop.f32.mrf.mxu3 }
 0xe4d   : > { %v16549_v39 = vadd.f32 %v7878_v21, %v16388_v49  ;;  %v13123_v49 = vld [vmem:[%s16858_s13 + $0x218] sm:$0xff] }
 0xe4e   : > { %v8074_v38 = vpop.f32.mrf.mxu0  ;;  %8979 = vmatpush.bf16.msrb.mxu0 %v13123_v49 }
 0xe4f   : > { %v16554_v50 = vadd.f32 %v8074_v38, %v16391_v6  ;;  %v7953_v6 = vld [vmem:[#allocation2 + $0x169] sm:$0xff] }
 0xe50   : > { %v16569_v21 = vpack.c.bf16 %v7954_v45, %v7953_v6 }
 0xe51   : > { %8345 = vmatmul.bf16.gmra.mxu1 %v16551_v16 }
 0xe52   : > { %8580 = vmatmul.bf16.gmra.mxu2 %v8456_v2  ;;  %8980 = vmatpush.bf16.msrb.mxu0 %v13122_v15  ;;  %v16582_v2 = vpack.c.bf16 %v8188_v9, %v8187_v31  ;;  %v13190_v31 = vld [vmem:[#allocation3] sm:$0xff] }
 0xe54   : > { %v7880_v30 = vpop.f32.mrf.mxu3 }
 0xe55   : > { %v16564_v47 = vadd.f32 %v7880_v30, %v16400_v42  ;;  %v13121_v42 = vld [vmem:[%s16858_s13 + $0x208] sm:$0xff] }
 0xe56   : > { %v8077_v22 = vpop.f32.mrf.mxu0  ;;  %8981 = vmatpush.bf16.msrb.mxu0 %v13121_v42  ;;  %v7956_v30 = vld [vmem:[#allocation2 + $0x189] sm:$0xff] }
 0xe57   : > { %v16567_v12 = vadd.f32 %v8077_v22, %v16403_v62  ;;  %v7955_v22 = vld [vmem:[#allocation2 + $0x181] sm:$0xff] }
 0xe58   : > { %v8189_v42 = vld [vmem:[#allocation2 + $0x182] sm:$0xff] }
 0xe59   : > { %8779 = vmatmul.bf16.gmra.mxu3 %v16415_v18  ;;  %8116 = vmatmul.bf16.gmra.mxu0 %v16569_v21  ;;  %v13120_v18 = vld [vmem:[%s16858_s13 + $0x200] sm:$0xff] }
 0xe5a   : > { %8982 = vmatpush.bf16.msrb.mxu0 %v13120_v18  ;;  %v8862_v18 = vld [vmem:[#allocation2 + $0x32] sm:$0xff] }
 0xe5c   : > { %v7883_v7 = vpop.f32.mrf.mxu3 }
 0xe5d   : > { %v16580_v62 = vadd.f32 %v7883_v7, %v16408_v44 }
 0xe5e   : > { %v8079_v38 = vpop.f32.mrf.mxu0 }
 0xe5f   : > { %v16585_v14 = vadd.f32 %v8079_v38, %v16411_v36  ;;  %v16598_v36 = vpack.c.bf16 %v7956_v30, %v7955_v22 }
 0xe61   : > { %8350 = vmatmul.bf16.gmra.mxu1 %v16582_v2 }
 0xe62   : > { %8585 = vmatmul.bf16.gmra.mxu2 %v16413_v46  ;;  %v8190_v46 = vld [vmem:[#allocation2 + $0x18a] sm:$0xff] }
 0xe63   : > { %v16605_v38 = vpack.c.bf16 %v8190_v46, %v8189_v42 }
 0xe64   : > { %v7885_v49 = vpop.f32.mrf.mxu3 }
 0xe65   : > { %v16593_v44 = vadd.f32 %v7885_v49, %v16419_v4  ;;  %v8458_v4 = vpack.c.bf16 %v13190_v31, %v13190_v31  ;;  %v8863_v49 = vld [vmem:[#allocation2 + $0x3a] sm:$0xff] }
 0xe66   : > { %v8082_v45 = vpop.f32.mrf.mxu0  ;;  %v8911_v22 = vpack.c.bf16 %v8863_v49, %v8862_v18 }
 0xe67   : > { %v16596_v6 = vadd.f32 %v8082_v45, %v16422_v34 }
 0xe69   : > { %8784 = vmatmul.bf16.gmra.mxu3 %v16435_v26  ;;  %8121 = vmatmul.bf16.gmra.mxu0 %v16598_v36 }
 0xe6c   : > { %v7888_v15 = vpop.f32.mrf.mxu3 }
 0xe6d   : > { %v16603_v7 = vadd.f32 %v7888_v15, %v16427_v54 }
 0xe6e   : > { %v8084_v9 = vpop.f32.mrf.mxu0 }
 0xe6f   : > { %v16608_v34 = vadd.f32 %v8084_v9, %v16430_v41 }
 0xe71   : > { %8355 = vmatmul.bf16.gmra.mxu1 %v16605_v38 }
 0xe72   : > { %8590 = vmatmul.bf16.gmra.mxu2 %v8458_v4  ;;  %v8864_v4 = vld [vmem:[#allocation2 + $0x4a] sm:$0xff] }
 0xe74   : > { %v7890_v26 = vpop.f32.mrf.mxu3 }
 0xe75   : > { %v16612_v30 = vadd.f32 %v7890_v26, %v16441_v5  ;;  %v8865_v5 = vld [vmem:[#allocation2 + $0x52] sm:$0xff] }
 0xe76   : > { %v8087_v45 = vpop.f32.mrf.mxu0 }
 0xe77   : > { %v16615_v54 = vadd.f32 %v8087_v45, %v16444_v28 }
 0xe79   : > { %8789 = vmatmul.bf16.gmra.mxu3 %v16455_v63  ;;  %8983 = vmatmul.bf16.vlgmr.msrb.gmra.mxu0 %v8911_v22  ;;  %v8912_v63 = vpack.c.bf16 %v8865_v5, %v8864_v4  ;;  %v8866_v22 = vld [vmem:[#allocation2 + $0x62] sm:$0xff] }
 0xe7c   : > { %v8750_v15 = vpop.f32.mrf.mxu3 }
 0xe7d   : > { %v16619_v41 = vadd.f32 %v8750_v15, %v16452_v59 }
 0xe7e   : > { %v8089_v42 = vpop.f32.mrf.mxu0 }
 0xe7f   : > { %v16622_v46 = vadd.f32 %v8089_v42, %v16450_v60 }
 0xe84   : > { %v8752_v31 = vpop.f32.mrf.mxu3 }
 0xe85   : > { %v16625_v9 = vadd.f32 %v8752_v31, %v16462_v20  ;;  %v8867_v20 = vld [vmem:[#allocation2 + $0x6a] sm:$0xff] }
 0xe86   : > { %v8092_v28 = vpop.f32.mrf.mxu0 }
 0xe87   : > { %v16628_v26 = vadd.f32 %v8092_v28, %v16460_v48 }
 0xe89   : > { %8794 = vmatmul.bf16.gmra.mxu3 %v16474_v56  ;;  %8988 = vmatmul.bf16.gmra.mxu0 %v8912_v63  ;;  %v8913_v56 = vpack.c.bf16 %v8867_v20, %v8866_v22 }
 0xe8c   : > { %v8755_v59 = vpop.f32.mrf.mxu3 }
 0xe8d   : > { %v16632_v18 = vadd.f32 %v8755_v59, %v16471_v13 }
 0xe8e   : > { %v8094_v60 = vpop.f32.mrf.mxu0 }
 0xe8f   : > { %v16635_v49 = vadd.f32 %v8094_v60, %v16469_v61 }
 0xe94   : > { %v8757_v45 = vpop.f32.mrf.mxu3 }
 0xe95   : > { %v16638_v15 = vadd.f32 %v8757_v45, %v16481_v52 }
 0xe96   : > { %v8097_v48 = vpop.f32.mrf.mxu0 }
 0xe97   : > { %v16641_v42 = vadd.f32 %v8097_v48, %v16479_v0 }
 0xe99   : > { %8799 = vmatmul.bf16.gmra.mxu3 %v16493_v25  ;;  %8993 = vmatmul.bf16.gmra.mxu0 %v8913_v56  ;;  %v8301_v56 = vpop.f32.mrf.mxu1 }
 0xe9c   : > { %v8760_v13 = vpop.f32.mrf.mxu3 }
 0xe9d   : > { %v16645_v31 = vadd.f32 %v8760_v13, %v16490_v10 }
 0xe9e   : > { %v8099_v61 = vpop.f32.mrf.mxu0 }
 0xe9f   : > { %v16648_v4 = vadd.f32 %v8099_v61, %v16488_v33  ;;  %v8536_v61 = vpop.f32.mrf.mxu2 }
 0xea4   : > { %v8762_v5 = vpop.f32.mrf.mxu3 }
 0xea5   : > { %v16651_v52 = vadd.f32 %v8762_v5, %v16500_v3 }
 0xea6   : > { %v8102_v28 = vpop.f32.mrf.mxu0 }
 0xea7   : > { %v16654_v0 = vadd.f32 %v8102_v28, %v16498_v32 }
 0xea9   : > { %8804 = vmatmul.bf16.gmra.mxu3 %v16514_v19  ;;  %8998 = vmatmul.bf16.gmra.mxu0 %v16350_v37 }
 0xeac   : > { %v8765_v25 = vpop.f32.mrf.mxu3 }
 0xead   : > { %v16659_v10 = vadd.f32 %v8765_v25, %v16509_v23 }
 0xeae   : > { %v8104_v63 = vpop.f32.mrf.mxu0 }
 0xeaf   : > { %v16662_v33 = vadd.f32 %v8104_v63, %v16507_v51  ;;  %v16927_v63 = vld [vmem:[#allocation11_spill] sm:$0xff] }
 0xeb4   : > { %v8767_v59 = vpop.f32.mrf.mxu3 }
 0xeb5   : > { %v16665_v3 = vadd.f32 %v8767_v59, %v16521_v29  ;;  %v8303_v59 = vpop.f32.mrf.mxu1 }
 0xeb6   : > { %v8107_v60 = vpop.f32.mrf.mxu0 }
 0xeb7   : > { %v16668_v32 = vadd.f32 %v8107_v60, %v16519_v53 }
 0xeb9   : > { %8809 = vmatmul.bf16.gmra.mxu3 %v16538_v35  ;;  %9003 = vmatmul.bf16.gmra.mxu0 %v16379_v24 }
 0xebe   : > { %v8109_v37 = vpop.f32.mrf.mxu0 }
 0xebf   : > { %v16673_v23 = vadd.f32 %v8109_v37, %v16533_v8  ;;  %v8538_v37 = vpop.f32.mrf.mxu2 }
 0xec6   : > { %v8112_v19 = vpop.f32.mrf.mxu0 }
 0xec7   : > { %v16676_v51 = vadd.f32 %v8112_v19, %v16549_v39 }
 0xec9   : > { %8814 = vmatmul.bf16.gmra.mxu3 %v16569_v21  ;;  %9008 = vmatmul.bf16.gmra.mxu0 %v16405_v27  ;;  %v8658_v21 = vld [vmem:[#allocation2 + $0x199] sm:$0xff]  ;;  %v8659_v27 = vld [vmem:[#allocation2 + $0x1a1] sm:$0xff] }
 0xeca   : > { %v8692_v45 = vpack.c.bf16 %v8659_v27, %v8658_v21  ;;  %v8306_v21 = vpop.f32.mrf.mxu1 }
 0xece   : > { %v8114_v29 = vpop.f32.mrf.mxu0 }
 0xecf   : > { %v16681_v53 = vadd.f32 %v8114_v29, %v16564_v47 }
 0xed6   : > { %v8117_v35 = vpop.f32.mrf.mxu0 }
 0xed7   : > { %v16684_v24 = vadd.f32 %v8117_v35, %v16580_v62 }
 0xed9   : > { %8819 = vmatmul.bf16.gmra.mxu3 %v16598_v36  ;;  %9013 = vmatmul.bf16.gmra.mxu0 %v16424_v40  ;;  %v16702_v40 = vld [vmem:[%s16859_s14] ss:$0 sm:$0xff] }
 0xede   : > { %v8119_v8 = vpop.f32.mrf.mxu0 }
 0xedf   : > { %v16689_v39 = vadd.f32 %v8119_v8, %v16593_v44 }
 0xee6   : > { %v8122_v22 = vpop.f32.mrf.mxu0 }
 0xee7   : > { %v16692_v47 = vadd.f32 %v8122_v22, %v16603_v7 }
 0xee9   : > { %8824 = vmatmul.bf16.gmra.mxu3 %v8692_v45  ;;  %9018 = vmatmul.bf16.gmra.mxu0 %v16446_v55 }
 0xeee   : > { %v8124_v62 = vpop.f32.mrf.mxu0 }
 0xeef   : > { %v16696_v36 = vadd.f32 %v8124_v62, %v16612_v30 }
 0xef6   : > { %v8984_v44 = vpop.f32.mrf.mxu0 }
 0xef7   : > { %v9064_v20 = vadd.f32 %v8984_v44, %v16619_v41  ;;  %v8770_v41 = vpop.f32.mrf.mxu3 }
 0xef9   : > { %v9100_v7 = vadd.f32 %v16702_v40, %v9064_v20  ;;  %9023 = vmatmul.bf16.gmra.mxu0 %v16464_v17  ;;  %v8308_v20 = vpop.f32.mrf.mxu1 }
 0xefb   : > { %v9132_v55 = vmax.f32 %v9100_v7, 0.0 }
 0xefd   : > { %9164 = vst [vmem:[%s16709_s26] sm:$0xff] %v9132_v55 }
 0xefe   : > { %v8986_v30 = vpop.f32.mrf.mxu0 }
 0xeff   : > { %v9065_v48 = vadd.f32 %v8986_v30, %v16625_v9  ;;  %v8772_v9 = vpop.f32.mrf.mxu3 }
 0xf01   : > { %v9101_v13 = vadd.f32 %v16702_v40, %v9065_v48 }
 0xf03   : > { %v9133_v5 = vmax.f32 %v9101_v13, 0.0 }
 0xf05   : > { %9165 = vst [vmem:[%s16709_s26 + $0x8] sm:$0xff] %v9133_v5 }
 0xf06   : > { %v8989_v28 = vpop.f32.mrf.mxu0 }
 0xf07   : > { %v9066_v17 = vadd.f32 %v8989_v28, %v16632_v18  ;;  %v8541_v18 = vpop.f32.mrf.mxu2  ;;  %v8775_v22 = vpop.f32.mrf.mxu3 }
 0xf08   : > { %v8311_v28 = vpop.f32.mrf.mxu1 }
 0xf09   : > { %v9102_v25 = vadd.f32 %v16702_v40, %v9066_v17  ;;  %9028 = vmatmul.bf16.gmra.mxu0 %v16927_v63 }
 0xf0b   : > { %v9134_v60 = vmax.f32 %v9102_v25, 0.0 }
 0xf0d   : > { %9166 = vst [vmem:[%s16709_s26 + $0x10] sm:$0xff] %v9134_v60 }
 0xf0e   : > { %v8991_v19 = vpop.f32.mrf.mxu0 }
 0xf0f   : > { %v9067_v29 = vadd.f32 %v8991_v19, %v16638_v15  ;;  %v8543_v55 = vpop.f32.mrf.mxu2  ;;  %v8777_v48 = vpop.f32.mrf.mxu3  ;;  %v8369_v19 = vadd.f32 %v8301_v56, %v16512_v43 }
 0xf11   : > { %v9103_v35 = vadd.f32 %v16702_v40, %v9067_v29 }
 0xf13   : > { %v9135_v8 = vmax.f32 %v9103_v35, 0.0  ;;  %v8313_v35 = vpop.f32.mrf.mxu1 }
 0xf15   : > { %9167 = vst [vmem:[%s16709_s26 + $0x18] sm:$0xff] %v9135_v8 }
 0xf16   : > { %v8994_v27 = vpop.f32.mrf.mxu0 }
 0xf17   : > { %v9068_v45 = vadd.f32 %v8994_v27, %v16645_v31  ;;  %v8546_v17 = vpop.f32.mrf.mxu2  ;;  %v8780_v63 = vpop.f32.mrf.mxu3 }
 0xf19   : > { %v9104_v62 = vadd.f32 %v16702_v40, %v9068_v45  ;;  %9033 = vmatmul.bf16.gmra.mxu0 %v16502_v58 }
 0xf1b   : > { %v9136_v44 = vmax.f32 %v9104_v62, 0.0  ;;  %v8316_v56 = vpop.f32.mrf.mxu1 }
 0xf1d   : > { %9168 = vst [vmem:[%s16709_s26 + $0x20] sm:$0xff] %v9136_v44 }
 0xf1e   : > { %v8996_v15 = vpop.f32.mrf.mxu0 }
 0xf1f   : > { %v9069_v7 = vadd.f32 %v8996_v15, %v16651_v52  ;;  %v8548_v27 = vpop.f32.mrf.mxu2  ;;  %v8782_v62 = vpop.f32.mrf.mxu3  ;;  %v8370_v15 = vadd.f32 %v8303_v59, %v16526_v11 }
 0xf21   : > { %v9105_v30 = vadd.f32 %v16702_v40, %v9069_v7  ;;  %v8605_v43 = vadd.f32 %v8538_v37, %v8370_v15 }
 0xf23   : > { %v9137_v13 = vmax.f32 %v9105_v30, 0.0  ;;  %v8839_v30 = vadd.f32 %v8772_v9, %v8605_v43  ;;  %v8372_v9 = vadd.f32 %v8308_v20, %v16554_v50 }
 0xf25   : > { %9169 = vst [vmem:[%s16709_s26 + $0x28] sm:$0xff] %v9137_v13 }
 0xf26   : > { %v8999_v5 = vpop.f32.mrf.mxu0 }
 0xf27   : > { %v9070_v31 = vadd.f32 %v8999_v5, %v16659_v10  ;;  %v8604_v10 = vadd.f32 %v8536_v61, %v8369_v19  ;;  %v8551_v61 = vpop.f32.mrf.mxu2 }
 0xf29   : > { %v9106_v58 = vadd.f32 %v16702_v40, %v9070_v31  ;;  %9038 = vmatmul.bf16.gmra.mxu0 %v16523_v1  ;;  %v8838_v45 = vadd.f32 %v8770_v41, %v8604_v10  ;;  %v8785_v41 = vpop.f32.mrf.mxu3  ;;  %v8371_v31 = vadd.f32 %v8306_v21, %v16536_v57  ;;  %v8607_v57 = vadd.f32 %v8543_v55, %v8372_v9 }
 0xf2a   : > { %v8374_v55 = vadd.f32 %v8313_v35, %v16585_v14  ;;  %v8893_v14 = vld [vmem:[#allocation2 + $0x1a2] sm:$0xff] }
 0xf2b   : > { %v9138_v25 = vmax.f32 %v9106_v58, 0.0  ;;  %v8606_v11 = vadd.f32 %v8541_v18, %v8371_v31  ;;  %v8841_v10 = vadd.f32 %v8777_v48, %v8607_v57 }
 0xf2d   : > { %9170 = vst [vmem:[%s16709_s26 + $0x30] sm:$0xff] %v9138_v25  ;;  %v8840_v25 = vadd.f32 %v8775_v22, %v8606_v11  ;;  %v8892_v11 = vld [vmem:[#allocation2 + $0x19a] sm:$0xff] }
 0xf2e   : > { %v9001_v52 = vpop.f32.mrf.mxu0 }
 0xf2f   : > { %v9071_v60 = vadd.f32 %v9001_v52, %v16665_v3  ;;  %v8318_v52 = vpop.f32.mrf.mxu1 }
 0xf31   : > { %v9107_v29 = vadd.f32 %v16702_v40, %v9071_v60  ;;  %v8553_v60 = vpop.f32.mrf.mxu2 }
 0xf33   : > { %v9139_v8 = vmax.f32 %v9107_v29, 0.0  ;;  %v8787_v29 = vpop.f32.mrf.mxu3 }
 0xf35   : > { %9171 = vst [vmem:[%s16709_s26 + $0x38] sm:$0xff] %v9139_v8 }
 0xf36   : > { %v9004_v1 = vpop.f32.mrf.mxu0 }
 0xf37   : > { %v9072_v44 = vadd.f32 %v9004_v1, %v8838_v45  ;;  %v8321_v22 = vpop.f32.mrf.mxu1  ;;  %v8373_v45 = vadd.f32 %v8311_v28, %v16567_v12 }
 0xf39   : > { %v9108_v7 = vadd.f32 %v16702_v40, %v9072_v44  ;;  %9043 = vmatmul.bf16.gmra.mxu0 %v16551_v16  ;;  %v8556_v44 = vpop.f32.mrf.mxu2  ;;  %v8608_v50 = vadd.f32 %v8546_v17, %v8373_v45 }
 0xf3b   : > { %v9140_v3 = vmax.f32 %v9108_v7, 0.0  ;;  %v8790_v15 = vpop.f32.mrf.mxu3  ;;  %v8842_v7 = vadd.f32 %v8780_v63, %v8608_v50  ;;  %v8375_v63 = vadd.f32 %v8316_v56, %v16596_v6 }
 0xf3d   : > { %9172 = vst [vmem:[%s16709_s26 + $0x40] sm:$0xff] %v9140_v3  ;;  %v8610_v35 = vadd.f32 %v8551_v61, %v8375_v63 }
 0xf3e   : > { %v9006_v13 = vpop.f32.mrf.mxu0 }
 0xf3f   : > { %v9073_v5 = vadd.f32 %v9006_v13, %v8839_v30  ;;  %v8323_v3 = vpop.f32.mrf.mxu1  ;;  %v8609_v30 = vadd.f32 %v8548_v27, %v8374_v55  ;;  %v8926_v27 = vpack.c.bf16 %v8893_v14, %v8892_v11 }
 0xf41   : > { %v9109_v58 = vadd.f32 %v16702_v40, %v9073_v5  ;;  %v8558_v28 = vpop.f32.mrf.mxu2  ;;  %v8843_v13 = vadd.f32 %v8782_v62, %v8609_v30 }
 0xf43   : > { %v9141_v59 = vmax.f32 %v9109_v58, 0.0  ;;  %v8792_v17 = vpop.f32.mrf.mxu3 }
 0xf45   : > { %9173 = vst [vmem:[%s16709_s26 + $0x48] sm:$0xff] %v9141_v59 }
 0xf46   : > { %v9009_v16 = vpop.f32.mrf.mxu0 }
 0xf47   : > { %v9074_v37 = vadd.f32 %v9009_v16, %v8840_v25  ;;  %v8844_v25 = vadd.f32 %v8785_v41, %v8610_v35 }
 0xf49   : > { %v9110_v19 = vadd.f32 %v16702_v40, %v9074_v37  ;;  %9048 = vmatmul.bf16.gmra.mxu0 %v16582_v2  ;;  %v8561_v16 = vpop.f32.mrf.mxu2 }
 0xf4b   : > { %v9142_v21 = vmax.f32 %v9110_v19, 0.0  ;;  %v8795_v9 = vpop.f32.mrf.mxu3  ;;  %v8376_v19 = vadd.f32 %v8318_v52, %v16608_v34 }
 0xf4d   : > { %9174 = vst [vmem:[%s16709_s26 + $0x50] sm:$0xff] %v9142_v21  ;;  %v8611_v6 = vadd.f32 %v8553_v60, %v8376_v19 }
 0xf4e   : > { %v9011_v18 = vpop.f32.mrf.mxu0 }
 0xf4f   : > { %v9075_v8 = vadd.f32 %v9011_v18, %v8841_v10  ;;  %v8845_v21 = vadd.f32 %v8787_v29, %v8611_v6  ;;  %v8378_v29 = vadd.f32 %v8323_v3, %v16622_v46 }
 0xf51   : > { %v9111_v1 = vadd.f32 %v16702_v40, %v9075_v8  ;;  %v8563_v41 = vpop.f32.mrf.mxu2  ;;  %v8377_v8 = vadd.f32 %v8321_v22, %v16615_v54  ;;  %v8613_v55 = vadd.f32 %v8558_v28, %v8378_v29 }
 0xf53   : > { %v9143_v20 = vmax.f32 %v9111_v1, 0.0  ;;  %v8797_v1 = vpop.f32.mrf.mxu3  ;;  %v8612_v50 = vadd.f32 %v8556_v44, %v8377_v8  ;;  %v8847_v22 = vadd.f32 %v8792_v17, %v8613_v55 }
 0xf55   : > { %9175 = vst [vmem:[%s16709_s26 + $0x58] sm:$0xff] %v9143_v20  ;;  %v8846_v52 = vadd.f32 %v8790_v15, %v8612_v50 }
 0xf56   : > { %v9014_v2 = vpop.f32.mrf.mxu0 }
 0xf57   : > { %v9076_v43 = vadd.f32 %v9014_v2, %v8842_v7 }
 0xf59   : > { %v9112_v48 = vadd.f32 %v16702_v40, %v9076_v43  ;;  %9053 = vmatmul.bf16.gmra.mxu0 %v16605_v38  ;;  %v8326_v38 = vpop.f32.mrf.mxu1  ;;  %v8566_v43 = vpop.f32.mrf.mxu2 }
 0xf5a   : > { %v8379_v44 = vadd.f32 %v8326_v38, %v16628_v26 }
 0xf5b   : > { %v9144_v12 = vmax.f32 %v9112_v48, 0.0  ;;  %v8800_v54 = vpop.f32.mrf.mxu3 }
 0xf5d   : > { %9176 = vst [vmem:[%s16709_s26 + $0x60] sm:$0xff] %v9144_v12 }
 0xf5e   : > { %v9016_v5 = vpop.f32.mrf.mxu0 }
 0xf5f   : > { %v9077_v31 = vadd.f32 %v9016_v5, %v8843_v13  ;;  %v8614_v5 = vadd.f32 %v8561_v16, %v8379_v44 }
 0xf61   : > { %v9113_v58 = vadd.f32 %v16702_v40, %v9077_v31  ;;  %v8328_v61 = vpop.f32.mrf.mxu1  ;;  %v8568_v46 = vpop.f32.mrf.mxu2  ;;  %v8848_v3 = vadd.f32 %v8795_v9, %v8614_v5 }
 0xf62   : > { %v8380_v11 = vadd.f32 %v8328_v61, %v16635_v49 }
 0xf63   : > { %v9145_v59 = vmax.f32 %v9113_v58, 0.0  ;;  %v8802_v63 = vpop.f32.mrf.mxu3 }
 0xf64   : > { %v8615_v14 = vadd.f32 %v8563_v41, %v8380_v11 }
 0xf65   : > { %9177 = vst [vmem:[%s16709_s26 + $0x68] sm:$0xff] %v9145_v59 }
 0xf66   : > { %v9019_v37 = vpop.f32.mrf.mxu0  ;;  %v8849_v59 = vadd.f32 %v8797_v1, %v8615_v14 }
 0xf67   : > { %v9078_v62 = vadd.f32 %v9019_v37, %v8844_v25 }
 0xf69   : > { %v9114_v57 = vadd.f32 %v16702_v40, %v9078_v62  ;;  %9058 = vmatmul.bf16.gmra.mxu0 %v8926_v27  ;;  %v8331_v60 = vpop.f32.mrf.mxu1  ;;  %v8571_v38 = vpop.f32.mrf.mxu2 }
 0xf6a   : > { %v8381_v37 = vadd.f32 %v8331_v60, %v16641_v42 }
 0xf6b   : > { %v9146_v56 = vmax.f32 %v9114_v57, 0.0  ;;  %v8805_v16 = vpop.f32.mrf.mxu3 }
 0xf6c   : > { %v8616_v9 = vadd.f32 %v8566_v43, %v8381_v37 }
 0xf6d   : > { %9178 = vst [vmem:[%s16709_s26 + $0x70] sm:$0xff] %v9146_v56 }
 0xf6e   : > { %v9021_v10 = vpop.f32.mrf.mxu0  ;;  %v8850_v49 = vadd.f32 %v8800_v54, %v8616_v9 }
 0xf6f   : > { %v9079_v18 = vadd.f32 %v9021_v10, %v8845_v21 }
 0xf71   : > { %v9115_v45 = vadd.f32 %v16702_v40, %v9079_v18  ;;  %v8333_v13 = vpop.f32.mrf.mxu1  ;;  %v8573_v21 = vpop.f32.mrf.mxu2 }
 0xf72   : > { %v8382_v61 = vadd.f32 %v8333_v13, %v16648_v4 }
 0xf73   : > { %v9147_v34 = vmax.f32 %v9115_v45, 0.0  ;;  %v8807_v18 = vpop.f32.mrf.mxu3 }
 0xf74   : > { %v8617_v41 = vadd.f32 %v8568_v46, %v8382_v61 }
 0xf75   : > { %9179 = vst [vmem:[%s16709_s26 + $0x78] sm:$0xff] %v9147_v34 }
 0xf76   : > { %v9024_v20 = vpop.f32.mrf.mxu0  ;;  %v8851_v42 = vadd.f32 %v8802_v63, %v8617_v41 }
 0xf77   : > { %v9080_v7 = vadd.f32 %v9024_v20, %v8846_v52 }
 0xf79   : > { %v9116_v2 = vadd.f32 %v16702_v40, %v9080_v7  ;;  %v8336_v26 = vpop.f32.mrf.mxu1  ;;  %v8576_v20 = vpop.f32.mrf.mxu2 }
 0xf7a   : > { %v8383_v34 = vadd.f32 %v8336_v26, %v16654_v0 }
 0xf7b   : > { %v9148_v48 = vmax.f32 %v9116_v2, 0.0  ;;  %v8810_v4 = vpop.f32.mrf.mxu3 }
 0xf7c   : > { %v8618_v7 = vadd.f32 %v8571_v38, %v8383_v34 }
 0xf7d   : > { %9180 = vst [vmem:[%s16709_s26 + $0x80] sm:$0xff] %v9148_v48 }
 0xf7e   : > { %v9026_v30 = vpop.f32.mrf.mxu0  ;;  %v8852_v29 = vadd.f32 %v8805_v16, %v8618_v7 }
 0xf7f   : > { %v9081_v12 = vadd.f32 %v9026_v30, %v8847_v22 }
 0xf81   : > { %v9117_v15 = vadd.f32 %v16702_v40, %v9081_v12  ;;  %v8338_v57 = vpop.f32.mrf.mxu1  ;;  %v8578_v0 = vpop.f32.mrf.mxu2 }
 0xf82   : > { %v8384_v55 = vadd.f32 %v8338_v57, %v16662_v33 }
 0xf83   : > { %v9149_v31 = vmax.f32 %v9117_v15, 0.0  ;;  %v8812_v44 = vpop.f32.mrf.mxu3 }
 0xf84   : > { %v8619_v22 = vadd.f32 %v8573_v21, %v8384_v55 }
 0xf85   : > { %9181 = vst [vmem:[%s16709_s26 + $0x88] sm:$0xff] %v9149_v31 }
 0xf86   : > { %v9029_v58 = vpop.f32.mrf.mxu0  ;;  %v8853_v12 = vadd.f32 %v8807_v18, %v8619_v22 }
 0xf87   : > { %v9082_v28 = vadd.f32 %v9029_v58, %v8848_v3 }
 0xf89   : > { %v9118_v17 = vadd.f32 %v16702_v40, %v9082_v28  ;;  %v8341_v50 = vpop.f32.mrf.mxu1  ;;  %v8581_v58 = vpop.f32.mrf.mxu2 }
 0xf8a   : > { %v8385_v5 = vadd.f32 %v8341_v50, %v16668_v32 }
 0xf8b   : > { %v9150_v35 = vmax.f32 %v9118_v17, 0.0  ;;  %v8815_v17 = vpop.f32.mrf.mxu3 }
 0xf8c   : > { %v8620_v46 = vadd.f32 %v8576_v20, %v8385_v5 }
 0xf8d   : > { %9182 = vst [vmem:[%s16709_s26 + $0x90] sm:$0xff] %v9150_v35 }
 0xf8e   : > { %v9031_v25 = vpop.f32.mrf.mxu0  ;;  %v8854_v63 = vadd.f32 %v8810_v4, %v8620_v46 }
 0xf8f   : > { %v9083_v27 = vadd.f32 %v9031_v25, %v8849_v59 }
 0xf91   : > { %v9119_v62 = vadd.f32 %v16702_v40, %v9083_v27  ;;  %v8343_v54 = vpop.f32.mrf.mxu1  ;;  %v8583_v16 = vpop.f32.mrf.mxu2 }
 0xf92   : > { %v8386_v14 = vadd.f32 %v8343_v54, %v16673_v23 }
 0xf93   : > { %v9151_v19 = vmax.f32 %v9119_v62, 0.0  ;;  %v8817_v9 = vpop.f32.mrf.mxu3 }
 0xf94   : > { %v8621_v26 = vadd.f32 %v8578_v0, %v8386_v14 }
 0xf95   : > { %9183 = vst [vmem:[%s16709_s26 + $0x98] sm:$0xff] %v9151_v19 }
 0xf96   : > { %v9034_v6 = vpop.f32.mrf.mxu0  ;;  %v8855_v32 = vadd.f32 %v8812_v44, %v8621_v26 }
 0xf97   : > { %v9084_v56 = vadd.f32 %v9034_v6, %v8850_v49 }
 0xf99   : > { %v9120_v10 = vadd.f32 %v16702_v40, %v9084_v56  ;;  %v8346_v33 = vpop.f32.mrf.mxu1 }
 0xf9a   : > { %v8387_v37 = vadd.f32 %v8346_v33, %v16676_v51 }
 0xf9b   : > { %v9152_v8 = vmax.f32 %v9120_v10, 0.0  ;;  %v8586_v10 = vpop.f32.mrf.mxu2  ;;  %v8820_v51 = vpop.f32.mrf.mxu3 }
 0xf9c   : > { %v8622_v19 = vadd.f32 %v8581_v58, %v8387_v37 }
 0xf9d   : > { %9184 = vst [vmem:[%s16709_s26 + $0xa0] sm:$0xff] %v9152_v8 }
 0xf9e   : > { %v9036_v45 = vpop.f32.mrf.mxu0  ;;  %v8856_v23 = vadd.f32 %v8815_v17, %v8622_v19 }
 0xf9f   : > { %v9085_v1 = vadd.f32 %v9036_v45, %v8851_v42 }
 0xfa1   : > { %v9121_v52 = vadd.f32 %v16702_v40, %v9085_v1  ;;  %v8348_v38 = vpop.f32.mrf.mxu1 }
 0xfa2   : > { %v8388_v21 = vadd.f32 %v8348_v38, %v16681_v53 }
 0xfa3   : > { %v9153_v60 = vmax.f32 %v9121_v52, 0.0  ;;  %v8588_v53 = vpop.f32.mrf.mxu2 }
 0xfa4   : > { %v8623_v18 = vadd.f32 %v8583_v16, %v8388_v21 }
 0xfa5   : > { %9185 = vst [vmem:[%s16709_s26 + $0xa8] sm:$0xff] %v9153_v60  ;;  %v8822_v60 = vpop.f32.mrf.mxu3 }
 0xfa6   : > { %v9039_v2 = vpop.f32.mrf.mxu0  ;;  %v8857_v8 = vadd.f32 %v8817_v9, %v8623_v18 }
 0xfa7   : > { %v9086_v43 = vadd.f32 %v9039_v2, %v8852_v29 }
 0xfa9   : > { %v9122_v48 = vadd.f32 %v16702_v40, %v9086_v43  ;;  %v8351_v56 = vpop.f32.mrf.mxu1 }
 0xfaa   : > { %v8389_v1 = vadd.f32 %v8351_v56, %v16684_v24 }
 0xfab   : > { %v9154_v30 = vmax.f32 %v9122_v48, 0.0  ;;  %v8591_v22 = vpop.f32.mrf.mxu2 }
 0xfac   : > { %v8624_v52 = vadd.f32 %v8586_v10, %v8389_v1 }
 0xfad   : > { %9186 = vst [vmem:[%s16709_s26 + $0xb0] sm:$0xff] %v9154_v30 }
 0xfae   : > { %v9041_v15 = vpop.f32.mrf.mxu0  ;;  %v8858_v7 = vadd.f32 %v8820_v51, %v8624_v52 }
 0xfaf   : > { %v9087_v13 = vadd.f32 %v9041_v15, %v8853_v12  ;;  %v8825_v12 = vpop.f32.mrf.mxu3 }
 0xfb1   : > { %v9123_v31 = vadd.f32 %v16702_v40, %v9087_v13  ;;  %v8353_v34 = vpop.f32.mrf.mxu1 }
 0xfb2   : > { %v8390_v2 = vadd.f32 %v8353_v34, %v16689_v39 }
 0xfb3   : > { %v9155_v3 = vmax.f32 %v9123_v31, 0.0  ;;  %v8593_v33 = vpop.f32.mrf.mxu2 }
 0xfb4   : > { %v8625_v55 = vadd.f32 %v8588_v53, %v8390_v2 }
 0xfb5   : > { %9187 = vst [vmem:[%s16709_s26 + $0xb8] sm:$0xff] %v9155_v3 }
 0xfb6   : > { %v9044_v28 = vpop.f32.mrf.mxu0  ;;  %v8859_v54 = vadd.f32 %v8822_v60, %v8625_v55 }
 0xfb7   : > { %v9088_v11 = vadd.f32 %v9044_v28, %v8854_v63 }
 0xfb9   : > { %v9124_v35 = vadd.f32 %v16702_v40, %v9088_v11  ;;  %v8356_v24 = vpop.f32.mrf.mxu1 }
 0xfba   : > { %v8391_v44 = vadd.f32 %v8356_v24, %v16692_v47  ;;  %v8827_v47 = vpop.f32.mrf.mxu3 }
 0xfbb   : > { %v9156_v59 = vmax.f32 %v9124_v35, 0.0 }
 0xfbc   : > { %v8626_v13 = vadd.f32 %v8591_v22, %v8391_v44 }
 0xfbd   : > { %9188 = vst [vmem:[%s16709_s26 + $0xc0] sm:$0xff] %v9156_v59 }
 0xfbe   : > { %v9046_v25 = vpop.f32.mrf.mxu0  ;;  %v8860_v5 = vadd.f32 %v8825_v12, %v8626_v13 }
 0xfbf   : > { %v9089_v27 = vadd.f32 %v9046_v25, %v8855_v32 }
 0xfc1   : > { %v9125_v62 = vadd.f32 %v16702_v40, %v9089_v27  ;;  %v8358_v31 = vpop.f32.mrf.mxu1 }
 0xfc2   : > { %v8392_v63 = vadd.f32 %v8358_v31, %v16696_v36 }
 0xfc3   : > { %v9157_v49 = vmax.f32 %v9125_v62, 0.0 }
 0xfc4   : > { %v8627_v28 = vadd.f32 %v8593_v33, %v8392_v63 }
 0xfc5   : > { %9189 = vst [vmem:[%s16709_s26 + $0xc8] sm:$0xff] %v9157_v49 }
 0xfc6   : > { %v9049_v57 = vpop.f32.mrf.mxu0  ;;  %v8861_v17 = vadd.f32 %v8827_v47, %v8627_v28 }
 0xfc7   : > { %v9090_v6 = vadd.f32 %v9049_v57, %v8856_v23 }
 0xfc9   : > { %v9126_v61 = vadd.f32 %v16702_v40, %v9090_v6 }
 0xfcb   : > { %v9158_v41 = vmax.f32 %v9126_v61, 0.0 }
 0xfcd   : > { %9190 = vst [vmem:[%s16709_s26 + $0xd0] sm:$0xff] %v9158_v41 }
 0xfce   : > { %v9051_v42 = vpop.f32.mrf.mxu0 }
 0xfcf   : > { %v9091_v45 = vadd.f32 %v9051_v42, %v8857_v8 }
 0xfd1   : > { %v9127_v50 = vadd.f32 %v16702_v40, %v9091_v45 }
 0xfd3   : > { %v9159_v20 = vmax.f32 %v9127_v50, 0.0 }
 0xfd5   : > { %9191 = vst [vmem:[%s16709_s26 + $0xd8] sm:$0xff] %v9159_v20 }
 0xfd6   : > { %v9054_v4 = vpop.f32.mrf.mxu0 }
 0xfd7   : > { %v9092_v29 = vadd.f32 %v9054_v4, %v8858_v7 }
 0xfd9   : > { %v9128_v43 = vadd.f32 %v16702_v40, %v9092_v29 }
 0xfdb   : > { %v9160_v48 = vmax.f32 %v9128_v43, 0.0 }
 0xfdd   : > { %9192 = vst [vmem:[%s16709_s26 + $0xe0] sm:$0xff] %v9160_v48 }
 0xfde   : > { %v9056_v30 = vpop.f32.mrf.mxu0 }
 0xfdf   : > { %v9093_v0 = vadd.f32 %v9056_v30, %v8859_v54 }
 0xfe1   : > { %v9129_v15 = vadd.f32 %v16702_v40, %v9093_v0 }
 0xfe3   : > { %v9161_v39 = vmax.f32 %v9129_v15, 0.0 }
 0xfe5   : > { %9193 = vst [vmem:[%s16709_s26 + $0xe8] sm:$0xff] %v9161_v39 }
 0xfe6   : > { %v9059_v46 = vpop.f32.mrf.mxu0 }
 0xfe7   : > { %v9094_v3 = vadd.f32 %v9059_v46, %v8860_v5 }
 0xfe9   : > { %v9130_v58 = vadd.f32 %v16702_v40, %v9094_v3 }
 0xfeb   : > { %v9162_v11 = vmax.f32 %v9130_v58, 0.0 }
 0xfed   : > { %9194 = vst [vmem:[%s16709_s26 + $0xf0] sm:$0xff] %v9162_v11 }
 0xfee   : > { %v9061_v14 = vpop.f32.mrf.mxu0 }
 0xfef   : > { %v9095_v35 = vadd.f32 %v9061_v14, %v8861_v17 }
 0xff1   : > { %v9131_v36 = vadd.f32 %v16702_v40, %v9095_v35 }
 0xff3   : > { %v9163_v26 = vmax.f32 %v9131_v36, 0.0 }
 0xff5   : > { %9195 = vst [vmem:[%s16709_s26 + $0xf8] sm:$0xff] %v9163_v26 }
 0xff6   : > { %13218 = shalt.err (!%p13215_p3)
}
 0xff7   : > { %s13257_s0 = smov 128   ;;  %s13258_s26 = smov 8  }
 0xff8   : > { %13135 = dma.vmem_to_hbm [thread:$0]  (%p13377_p5), %s9210_s27, 4096, %s9212_s24, %s9197_s22, %s13257_s0, %s13257_s0, %s13258_s26  }
 0xff9 PF: > { %p13141_p4 = scmp.ge.s32.totalorder %s13253_s21, 2  ;;  %s9226_s23 = sand.u32 1, %s13241_s18  }
 0xffa   : > { %s9227_s25 = scalar_lea.sflag [#allocation5], %s9226_s23 }
 0xffb   : > { %p13138_p7 = pnand %p13141_p4, %p13381_p6 }
 0xffd   : > { %p13139_p8 = pneg %p13138_p7 }
 0xfff   : > { %13236 = dma.done.wait (%p13139_p8), %s9227_s25, 4096  }
0x1000   : > { %13238 = vsyncadd (%p13139_p8), %s9227_s25, 4294963200  ;;  %s16929_s21 = sld [smem:[#allocation8_spill]]  ;;  %s16932_s18 = smov %s13245_s19 }
0x1001   : > { %s16930_s29 = sld [smem:[#allocation7_spill]] }
0x1002   : > { %s16931_s20 = sld [smem:[#allocation9_spill]] }
0x1006   : > { %p25_p9 = scmp.ge.s32.totalorder %s16929_s21, 4  }
0x1007   : > { %s16933_s19 = smov %s16930_s29 }
0x1008   :  { %27 = sbr.rel (!%p25_p9) target bundleno = 6 (0x6), region = 182 }
0x100d   :  { %9233 = vsyncpa [#allocation5], 1 }
0x100e   :  { %9235 = vsyncpa [#allocation5 + $0x1], 1 }

</bundles_post_ra>
